<compile_context>
chip_gen: v6e
topology: v6e:2x2x1
jax: 0.10.0
libtpu: 0.0.40
codegen_flags: <defaults>
</compile_context>

<pallas_src>
import functools
import numpy as np
import jax
import jax.numpy as jnp
from jax import lax
from jax.experimental import pallas as pl
from jax.experimental.pallas import tpu as pltpu

NUM_CLASSES = 40          # DATASET_NUM_CLASS[dataset] stand-in (e.g. modelnet40)
BN_EPS = 1e-5
TILE_N = 1024             # point rows per grid step (multiple of 8; <=1024 for v7x)
TRUNK_VMEM_LIMIT = 48 * 1024 * 1024


def _round_up(x, m):
    return ((x + m - 1) // m) * m


# ----------------- fused conv trunk (+ global max-pool) ------------------

def _trunk_kernel(*refs, n_layers, relus, n_valid, tn, nt_per, n_splits,
                  mask_rows):
    x_ref = refs[0]
    idx = 1
    ws, bs = [], []
    for l in range(n_layers):
        ws.append(refs[idx]); idx += 1
        if l < n_layers - 1:                       # last layer bias is deferred
            bs.append(refs[idx]); idx += 1
        else:
            bs.append(None)
    g_ref = refs[idx]

    sp = pl.program_id(1)
    t = pl.program_id(2)

    @pl.when(t == 0)
    def _():
        g_ref[...] = jnp.full(g_ref.shape, -jnp.inf, g_ref.dtype)

    h = x_ref[0]                                   # (tn, Cin) f32
    for l in range(n_layers):
        w = ws[l][0]                               # (ci, co) bf16, BN scale folded
        ci = w.shape[0]
        if ci <= 8:
            # tiny contraction (3 input channels): unrolled broadcast-MAC on VPU
            hf = h.astype(jnp.float32)
            wf = w.astype(jnp.float32)
            y = hf[:, 0:1] * wf[0:1, :]
            for kk in range(1, ci):
                y = y + hf[:, kk:kk + 1] * wf[kk:kk + 1, :]
        else:
            y = jnp.dot(h.astype(jnp.bfloat16), w,
                        preferred_element_type=jnp.float32)
        if l < n_layers - 1:
            y = y + bs[l][...]                     # folded BN bias (f32)
            if relus[l]:
                y = jnp.maximum(y, 0.0)
        h = y                                      # keep f32 between layers

    def accum(hv):
        g_ref[0, 0] = jnp.maximum(g_ref[0, 0], jnp.max(hv, axis=0, keepdims=True))

    if mask_rows:
        is_last = jnp.logical_and(sp == n_splits - 1, t == nt_per - 1)

        @pl.when(jnp.logical_not(is_last))
        def _():
            accum(h)

        @pl.when(is_last)
        def _():
            base = (sp * nt_per + t) * tn
            row = base + lax.broadcasted_iota(jnp.int32, (h.shape[0], 1), 0)
            accum(jnp.where(row < n_valid, h, -jnp.inf))
    else:
        accum(h)


def _conv_trunk(x, n_valid, layers, per_batch, relus):
    """x: (B, Np, Cin) f32, Np multiple of 8, rows >= n_valid are padding.
    layers: list of {'w': (1|B, ci, co) bf16 (BN scale folded), 'bias': (1, co)}.
    Returns (B, C_last) f32: max over valid points of the fused conv chain
    (last layer's bias/relu applied after the pooled max)."""
    B, Np, cin = x.shape
    tn = min(TILE_N, Np)
    nt = pl.cdiv(Np, tn)
    # split the point axis into a second 'parallel' dim for v7x's 2 TCs at
    # small batch; partial maxes are combined outside the kernel.
    n_splits = 2 if (nt >= 2 and nt % 2 == 0 and B <= 4) else 1
    nt_per = nt // n_splits
    c_last = layers[-1]["w"].shape[-1]
    n_layers = len(layers)
    mask_rows = (tn * nt != n_valid)

    in_specs = [pl.BlockSpec((1, tn, cin),
                             lambda b, s, t: (b, s * nt_per + t, 0))]
    args = [x]
    for l, (lyr, pb) in enumerate(zip(layers, per_batch)):
        ci, co = lyr["w"].shape[1], lyr["w"].shape[2]
        w_map = (lambda b, s, t: (b, 0, 0)) if pb else (lambda b, s, t: (0, 0, 0))
        in_specs.append(pl.BlockSpec((1, ci, co), w_map))
        args.append(lyr["w"])
        if l < n_layers - 1:
            in_specs.append(pl.BlockSpec((1, co), lambda b, s, t: (0, 0)))
            args.append(lyr["bias"])

    out = pl.pallas_call(
        functools.partial(_trunk_kernel, n_layers=n_layers, relus=tuple(relus),
                          n_valid=n_valid, tn=tn, nt_per=nt_per,
                          n_splits=n_splits, mask_rows=mask_rows),
        out_shape=jax.ShapeDtypeStruct((B, n_splits, 1, c_last), jnp.float32),
        grid=(B, n_splits, nt_per),
        in_specs=in_specs,
        out_specs=pl.BlockSpec((1, 1, 1, c_last), lambda b, s, t: (b, s, 0, 0)),
        compiler_params=pltpu.CompilerParams(
            dimension_semantics=("parallel", "parallel", "arbitrary"),
            vmem_limit_bytes=TRUNK_VMEM_LIMIT),
    )(*args)

    g = jnp.max(out[:, :, 0, :], axis=1)          # combine split partial maxes
    g = g + layers[-1]["bias"]                    # deferred last-layer bias
    if relus[-1]:
        g = jnp.maximum(g, 0.0)                   # deferred last-layer relu
    return g


# ---------------------------- fused FC head ------------------------------

def _mlp_head_kernel(x_ref, w1_ref, b1_ref, w2_ref, b2_ref, w3_ref, b3_ref,
                     o_ref, *, final):
    h = x_ref[...]
    h = jnp.maximum(
        jnp.dot(h.astype(jnp.bfloat16), w1_ref[...],
                preferred_element_type=jnp.float32) + b1_ref[...], 0.0)
    # TODO(synk): Dropout(p=0.3) before bn2 in PointNetCls is identity in eval.
    h = jnp.maximum(
        jnp.dot(h.astype(jnp.bfloat16), w2_ref[...],
                preferred_element_type=jnp.float32) + b2_ref[...], 0.0)
    y = jnp.dot(h.astype(jnp.bfloat16), w3_ref[...],
                preferred_element_type=jnp.float32) + b3_ref[...]
    if final == "log_softmax":
        m = jnp.max(y, axis=-1, keepdims=True)
        z = y - m
        y = z - jnp.log(jnp.sum(jnp.exp(z), axis=-1, keepdims=True))
    o_ref[...] = y


def _mlp_head(g, l1, l2, l3, final, extra_bias=None):
    """g: (B, Cin) -> (B, Cout); fused fc1(+bn,relu) fc2(+bn,relu) fc3 (+final).
    Large fc3 output widths are chunked over the grid so the big fc3 weight
    streams double-buffered (fc1/fc2 are recomputed per chunk; M is tiny)."""
    B, cin = g.shape
    Bp = _round_up(B, 8)
    if Bp != B:
        g = jnp.pad(g, ((0, Bp - B), (0, 0)))
    b3 = l3["bias"] if extra_bias is None else l3["bias"] + extra_bias
    c1 = l1["w"].shape[-1]
    c2 = l2["w"].shape[-1]
    cout = l3["w"].shape[-1]

    if final != "log_softmax" and cout > 1024 and cout % 1024 == 0:
        tc = 1024
    else:
        tc = cout
    n_chunks = cout // tc

    const2 = lambda c: (0, 0)
    out = pl.pallas_call(
        functools.partial(_mlp_head_kernel, final=final),
        out_shape=jax.ShapeDtypeStruct((Bp, cout), jnp.float32),
        grid=(n_chunks,),
        in_specs=[pl.BlockSpec((Bp, cin), const2),
                  pl.BlockSpec((cin, c1), const2),
                  pl.BlockSpec((1, c1), const2),
                  pl.BlockSpec((c1, c2), const2),
                  pl.BlockSpec((1, c2), const2),
                  pl.BlockSpec((c2, tc), lambda c: (0, c)),
                  pl.BlockSpec((1, tc), lambda c: (0, c))],
        out_specs=pl.BlockSpec((Bp, tc), lambda c: (0, c)),
        compiler_params=pltpu.CompilerParams(
            dimension_semantics=("arbitrary",)),
    )(g, l1["w"], l1["bias"], l2["w"], l2["bias"], l3["w"], b3)
    return out[:B]


# --------------------------- parameter setup -----------------------------

def _init_layer(key, cin, cout, bn=True, conv=False):
    ks = jax.random.split(key, 6)
    w = jax.random.normal(ks[0], (cin, cout), jnp.float32) / np.sqrt(cin)
    b = 0.01 * jax.random.normal(ks[1], (cout,), jnp.float32)
    if bn:
        gamma = 1.0 + 0.1 * jax.random.normal(ks[2], (cout,), jnp.float32)
        beta = 0.1 * jax.random.normal(ks[3], (cout,), jnp.float32)
        rmean = 0.1 * jax.random.normal(ks[4], (cout,), jnp.float32)
        rvar = jnp.abs(1.0 + 0.1 * jax.random.normal(ks[5], (cout,), jnp.float32))
        scale = gamma / jnp.sqrt(rvar + BN_EPS)
        bias = (b - rmean) * scale + beta        # BN(xW + b) folded to bias
        w = w * scale[None, :]                   # ... and scale folded into W
    else:
        bias = b
    wq = w.astype(jnp.bfloat16)                  # bf16 MXU inputs, f32 accumulate
    if conv:
        wq = wq.reshape(1, cin, cout)
    return {"w": wq, "bias": bias.reshape(1, cout)}


def _init_stn(key, k):
    ks = jax.random.split(key, 6)
    return {
        "conv1": _init_layer(ks[0], k, 64, conv=True),
        "conv2": _init_layer(ks[1], 64, 128, conv=True),
        "conv3": _init_layer(ks[2], 128, 1024, conv=True),
        "fc1": _init_layer(ks[3], 1024, 512),
        "fc2": _init_layer(ks[4], 512, 256),
        "fc3": _init_layer(ks[5], 256, k * k, bn=False),
    }


def init_pointnet_params(key, num_classes=NUM_CLASSES):
    ks = jax.random.split(key, 8)
    return {
        "stn": _init_stn(ks[0], 3),          # STN3d
        "fstn": _init_stn(ks[1], 64),        # STNkd(k=64), feature_transform=True
        "conv1": _init_layer(ks[2], 3, 64, conv=True),
        "conv2": _init_layer(ks[3], 64, 128, conv=True),
        "conv3": _init_layer(ks[4], 128, 1024, conv=True),
        "fc1": _init_layer(ks[5], 1024, 512),
        "fc2": _init_layer(ks[6], 512, 256),
        "fc3": _init_layer(ks[7], 256, num_classes, bn=False),
    }


def _fold_transform(trans, conv_layer):
    """Fold torch.bmm(x, trans) into the following 1x1 conv:
    W_eff[b] = trans[b] @ W_scaled (BN scale is per-output-column, so folding
    it into W first commutes with this product); bias is unchanged."""
    w = conv_layer["w"][0].astype(jnp.float32)           # (ci, co), scale folded
    w_eff = jnp.einsum("bij,jk->bik", trans, w).astype(jnp.bfloat16)
    return {"w": w_eff, "bias": conv_layer["bias"]}


# -------------------------------- forward --------------------------------

def pointnet_forward(params, pc):
    """pc: (B, N, 3) float point cloud (same as the PyTorch wrapper input)."""
    pc = pc.astype(jnp.float32)
    B, N, _ = pc.shape
    Np = _round_up(N, 8)
    xp = jnp.pad(pc, ((0, 0), (0, Np - N), (0, 0))) if Np != N else pc

    # --- STN3d: input spatial transform ---
    stn = params["stn"]
    g3 = _conv_trunk(xp, N, [stn["conv1"], stn["conv2"], stn["conv3"]],
                     per_batch=(False, False, False), relus=(True, True, True))
    eye3 = jnp.eye(3, dtype=jnp.float32).reshape(1, 9)
    trans = _mlp_head(g3, stn["fc1"], stn["fc2"], stn["fc3"],
                      final="none", extra_bias=eye3).reshape(B, 3, 3)

    # fold bmm(pc, trans) into conv1 -> per-batch effective weight (B, 3, 64)
    conv1_eff = _fold_transform(trans, params["conv1"])

    # --- STNkd (k=64) feature transform, with main conv1 fused in front ---
    fstn = params["fstn"]
    gf = _conv_trunk(xp, N,
                     [conv1_eff, fstn["conv1"], fstn["conv2"], fstn["conv3"]],
                     per_batch=(True, False, False, False),
                     relus=(True, True, True, True))
    eye64 = jnp.eye(64, dtype=jnp.float32).reshape(1, 64 * 64)
    trans_feat = _mlp_head(gf, fstn["fc1"], fstn["fc2"], fstn["fc3"],
                           final="none", extra_bias=eye64).reshape(B, 64, 64)

    # fold bmm(h1, trans_feat) into conv2 -> per-batch weight (B, 64, 128)
    conv2_eff = _fold_transform(trans_feat, params["conv2"])

    # --- main trunk: conv1 -> conv2 -> conv3 (bn3, no relu) -> global max ---
    gm = _conv_trunk(xp, N, [conv1_eff, conv2_eff, params["conv3"]],
                     per_batch=(True, True, False), relus=(True, True, False))

    # --- classification head: fc1 -> fc2 -> fc3 -> log_softmax ---
    logit = _mlp_head(gm, params["fc1"], params["fc2"], params["fc3"],
                      final="log_softmax")

    # wrapper returns the (untouched) point cloud back as 'recons' (B, N, 3)
    return {"logit": logit, "trans_feat": trans_feat, "recons": pc}


if __name__ == "__main__":
    B, N = 2, 16
    pc = jax.random.normal(jax.random.PRNGKey(0), (B, N, 3), jnp.float32)
    params = init_pointnet_params(jax.random.PRNGKey(1))
    out = jax.jit(pointnet_forward)(params, pc)
    jax.block_until_ready(out)
    assert out["logit"].shape == (B, NUM_CLASSES)
    assert out["trans_feat"].shape == (B, 64, 64)
    assert out["recons"].shape == (B, N, 3)
    assert bool(jnp.all(jnp.isfinite(out["logit"])))
    assert bool(jnp.all(jnp.isfinite(out["trans_feat"])))
    print("KERNEL_OK")
</pallas_src>

<mosaic_0001>
module attributes {stable_mosaic.version = 11 : i64} {
  func.func @_trunk_kernel(%arg0: i32, %arg1: i32, %arg2: i32, %arg3: memref<1x16x3xf32, #tpu.memory_space<vmem>>, %arg4: memref<1x3x64xbf16, #tpu.memory_space<vmem>>, %arg5: memref<1x64xf32, #tpu.memory_space<vmem>>, %arg6: memref<1x64x128xbf16, #tpu.memory_space<vmem>>, %arg7: memref<1x128xf32, #tpu.memory_space<vmem>>, %arg8: memref<1x128x1024xbf16, #tpu.memory_space<vmem>>, %arg9: memref<1x1x1x1024xf32, #tpu.memory_space<vmem>>) attributes {dimension_semantics = [#tpu.dimension_semantics<parallel>, #tpu.dimension_semantics<parallel>, #tpu.dimension_semantics<arbitrary>], iteration_bounds = array<i64: 2, 1, 1>, scalar_prefetch = 0 : i64, scratch_operands = 0 : i64, tpu.core_type = #tpu.core_type<tc>, window_params = [{transform_indices = @transform_0, window_bounds = array<i64: 1, 16, 3>}, {pipeline_mode = #tpu.pipeline_mode<synchronous>, transform_indices = @transform_1, window_bounds = array<i64: 1, 3, 64>}, {pipeline_mode = #tpu.pipeline_mode<synchronous>, transform_indices = @transform_2, window_bounds = array<i64: 1, 64>}, {pipeline_mode = #tpu.pipeline_mode<synchronous>, transform_indices = @transform_3, window_bounds = array<i64: 1, 64, 128>}, {pipeline_mode = #tpu.pipeline_mode<synchronous>, transform_indices = @transform_4, window_bounds = array<i64: 1, 128>}, {pipeline_mode = #tpu.pipeline_mode<synchronous>, transform_indices = @transform_5, window_bounds = array<i64: 1, 128, 1024>}, {transform_indices = @transform_6, window_bounds = array<i64: 1, 1, 1, 1024>}]} {
    %c0_i32 = arith.constant 0 : i32
    %0 = arith.cmpi eq, %arg2, %c0_i32 : i32
    %1 = arith.extui %0 : i1 to i32
    %c0_i32_0 = arith.constant 0 : i32
    %2 = arith.cmpi ne, %1, %c0_i32_0 : i32
    scf.if %2 {
      %cst_28 = arith.constant 0xFF800000 : f32
      %51 = vector.broadcast %cst_28 : f32 to vector<1x1x1x1024xf32>
      %c0_29 = arith.constant 0 : index
      %c0_30 = arith.constant 0 : index
      %c0_31 = arith.constant 0 : index
      %c0_32 = arith.constant 0 : index
      %52 = vector.load %arg9[%c0_29, %c0_30, %c0_31, %c0_32] : memref<1x1x1x1024xf32, #tpu.memory_space<vmem>>, vector<1x1x1x1024xf32>
      tpu.vector_store %arg9[%c0_29, %c0_30, %c0_31, %c0_32], %51 {strides = array<i32>} : memref<1x1x1x1024xf32, #tpu.memory_space<vmem>>, vector<1x1x1x1024xf32>,
    } else {
    }
    %c0 = arith.constant 0 : index
    %c0_1 = arith.constant 0 : index
    %c0_2 = arith.constant 0 : index
    %3 = vector.load %arg3[%c0, %c0_1, %c0_2] : memref<1x16x3xf32, #tpu.memory_space<vmem>>, vector<1x16x3xf32>
    %4 = vector.shape_cast %3 : vector<1x16x3xf32> to vector<16x3xf32>
    %c0_3 = arith.constant 0 : index
    %c0_4 = arith.constant 0 : index
    %c0_5 = arith.constant 0 : index
    %5 = vector.load %arg4[%c0_3, %c0_4, %c0_5] : memref<1x3x64xbf16, #tpu.memory_space<vmem>>, vector<1x3x64xbf16>
    %6 = vector.shape_cast %5 : vector<1x3x64xbf16> to vector<3x64xbf16>
    %7 = arith.extf %6 : vector<3x64xbf16> to vector<3x64xf32>
    %8 = vector.extract_strided_slice %4 {offsets = [0, 0], sizes = [16, 1], strides = [1, 1]} : vector<16x3xf32> to vector<16x1xf32>
    %9 = vector.extract_strided_slice %7 {offsets = [0, 0], sizes = [1, 64], strides = [1, 1]} : vector<3x64xf32> to vector<1x64xf32>
    %10 = vector.broadcast %8 : vector<16x1xf32> to vector<16x64xf32>
    %11 = vector.broadcast %9 : vector<1x64xf32> to vector<16x64xf32>
    %12 = arith.mulf %10, %11 : vector<16x64xf32>
    %13 = vector.extract_strided_slice %4 {offsets = [0, 1], sizes = [16, 1], strides = [1, 1]} : vector<16x3xf32> to vector<16x1xf32>
    %14 = vector.extract_strided_slice %7 {offsets = [1, 0], sizes = [1, 64], strides = [1, 1]} : vector<3x64xf32> to vector<1x64xf32>
    %15 = vector.broadcast %13 : vector<16x1xf32> to vector<16x64xf32>
    %16 = vector.broadcast %14 : vector<1x64xf32> to vector<16x64xf32>
    %17 = arith.mulf %15, %16 : vector<16x64xf32>
    %18 = arith.addf %12, %17 : vector<16x64xf32>
    %19 = vector.extract_strided_slice %4 {offsets = [0, 2], sizes = [16, 1], strides = [1, 1]} : vector<16x3xf32> to vector<16x1xf32>
    %20 = vector.extract_strided_slice %7 {offsets = [2, 0], sizes = [1, 64], strides = [1, 1]} : vector<3x64xf32> to vector<1x64xf32>
    %21 = vector.broadcast %19 : vector<16x1xf32> to vector<16x64xf32>
    %22 = vector.broadcast %20 : vector<1x64xf32> to vector<16x64xf32>
    %23 = arith.mulf %21, %22 : vector<16x64xf32>
    %24 = arith.addf %18, %23 : vector<16x64xf32>
    %c0_6 = arith.constant 0 : index
    %c0_7 = arith.constant 0 : index
    %25 = vector.load %arg5[%c0_6, %c0_7] : memref<1x64xf32, #tpu.memory_space<vmem>>, vector<1x64xf32>
    %26 = vector.broadcast %25 : vector<1x64xf32> to vector<16x64xf32>
    %27 = arith.addf %24, %26 : vector<16x64xf32>
    %cst = arith.constant 0.000000e+00 : f32
    %28 = vector.broadcast %cst : f32 to vector<16x64xf32>
    %29 = arith.maximumf %27, %28 : vector<16x64xf32>
    %c0_8 = arith.constant 0 : index
    %c0_9 = arith.constant 0 : index
    %c0_10 = arith.constant 0 : index
    %30 = vector.load %arg6[%c0_8, %c0_9, %c0_10] : memref<1x64x128xbf16, #tpu.memory_space<vmem>>, vector<1x64x128xbf16>
    %31 = vector.shape_cast %30 : vector<1x64x128xbf16> to vector<64x128xbf16>
    %32 = arith.truncf %29 : vector<16x64xf32> to vector<16x64xbf16>
    %cst_11 = arith.constant dense<0.000000e+00> : vector<16x128xf32>
    %33 = tpu.matmul %32, %31, %cst_11 {dimension_numbers = #tpu.dot_dimension_numbers<[1], [0], [0], [1], [0, 0, 1, 1], [], []>} : vector<16x64xbf16>, vector<64x128xbf16>, vector<16x128xf32> -> vector<16x128xf32>
    %c0_12 = arith.constant 0 : index
    %c0_13 = arith.constant 0 : index
    %34 = vector.load %arg7[%c0_12, %c0_13] : memref<1x128xf32, #tpu.memory_space<vmem>>, vector<1x128xf32>
    %35 = vector.broadcast %34 : vector<1x128xf32> to vector<16x128xf32>
    %36 = arith.addf %33, %35 : vector<16x128xf32>
    %cst_14 = arith.constant 0.000000e+00 : f32
    %37 = vector.broadcast %cst_14 : f32 to vector<16x128xf32>
    %38 = arith.maximumf %36, %37 : vector<16x128xf32>
    %c0_15 = arith.constant 0 : index
    %c0_16 = arith.constant 0 : index
    %c0_17 = arith.constant 0 : index
    %39 = vector.load %arg8[%c0_15, %c0_16, %c0_17] : memref<1x128x1024xbf16, #tpu.memory_space<vmem>>, vector<1x128x1024xbf16>
    %40 = vector.shape_cast %39 : vector<1x128x1024xbf16> to vector<128x1024xbf16>
    %41 = arith.truncf %38 : vector<16x128xf32> to vector<16x128xbf16>
    %cst_18 = arith.constant dense<0.000000e+00> : vector<16x1024xf32>
    %42 = tpu.matmul %41, %40, %cst_18 {dimension_numbers = #tpu.dot_dimension_numbers<[1], [0], [0], [1], [0, 0, 1, 1], [], []>} : vector<16x128xbf16>, vector<128x1024xbf16>, vector<16x1024xf32> -> vector<16x1024xf32>
    %c0_19 = arith.constant 0 : index
    %c0_20 = arith.constant 0 : index
    %c0_21 = arith.constant 0 : index
    %c0_22 = arith.constant 0 : index
    %43 = vector.load %arg9[%c0_19, %c0_20, %c0_21, %c0_22] : memref<1x1x1x1024xf32, #tpu.memory_space<vmem>>, vector<1x1x1x1024xf32>
    %44 = vector.shape_cast %43 : vector<1x1x1x1024xf32> to vector<1x1024xf32>
    %cst_23 = arith.constant dense<0xFF800000> : vector<1024xf32>
    %45 = vector.multi_reduction <maximumf>, %42, %cst_23 [0] : vector<16x1024xf32> to vector<1024xf32>
    %46 = vector.shape_cast %45 : vector<1024xf32> to vector<1x1024xf32>
    %47 = arith.maximumf %44, %46 : vector<1x1024xf32>
    %c0_24 = arith.constant 0 : index
    %c0_25 = arith.constant 0 : index
    %c0_26 = arith.constant 0 : index
    %c0_27 = arith.constant 0 : index
    %48 = vector.load %arg9[%c0_24, %c0_25, %c0_26, %c0_27] : memref<1x1x1x1024xf32, #tpu.memory_space<vmem>>, vector<1x1x1x1024xf32>
    %49 = vector.shape_cast %48 : vector<1x1x1x1024xf32> to vector<1x1024xf32>
    %50 = vector.shape_cast %47 : vector<1x1024xf32> to vector<1x1x1x1024xf32>
    tpu.vector_store %arg9[%c0_24, %c0_25, %c0_26, %c0_27], %50 {strides = array<i32>} : memref<1x1x1x1024xf32, #tpu.memory_space<vmem>>, vector<1x1x1x1024xf32>,
    return
  }
  func.func @transform_0(%arg0: i32, %arg1: i32, %arg2: i32) -> (i32, i32, i32) {
    %c1_i32 = arith.constant 1 : i32
    %0 = arith.muli %arg1, %c1_i32 : i32
    %1 = arith.addi %0, %arg2 : i32
    %c0_i32 = arith.constant 0 : i32
    %c0_i32_0 = arith.constant 0 : i32
    return %arg0, %1, %c0_i32 : i32, i32, i32
  }
  func.func @transform_1(%arg0: i32, %arg1: i32, %arg2: i32) -> (i32, i32, i32) {
    %c0_i32 = arith.constant 0 : i32
    %c0_i32_0 = arith.constant 0 : i32
    %c0_i32_1 = arith.constant 0 : i32
    %c0_i32_2 = arith.constant 0 : i32
    return %c0_i32, %c0_i32_0, %c0_i32_1 : i32, i32, i32
  }
  func.func @transform_2(%arg0: i32, %arg1: i32, %arg2: i32) -> (i32, i32) {
    %c0_i32 = arith.constant 0 : i32
    %c0_i32_0 = arith.constant 0 : i32
    %c0_i32_1 = arith.constant 0 : i32
    return %c0_i32, %c0_i32_0 : i32, i32
  }
  func.func @transform_3(%arg0: i32, %arg1: i32, %arg2: i32) -> (i32, i32, i32) {
    %c0_i32 = arith.constant 0 : i32
    %c0_i32_0 = arith.constant 0 : i32
    %c0_i32_1 = arith.constant 0 : i32
    %c0_i32_2 = arith.constant 0 : i32
    return %c0_i32, %c0_i32_0, %c0_i32_1 : i32, i32, i32
  }
  func.func @transform_4(%arg0: i32, %arg1: i32, %arg2: i32) -> (i32, i32) {
    %c0_i32 = arith.constant 0 : i32
    %c0_i32_0 = arith.constant 0 : i32
    %c0_i32_1 = arith.constant 0 : i32
    return %c0_i32, %c0_i32_0 : i32, i32
  }
  func.func @transform_5(%arg0: i32, %arg1: i32, %arg2: i32) -> (i32, i32, i32) {
    %c0_i32 = arith.constant 0 : i32
    %c0_i32_0 = arith.constant 0 : i32
    %c0_i32_1 = arith.constant 0 : i32
    %c0_i32_2 = arith.constant 0 : i32
    return %c0_i32, %c0_i32_0, %c0_i32_1 : i32, i32, i32
  }
  func.func @transform_6(%arg0: i32, %arg1: i32, %arg2: i32) -> (i32, i32, i32, i32) {
    %c0_i32 = arith.constant 0 : i32
    %c0_i32_0 = arith.constant 0 : i32
    %c0_i32_1 = arith.constant 0 : i32
    return %arg0, %arg1, %c0_i32, %c0_i32_0 : i32, i32, i32, i32
  }
}

module attributes {stable_mosaic.version = 11 : i64} {
  func.func @_mlp_head_kernel(%arg0: i32, %arg1: memref<8x1024xf32, #tpu.memory_space<vmem>>, %arg2: memref<1024x512xbf16, #tpu.memory_space<vmem>>, %arg3: memref<1x512xf32, #tpu.memory_space<vmem>>, %arg4: memref<512x256xbf16, #tpu.memory_space<vmem>>, %arg5: memref<1x256xf32, #tpu.memory_space<vmem>>, %arg6: memref<256x9xbf16, #tpu.memory_space<vmem>>, %arg7: memref<1x9xf32, #tpu.memory_space<vmem>>, %arg8: memref<8x9xf32, #tpu.memory_space<vmem>>) attributes {dimension_semantics = [#tpu.dimension_semantics<arbitrary>], iteration_bounds = array<i64: 1>, scalar_prefetch = 0 : i64, scratch_operands = 0 : i64, tpu.core_type = #tpu.core_type<tc>, window_params = [{pipeline_mode = #tpu.pipeline_mode<synchronous>, transform_indices = @transform_0, window_bounds = array<i64: 8, 1024>}, {pipeline_mode = #tpu.pipeline_mode<synchronous>, transform_indices = @transform_1, window_bounds = array<i64: 1024, 512>}, {pipeline_mode = #tpu.pipeline_mode<synchronous>, transform_indices = @transform_2, window_bounds = array<i64: 1, 512>}, {pipeline_mode = #tpu.pipeline_mode<synchronous>, transform_indices = @transform_3, window_bounds = array<i64: 512, 256>}, {pipeline_mode = #tpu.pipeline_mode<synchronous>, transform_indices = @transform_4, window_bounds = array<i64: 1, 256>}, {transform_indices = @transform_5, window_bounds = array<i64: 256, 9>}, {transform_indices = @transform_6, window_bounds = array<i64: 1, 9>}, {transform_indices = @transform_7, window_bounds = array<i64: 8, 9>}]} {
    %c0 = arith.constant 0 : index
    %c0_0 = arith.constant 0 : index
    %0 = vector.load %arg1[%c0, %c0_0] : memref<8x1024xf32, #tpu.memory_space<vmem>>, vector<8x1024xf32>
    %1 = arith.truncf %0 : vector<8x1024xf32> to vector<8x1024xbf16>
    %c0_1 = arith.constant 0 : index
    %c0_2 = arith.constant 0 : index
    %2 = vector.load %arg2[%c0_1, %c0_2] : memref<1024x512xbf16, #tpu.memory_space<vmem>>, vector<1024x512xbf16>
    %cst = arith.constant dense<0.000000e+00> : vector<8x512xf32>
    %3 = tpu.matmul %1, %2, %cst {dimension_numbers = #tpu.dot_dimension_numbers<[1], [0], [0], [1], [0, 0, 1, 1], [], []>} : vector<8x1024xbf16>, vector<1024x512xbf16>, vector<8x512xf32> -> vector<8x512xf32>
    %c0_3 = arith.constant 0 : index
    %c0_4 = arith.constant 0 : index
    %4 = vector.load %arg3[%c0_3, %c0_4] : memref<1x512xf32, #tpu.memory_space<vmem>>, vector<1x512xf32>
    %5 = vector.broadcast %4 : vector<1x512xf32> to vector<8x512xf32>
    %6 = arith.addf %3, %5 : vector<8x512xf32>
    %cst_5 = arith.constant 0.000000e+00 : f32
    %7 = vector.broadcast %cst_5 : f32 to vector<8x512xf32>
    %8 = arith.maximumf %6, %7 : vector<8x512xf32>
    %9 = arith.truncf %8 : vector<8x512xf32> to vector<8x512xbf16>
    %c0_6 = arith.constant 0 : index
    %c0_7 = arith.constant 0 : index
    %10 = vector.load %arg4[%c0_6, %c0_7] : memref<512x256xbf16, #tpu.memory_space<vmem>>, vector<512x256xbf16>
    %cst_8 = arith.constant dense<0.000000e+00> : vector<8x256xf32>
    %11 = tpu.matmul %9, %10, %cst_8 {dimension_numbers = #tpu.dot_dimension_numbers<[1], [0], [0], [1], [0, 0, 1, 1], [], []>} : vector<8x512xbf16>, vector<512x256xbf16>, vector<8x256xf32> -> vector<8x256xf32>
    %c0_9 = arith.constant 0 : index
    %c0_10 = arith.constant 0 : index
    %12 = vector.load %arg5[%c0_9, %c0_10] : memref<1x256xf32, #tpu.memory_space<vmem>>, vector<1x256xf32>
    %13 = vector.broadcast %12 : vector<1x256xf32> to vector<8x256xf32>
    %14 = arith.addf %11, %13 : vector<8x256xf32>
    %cst_11 = arith.constant 0.000000e+00 : f32
    %15 = vector.broadcast %cst_11 : f32 to vector<8x256xf32>
    %16 = arith.maximumf %14, %15 : vector<8x256xf32>
    %17 = arith.truncf %16 : vector<8x256xf32> to vector<8x256xbf16>
    %c0_12 = arith.constant 0 : index
    %c0_13 = arith.constant 0 : index
    %18 = vector.load %arg6[%c0_12, %c0_13] : memref<256x9xbf16, #tpu.memory_space<vmem>>, vector<256x9xbf16>
    %cst_14 = arith.constant dense<0.000000e+00> : vector<8x9xf32>
    %19 = tpu.matmul %17, %18, %cst_14 {dimension_numbers = #tpu.dot_dimension_numbers<[1], [0], [0], [1], [0, 0, 1, 1], [], []>} : vector<8x256xbf16>, vector<256x9xbf16>, vector<8x9xf32> -> vector<8x9xf32>
    %c0_15 = arith.constant 0 : index
    %c0_16 = arith.constant 0 : index
    %20 = vector.load %arg7[%c0_15, %c0_16] : memref<1x9xf32, #tpu.memory_space<vmem>>, vector<1x9xf32>
    %21 = vector.broadcast %20 : vector<1x9xf32> to vector<8x9xf32>
    %22 = arith.addf %19, %21 : vector<8x9xf32>
    %c0_17 = arith.constant 0 : index
    %c0_18 = arith.constant 0 : index
    %23 = vector.load %arg8[%c0_17, %c0_18] : memref<8x9xf32, #tpu.memory_space<vmem>>, vector<8x9xf32>
    tpu.vector_store %arg8[%c0_17, %c0_18], %22 {strides = array<i32>} : memref<8x9xf32, #tpu.memory_space<vmem>>, vector<8x9xf32>,
    return
  }
  func.func @transform_0(%arg0: i32) -> (i32, i32) {
    %c0_i32 = arith.constant 0 : i32
    %c0_i32_0 = arith.constant 0 : i32
    %c0_i32_1 = arith.constant 0 : i32
    return %c0_i32, %c0_i32_0 : i32, i32
  }
  func.func @transform_1(%arg0: i32) -> (i32, i32) {
    %c0_i32 = arith.constant 0 : i32
    %c0_i32_0 = arith.constant 0 : i32
    %c0_i32_1 = arith.constant 0 : i32
    return %c0_i32, %c0_i32_0 : i32, i32
  }
  func.func @transform_2(%arg0: i32) -> (i32, i32) {
    %c0_i32 = arith.constant 0 : i32
    %c0_i32_0 = arith.constant 0 : i32
    %c0_i32_1 = arith.constant 0 : i32
    return %c0_i32, %c0_i32_0 : i32, i32
  }
  func.func @transform_3(%arg0: i32) -> (i32, i32) {
    %c0_i32 = arith.constant 0 : i32
    %c0_i32_0 = arith.constant 0 : i32
    %c0_i32_1 = arith.constant 0 : i32
    return %c0_i32, %c0_i32_0 : i32, i32
  }
  func.func @transform_4(%arg0: i32) -> (i32, i32) {
    %c0_i32 = arith.constant 0 : i32
    %c0_i32_0 = arith.constant 0 : i32
    %c0_i32_1 = arith.constant 0 : i32
    return %c0_i32, %c0_i32_0 : i32, i32
  }
  func.func @transform_5(%arg0: i32) -> (i32, i32) {
    %c0_i32 = arith.constant 0 : i32
    %c0_i32_0 = arith.constant 0 : i32
    return %c0_i32, %arg0 : i32, i32
  }
  func.func @transform_6(%arg0: i32) -> (i32, i32) {
    %c0_i32 = arith.constant 0 : i32
    %c0_i32_0 = arith.constant 0 : i32
    return %c0_i32, %arg0 : i32, i32
  }
  func.func @transform_7(%arg0: i32) -> (i32, i32) {
    %c0_i32 = arith.constant 0 : i32
    %c0_i32_0 = arith.constant 0 : i32
    return %c0_i32, %arg0 : i32, i32
  }
}

module attributes {stable_mosaic.version = 11 : i64} {
  func.func @_trunk_kernel(%arg0: i32, %arg1: i32, %arg2: i32, %arg3: memref<1x16x3xf32, #tpu.memory_space<vmem>>, %arg4: memref<1x3x64xbf16, #tpu.memory_space<vmem>>, %arg5: memref<1x64xf32, #tpu.memory_space<vmem>>, %arg6: memref<1x64x64xbf16, #tpu.memory_space<vmem>>, %arg7: memref<1x64xf32, #tpu.memory_space<vmem>>, %arg8: memref<1x64x128xbf16, #tpu.memory_space<vmem>>, %arg9: memref<1x128xf32, #tpu.memory_space<vmem>>, %arg10: memref<1x128x1024xbf16, #tpu.memory_space<vmem>>, %arg11: memref<1x1x1x1024xf32, #tpu.memory_space<vmem>>) attributes {dimension_semantics = [#tpu.dimension_semantics<parallel>, #tpu.dimension_semantics<parallel>, #tpu.dimension_semantics<arbitrary>], iteration_bounds = array<i64: 2, 1, 1>, scalar_prefetch = 0 : i64, scratch_operands = 0 : i64, tpu.core_type = #tpu.core_type<tc>, window_params = [{transform_indices = @transform_0, window_bounds = array<i64: 1, 16, 3>}, {transform_indices = @transform_1, window_bounds = array<i64: 1, 3, 64>}, {pipeline_mode = #tpu.pipeline_mode<synchronous>, transform_indices = @transform_2, window_bounds = array<i64: 1, 64>}, {pipeline_mode = #tpu.pipeline_mode<synchronous>, transform_indices = @transform_3, window_bounds = array<i64: 1, 64, 64>}, {pipeline_mode = #tpu.pipeline_mode<synchronous>, transform_indices = @transform_4, window_bounds = array<i64: 1, 64>}, {pipeline_mode = #tpu.pipeline_mode<synchronous>, transform_indices = @transform_5, window_bounds = array<i64: 1, 64, 128>}, {pipeline_mode = #tpu.pipeline_mode<synchronous>, transform_indices = @transform_6, window_bounds = array<i64: 1, 128>}, {pipeline_mode = #tpu.pipeline_mode<synchronous>, transform_indices = @transform_7, window_bounds = array<i64: 1, 128, 1024>}, {transform_indices = @transform_8, window_bounds = array<i64: 1, 1, 1, 1024>}]} {
    %c0_i32 = arith.constant 0 : i32
    %0 = arith.cmpi eq, %arg2, %c0_i32 : i32
    %1 = arith.extui %0 : i1 to i32
    %c0_i32_0 = arith.constant 0 : i32
    %2 = arith.cmpi ne, %1, %c0_i32_0 : i32
    scf.if %2 {
      %cst_35 = arith.constant 0xFF800000 : f32
      %60 = vector.broadcast %cst_35 : f32 to vector<1x1x1x1024xf32>
      %c0_36 = arith.constant 0 : index
      %c0_37 = arith.constant 0 : index
      %c0_38 = arith.constant 0 : index
      %c0_39 = arith.constant 0 : index
      %61 = vector.load %arg11[%c0_36, %c0_37, %c0_38, %c0_39] : memref<1x1x1x1024xf32, #tpu.memory_space<vmem>>, vector<1x1x1x1024xf32>
      tpu.vector_store %arg11[%c0_36, %c0_37, %c0_38, %c0_39], %60 {strides = array<i32>} : memref<1x1x1x1024xf32, #tpu.memory_space<vmem>>, vector<1x1x1x1024xf32>,
    } else {
    }
    %c0 = arith.constant 0 : index
    %c0_1 = arith.constant 0 : index
    %c0_2 = arith.constant 0 : index
    %3 = vector.load %arg3[%c0, %c0_1, %c0_2] : memref<1x16x3xf32, #tpu.memory_space<vmem>>, vector<1x16x3xf32>
    %4 = vector.shape_cast %3 : vector<1x16x3xf32> to vector<16x3xf32>
    %c0_3 = arith.constant 0 : index
    %c0_4 = arith.constant 0 : index
    %c0_5 = arith.constant 0 : index
    %5 = vector.load %arg4[%c0_3, %c0_4, %c0_5] : memref<1x3x64xbf16, #tpu.memory_space<vmem>>, vector<1x3x64xbf16>
    %6 = vector.shape_cast %5 : vector<1x3x64xbf16> to vector<3x64xbf16>
    %7 = arith.extf %6 : vector<3x64xbf16> to vector<3x64xf32>
    %8 = vector.extract_strided_slice %4 {offsets = [0, 0], sizes = [16, 1], strides = [1, 1]} : vector<16x3xf32> to vector<16x1xf32>
    %9 = vector.extract_strided_slice %7 {offsets = [0, 0], sizes = [1, 64], strides = [1, 1]} : vector<3x64xf32> to vector<1x64xf32>
    %10 = vector.broadcast %8 : vector<16x1xf32> to vector<16x64xf32>
    %11 = vector.broadcast %9 : vector<1x64xf32> to vector<16x64xf32>
    %12 = arith.mulf %10, %11 : vector<16x64xf32>
    %13 = vector.extract_strided_slice %4 {offsets = [0, 1], sizes = [16, 1], strides = [1, 1]} : vector<16x3xf32> to vector<16x1xf32>
    %14 = vector.extract_strided_slice %7 {offsets = [1, 0], sizes = [1, 64], strides = [1, 1]} : vector<3x64xf32> to vector<1x64xf32>
    %15 = vector.broadcast %13 : vector<16x1xf32> to vector<16x64xf32>
    %16 = vector.broadcast %14 : vector<1x64xf32> to vector<16x64xf32>
    %17 = arith.mulf %15, %16 : vector<16x64xf32>
    %18 = arith.addf %12, %17 : vector<16x64xf32>
    %19 = vector.extract_strided_slice %4 {offsets = [0, 2], sizes = [16, 1], strides = [1, 1]} : vector<16x3xf32> to vector<16x1xf32>
    %20 = vector.extract_strided_slice %7 {offsets = [2, 0], sizes = [1, 64], strides = [1, 1]} : vector<3x64xf32> to vector<1x64xf32>
    %21 = vector.broadcast %19 : vector<16x1xf32> to vector<16x64xf32>
    %22 = vector.broadcast %20 : vector<1x64xf32> to vector<16x64xf32>
    %23 = arith.mulf %21, %22 : vector<16x64xf32>
    %24 = arith.addf %18, %23 : vector<16x64xf32>
    %c0_6 = arith.constant 0 : index
    %c0_7 = arith.constant 0 : index
    %25 = vector.load %arg5[%c0_6, %c0_7] : memref<1x64xf32, #tpu.memory_space<vmem>>, vector<1x64xf32>
    %26 = vector.broadcast %25 : vector<1x64xf32> to vector<16x64xf32>
    %27 = arith.addf %24, %26 : vector<16x64xf32>
    %cst = arith.constant 0.000000e+00 : f32
    %28 = vector.broadcast %cst : f32 to vector<16x64xf32>
    %29 = arith.maximumf %27, %28 : vector<16x64xf32>
    %c0_8 = arith.constant 0 : index
    %c0_9 = arith.constant 0 : index
    %c0_10 = arith.constant 0 : index
    %30 = vector.load %arg6[%c0_8, %c0_9, %c0_10] : memref<1x64x64xbf16, #tpu.memory_space<vmem>>, vector<1x64x64xbf16>
    %31 = vector.shape_cast %30 : vector<1x64x64xbf16> to vector<64x64xbf16>
    %32 = arith.truncf %29 : vector<16x64xf32> to vector<16x64xbf16>
    %cst_11 = arith.constant dense<0.000000e+00> : vector<16x64xf32>
    %33 = tpu.matmul %32, %31, %cst_11 {dimension_numbers = #tpu.dot_dimension_numbers<[1], [0], [0], [1], [0, 0, 1, 1], [], []>} : vector<16x64xbf16>, vector<64x64xbf16>, vector<16x64xf32> -> vector<16x64xf32>
    %c0_12 = arith.constant 0 : index
    %c0_13 = arith.constant 0 : index
    %34 = vector.load %arg7[%c0_12, %c0_13] : memref<1x64xf32, #tpu.memory_space<vmem>>, vector<1x64xf32>
    %35 = vector.broadcast %34 : vector<1x64xf32> to vector<16x64xf32>
    %36 = arith.addf %33, %35 : vector<16x64xf32>
    %cst_14 = arith.constant 0.000000e+00 : f32
    %37 = vector.broadcast %cst_14 : f32 to vector<16x64xf32>
    %38 = arith.maximumf %36, %37 : vector<16x64xf32>
    %c0_15 = arith.constant 0 : index
    %c0_16 = arith.constant 0 : index
    %c0_17 = arith.constant 0 : index
    %39 = vector.load %arg8[%c0_15, %c0_16, %c0_17] : memref<1x64x128xbf16, #tpu.memory_space<vmem>>, vector<1x64x128xbf16>
    %40 = vector.shape_cast %39 : vector<1x64x128xbf16> to vector<64x128xbf16>
    %41 = arith.truncf %38 : vector<16x64xf32> to vector<16x64xbf16>
    %cst_18 = arith.constant dense<0.000000e+00> : vector<16x128xf32>
    %42 = tpu.matmul %41, %40, %cst_18 {dimension_numbers = #tpu.dot_dimension_numbers<[1], [0], [0], [1], [0, 0, 1, 1], [], []>} : vector<16x64xbf16>, vector<64x128xbf16>, vector<16x128xf32> -> vector<16x128xf32>
    %c0_19 = arith.constant 0 : index
    %c0_20 = arith.constant 0 : index
    %43 = vector.load %arg9[%c0_19, %c0_20] : memref<1x128xf32, #tpu.memory_space<vmem>>, vector<1x128xf32>
    %44 = vector.broadcast %43 : vector<1x128xf32> to vector<16x128xf32>
    %45 = arith.addf %42, %44 : vector<16x128xf32>
    %cst_21 = arith.constant 0.000000e+00 : f32
    %46 = vector.broadcast %cst_21 : f32 to vector<16x128xf32>
    %47 = arith.maximumf %45, %46 : vector<16x128xf32>
    %c0_22 = arith.constant 0 : index
    %c0_23 = arith.constant 0 : index
    %c0_24 = arith.constant 0 : index
    %48 = vector.load %arg10[%c0_22, %c0_23, %c0_24] : memref<1x128x1024xbf16, #tpu.memory_space<vmem>>, vector<1x128x1024xbf16>
    %49 = vector.shape_cast %48 : vector<1x128x1024xbf16> to vector<128x1024xbf16>
    %50 = arith.truncf %47 : vector<16x128xf32> to vector<16x128xbf16>
    %cst_25 = arith.constant dense<0.000000e+00> : vector<16x1024xf32>
    %51 = tpu.matmul %50, %49, %cst_25 {dimension_numbers = #tpu.dot_dimension_numbers<[1], [0], [0], [1], [0, 0, 1, 1], [], []>} : vector<16x128xbf16>, vector<128x1024xbf16>, vector<16x1024xf32> -> vector<16x1024xf32>
    %c0_26 = arith.constant 0 : index
    %c0_27 = arith.constant 0 : index
    %c0_28 = arith.constant 0 : index
    %c0_29 = arith.constant 0 : index
    %52 = vector.load %arg11[%c0_26, %c0_27, %c0_28, %c0_29] : memref<1x1x1x1024xf32, #tpu.memory_space<vmem>>, vector<1x1x1x1024xf32>
    %53 = vector.shape_cast %52 : vector<1x1x1x1024xf32> to vector<1x1024xf32>
    %cst_30 = arith.constant dense<0xFF800000> : vector<1024xf32>
    %54 = vector.multi_reduction <maximumf>, %51, %cst_30 [0] : vector<16x1024xf32> to vector<1024xf32>
    %55 = vector.shape_cast %54 : vector<1024xf32> to vector<1x1024xf32>
    %56 = arith.maximumf %53, %55 : vector<1x1024xf32>
    %c0_31 = arith.constant 0 : index
    %c0_32 = arith.constant 0 : index
    %c0_33 = arith.constant 0 : index
    %c0_34 = arith.constant 0 : index
    %57 = vector.load %arg11[%c0_31, %c0_32, %c0_33, %c0_34] : memref<1x1x1x1024xf32, #tpu.memory_space<vmem>>, vector<1x1x1x1024xf32>
    %58 = vector.shape_cast %57 : vector<1x1x1x1024xf32> to vector<1x1024xf32>
    %59 = vector.shape_cast %56 : vector<1x1024xf32> to vector<1x1x1x1024xf32>
    tpu.vector_store %arg11[%c0_31, %c0_32, %c0_33, %c0_34], %59 {strides = array<i32>} : memref<1x1x1x1024xf32, #tpu.memory_space<vmem>>, vector<1x1x1x1024xf32>,
    return
  }
  func.func @transform_0(%arg0: i32, %arg1: i32, %arg2: i32) -> (i32, i32, i32) {
    %c1_i32 = arith.constant 1 : i32
    %0 = arith.muli %arg1, %c1_i32 : i32
    %1 = arith.addi %0, %arg2 : i32
    %c0_i32 = arith.constant 0 : i32
    %c0_i32_0 = arith.constant 0 : i32
    return %arg0, %1, %c0_i32 : i32, i32, i32
  }
  func.func @transform_1(%arg0: i32, %arg1: i32, %arg2: i32) -> (i32, i32, i32) {
    %c0_i32 = arith.constant 0 : i32
    %c0_i32_0 = arith.constant 0 : i32
    %c0_i32_1 = arith.constant 0 : i32
    return %arg0, %c0_i32, %c0_i32_0 : i32, i32, i32
  }
  func.func @transform_2(%arg0: i32, %arg1: i32, %arg2: i32) -> (i32, i32) {
    %c0_i32 = arith.constant 0 : i32
    %c0_i32_0 = arith.constant 0 : i32
    %c0_i32_1 = arith.constant 0 : i32
    return %c0_i32, %c0_i32_0 : i32, i32
  }
  func.func @transform_3(%arg0: i32, %arg1: i32, %arg2: i32) -> (i32, i32, i32) {
    %c0_i32 = arith.constant 0 : i32
    %c0_i32_0 = arith.constant 0 : i32
    %c0_i32_1 = arith.constant 0 : i32
    %c0_i32_2 = arith.constant 0 : i32
    return %c0_i32, %c0_i32_0, %c0_i32_1 : i32, i32, i32
  }
  func.func @transform_4(%arg0: i32, %arg1: i32, %arg2: i32) -> (i32, i32) {
    %c0_i32 = arith.constant 0 : i32
    %c0_i32_0 = arith.constant 0 : i32
    %c0_i32_1 = arith.constant 0 : i32
    return %c0_i32, %c0_i32_0 : i32, i32
  }
  func.func @transform_5(%arg0: i32, %arg1: i32, %arg2: i32) -> (i32, i32, i32) {
    %c0_i32 = arith.constant 0 : i32
    %c0_i32_0 = arith.constant 0 : i32
    %c0_i32_1 = arith.constant 0 : i32
    %c0_i32_2 = arith.constant 0 : i32
    return %c0_i32, %c0_i32_0, %c0_i32_1 : i32, i32, i32
  }
  func.func @transform_6(%arg0: i32, %arg1: i32, %arg2: i32) -> (i32, i32) {
    %c0_i32 = arith.constant 0 : i32
    %c0_i32_0 = arith.constant 0 : i32
    %c0_i32_1 = arith.constant 0 : i32
    return %c0_i32, %c0_i32_0 : i32, i32
  }
  func.func @transform_7(%arg0: i32, %arg1: i32, %arg2: i32) -> (i32, i32, i32) {
    %c0_i32 = arith.constant 0 : i32
    %c0_i32_0 = arith.constant 0 : i32
    %c0_i32_1 = arith.constant 0 : i32
    %c0_i32_2 = arith.constant 0 : i32
    return %c0_i32, %c0_i32_0, %c0_i32_1 : i32, i32, i32
  }
  func.func @transform_8(%arg0: i32, %arg1: i32, %arg2: i32) -> (i32, i32, i32, i32) {
    %c0_i32 = arith.constant 0 : i32
    %c0_i32_0 = arith.constant 0 : i32
    %c0_i32_1 = arith.constant 0 : i32
    return %arg0, %arg1, %c0_i32, %c0_i32_0 : i32, i32, i32, i32
  }
}

module attributes {stable_mosaic.version = 11 : i64} {
  func.func @_mlp_head_kernel(%arg0: i32, %arg1: memref<8x1024xf32, #tpu.memory_space<vmem>>, %arg2: memref<1024x512xbf16, #tpu.memory_space<vmem>>, %arg3: memref<1x512xf32, #tpu.memory_space<vmem>>, %arg4: memref<512x256xbf16, #tpu.memory_space<vmem>>, %arg5: memref<1x256xf32, #tpu.memory_space<vmem>>, %arg6: memref<256x1024xbf16, #tpu.memory_space<vmem>>, %arg7: memref<1x1024xf32, #tpu.memory_space<vmem>>, %arg8: memref<8x1024xf32, #tpu.memory_space<vmem>>) attributes {dimension_semantics = [#tpu.dimension_semantics<arbitrary>], iteration_bounds = array<i64: 4>, scalar_prefetch = 0 : i64, scratch_operands = 0 : i64, tpu.core_type = #tpu.core_type<tc>, window_params = [{pipeline_mode = #tpu.pipeline_mode<synchronous>, transform_indices = @transform_0, window_bounds = array<i64: 8, 1024>}, {pipeline_mode = #tpu.pipeline_mode<synchronous>, transform_indices = @transform_1, window_bounds = array<i64: 1024, 512>}, {pipeline_mode = #tpu.pipeline_mode<synchronous>, transform_indices = @transform_2, window_bounds = array<i64: 1, 512>}, {pipeline_mode = #tpu.pipeline_mode<synchronous>, transform_indices = @transform_3, window_bounds = array<i64: 512, 256>}, {pipeline_mode = #tpu.pipeline_mode<synchronous>, transform_indices = @transform_4, window_bounds = array<i64: 1, 256>}, {transform_indices = @transform_5, window_bounds = array<i64: 256, 1024>}, {transform_indices = @transform_6, window_bounds = array<i64: 1, 1024>}, {transform_indices = @transform_7, window_bounds = array<i64: 8, 1024>}]} {
    %c0 = arith.constant 0 : index
    %c0_0 = arith.constant 0 : index
    %0 = vector.load %arg1[%c0, %c0_0] : memref<8x1024xf32, #tpu.memory_space<vmem>>, vector<8x1024xf32>
    %1 = arith.truncf %0 : vector<8x1024xf32> to vector<8x1024xbf16>
    %c0_1 = arith.constant 0 : index
    %c0_2 = arith.constant 0 : index
    %2 = vector.load %arg2[%c0_1, %c0_2] : memref<1024x512xbf16, #tpu.memory_space<vmem>>, vector<1024x512xbf16>
    %cst = arith.constant dense<0.000000e+00> : vector<8x512xf32>
    %3 = tpu.matmul %1, %2, %cst {dimension_numbers = #tpu.dot_dimension_numbers<[1], [0], [0], [1], [0, 0, 1, 1], [], []>} : vector<8x1024xbf16>, vector<1024x512xbf16>, vector<8x512xf32> -> vector<8x512xf32>
    %c0_3 = arith.constant 0 : index
    %c0_4 = arith.constant 0 : index
    %4 = vector.load %arg3[%c0_3, %c0_4] : memref<1x512xf32, #tpu.memory_space<vmem>>, vector<1x512xf32>
    %5 = vector.broadcast %4 : vector<1x512xf32> to vector<8x512xf32>
    %6 = arith.addf %3, %5 : vector<8x512xf32>
    %cst_5 = arith.constant 0.000000e+00 : f32
    %7 = vector.broadcast %cst_5 : f32 to vector<8x512xf32>
    %8 = arith.maximumf %6, %7 : vector<8x512xf32>
    %9 = arith.truncf %8 : vector<8x512xf32> to vector<8x512xbf16>
    %c0_6 = arith.constant 0 : index
    %c0_7 = arith.constant 0 : index
    %10 = vector.load %arg4[%c0_6, %c0_7] : memref<512x256xbf16, #tpu.memory_space<vmem>>, vector<512x256xbf16>
    %cst_8 = arith.constant dense<0.000000e+00> : vector<8x256xf32>
    %11 = tpu.matmul %9, %10, %cst_8 {dimension_numbers = #tpu.dot_dimension_numbers<[1], [0], [0], [1], [0, 0, 1, 1], [], []>} : vector<8x512xbf16>, vector<512x256xbf16>, vector<8x256xf32> -> vector<8x256xf32>
    %c0_9 = arith.constant 0 : index
    %c0_10 = arith.constant 0 : index
    %12 = vector.load %arg5[%c0_9, %c0_10] : memref<1x256xf32, #tpu.memory_space<vmem>>, vector<1x256xf32>
    %13 = vector.broadcast %12 : vector<1x256xf32> to vector<8x256xf32>
    %14 = arith.addf %11, %13 : vector<8x256xf32>
    %cst_11 = arith.constant 0.000000e+00 : f32
    %15 = vector.broadcast %cst_11 : f32 to vector<8x256xf32>
    %16 = arith.maximumf %14, %15 : vector<8x256xf32>
    %17 = arith.truncf %16 : vector<8x256xf32> to vector<8x256xbf16>
    %c0_12 = arith.constant 0 : index
    %c0_13 = arith.constant 0 : index
    %18 = vector.load %arg6[%c0_12, %c0_13] : memref<256x1024xbf16, #tpu.memory_space<vmem>>, vector<256x1024xbf16>
    %cst_14 = arith.constant dense<0.000000e+00> : vector<8x1024xf32>
    %19 = tpu.matmul %17, %18, %cst_14 {dimension_numbers = #tpu.dot_dimension_numbers<[1], [0], [0], [1], [0, 0, 1, 1], [], []>} : vector<8x256xbf16>, vector<256x1024xbf16>, vector<8x1024xf32> -> vector<8x1024xf32>
    %c0_15 = arith.constant 0 : index
    %c0_16 = arith.constant 0 : index
    %20 = vector.load %arg7[%c0_15, %c0_16] : memref<1x1024xf32, #tpu.memory_space<vmem>>, vector<1x1024xf32>
    %21 = vector.broadcast %20 : vector<1x1024xf32> to vector<8x1024xf32>
    %22 = arith.addf %19, %21 : vector<8x1024xf32>
    %c0_17 = arith.constant 0 : index
    %c0_18 = arith.constant 0 : index
    %23 = vector.load %arg8[%c0_17, %c0_18] : memref<8x1024xf32, #tpu.memory_space<vmem>>, vector<8x1024xf32>
    tpu.vector_store %arg8[%c0_17, %c0_18], %22 {strides = array<i32>} : memref<8x1024xf32, #tpu.memory_space<vmem>>, vector<8x1024xf32>,
    return
  }
  func.func @transform_0(%arg0: i32) -> (i32, i32) {
    %c0_i32 = arith.constant 0 : i32
    %c0_i32_0 = arith.constant 0 : i32
    %c0_i32_1 = arith.constant 0 : i32
    return %c0_i32, %c0_i32_0 : i32, i32
  }
  func.func @transform_1(%arg0: i32) -> (i32, i32) {
    %c0_i32 = arith.constant 0 : i32
    %c0_i32_0 = arith.constant 0 : i32
    %c0_i32_1 = arith.constant 0 : i32
    return %c0_i32, %c0_i32_0 : i32, i32
  }
  func.func @transform_2(%arg0: i32) -> (i32, i32) {
    %c0_i32 = arith.constant 0 : i32
    %c0_i32_0 = arith.constant 0 : i32
    %c0_i32_1 = arith.constant 0 : i32
    return %c0_i32, %c0_i32_0 : i32, i32
  }
  func.func @transform_3(%arg0: i32) -> (i32, i32) {
    %c0_i32 = arith.constant 0 : i32
    %c0_i32_0 = arith.constant 0 : i32
    %c0_i32_1 = arith.constant 0 : i32
    return %c0_i32, %c0_i32_0 : i32, i32
  }
  func.func @transform_4(%arg0: i32) -> (i32, i32) {
    %c0_i32 = arith.constant 0 : i32
    %c0_i32_0 = arith.constant 0 : i32
    %c0_i32_1 = arith.constant 0 : i32
    return %c0_i32, %c0_i32_0 : i32, i32
  }
  func.func @transform_5(%arg0: i32) -> (i32, i32) {
    %c0_i32 = arith.constant 0 : i32
    %c0_i32_0 = arith.constant 0 : i32
    return %c0_i32, %arg0 : i32, i32
  }
  func.func @transform_6(%arg0: i32) -> (i32, i32) {
    %c0_i32 = arith.constant 0 : i32
    %c0_i32_0 = arith.constant 0 : i32
    return %c0_i32, %arg0 : i32, i32
  }
  func.func @transform_7(%arg0: i32) -> (i32, i32) {
    %c0_i32 = arith.constant 0 : i32
    %c0_i32_0 = arith.constant 0 : i32
    return %c0_i32, %arg0 : i32, i32
  }
}

module attributes {stable_mosaic.version = 11 : i64} {
  func.func @_trunk_kernel(%arg0: i32, %arg1: i32, %arg2: i32, %arg3: memref<1x16x3xf32, #tpu.memory_space<vmem>>, %arg4: memref<1x3x64xbf16, #tpu.memory_space<vmem>>, %arg5: memref<1x64xf32, #tpu.memory_space<vmem>>, %arg6: memref<1x64x128xbf16, #tpu.memory_space<vmem>>, %arg7: memref<1x128xf32, #tpu.memory_space<vmem>>, %arg8: memref<1x128x1024xbf16, #tpu.memory_space<vmem>>, %arg9: memref<1x1x1x1024xf32, #tpu.memory_space<vmem>>) attributes {dimension_semantics = [#tpu.dimension_semantics<parallel>, #tpu.dimension_semantics<parallel>, #tpu.dimension_semantics<arbitrary>], iteration_bounds = array<i64: 2, 1, 1>, scalar_prefetch = 0 : i64, scratch_operands = 0 : i64, tpu.core_type = #tpu.core_type<tc>, window_params = [{transform_indices = @transform_0, window_bounds = array<i64: 1, 16, 3>}, {transform_indices = @transform_1, window_bounds = array<i64: 1, 3, 64>}, {pipeline_mode = #tpu.pipeline_mode<synchronous>, transform_indices = @transform_2, window_bounds = array<i64: 1, 64>}, {transform_indices = @transform_3, window_bounds = array<i64: 1, 64, 128>}, {pipeline_mode = #tpu.pipeline_mode<synchronous>, transform_indices = @transform_4, window_bounds = array<i64: 1, 128>}, {pipeline_mode = #tpu.pipeline_mode<synchronous>, transform_indices = @transform_5, window_bounds = array<i64: 1, 128, 1024>}, {transform_indices = @transform_6, window_bounds = array<i64: 1, 1, 1, 1024>}]} {
    %c0_i32 = arith.constant 0 : i32
    %0 = arith.cmpi eq, %arg2, %c0_i32 : i32
    %1 = arith.extui %0 : i1 to i32
    %c0_i32_0 = arith.constant 0 : i32
    %2 = arith.cmpi ne, %1, %c0_i32_0 : i32
    scf.if %2 {
      %cst_28 = arith.constant 0xFF800000 : f32
      %51 = vector.broadcast %cst_28 : f32 to vector<1x1x1x1024xf32>
      %c0_29 = arith.constant 0 : index
      %c0_30 = arith.constant 0 : index
      %c0_31 = arith.constant 0 : index
      %c0_32 = arith.constant 0 : index
      %52 = vector.load %arg9[%c0_29, %c0_30, %c0_31, %c0_32] : memref<1x1x1x1024xf32, #tpu.memory_space<vmem>>, vector<1x1x1x1024xf32>
      tpu.vector_store %arg9[%c0_29, %c0_30, %c0_31, %c0_32], %51 {strides = array<i32>} : memref<1x1x1x1024xf32, #tpu.memory_space<vmem>>, vector<1x1x1x1024xf32>,
    } else {
    }
    %c0 = arith.constant 0 : index
    %c0_1 = arith.constant 0 : index
    %c0_2 = arith.constant 0 : index
    %3 = vector.load %arg3[%c0, %c0_1, %c0_2] : memref<1x16x3xf32, #tpu.memory_space<vmem>>, vector<1x16x3xf32>
    %4 = vector.shape_cast %3 : vector<1x16x3xf32> to vector<16x3xf32>
    %c0_3 = arith.constant 0 : index
    %c0_4 = arith.constant 0 : index
    %c0_5 = arith.constant 0 : index
    %5 = vector.load %arg4[%c0_3, %c0_4, %c0_5] : memref<1x3x64xbf16, #tpu.memory_space<vmem>>, vector<1x3x64xbf16>
    %6 = vector.shape_cast %5 : vector<1x3x64xbf16> to vector<3x64xbf16>
    %7 = arith.extf %6 : vector<3x64xbf16> to vector<3x64xf32>
    %8 = vector.extract_strided_slice %4 {offsets = [0, 0], sizes = [16, 1], strides = [1, 1]} : vector<16x3xf32> to vector<16x1xf32>
    %9 = vector.extract_strided_slice %7 {offsets = [0, 0], sizes = [1, 64], strides = [1, 1]} : vector<3x64xf32> to vector<1x64xf32>
    %10 = vector.broadcast %8 : vector<16x1xf32> to vector<16x64xf32>
    %11 = vector.broadcast %9 : vector<1x64xf32> to vector<16x64xf32>
    %12 = arith.mulf %10, %11 : vector<16x64xf32>
    %13 = vector.extract_strided_slice %4 {offsets = [0, 1], sizes = [16, 1], strides = [1, 1]} : vector<16x3xf32> to vector<16x1xf32>
    %14 = vector.extract_strided_slice %7 {offsets = [1, 0], sizes = [1, 64], strides = [1, 1]} : vector<3x64xf32> to vector<1x64xf32>
    %15 = vector.broadcast %13 : vector<16x1xf32> to vector<16x64xf32>
    %16 = vector.broadcast %14 : vector<1x64xf32> to vector<16x64xf32>
    %17 = arith.mulf %15, %16 : vector<16x64xf32>
    %18 = arith.addf %12, %17 : vector<16x64xf32>
    %19 = vector.extract_strided_slice %4 {offsets = [0, 2], sizes = [16, 1], strides = [1, 1]} : vector<16x3xf32> to vector<16x1xf32>
    %20 = vector.extract_strided_slice %7 {offsets = [2, 0], sizes = [1, 64], strides = [1, 1]} : vector<3x64xf32> to vector<1x64xf32>
    %21 = vector.broadcast %19 : vector<16x1xf32> to vector<16x64xf32>
    %22 = vector.broadcast %20 : vector<1x64xf32> to vector<16x64xf32>
    %23 = arith.mulf %21, %22 : vector<16x64xf32>
    %24 = arith.addf %18, %23 : vector<16x64xf32>
    %c0_6 = arith.constant 0 : index
    %c0_7 = arith.constant 0 : index
    %25 = vector.load %arg5[%c0_6, %c0_7] : memref<1x64xf32, #tpu.memory_space<vmem>>, vector<1x64xf32>
    %26 = vector.broadcast %25 : vector<1x64xf32> to vector<16x64xf32>
    %27 = arith.addf %24, %26 : vector<16x64xf32>
    %cst = arith.constant 0.000000e+00 : f32
    %28 = vector.broadcast %cst : f32 to vector<16x64xf32>
    %29 = arith.maximumf %27, %28 : vector<16x64xf32>
    %c0_8 = arith.constant 0 : index
    %c0_9 = arith.constant 0 : index
    %c0_10 = arith.constant 0 : index
    %30 = vector.load %arg6[%c0_8, %c0_9, %c0_10] : memref<1x64x128xbf16, #tpu.memory_space<vmem>>, vector<1x64x128xbf16>
    %31 = vector.shape_cast %30 : vector<1x64x128xbf16> to vector<64x128xbf16>
    %32 = arith.truncf %29 : vector<16x64xf32> to vector<16x64xbf16>
    %cst_11 = arith.constant dense<0.000000e+00> : vector<16x128xf32>
    %33 = tpu.matmul %32, %31, %cst_11 {dimension_numbers = #tpu.dot_dimension_numbers<[1], [0], [0], [1], [0, 0, 1, 1], [], []>} : vector<16x64xbf16>, vector<64x128xbf16>, vector<16x128xf32> -> vector<16x128xf32>
    %c0_12 = arith.constant 0 : index
    %c0_13 = arith.constant 0 : index
    %34 = vector.load %arg7[%c0_12, %c0_13] : memref<1x128xf32, #tpu.memory_space<vmem>>, vector<1x128xf32>
    %35 = vector.broadcast %34 : vector<1x128xf32> to vector<16x128xf32>
    %36 = arith.addf %33, %35 : vector<16x128xf32>
    %cst_14 = arith.constant 0.000000e+00 : f32
    %37 = vector.broadcast %cst_14 : f32 to vector<16x128xf32>
    %38 = arith.maximumf %36, %37 : vector<16x128xf32>
    %c0_15 = arith.constant 0 : index
    %c0_16 = arith.constant 0 : index
    %c0_17 = arith.constant 0 : index
    %39 = vector.load %arg8[%c0_15, %c0_16, %c0_17] : memref<1x128x1024xbf16, #tpu.memory_space<vmem>>, vector<1x128x1024xbf16>
    %40 = vector.shape_cast %39 : vector<1x128x1024xbf16> to vector<128x1024xbf16>
    %41 = arith.truncf %38 : vector<16x128xf32> to vector<16x128xbf16>
    %cst_18 = arith.constant dense<0.000000e+00> : vector<16x1024xf32>
    %42 = tpu.matmul %41, %40, %cst_18 {dimension_numbers = #tpu.dot_dimension_numbers<[1], [0], [0], [1], [0, 0, 1, 1], [], []>} : vector<16x128xbf16>, vector<128x1024xbf16>, vector<16x1024xf32> -> vector<16x1024xf32>
    %c0_19 = arith.constant 0 : index
    %c0_20 = arith.constant 0 : index
    %c0_21 = arith.constant 0 : index
    %c0_22 = arith.constant 0 : index
    %43 = vector.load %arg9[%c0_19, %c0_20, %c0_21, %c0_22] : memref<1x1x1x1024xf32, #tpu.memory_space<vmem>>, vector<1x1x1x1024xf32>
    %44 = vector.shape_cast %43 : vector<1x1x1x1024xf32> to vector<1x1024xf32>
    %cst_23 = arith.constant dense<0xFF800000> : vector<1024xf32>
    %45 = vector.multi_reduction <maximumf>, %42, %cst_23 [0] : vector<16x1024xf32> to vector<1024xf32>
    %46 = vector.shape_cast %45 : vector<1024xf32> to vector<1x1024xf32>
    %47 = arith.maximumf %44, %46 : vector<1x1024xf32>
    %c0_24 = arith.constant 0 : index
    %c0_25 = arith.constant 0 : index
    %c0_26 = arith.constant 0 : index
    %c0_27 = arith.constant 0 : index
    %48 = vector.load %arg9[%c0_24, %c0_25, %c0_26, %c0_27] : memref<1x1x1x1024xf32, #tpu.memory_space<vmem>>, vector<1x1x1x1024xf32>
    %49 = vector.shape_cast %48 : vector<1x1x1x1024xf32> to vector<1x1024xf32>
    %50 = vector.shape_cast %47 : vector<1x1024xf32> to vector<1x1x1x1024xf32>
    tpu.vector_store %arg9[%c0_24, %c0_25, %c0_26, %c0_27], %50 {strides = array<i32>} : memref<1x1x1x1024xf32, #tpu.memory_space<vmem>>, vector<1x1x1x1024xf32>,
    return
  }
  func.func @transform_0(%arg0: i32, %arg1: i32, %arg2: i32) -> (i32, i32, i32) {
    %c1_i32 = arith.constant 1 : i32
    %0 = arith.muli %arg1, %c1_i32 : i32
    %1 = arith.addi %0, %arg2 : i32
    %c0_i32 = arith.constant 0 : i32
    %c0_i32_0 = arith.constant 0 : i32
    return %arg0, %1, %c0_i32 : i32, i32, i32
  }
  func.func @transform_1(%arg0: i32, %arg1: i32, %arg2: i32) -> (i32, i32, i32) {
    %c0_i32 = arith.constant 0 : i32
    %c0_i32_0 = arith.constant 0 : i32
    %c0_i32_1 = arith.constant 0 : i32
    return %arg0, %c0_i32, %c0_i32_0 : i32, i32, i32
  }
  func.func @transform_2(%arg0: i32, %arg1: i32, %arg2: i32) -> (i32, i32) {
    %c0_i32 = arith.constant 0 : i32
    %c0_i32_0 = arith.constant 0 : i32
    %c0_i32_1 = arith.constant 0 : i32
    return %c0_i32, %c0_i32_0 : i32, i32
  }
  func.func @transform_3(%arg0: i32, %arg1: i32, %arg2: i32) -> (i32, i32, i32) {
    %c0_i32 = arith.constant 0 : i32
    %c0_i32_0 = arith.constant 0 : i32
    %c0_i32_1 = arith.constant 0 : i32
    return %arg0, %c0_i32, %c0_i32_0 : i32, i32, i32
  }
  func.func @transform_4(%arg0: i32, %arg1: i32, %arg2: i32) -> (i32, i32) {
    %c0_i32 = arith.constant 0 : i32
    %c0_i32_0 = arith.constant 0 : i32
    %c0_i32_1 = arith.constant 0 : i32
    return %c0_i32, %c0_i32_0 : i32, i32
  }
  func.func @transform_5(%arg0: i32, %arg1: i32, %arg2: i32) -> (i32, i32, i32) {
    %c0_i32 = arith.constant 0 : i32
    %c0_i32_0 = arith.constant 0 : i32
    %c0_i32_1 = arith.constant 0 : i32
    %c0_i32_2 = arith.constant 0 : i32
    return %c0_i32, %c0_i32_0, %c0_i32_1 : i32, i32, i32
  }
  func.func @transform_6(%arg0: i32, %arg1: i32, %arg2: i32) -> (i32, i32, i32, i32) {
    %c0_i32 = arith.constant 0 : i32
    %c0_i32_0 = arith.constant 0 : i32
    %c0_i32_1 = arith.constant 0 : i32
    return %arg0, %arg1, %c0_i32, %c0_i32_0 : i32, i32, i32, i32
  }
}

module attributes {stable_mosaic.version = 11 : i64} {
  func.func @_mlp_head_kernel(%arg0: i32, %arg1: memref<8x1024xf32, #tpu.memory_space<vmem>>, %arg2: memref<1024x512xbf16, #tpu.memory_space<vmem>>, %arg3: memref<1x512xf32, #tpu.memory_space<vmem>>, %arg4: memref<512x256xbf16, #tpu.memory_space<vmem>>, %arg5: memref<1x256xf32, #tpu.memory_space<vmem>>, %arg6: memref<256x40xbf16, #tpu.memory_space<vmem>>, %arg7: memref<1x40xf32, #tpu.memory_space<vmem>>, %arg8: memref<8x40xf32, #tpu.memory_space<vmem>>) attributes {dimension_semantics = [#tpu.dimension_semantics<arbitrary>], iteration_bounds = array<i64: 1>, scalar_prefetch = 0 : i64, scratch_operands = 0 : i64, tpu.core_type = #tpu.core_type<tc>, window_params = [{pipeline_mode = #tpu.pipeline_mode<synchronous>, transform_indices = @transform_0, window_bounds = array<i64: 8, 1024>}, {pipeline_mode = #tpu.pipeline_mode<synchronous>, transform_indices = @transform_1, window_bounds = array<i64: 1024, 512>}, {pipeline_mode = #tpu.pipeline_mode<synchronous>, transform_indices = @transform_2, window_bounds = array<i64: 1, 512>}, {pipeline_mode = #tpu.pipeline_mode<synchronous>, transform_indices = @transform_3, window_bounds = array<i64: 512, 256>}, {pipeline_mode = #tpu.pipeline_mode<synchronous>, transform_indices = @transform_4, window_bounds = array<i64: 1, 256>}, {transform_indices = @transform_5, window_bounds = array<i64: 256, 40>}, {transform_indices = @transform_6, window_bounds = array<i64: 1, 40>}, {transform_indices = @transform_7, window_bounds = array<i64: 8, 40>}]} {
    %c0 = arith.constant 0 : index
    %c0_0 = arith.constant 0 : index
    %0 = vector.load %arg1[%c0, %c0_0] : memref<8x1024xf32, #tpu.memory_space<vmem>>, vector<8x1024xf32>
    %1 = arith.truncf %0 : vector<8x1024xf32> to vector<8x1024xbf16>
    %c0_1 = arith.constant 0 : index
    %c0_2 = arith.constant 0 : index
    %2 = vector.load %arg2[%c0_1, %c0_2] : memref<1024x512xbf16, #tpu.memory_space<vmem>>, vector<1024x512xbf16>
    %cst = arith.constant dense<0.000000e+00> : vector<8x512xf32>
    %3 = tpu.matmul %1, %2, %cst {dimension_numbers = #tpu.dot_dimension_numbers<[1], [0], [0], [1], [0, 0, 1, 1], [], []>} : vector<8x1024xbf16>, vector<1024x512xbf16>, vector<8x512xf32> -> vector<8x512xf32>
    %c0_3 = arith.constant 0 : index
    %c0_4 = arith.constant 0 : index
    %4 = vector.load %arg3[%c0_3, %c0_4] : memref<1x512xf32, #tpu.memory_space<vmem>>, vector<1x512xf32>
    %5 = vector.broadcast %4 : vector<1x512xf32> to vector<8x512xf32>
    %6 = arith.addf %3, %5 : vector<8x512xf32>
    %cst_5 = arith.constant 0.000000e+00 : f32
    %7 = vector.broadcast %cst_5 : f32 to vector<8x512xf32>
    %8 = arith.maximumf %6, %7 : vector<8x512xf32>
    %9 = arith.truncf %8 : vector<8x512xf32> to vector<8x512xbf16>
    %c0_6 = arith.constant 0 : index
    %c0_7 = arith.constant 0 : index
    %10 = vector.load %arg4[%c0_6, %c0_7] : memref<512x256xbf16, #tpu.memory_space<vmem>>, vector<512x256xbf16>
    %cst_8 = arith.constant dense<0.000000e+00> : vector<8x256xf32>
    %11 = tpu.matmul %9, %10, %cst_8 {dimension_numbers = #tpu.dot_dimension_numbers<[1], [0], [0], [1], [0, 0, 1, 1], [], []>} : vector<8x512xbf16>, vector<512x256xbf16>, vector<8x256xf32> -> vector<8x256xf32>
    %c0_9 = arith.constant 0 : index
    %c0_10 = arith.constant 0 : index
    %12 = vector.load %arg5[%c0_9, %c0_10] : memref<1x256xf32, #tpu.memory_space<vmem>>, vector<1x256xf32>
    %13 = vector.broadcast %12 : vector<1x256xf32> to vector<8x256xf32>
    %14 = arith.addf %11, %13 : vector<8x256xf32>
    %cst_11 = arith.constant 0.000000e+00 : f32
    %15 = vector.broadcast %cst_11 : f32 to vector<8x256xf32>
    %16 = arith.maximumf %14, %15 : vector<8x256xf32>
    %17 = arith.truncf %16 : vector<8x256xf32> to vector<8x256xbf16>
    %c0_12 = arith.constant 0 : index
    %c0_13 = arith.constant 0 : index
    %18 = vector.load %arg6[%c0_12, %c0_13] : memref<256x40xbf16, #tpu.memory_space<vmem>>, vector<256x40xbf16>
    %cst_14 = arith.constant dense<0.000000e+00> : vector<8x40xf32>
    %19 = tpu.matmul %17, %18, %cst_14 {dimension_numbers = #tpu.dot_dimension_numbers<[1], [0], [0], [1], [0, 0, 1, 1], [], []>} : vector<8x256xbf16>, vector<256x40xbf16>, vector<8x40xf32> -> vector<8x40xf32>
    %c0_15 = arith.constant 0 : index
    %c0_16 = arith.constant 0 : index
    %20 = vector.load %arg7[%c0_15, %c0_16] : memref<1x40xf32, #tpu.memory_space<vmem>>, vector<1x40xf32>
    %21 = vector.broadcast %20 : vector<1x40xf32> to vector<8x40xf32>
    %22 = arith.addf %19, %21 : vector<8x40xf32>
    %cst_17 = arith.constant dense<0xFF800000> : vector<8xf32>
    %23 = vector.multi_reduction <maximumf>, %22, %cst_17 [1] : vector<8x40xf32> to vector<8xf32>
    %24 = vector.shape_cast %23 : vector<8xf32> to vector<8x1xf32>
    %25 = vector.broadcast %24 : vector<8x1xf32> to vector<8x40xf32>
    %26 = arith.subf %22, %25 : vector<8x40xf32>
    %27 = math.exp %26 : vector<8x40xf32>
    %cst_18 = arith.constant dense<0.000000e+00> : vector<8xf32>
    %28 = vector.multi_reduction <add>, %27, %cst_18 [1] : vector<8x40xf32> to vector<8xf32>
    %29 = vector.shape_cast %28 : vector<8xf32> to vector<8x1xf32>
    %30 = math.log %29 : vector<8x1xf32>
    %31 = vector.broadcast %30 : vector<8x1xf32> to vector<8x40xf32>
    %32 = arith.subf %26, %31 : vector<8x40xf32>
    %c0_19 = arith.constant 0 : index
    %c0_20 = arith.constant 0 : index
    %33 = vector.load %arg8[%c0_19, %c0_20] : memref<8x40xf32, #tpu.memory_space<vmem>>, vector<8x40xf32>
    tpu.vector_store %arg8[%c0_19, %c0_20], %32 {strides = array<i32>} : memref<8x40xf32, #tpu.memory_space<vmem>>, vector<8x40xf32>,
    return
  }
  func.func @transform_0(%arg0: i32) -> (i32, i32) {
    %c0_i32 = arith.constant 0 : i32
    %c0_i32_0 = arith.constant 0 : i32
    %c0_i32_1 = arith.constant 0 : i32
    return %c0_i32, %c0_i32_0 : i32, i32
  }
  func.func @transform_1(%arg0: i32) -> (i32, i32) {
    %c0_i32 = arith.constant 0 : i32
    %c0_i32_0 = arith.constant 0 : i32
    %c0_i32_1 = arith.constant 0 : i32
    return %c0_i32, %c0_i32_0 : i32, i32
  }
  func.func @transform_2(%arg0: i32) -> (i32, i32) {
    %c0_i32 = arith.constant 0 : i32
    %c0_i32_0 = arith.constant 0 : i32
    %c0_i32_1 = arith.constant 0 : i32
    return %c0_i32, %c0_i32_0 : i32, i32
  }
  func.func @transform_3(%arg0: i32) -> (i32, i32) {
    %c0_i32 = arith.constant 0 : i32
    %c0_i32_0 = arith.constant 0 : i32
    %c0_i32_1 = arith.constant 0 : i32
    return %c0_i32, %c0_i32_0 : i32, i32
  }
  func.func @transform_4(%arg0: i32) -> (i32, i32) {
    %c0_i32 = arith.constant 0 : i32
    %c0_i32_0 = arith.constant 0 : i32
    %c0_i32_1 = arith.constant 0 : i32
    return %c0_i32, %c0_i32_0 : i32, i32
  }
  func.func @transform_5(%arg0: i32) -> (i32, i32) {
    %c0_i32 = arith.constant 0 : i32
    %c0_i32_0 = arith.constant 0 : i32
    return %c0_i32, %arg0 : i32, i32
  }
  func.func @transform_6(%arg0: i32) -> (i32, i32) {
    %c0_i32 = arith.constant 0 : i32
    %c0_i32_0 = arith.constant 0 : i32
    return %c0_i32, %arg0 : i32, i32
  }
  func.func @transform_7(%arg0: i32) -> (i32, i32) {
    %c0_i32 = arith.constant 0 : i32
    %c0_i32_0 = arith.constant 0 : i32
    return %c0_i32, %arg0 : i32, i32
  }
}

</mosaic_0001>

<bundles_post_ra>
// kernel: pointnet_forward.6
= control target key start
LH: loop header
LB: loop body
LE: loop exit
PB: predicated region body
PF: predicated region fallthrough
CT: control target
= control target key end

     0   :  { %11 = vsyncpa [#allocation3], 0  ;;  %s1902_s0 = inlined_call_operand.vmem [shape: f32[2,16,3], index: 0, kind: input, shape index: {}]   ;;  %s1903_s1 = inlined_call_operand.hbm [shape: bf16[1,3,64], index: 1, kind: input, shape index: {}]   ;;  %s1904_s2 = inlined_call_operand.hbm [shape: f32[1,64], index: 2, kind: input, shape index: {}]   ;;  %s1905_s3 = inlined_call_operand.hbm [shape: bf16[1,64,128], index: 3, kind: input, shape index: {}]   ;;  %s1906_s4 = inlined_call_operand.hbm [shape: f32[1,128], index: 4, kind: input, shape index: {}]   ;;  %s1907_s5 = inlined_call_operand.hbm [shape: bf16[1,128,1024], index: 5, kind: input, shape index: {}]   ;;  %s1908_s6 = inlined_call_operand.vmem [shape: f32[2,1,1,1024], index: 6, kind: output, shape index: {}]  }
   0x1   :  { %12 = vsyncpa [#allocation5], 0 }
   0x2   :  { %13 = vsyncpa [#allocation8], 0  ;;  %s1755_s21 = smov 0   ;;  %s1757_s22 = smov 0  }
   0x3   :  { %s1759_s23 = smov 0  }
   0x4 LB: > { %s1705_s24 = smov [#allocation4]   ;;  %s1336_s26 = sadd.s32 4294967295, %s1703_s23   ;;  %s1703_s23 = sphi %s1759_s23, %s19_s23   ;;  %s1699_s22 = sphi %s1757_s22, %s1921_s22   ;;  %s1695_s21 = sphi %s1755_s21, %s1920_s21  }
   0x5   : > { %s230_s25 = sshll.u32 %s1705_s24, 4  ;;  %p1338_p0 = scmp.ge.s32.totalorder %s1703_s23, 1  ;;  %s231_s25 = int_to_ptr.vmem [resolvable:$true] %s230_s25 }
   0x6   : > { %p206_p1 = scmp.lt.s32.totalorder %s1703_s23, 3  ;;  %p1773_p2 = scmp.eq.s32.totalorder %s1336_s26, 0 }
   0x7   : > { %s1706_s29 = smov [#allocation7]   ;;  %s38_s8 = sadd.s32 1, %s1699_s22 }
   0x8   : > { %s1912_s27 = scalar_select %p1773_p2, 1, 0 }
   0x9   : > { %p1777_p3 = pnand %p1338_p0, %p206_p1  ;;  %s254_s30 = sshll.u32 %s1706_s29, 4  ;;  %s255_s30 = int_to_ptr.vmem [resolvable:$true] %s254_s30 }
   0xa   : > { %p1790_p6 = scmp.ge.s32.totalorder %s38_s8, 2  ;;  %s1550_s11 = scalar_lea.vmem %s231_s25, 16 }
   0xb   : > { %s1913_s28 = scalar_select %p1777_p3, 1, 0 }
   0xc   : > { %p1465_p4 = pneg %p1777_p3  ;;  %p1551_p8 = scmp.ne.s32.totalorder %s231_s25, %s1550_s11 }
   0xd   : > { %s1915_s9 = scalar_select %p1790_p6, 1, 0 }
   0xe   : > { %p1785_p5 = pnand %p1773_p2, %p1465_p4  ;;  %s1557_s12 = scalar_lea.vmem %s231_s25, 32 }
   0xf   : > { %p1558_p11 = scmp.lt.s32.totalorder %s231_s25, %s231_s25  ;;  %p1559_p12 = scmp.lt.s32.totalorder %s1557_s12, %s1550_s11 }
  0x10   : > { %p1796_p7 = pneg %p1785_p5 }
  0x11   : > { %p1560_p13 = por %p1559_p12, %p1558_p11 }
  0x12   : > { %p1553_p9 = pnand %p1551_p8, %p1796_p7 }
  0x14   : > { %p1554_p10 = pneg %p1553_p9 }
  0x16   : > { %p1561_p0 = pnand %p1560_p13, %p1554_p10 }
  0x18   : > { %1564 = shalt.err (!%p1561_p0)
}
  0x19   : > { %1471 = dma.hbm_to_vmem [thread:$0]  (!%p1785_p5), %s1904_s2, 16, %s231_s25, [#allocation5]  }
  0x1a   : > { %s1576_s15 = scalar_lea.vmem %s255_s30, 16  ;;  %s1583_s16 = scalar_lea.vmem %s255_s30, 32 }
  0x1b   : > { %p1577_p1 = scmp.ne.s32.totalorder %s255_s30, %s1576_s15  ;;  %p1584_p8 = scmp.lt.s32.totalorder %s255_s30, %s255_s30 }
  0x1c   : > { %p1585_p9 = scmp.lt.s32.totalorder %s1583_s16, %s1576_s15 }
  0x1d   : > { %p1579_p4 = pnand %p1577_p1, %p1796_p7 }
  0x1e   : > { %p1586_p3 = por %p1585_p9, %p1584_p8 }
  0x1f   : > { %p1580_p2 = pneg %p1579_p4 }
  0x21   : > { %p1587_p6 = pnand %p1586_p3, %p1580_p2 }
  0x23   : > { %1590 = shalt.err (!%p1587_p6)
}
  0x24   : > { %1477 = dma.hbm_to_vmem [thread:$0]  (!%p1785_p5), %s1906_s4, 16, %s255_s30, [#allocation8]  }
  0x25   : > { %p1917_p10 = scmp.ne.s32.totalorder %s1915_s9, 0  ;;  %s1707_s19 = smov [#allocation2]  }
  0x26   : > { %s219_s20 = sshll.u32 %s1707_s19, 4  ;;  %s1708_s24 = smov [#allocation6]   ;;  %s220_s20 = int_to_ptr.vmem [resolvable:$true] %s219_s20 }
  0x27   : > { %s1923_s8 = smov (%p1917_p10, %s38_s8), 0  ;;  %s240_s25 = sshll.u32 %s1708_s24, 4  ;;  %s241_s25 = int_to_ptr.vmem [resolvable:$true] %s240_s25 }
  0x28   : > { %s1602_s26 = scalar_lea.vmem %s220_s20, 32  ;;  %p1610_p6 = scmp.lt.s32.totalorder %s220_s20, %s220_s20 }
  0x29   : > { %p1603_p11 = scmp.ne.s32.totalorder %s220_s20, %s1602_s26  ;;  %p1611_p12 = scmp.lt.s32.totalorder %s1602_s26, %s1602_s26 }
  0x2b   : > { %p1605_p2 = pnand %p1603_p11, %p1796_p7  ;;  %p1612_p13 = por %p1611_p12, %p1610_p6 }
  0x2d   : > { %p1606_p3 = pneg %p1605_p2 }
  0x2f   : > { %p1613_p0 = pnand %p1612_p13, %p1606_p3 }
  0x31   : > { %1616 = shalt.err (!%p1613_p0)
}
  0x32   : > { %1468 = dma.hbm_to_vmem [thread:$0]  (!%p1785_p5), %s1903_s1, 32, %s220_s20, [#allocation3]  }
  0x33   : > { %s1628_s9 = scalar_lea.vmem %s241_s25, 512  ;;  %p1636_p9 = scmp.lt.s32.totalorder %s241_s25, %s241_s25 }
  0x34   : > { %p1629_p1 = scmp.ne.s32.totalorder %s241_s25, %s1628_s9  ;;  %p1637_p10 = scmp.lt.s32.totalorder %s1628_s9, %s1628_s9 }
  0x36   : > { %p1631_p4 = pnand %p1629_p1, %p1796_p7  ;;  %p1638_p11 = por %p1637_p10, %p1636_p9 }
  0x38   : > { %p1632_p8 = pneg %p1631_p4 }
  0x3a   : > { %p1639_p2 = pnand %p1638_p11, %p1632_p8 }
  0x3c   : > { %1642 = shalt.err (!%p1639_p2)
}
  0x3d   : > { %s1709_s11 = smov 64   ;;  %s1710_s12 = smov 4  }
  0x3e   : > { %1474 = dma.hbm_to_vmem [thread:$0]  (!%p1785_p5), %s1905_s3, 512, %s241_s25, [#allocation5], %s1709_s11, %s1709_s11, %s1710_s12  }
  0x3f   : > { %s1711_s15 = smov [#allocation9]  }
  0x40   : > { %s264_s16 = sshll.u32 %s1711_s15, 4  ;;  %s265_s16 = int_to_ptr.vmem [resolvable:$true] %s264_s16 }
  0x41   : > { %s1654_s17 = scalar_lea.vmem %s265_s16, 8192  ;;  %p1662_p13 = scmp.lt.s32.totalorder %s265_s16, %s265_s16 }
  0x42   : > { %p1655_p3 = scmp.ne.s32.totalorder %s265_s16, %s1654_s17  ;;  %p1663_p0 = scmp.lt.s32.totalorder %s1654_s17, %s1654_s17 }
  0x44   : > { %p1657_p6 = pnand %p1655_p3, %p1796_p7  ;;  %p1664_p1 = por %p1663_p0, %p1662_p13 }
  0x46   : > { %p1658_p12 = pneg %p1657_p6 }
  0x48   : > { %p1665_p4 = pnand %p1664_p1, %p1658_p12 }
  0x4a   : > { %1668 = shalt.err (!%p1665_p4)
}
  0x4b   : > { %s1712_s18 = smov 512   ;;  %s1713_s19 = smov 32  }
  0x4c   : > { %1480 = dma.hbm_to_vmem [thread:$0]  (!%p1785_p5), %s1907_s5, 8192, %s265_s16, [#allocation8], %s1712_s18, %s1712_s18, %s1713_s19  }
  0x4d   : > { %p1918_p8 = scmp.ne.s32.totalorder %s1913_s28, 0 }
  0x4e   : > { %p1919_p9 = scmp.ne.s32.totalorder (!%p1918_p8), %s1912_s27, 0 }
  0x4f   : > { %295 = sbr.rel (%p1918_p8) target bundleno = 697 (0x2b9), region = 44 }
  0x54   : > { %1682 = dma.done.wait (%p1919_p9), [#allocation3], 32  }
  0x55   : > { %1684 = vsyncadd (%p1919_p9), [#allocation3], 4294967264 }
  0x56   : > { %1686 = dma.done.wait (%p1919_p9), [#allocation5], 528  }
  0x57   : > { %1688 = vsyncadd (%p1919_p9), [#allocation5], 4294966768 }
  0x58   : > { %1690 = dma.done.wait (%p1919_p9), [#allocation8], 8208  }
  0x59   : > { %1692 = vsyncadd (%p1919_p9), [#allocation8], 4294959088  ;;  %p351_p5 = scmp.lt.s32.totalorder %s1695_s21, 1  ;;  %v1714_v0 = vmov 1   ;;  %v1715_v1 = vmov 0   ;;  %v1716_v3 = vmov 0.0   ;;  %v389_v38 = vlaneseq }
  0x5a   : > { %1532 = vset.pattern.permute.xlu1 %v1714_v0  ;;  %1531 = vset.pattern.permute.xlu0 %v1715_v1  ;;  %v1535_v4 = vld [vmem:[#allocation6 + $0x18] sm:$0xff]   ;;  %v1536_v6 = vld [vmem:[#allocation6 + $0x10] sm:$0xff]   ;;  %v1537_v7 = vld [vmem:[#allocation6 + $0x8] sm:$0xff]   ;;  %v1717_v8 = vmov 2   ;;  %vm1718_vm0 = vmmov 0   ;;  %vm478_vm1 = vcmask 523264  }
  0x5b   : > { %s1925_s21 = smov (!%p351_p5, %s1695_s21), 1  ;;  %942 = vmatprep.mubr.bf16.mxu1 %v1715_v1  ;;  %1433 = vmatprep.subr.bf16.mxu0 %v1716_v3  ;;  %v1538_v9 = vld [vmem:[#allocation6] sm:$0xff]   ;;  %v1863_v12 = vld [vmem:[#allocation9 + $0x1c8] sm:$0xff]  ;;  %v1871_v39 = vshrl.u32 %v389_v38, 7  ;;  %v377_v40 = vld [vmem:[#allocation2] sm:$0x3] }
  0x5c   : > { %s1427_s28 = sshll.u32 %s1925_s21, 4  ;;  %1434 = vmatpush3.bf16.msra.mxu0 %v1535_v4  ;;  %1441 = vmatprep.mubr.msk.bf16.mxu0 %vm1718_vm0, %v1716_v3  ;;  %v581_v10 = vld [vmem:[#allocation9 + $0x1c0] sm:$0xff]  ;;  %v1865_v14 = vld [vmem:[#allocation9 + $0x1e8] sm:$0xff]  ;;  %v378_v41 = vunpack.c.l.bf16 %v377_v40  ;;  %v1354_v62 = vld [vmem:[#allocation4] ss:$0 sm:$0xff]  ;;  %s1353_s27 = sshll.u32 %s1925_s21, 3 }
  0x5d   : > { %s358_s25 = scalar_lea.vmem %s1902_s0, %s1427_s28  ;;  %1435 = vmatprep.subr.bf16.mxu0 %v1716_v3  ;;  %v585_v11 = vld [vmem:[#allocation9 + $0x1e0] sm:$0xff]  ;;  %v1419_v18 = vcombine.low %v1863_v12, %v1865_v14  ;;  %v1420_v19 = vcombine.high %v1863_v12, %v1865_v14  ;;  %v405_v42 = vsub.s32 1, %v1871_v39  ;;  %v391_v43 = vsub.s32 0, %v1871_v39  ;;  %v574_v4 = vld [vmem:[#allocation9 + $0x188] sm:$0xff]  ;;  %s368_s30 = scalar_lea.vmem %s1908_s6, %s1353_s27 }
  0x5e   : > { %v375_v2 = vld [vmem:[%s358_s25] sm:$0xff]  ;;  %v376_v5 = vld [vmem:[%s358_s25 + $0x8] sm:$0xff]  ;;  %v1418_v13 = vcombine.high %v581_v10, %v585_v11  ;;  %v1417_v15 = vcombine.low %v581_v10, %v585_v11  ;;  %v421_v46 = vsub.s32 2, %v1871_v39 }
  0x5f   : > { %396 = vperm.xlu1 %1532, %v375_v2   ;;  %381 = vperm.xlu0 %1531, %v375_v2   ;;  %v573_v16 = vld [vmem:[#allocation9 + $0x180] sm:$0xff]  ;;  %v406_v47 = vrot.slane %v378_v41, %v405_v42  ;;  %v392_v48 = vrot.slane %v378_v41, %v391_v43  ;;  %v566_v10 = vld [vmem:[#allocation9 + $0x148] sm:$0xff] }
  0x60   : > { %1436 = vmatpush3.bf16.msra.mxu0 %v1536_v6  ;;  %v577_v17 = vld [vmem:[#allocation9 + $0x1a0] sm:$0xff]  ;;  %910 = vmatprep.subr.bf16.mxu1 %v1418_v13  ;;  %v422_v51 = vrot.slane %v378_v41, %v421_v46  ;;  %v570_v11 = vld [vmem:[#allocation9 + $0x168] sm:$0xff]  ;;  %v584_v46 = vld [vmem:[#allocation9 + $0x1d8] sm:$0xff] }
  0x61   : > { %1437 = vmatprep.subr.bf16.mxu0 %v1716_v3  ;;  %v1410_v20 = vcombine.high %v573_v16, %v577_v17  ;;  %911 = vmatpush1.bf16.msra.mxu1 %v1417_v15  ;;  %v1409_v21 = vcombine.low %v573_v16, %v577_v17  ;;  %v565_v22 = vld [vmem:[#allocation9 + $0x140] sm:$0xff]  ;;  %v1404_v15 = vcombine.high %v566_v10, %v570_v11  ;;  %v558_v16 = vld [vmem:[#allocation9 + $0x108] sm:$0xff] }
  0x62   : > { %v569_v23 = vld [vmem:[#allocation9 + $0x160] sm:$0xff]  ;;  %v562_v17 = vld [vmem:[#allocation9 + $0x128] sm:$0xff] }
  0x63   : > { %400 = vperm.xlu1 %1532, %v376_v5   ;;  %386 = vperm.xlu0 %1531, %v376_v5   ;;  %v1402_v24 = vcombine.high %v565_v22, %v569_v23  ;;  %v1401_v25 = vcombine.low %v565_v22, %v569_v23  ;;  %v557_v26 = vld [vmem:[#allocation9 + $0x100] sm:$0xff]  ;;  %v554_v22 = vld [vmem:[#allocation9 + $0xe8] sm:$0xff]  ;;  %v1395_v23 = vcombine.low %v558_v16, %v562_v17 }
  0x64   : > { %1438 = vmatpush3.bf16.msra.mxu0 %v1537_v7  ;;  %912 = vmatprep.subr.bf16.mxu1 %v1410_v20  ;;  %v561_v27 = vld [vmem:[#allocation9 + $0x120] sm:$0xff]  ;;  %v1396_v20 = vcombine.high %v558_v16, %v562_v17  ;;  %v546_v12 = vld [vmem:[#allocation9 + $0xa8] sm:$0xff]  ;;  %v563_v16 = vld [vmem:[#allocation9 + $0x130] sm:$0xff] }
  0x65   : > { %1439 = vmatprep.subr.bf16.mxu0 %v1716_v3  ;;  %913 = vmatpush1.bf16.msra.mxu1 %v1409_v21  ;;  %v1394_v28 = vcombine.high %v557_v26, %v561_v27  ;;  %v1393_v29 = vcombine.low %v557_v26, %v561_v27  ;;  %v549_v30 = vld [vmem:[#allocation9 + $0xc0] sm:$0xff]  ;;  %v550_v21 = vld [vmem:[#allocation9 + $0xc8] sm:$0xff]  ;;  %v560_v17 = vld [vmem:[#allocation9 + $0x118] sm:$0xff] }
  0x66   : > { %914 = vmatprep.subr.bf16.mxu1 %v1402_v24  ;;  %v553_v31 = vld [vmem:[#allocation9 + $0xe0] sm:$0xff]  ;;  %v1388_v24 = vcombine.high %v550_v21, %v554_v22  ;;  %v1387_v14 = vcombine.low %v550_v21, %v554_v22  ;;  %v530_v40 = vld [vmem:[#allocation9 + $0x28] sm:$0xff] }
  0x67   : > { %1534 = vset.pattern.permute.xlu1 %v1717_v8  ;;  %1533 = vset.pattern.permute.xlu0 %v1717_v8  ;;  %v1386_v32 = vcombine.high %v549_v30, %v553_v31  ;;  %v1385_v33 = vcombine.low %v549_v30, %v553_v31  ;;  %v541_v34 = vld [vmem:[#allocation9 + $0x80] sm:$0xff]  ;;  %v538_v31 = vld [vmem:[#allocation9 + $0x68] sm:$0xff] }
  0x68   : > { %416 = vperm.xlu1 %1534, %v376_v5   ;;  %412 = vperm.xlu0 %1533, %v375_v2   ;;  %v545_v35 = vld [vmem:[#allocation9 + $0xa0] sm:$0xff]  ;;  %v578_v5 = vld [vmem:[#allocation9 + $0x1a8] sm:$0xff] }
  0x69   : > { %1440 = vmatpush3.bf16.msra.mxu0 %v1538_v9  ;;  %915 = vmatpush1.bf16.msra.mxu1 %v1401_v25  ;;  %v1378_v36 = vcombine.high %v541_v34, %v545_v35  ;;  %v1377_v37 = vcombine.low %v541_v34, %v545_v35  ;;  %v1412_v9 = vcombine.high %v574_v4, %v578_v5  ;;  %v542_v25 = vld [vmem:[#allocation9 + $0x88] sm:$0xff]  ;;  %v533_v27 = vld [vmem:[#allocation9 + $0x40] sm:$0xff] }
  0x6a   : > { %953 = vmatprep.subr.bf16.mxu0 %v1420_v19  ;;  %916 = vmatprep.subr.bf16.mxu1 %v1394_v28  ;;  %v1411_v13 = vcombine.low %v574_v4, %v578_v5  ;;  %v1403_v19 = vcombine.low %v566_v10, %v570_v11  ;;  %v1379_v26 = vcombine.low %v542_v25, %v546_v12  ;;  %v537_v28 = vld [vmem:[#allocation9 + $0x60] sm:$0xff]  ;;  %v567_v5 = vld [vmem:[#allocation9 + $0x150] sm:$0xff] }
  0x6b   : > { %v1370_v30 = vcombine.high %v533_v27, %v537_v28  ;;  %v1369_v34 = vcombine.low %v533_v27, %v537_v28  ;;  %v525_v35 = vld [vmem:[#allocation9] sm:$0xff]  ;;  %v543_v28 = vld [vmem:[#allocation9 + $0x90] sm:$0xff] }
  0x6d   : > { %917 = vmatpush1.bf16.msra.mxu1 %v1393_v29  ;;  %v534_v29 = vld [vmem:[#allocation9 + $0x48] sm:$0xff] }
  0x6e   : > { %918 = vmatprep.subr.bf16.mxu1 %v1386_v32  ;;  %v1371_v32 = vcombine.low %v534_v29, %v538_v31 }
  0x71   : > { %919 = vmatpush1.bf16.msra.mxu1 %v1385_v33  ;;  %v1372_v33 = vcombine.high %v534_v29, %v538_v31  ;;  %v547_v29 = vld [vmem:[#allocation9 + $0xb0] sm:$0xff]  ;;  %v548_v31 = vld [vmem:[#allocation9 + $0xb8] sm:$0xff] }
  0x72   : > { %920 = vmatprep.subr.bf16.mxu1 %v1378_v36  ;;  %v529_v36 = vld [vmem:[#allocation9 + $0x20] sm:$0xff] }
  0x73   : > { %v1362_v38 = vcombine.high %v525_v35, %v529_v36  ;;  %v1361_v43 = vcombine.low %v525_v35, %v529_v36  ;;  %v535_v36 = vld [vmem:[#allocation9 + $0x50] sm:$0xff] }
  0x75   : > { %921 = vmatpush1.bf16.msra.mxu1 %v1377_v37  ;;  %v526_v37 = vld [vmem:[#allocation9 + $0x8] sm:$0xff] }
  0x76   : > { %922 = vmatprep.subr.bf16.mxu1 %v1370_v30  ;;  %v1363_v41 = vcombine.low %v526_v37, %v530_v40  ;;  %v1364_v42 = vcombine.high %v526_v37, %v530_v40  ;;  %v544_v30 = vld [vmem:[#allocation9 + $0x98] sm:$0xff]  ;;  %v539_v37 = vld [vmem:[#allocation9 + $0x70] sm:$0xff] }
  0x77   : > { %v1384_v35 = vcombine.high %v544_v30, %v548_v31  ;;  %v540_v40 = vld [vmem:[#allocation9 + $0x78] sm:$0xff] }
  0x79   : > { %923 = vmatpush1.bf16.msra.mxu1 %v1369_v34  ;;  %v1382_v34 = vcombine.high %v543_v28, %v547_v29 }
  0x7a   : > { %924 = vmatprep.subr.bf16.mxu1 %v1362_v38  ;;  %v536_v38 = vld [vmem:[#allocation9 + $0x58] sm:$0xff] }
  0x7d   : > { %925 = vmatpush1.bf16.msra.mxu1 %v1361_v43  ;;  %v1374_v43 = vcombine.high %v535_v36, %v539_v37 }
  0xda   : > { %v397_v44 = vpop.permute.xlu1 %396  ;;  %v382_v45 = vpop.permute.xlu0 %381 }
  0xdb   : > { %v407_v52 = vmul.f32 %v406_v47, %v397_v44  ;;  %v393_v53 = vmul.f32 %v392_v48, %v382_v45  ;;  %v583_v44 = vld [vmem:[#allocation9 + $0x1d0] sm:$0xff] }
  0xdc   : > { %v587_v45 = vld [vmem:[#allocation9 + $0x1f0] sm:$0xff] }
  0xdd   : > { %v409_v58 = vadd.f32 %v407_v52, %v393_v53  ;;  %v1355_v52 = vld [vmem:[#allocation7] ss:$0 sm:$0xff] }
  0xde   : > { %v401_v49 = vpop.permute.xlu1 %400  ;;  %v387_v50 = vpop.permute.xlu0 %386 }
  0xdf   : > { %v408_v54 = vmul.f32 %v406_v47, %v401_v49  ;;  %v394_v55 = vmul.f32 %v392_v48, %v387_v50  ;;  %v1422_v47 = vcombine.high %v583_v44, %v587_v45  ;;  %v588_v48 = vld [vmem:[#allocation9 + $0x1f8] sm:$0xff]  ;;  %v1421_v49 = vcombine.low %v583_v44, %v587_v45  ;;  %v527_v45 = vld [vmem:[#allocation9 + $0x10] sm:$0xff] }
  0xe0   : > { %v1423_v50 = vcombine.low %v584_v46, %v588_v48  ;;  %v1376_v44 = vcombine.high %v536_v38, %v540_v40 }
  0xe1   : > { %v410_v59 = vadd.f32 %v408_v54, %v394_v55  ;;  %996 = vmatprep.subr.bf16.mxu1 %v1422_v47  ;;  %v528_v47 = vld [vmem:[#allocation9 + $0x18] sm:$0xff] }
  0xe3   : > { %v417_v56 = vpop.permute.xlu1 %416  ;;  %v413_v57 = vpop.permute.xlu0 %412 }
  0xe4   : > { %v424_v60 = vmul.f32 %v422_v51, %v417_v56  ;;  %v423_v61 = vmul.f32 %v422_v51, %v413_v57  ;;  %v1424_v51 = vcombine.high %v584_v46, %v588_v48  ;;  %v531_v46 = vld [vmem:[#allocation9 + $0x30] sm:$0xff]  ;;  %v532_v48 = vld [vmem:[#allocation9 + $0x38] sm:$0xff] }
  0xe6   : > { %v426_v63 = vadd.f32 %v424_v60, %v410_v59  ;;  %v425_v0 = vadd.f32 %v423_v61, %v409_v58  ;;  %v575_v58 = vld [vmem:[#allocation9 + $0x190] sm:$0xff]  ;;  %v576_v61 = vld [vmem:[#allocation9 + $0x198] sm:$0xff] }
  0xe7   : > { %v579_v60 = vld [vmem:[#allocation9 + $0x1b0] sm:$0xff] }
  0xe8   : > { %v435_v2 = vadd.f32 %v1354_v62, %v426_v63  ;;  %v434_v3 = vadd.f32 %v1354_v62, %v425_v0  ;;  %v580_v62 = vld [vmem:[#allocation9 + $0x1b8] sm:$0xff] }
  0xe9   : > { %v1416_v4 = vcombine.high %v576_v61, %v580_v62  ;;  %v1415_v10 = vcombine.low %v576_v61, %v580_v62 }
  0xea   : > { %v437_v6 = vmax.f32 %v435_v2, 0.0  ;;  %v436_v7 = vmax.f32 %v434_v3, 0.0  ;;  %v1414_v3 = vcombine.high %v575_v58, %v579_v60 }
  0xec   : > { %v446_v8 = vpack.c.bf16 %v437_v6, %v436_v7  ;;  %v571_v6 = vld [vmem:[#allocation9 + $0x170] sm:$0xff]  ;;  %v568_v7 = vld [vmem:[#allocation9 + $0x158] sm:$0xff] }
  0xed   : > { %v1406_v11 = vcombine.high %v567_v5, %v571_v6 }
  0xee   : > { %1442 = vmatmul.mubr.msk.bf16.vlgmr.msra.gmra.mxu0 %vm478_vm1, %v446_v8  ;;  %v572_v8 = vld [vmem:[#allocation9 + $0x178] sm:$0xff] }
  0xef   : > { %954 = vmatpush1.bf16.msra.mxu0 %v1419_v18  ;;  %985 = vmatprep.mubr.bf16.mxu0 %v1715_v1  ;;  %v1380_v18 = vcombine.high %v542_v25, %v546_v12  ;;  %v1407_v21 = vcombine.low %v568_v7, %v572_v8  ;;  %v555_v25 = vld [vmem:[#allocation9 + $0xf0] sm:$0xff]  ;;  %v552_v12 = vld [vmem:[#allocation9 + $0xd8] sm:$0xff] }
  0xf0   : > { %955 = vmatprep.subr.bf16.mxu0 %v1412_v9  ;;  %v1413_v9 = vcombine.low %v575_v58, %v579_v60 }
  0xf3   : > { %956 = vmatpush1.bf16.msra.mxu0 %v1411_v13  ;;  %v1408_v13 = vcombine.high %v568_v7, %v572_v8 }
  0xf4   : > { %957 = vmatprep.subr.bf16.mxu0 %v1404_v15  ;;  %v559_v15 = vld [vmem:[#allocation9 + $0x110] sm:$0xff] }
  0xf5   : > { %v1398_v22 = vcombine.high %v559_v15, %v563_v16 }
  0xf7   : > { %958 = vmatpush1.bf16.msra.mxu0 %v1403_v19  ;;  %v564_v19 = vld [vmem:[#allocation9 + $0x138] sm:$0xff] }
  0xf8   : > { %959 = vmatprep.subr.bf16.mxu0 %v1396_v20  ;;  %v1405_v20 = vcombine.low %v567_v5, %v571_v6 }
  0xfb   : > { %960 = vmatpush1.bf16.msra.mxu0 %v1395_v23  ;;  %v1400_v23 = vcombine.high %v560_v17, %v564_v19 }
  0xfc   : > { %961 = vmatprep.subr.bf16.mxu0 %v1388_v24  ;;  %v551_v24 = vld [vmem:[#allocation9 + $0xd0] sm:$0xff] }
  0xfd   : > { %v1390_v27 = vcombine.high %v551_v24, %v555_v25 }
  0xff   : > { %962 = vmatpush1.bf16.msra.mxu0 %v1387_v14  ;;  %v556_v14 = vld [vmem:[#allocation9 + $0xf8] sm:$0xff] }
 0x100   : > { %963 = vmatprep.subr.bf16.mxu0 %v1380_v18  ;;  %v1397_v18 = vcombine.low %v559_v15, %v563_v16 }
 0x103   : > { %964 = vmatpush1.bf16.msra.mxu0 %v1379_v26  ;;  %v1399_v26 = vcombine.low %v560_v17, %v564_v19 }
 0x104   : > { %965 = vmatprep.subr.bf16.mxu0 %v1372_v33  ;;  %v1391_v33 = vcombine.low %v552_v12, %v556_v14 }
 0x107   : > { %966 = vmatpush1.bf16.msra.mxu0 %v1371_v32  ;;  %v1389_v32 = vcombine.low %v551_v24, %v555_v25 }
 0x108   : > { %967 = vmatprep.subr.bf16.mxu0 %v1364_v42  ;;  %v1383_v42 = vcombine.low %v544_v30, %v548_v31 }
 0x10b   : > { %968 = vmatpush1.bf16.msra.mxu0 %v1363_v41  ;;  %v1381_v41 = vcombine.low %v543_v28, %v547_v29 }
 0x10c   : > { %1039 = vmatprep.subr.bf16.mxu0 %v1424_v51  ;;  %v1366_v51 = vcombine.high %v527_v45, %v531_v46 }
 0x1ae   : > { %v516_v53 = vpop.f32.mrf.mxu0 }
 0x1af   : > { %v517_v55 = vadd.f32 %v1355_v52, %v516_v53  ;;  %v1365_v53 = vcombine.low %v527_v45, %v531_v46 }
 0x1b0   : > { %v1443_v54 = vpop.f32.mrf.mxu0 }
 0x1b1   : > { %v523_v63 = vmax.f32 %v517_v55, 0.0  ;;  %v1367_v54 = vcombine.low %v528_v47, %v532_v48 }
 0x1b2   : > { %v519_v56 = vpop.f32.mrf.mxu0 }
 0x1b3   : > { %v520_v57 = vadd.f32 %v1355_v52, %v519_v56  ;;  %v1368_v52 = vcombine.high %v528_v47, %v532_v48 }
 0x1b4   : > { %v1444_v59 = vpop.f32.mrf.mxu0 }
 0x1b5   : > { %v524_v0 = vmax.f32 %v520_v57, 0.0 }
 0x1b7   : > { %v1880_v2 = vpack.c.bf16 %v524_v0, %v523_v63 }
 0x1b9   : > { %943 = vmatmul.mubr.bf16.vlgmr.msra.gmra.mxu1 %v1880_v2  ;;  %986 = vmatmul.mubr.bf16.vlgmr.msra.gmra.mxu0 %v1880_v2 }
 0x1ba   : > { %997 = vmatpush1.bf16.msra.mxu1 %v1421_v49  ;;  %1040 = vmatpush1.bf16.msra.mxu0 %v1423_v50  ;;  %v1373_v49 = vcombine.low %v535_v36, %v539_v37  ;;  %v1375_v50 = vcombine.low %v536_v38, %v540_v40 }
 0x1bb   : > { %998 = vmatprep.subr.bf16.mxu1 %v1414_v3  ;;  %1041 = vmatprep.subr.bf16.mxu0 %v1416_v4 }
 0x1bc   : > { %1028 = vmatprep.mubr.bf16.mxu1 %v1715_v1  ;;  %1071 = vmatprep.mubr.bf16.mxu0 %v1715_v1  ;;  %v1392_v1 = vcombine.high %v552_v12, %v556_v14 }
 0x1be   : > { %999 = vmatpush1.bf16.msra.mxu1 %v1413_v9  ;;  %1042 = vmatpush1.bf16.msra.mxu0 %v1415_v10 }
 0x1bf   : > { %1000 = vmatprep.subr.bf16.mxu1 %v1406_v11  ;;  %1043 = vmatprep.subr.bf16.mxu0 %v1408_v13 }
 0x1c2   : > { %1001 = vmatpush1.bf16.msra.mxu1 %v1405_v20  ;;  %1044 = vmatpush1.bf16.msra.mxu0 %v1407_v21 }
 0x1c3   : > { %1002 = vmatprep.subr.bf16.mxu1 %v1398_v22  ;;  %1045 = vmatprep.subr.bf16.mxu0 %v1400_v23 }
 0x1c6   : > { %1003 = vmatpush1.bf16.msra.mxu1 %v1397_v18  ;;  %1046 = vmatpush1.bf16.msra.mxu0 %v1399_v26 }
 0x1c7   : > { %1004 = vmatprep.subr.bf16.mxu1 %v1390_v27  ;;  %1047 = vmatprep.subr.bf16.mxu0 %v1392_v1  ;;  %v1719_v1 = vmov 1966171168  }
 0x1c8   : > { %v1152_v28 = vunpack.c.l.s4 %v1719_v1 }
 0x1ca   : > { %1005 = vmatpush1.bf16.msra.mxu1 %v1389_v32  ;;  %1048 = vmatpush1.bf16.msra.mxu0 %v1391_v33 }
 0x1cb   : > { %1006 = vmatprep.subr.bf16.mxu1 %v1382_v34  ;;  %1049 = vmatprep.subr.bf16.mxu0 %v1384_v35 }
 0x1ce   : > { %1007 = vmatpush1.bf16.msra.mxu1 %v1381_v41  ;;  %1050 = vmatpush1.bf16.msra.mxu0 %v1383_v42 }
 0x1cf   : > { %1008 = vmatprep.subr.bf16.mxu1 %v1374_v43  ;;  %1051 = vmatprep.subr.bf16.mxu0 %v1376_v44  ;;  %v1153_v44 = vunpack.c.0.s8 %v1152_v28 }
 0x1d2   : > { %1009 = vmatpush1.bf16.msra.mxu1 %v1373_v49  ;;  %1052 = vmatpush1.bf16.msra.mxu0 %v1375_v50 }
 0x1d3   : > { %1010 = vmatprep.subr.bf16.mxu1 %v1366_v51  ;;  %1053 = vmatprep.subr.bf16.mxu0 %v1368_v52 }
 0x1d6   : > { %1011 = vmatpush1.bf16.msra.mxu1 %v1365_v53  ;;  %1054 = vmatpush1.bf16.msra.mxu0 %v1367_v54 }
 0x1d9   : > { %1029 = vmatmul.mubr.bf16.vlgmr.msra.gmra.mxu1 %v1880_v2  ;;  %1072 = vmatmul.mubr.bf16.vlgmr.msra.gmra.mxu0 %v1880_v2 }
 0x279   : > { %v944_v55 = vpop.f32.mrf.mxu1  ;;  %v987_v56 = vpop.f32.mrf.mxu0 }
 0x27b   : > { %v946_v57 = vpop.f32.mrf.mxu1  ;;  %v989_v58 = vpop.f32.mrf.mxu0 }
 0x27d   : > { %v948_v59 = vpop.f32.mrf.mxu1  ;;  %v991_v60 = vpop.f32.mrf.mxu0 }
 0x27e   : > { %v1083_v3 = vmax.f32 %v944_v55, %v948_v59  ;;  %v1097_v4 = vmax.f32 %v987_v56, %v991_v60 }
 0x27f   : > { %v950_v61 = vpop.f32.mrf.mxu1  ;;  %v993_v62 = vpop.f32.mrf.mxu0 }
 0x280   : > { %v1090_v63 = vmax.f32 %v946_v57, %v950_v61  ;;  %v1104_v0 = vmax.f32 %v989_v58, %v993_v62  ;;  %v1084_v7 = vrot.slane %v1083_v3, 4  ;;  %v1098_v8 = vrot.slane %v1097_v4, 4 }
 0x281   : > { %v1156_v57 = vsub.s32 %v1153_v44, %v1871_v39 }
 0x282   : > { %v1091_v5 = vrot.slane %v1090_v63, 4  ;;  %v1105_v6 = vrot.slane %v1104_v0, 4  ;;  %v1085_v11 = vmax.f32 %v1083_v3, %v1084_v7  ;;  %v1099_v2 = vmax.f32 %v1097_v4, %v1098_v8 }
 0x284   : > { %v1092_v9 = vmax.f32 %v1090_v63, %v1091_v5  ;;  %v1106_v10 = vmax.f32 %v1104_v0, %v1105_v6  ;;  %v1086_v16 = vrot.slane %v1085_v11, 2  ;;  %v1100_v17 = vrot.slane %v1099_v2, 2 }
 0x286   : > { %v1093_v13 = vrot.slane %v1092_v9, 2  ;;  %v1107_v15 = vrot.slane %v1106_v10, 2  ;;  %v1087_v25 = vmax.f32 %v1085_v11, %v1086_v16  ;;  %v1101_v12 = vmax.f32 %v1099_v2, %v1100_v17 }
 0x288   : > { %v1094_v21 = vmax.f32 %v1092_v9, %v1093_v13  ;;  %v1108_v22 = vmax.f32 %v1106_v10, %v1107_v15  ;;  %v1088_v37 = vrot.slane %v1087_v25, 1  ;;  %v1102_v38 = vrot.slane %v1101_v12, 1 }
 0x28a   : > { %v1095_v29 = vrot.slane %v1094_v21, 1  ;;  %v1109_v30 = vrot.slane %v1108_v22, 1  ;;  %v1089_v51 = vmax.f32 %v1087_v25, %v1088_v37  ;;  %v1103_v52 = vmax.f32 %v1101_v12, %v1102_v38 }
 0x28c   : > { %v1096_v45 = vmax.f32 %v1094_v21, %v1095_v29  ;;  %v1110_v46 = vmax.f32 %v1108_v22, %v1109_v30 }
 0x28e   : > { %v1147_v58 = vcombine.low %v1089_v51, %v1096_v45  ;;  %v1148_v59 = vcombine.low %v1103_v52, %v1110_v46 }
 0x290   : > { %v1157_v4 = vrot.slane %v1147_v58, %v1156_v57  ;;  %v1164_v5 = vrot.slane %v1148_v59, %v1156_v57 }
 0x292   : > { %v1179_v2 = vcombine.low %v1157_v4, %v1164_v5 }
 0x294   : > { %v1187_v16 = vrot.slane %v1179_v2, %v1156_v57 }
 0x299   : > { %v1030_v19 = vpop.f32.mrf.mxu1  ;;  %v1073_v20 = vpop.f32.mrf.mxu0 }
 0x29b   : > { %v1032_v23 = vpop.f32.mrf.mxu1  ;;  %v1075_v24 = vpop.f32.mrf.mxu0 }
 0x29d   : > { %v1034_v14 = vpop.f32.mrf.mxu1  ;;  %v1077_v18 = vpop.f32.mrf.mxu0 }
 0x29e   : > { %v1111_v26 = vmax.f32 %v1030_v19, %v1034_v14  ;;  %v1125_v27 = vmax.f32 %v1073_v20, %v1077_v18 }
 0x29f   : > { %v1036_v31 = vpop.f32.mrf.mxu1  ;;  %v1079_v32 = vpop.f32.mrf.mxu0 }
 0x2a0   : > { %v1112_v33 = vrot.slane %v1111_v26, 4  ;;  %v1126_v34 = vrot.slane %v1125_v27, 4  ;;  %v1118_v35 = vmax.f32 %v1032_v23, %v1036_v31  ;;  %v1132_v36 = vmax.f32 %v1075_v24, %v1079_v32 }
 0x2a2   : > { %v1113_v40 = vmax.f32 %v1111_v26, %v1112_v33  ;;  %v1127_v41 = vmax.f32 %v1125_v27, %v1126_v34  ;;  %v1119_v42 = vrot.slane %v1118_v35, 4  ;;  %v1133_v43 = vrot.slane %v1132_v36, 4 }
 0x2a4   : > { %v1114_v47 = vrot.slane %v1113_v40, 2  ;;  %v1128_v48 = vrot.slane %v1127_v41, 2  ;;  %v1120_v49 = vmax.f32 %v1118_v35, %v1119_v42  ;;  %v1134_v50 = vmax.f32 %v1132_v36, %v1133_v43 }
 0x2a6   : > { %v1115_v53 = vmax.f32 %v1113_v40, %v1114_v47  ;;  %v1129_v54 = vmax.f32 %v1127_v41, %v1128_v48  ;;  %v1121_v55 = vrot.slane %v1120_v49, 2  ;;  %v1135_v56 = vrot.slane %v1134_v50, 2 }
 0x2a8   : > { %v1116_v60 = vrot.slane %v1115_v53, 1  ;;  %v1130_v61 = vrot.slane %v1129_v54, 1  ;;  %v1122_v62 = vmax.f32 %v1120_v49, %v1121_v55  ;;  %v1136_v63 = vmax.f32 %v1134_v50, %v1135_v56 }
 0x2aa   : > { %v1123_v0 = vrot.slane %v1122_v62, 1  ;;  %v1137_v3 = vrot.slane %v1136_v63, 1  ;;  %v1117_v6 = vmax.f32 %v1115_v53, %v1116_v60  ;;  %v1131_v7 = vmax.f32 %v1129_v54, %v1130_v61 }
 0x2ac   : > { %v1124_v8 = vmax.f32 %v1122_v62, %v1123_v0  ;;  %v1138_v9 = vmax.f32 %v1136_v63, %v1137_v3 }
 0x2ae   : > { %v1149_v10 = vcombine.low %v1117_v6, %v1124_v8  ;;  %v1150_v11 = vcombine.low %v1131_v7, %v1138_v9 }
 0x2b0   : > { %v1171_v13 = vrot.slane %v1149_v10, %v1156_v57  ;;  %v1178_v39 = vrot.slane %v1150_v11, %v1156_v57 }
 0x2b2   : > { %v1180_v15 = vcombine.low %v1171_v13, %v1178_v39 }
 0x2b4   : > { %v1194_v17 = vrot.slane %v1180_v15, %v1156_v57 }
 0x2b6   : > { %v1195_v19 = vcombine.low %v1187_v16, %v1194_v17 }
 0x2b8   : > { %1198 = vst [vmem:[%s368_s30] sm:$0xff] %v1195_v19 }
 0x2b9 PF: > { %s19_s23 = sadd.s32 1, %s1703_s23   ;;  %s1920_s21 = smov %s1699_s22 }
 0x2ba   : > { %p16_p7 = scmp.ge.s32.totalorder %s19_s23, 4   ;;  %s1921_s22 = smov %s1923_s8 }
 0x2bc   :  { %18 = sbr.rel (!%p16_p7) target bundleno = 4 (0x4), region = 99 }
 0x2c1   :  { %1226 = vsyncpa [#allocation3], 1 }
 0x2c2   :  { %1228 = vsyncpa [#allocation3 + $0x1], 1 }
 0x2c3   :  { %1229 = vsyncpa [#allocation5], 1 }
 0x2c4   :  { %1230 = vsyncpa [#allocation8], 1 }

// kernel: pointnet_forward.8
= control target key start
LH: loop header
LB: loop body
LE: loop exit
PB: predicated region body
PF: predicated region fallthrough
CT: control target
= control target key end

     0   :  { %13 = vsyncpa [#allocation3], 0  ;;  %s2296_s0 = inlined_call_operand.vmem [shape: f32[2,16,3], index: 0, kind: input, shape index: {}]   ;;  %s2297_s1 = inlined_call_operand.vmem [shape: bf16[2,3,64], index: 1, kind: input, shape index: {}]   ;;  %s2298_s2 = inlined_call_operand.hbm [shape: f32[1,64], index: 2, kind: input, shape index: {}]   ;;  %s2299_s3 = inlined_call_operand.hbm [shape: bf16[1,64,64], index: 3, kind: input, shape index: {}]   ;;  %s2300_s4 = inlined_call_operand.hbm [shape: f32[1,64], index: 4, kind: input, shape index: {}]   ;;  %s2301_s5 = inlined_call_operand.hbm [shape: bf16[1,64,128], index: 5, kind: input, shape index: {}]   ;;  %s2302_s6 = inlined_call_operand.hbm [shape: f32[1,128], index: 6, kind: input, shape index: {}]   ;;  %s2303_s7 = inlined_call_operand.vmem [shape: bf16[1,128,1024], index: 7, kind: input, shape index: {}]   ;;  %s2304_s8 = inlined_call_operand.vmem [shape: f32[2,1,1,1024], index: 8, kind: output, shape index: {}]  }
   0x1   :  { %14 = vsyncpa [#allocation5], 0 }
   0x2   :  { %15 = vsyncpa [#allocation8], 0  ;;  %s1958_s27 = smov 0   ;;  %s1960_s28 = smov 0  }
   0x3   :  { %s1962_s29 = smov 0  }
   0x4 LB: > { %s1900_s30 = smov [#allocation4]   ;;  %s1505_s10 = sadd.s32 4294967295, %s1898_s29   ;;  %s1898_s29 = sphi %s1962_s29, %s21_s29   ;;  %s1894_s28 = sphi %s1960_s28, %s2313_s28   ;;  %s1890_s27 = sphi %s1958_s27, %s2312_s27  }
   0x5   : > { %s278_s9 = sshll.u32 %s1900_s30, 4  ;;  %p1507_p0 = scmp.ge.s32.totalorder %s1898_s29, 1  ;;  %s279_s9 = int_to_ptr.vmem [resolvable:$true] %s278_s9 }
   0x6   : > { %p255_p1 = scmp.lt.s32.totalorder %s1898_s29, 3  ;;  %p1976_p2 = scmp.eq.s32.totalorder %s1505_s10, 0 }
   0x7   : > { %s1901_s13 = smov [#allocation7]   ;;  %s40_s16 = sadd.s32 1, %s1894_s28 }
   0x8   : > { %s2307_s11 = scalar_select %p1976_p2, 1, 0 }
   0x9   : > { %p1980_p3 = pnand %p1507_p0, %p255_p1  ;;  %s302_s14 = sshll.u32 %s1901_s13, 4  ;;  %s303_s14 = int_to_ptr.vmem [resolvable:$true] %s302_s14 }
   0xa   : > { %s1745_s18 = scalar_lea.vmem %s279_s9, 512  ;;  %p1753_p10 = scmp.lt.s32.totalorder %s279_s9, %s279_s9 }
   0xb   : > { %p1658_p4 = pneg %p1980_p3  ;;  %p1746_p7 = scmp.ne.s32.totalorder %s279_s9, %s1745_s18 }
   0xc   : > { %p1754_p11 = scmp.lt.s32.totalorder %s1745_s18, %s1745_s18 }
   0xd   : > { %p1988_p5 = pnand %p1976_p2, %p1658_p4 }
   0xe   : > { %p1755_p12 = por %p1754_p11, %p1753_p10 }
   0xf   : > { %p1995_p6 = pneg %p1988_p5 }
  0x11   : > { %p1748_p8 = pnand %p1746_p7, %p1995_p6 }
  0x13   : > { %p1749_p9 = pneg %p1748_p8 }
  0x15   : > { %p1756_p13 = pnand %p1755_p12, %p1749_p9 }
  0x17   : > { %1759 = shalt.err (!%p1756_p13)
}
  0x18   : > { %s1902_s19 = smov 64   ;;  %s1903_s20 = smov 4  }
  0x19   : > { %1664 = dma.hbm_to_vmem [thread:$0]  (!%p1988_p5), %s2299_s3, 512, %s279_s9, [#allocation5], %s1902_s19, %s1902_s19, %s1903_s20  }
  0x1a   : > { %s1771_s23 = scalar_lea.vmem %s303_s14, 512  ;;  %p1779_p7 = scmp.lt.s32.totalorder %s303_s14, %s303_s14 }
  0x1b   : > { %p1772_p0 = scmp.ne.s32.totalorder %s303_s14, %s1771_s23  ;;  %p1780_p8 = scmp.lt.s32.totalorder %s1771_s23, %s1771_s23 }
  0x1d   : > { %p1774_p1 = pnand %p1772_p0, %p1995_p6  ;;  %p1781_p2 = por %p1780_p8, %p1779_p7 }
  0x1f   : > { %p1775_p4 = pneg %p1774_p1 }
  0x21   : > { %p1782_p10 = pnand %p1781_p2, %p1775_p4 }
  0x23   : > { %1785 = shalt.err (!%p1782_p10)
}
  0x24   : > { %1670 = dma.hbm_to_vmem [thread:$0]  (!%p1988_p5), %s2301_s5, 512, %s303_s14, [#allocation8], %s1902_s19, %s1902_s19, %s1903_s20  }
  0x25   : > { %p42_p9 = scmp.ge.s32.totalorder %s40_s16, 2  ;;  %s1904_s26 = smov [#allocation2]  }
  0x26   : > { %s268_s30 = sshll.u32 %s1904_s26, 4  ;;  %s1905_s9 = smov [#allocation6]   ;;  %s269_s30 = int_to_ptr.vmem [resolvable:$true] %s268_s30 }
  0x27   : > { %s2315_s16 = smov (%p42_p9, %s40_s16), 0  ;;  %s292_s10 = sshll.u32 %s1905_s9, 4  ;;  %s293_s10 = int_to_ptr.vmem [resolvable:$true] %s292_s10 }
  0x28   : > { %s1797_s13 = scalar_lea.vmem %s269_s30, 16  ;;  %s1804_s18 = scalar_lea.vmem %s269_s30, 32 }
  0x29   : > { %p1798_p11 = scmp.ne.s32.totalorder %s269_s30, %s1797_s13  ;;  %p1805_p13 = scmp.lt.s32.totalorder %s269_s30, %s269_s30 }
  0x2a   : > { %p1806_p0 = scmp.lt.s32.totalorder %s1804_s18, %s1797_s13 }
  0x2b   : > { %p1800_p2 = pnand %p1798_p11, %p1995_p6 }
  0x2c   : > { %p1807_p1 = por %p1806_p0, %p1805_p13 }
  0x2d   : > { %p1801_p12 = pneg %p1800_p2 }
  0x2f   : > { %p1808_p4 = pnand %p1807_p1, %p1801_p12 }
  0x31   : > { %1811 = shalt.err (!%p1808_p4)
}
  0x32   : > { %1661 = dma.hbm_to_vmem [thread:$0]  (!%p1988_p5), %s2298_s2, 16, %s269_s30, [#allocation3]  }
  0x33   : > { %s1823_s20 = scalar_lea.vmem %s293_s10, 16  ;;  %s1830_s21 = scalar_lea.vmem %s293_s10, 32 }
  0x34   : > { %p1824_p7 = scmp.ne.s32.totalorder %s293_s10, %s1823_s20  ;;  %p1831_p9 = scmp.lt.s32.totalorder %s293_s10, %s293_s10 }
  0x35   : > { %p1832_p11 = scmp.lt.s32.totalorder %s1830_s21, %s1823_s20 }
  0x36   : > { %p1826_p8 = pnand %p1824_p7, %p1995_p6 }
  0x37   : > { %p1833_p2 = por %p1832_p11, %p1831_p9 }
  0x38   : > { %p1827_p10 = pneg %p1826_p8 }
  0x3a   : > { %p1834_p13 = pnand %p1833_p2, %p1827_p10 }
  0x3c   : > { %1837 = shalt.err (!%p1834_p13)
}
  0x3d   : > { %1667 = dma.hbm_to_vmem [thread:$0]  (!%p1988_p5), %s2300_s4, 16, %s293_s10, [#allocation5]  }
  0x3e   : > { %s1906_s24 = smov [#allocation9]  }
  0x3f   : > { %s316_s25 = sshll.u32 %s1906_s24, 4  ;;  %s317_s25 = int_to_ptr.vmem [resolvable:$true] %s316_s25 }
  0x40   : > { %s1849_s26 = scalar_lea.vmem %s317_s25, 16  ;;  %s1856_s30 = scalar_lea.vmem %s317_s25, 32 }
  0x41   : > { %p1850_p12 = scmp.ne.s32.totalorder %s317_s25, %s1849_s26  ;;  %p1857_p4 = scmp.lt.s32.totalorder %s317_s25, %s317_s25 }
  0x42   : > { %p1858_p7 = scmp.lt.s32.totalorder %s1856_s30, %s1849_s26 }
  0x43   : > { %p1852_p0 = pnand %p1850_p12, %p1995_p6 }
  0x44   : > { %p1859_p8 = por %p1858_p7, %p1857_p4 }
  0x45   : > { %p1853_p1 = pneg %p1852_p0 }
  0x47   : > { %p1860_p10 = pnand %p1859_p8, %p1853_p1 }
  0x49   : > { %1863 = shalt.err (!%p1860_p10)
}
  0x4a   : > { %1673 = dma.hbm_to_vmem [thread:$0]  (!%p1988_p5), %s2302_s6, 16, %s317_s25, [#allocation8]  }
  0x4b   : > { %354 = sbr.rel (%p1980_p3) target bundleno = 896 (0x380), region = 52  ;;  %p2311_p9 = scmp.ne.s32.totalorder (!%p1980_p3), %s2307_s11, 0 }
  0x50   : > { %1877 = dma.done.wait (%p2311_p9), [#allocation3], 16  }
  0x51   : > { %1879 = vsyncadd (%p2311_p9), [#allocation3], 4294967280 }
  0x52   : > { %1881 = dma.done.wait (%p2311_p9), [#allocation5], 528  }
  0x53   : > { %1883 = vsyncadd (%p2311_p9), [#allocation5], 4294966768 }
  0x54   : > { %1885 = dma.done.wait (%p2311_p9), [#allocation8], 528  }
  0x55   : > { %1887 = vsyncadd (%p2311_p9), [#allocation8], 4294966768  ;;  %p418_p3 = scmp.lt.s32.totalorder %s1890_s27, 1  ;;  %v1907_v0 = vmov 1   ;;  %v1908_v1 = vmov 0   ;;  %v1909_v3 = vmov 0.0   ;;  %v460_v11 = vlaneseq }
  0x56   : > { %1723 = vset.pattern.permute.xlu1 %v1907_v0  ;;  %1722 = vset.pattern.permute.xlu0 %v1908_v1  ;;  %v1726_v4 = vld [vmem:[#allocation4 + $0x18] sm:$0xff]   ;;  %v1727_v6 = vld [vmem:[#allocation4 + $0x10] sm:$0xff]   ;;  %v1728_v7 = vld [vmem:[#allocation4 + $0x8] sm:$0xff]   ;;  %v1910_v8 = vmov 2   ;;  %vm1911_vm0 = vmmov 0   ;;  %vm549_vm1 = vcmask 523264  }
  0x57   : > { %s2317_s27 = smov (!%p418_p3, %s1890_s27), 1  ;;  %1614 = vmatprep.subr.bf16.mxu0 %v1909_v3  ;;  %1626 = vmatprep.subr.bf16.mxu1 %v1909_v3  ;;  %v1729_v9 = vld [vmem:[#allocation4] sm:$0xff]   ;;  %v2071_v12 = vshrl.u32 %v460_v11, 7  ;;  %v1524_v35 = vld [vmem:[#allocation2] ss:$0 sm:$0xff]  ;;  %v1731_v43 = vld [vmem:[#allocation7 + $0x10] sm:$0xff]  }
  0x58   : > { %s1603_s12 = sshll.u32 %s2317_s27, 4  ;;  %1615 = vmatpush3.bf16.msra.mxu0 %v1726_v4  ;;  %1622 = vmatprep.mubr.msk.bf16.mxu0 %vm1911_vm0, %v1909_v3  ;;  %v1730_v10 = vld [vmem:[#allocation7 + $0x18] sm:$0xff]   ;;  %s1522_s11 = sshll.u32 %s2317_s27, 1  ;;  %v1732_v44 = vld [vmem:[#allocation7 + $0x8] sm:$0xff]   ;;  %v1733_v45 = vld [vmem:[#allocation7] sm:$0xff]  }
  0x59   : > { %s425_s10 = scalar_lea.vmem %s2296_s0, %s1603_s12  ;;  %1616 = vmatprep.subr.bf16.mxu0 %v1909_v3  ;;  %1634 = vmatprep.mubr.msk.bf16.mxu1 %vm1911_vm0, %v1909_v3  ;;  %s431_s19 = scalar_lea.vmem %s2297_s1, %s1522_s11  ;;  %v476_v15 = vsub.s32 1, %v2071_v12  ;;  %v462_v16 = vsub.s32 0, %v2071_v12  ;;  %v492_v19 = vsub.s32 2, %v2071_v12  ;;  %v738_v46 = vld [vmem:[%s2303_s7 + $0x1c0] sm:$0xff]  ;;  %v739_v48 = vld [vmem:[%s2303_s7 + $0x1c8] sm:$0xff] }
  0x5a   : > { %v446_v2 = vld [vmem:[%s425_s10] sm:$0xff]  ;;  %v447_v5 = vld [vmem:[%s425_s10 + $0x8] sm:$0xff]  ;;  %1627 = vmatpush3.bf16.msra.mxu1 %v1730_v10  ;;  %s1523_s22 = sshll.u32 %s2317_s27, 3 }
  0x5b   : > { %467 = vperm.xlu1 %1723, %v446_v2   ;;  %452 = vperm.xlu0 %1722, %v446_v2   ;;  %v448_v13 = vld [vmem:[%s431_s19] sm:$0x3]  ;;  %v743_v51 = vld [vmem:[%s2303_s7 + $0x1e8] sm:$0xff]  ;;  %v1525_v11 = vld [vmem:[#allocation6] ss:$0 sm:$0xff]  ;;  %s439_s25 = scalar_lea.vmem %s2304_s8, %s1523_s22 }
  0x5c   : > { %1617 = vmatpush3.bf16.msra.mxu0 %v1727_v6  ;;  %1628 = vmatprep.subr.bf16.mxu1 %v1909_v3  ;;  %v449_v14 = vunpack.c.l.bf16 %v448_v13  ;;  %v742_v47 = vld [vmem:[%s2303_s7 + $0x1e0] sm:$0xff]  ;;  %v1595_v54 = vcombine.low %v739_v48, %v743_v51  ;;  %v1596_v55 = vcombine.high %v739_v48, %v743_v51 }
  0x5d   : > { %1618 = vmatprep.subr.bf16.mxu0 %v1909_v3  ;;  %v1593_v49 = vcombine.low %v738_v46, %v742_v47  ;;  %v1594_v50 = vcombine.high %v738_v46, %v742_v47  ;;  %v730_v52 = vld [vmem:[%s2303_s7 + $0x180] sm:$0xff]  ;;  %v695_v46 = vld [vmem:[%s2303_s7 + $0x68] sm:$0xff] }
  0x5e   : > { %v477_v20 = vrot.slane %v449_v14, %v476_v15  ;;  %v463_v21 = vrot.slane %v449_v14, %v462_v16  ;;  %v493_v24 = vrot.slane %v449_v14, %v492_v19  ;;  %1629 = vmatpush3.bf16.msra.mxu1 %v1731_v43  ;;  %v734_v53 = vld [vmem:[%s2303_s7 + $0x1a0] sm:$0xff]  ;;  %v731_v19 = vld [vmem:[%s2303_s7 + $0x188] sm:$0xff] }
  0x5f   : > { %471 = vperm.xlu1 %1723, %v447_v5   ;;  %457 = vperm.xlu0 %1722, %v447_v5   ;;  %v1586_v56 = vcombine.high %v730_v52, %v734_v53  ;;  %v1585_v57 = vcombine.low %v730_v52, %v734_v53  ;;  %v722_v58 = vld [vmem:[%s2303_s7 + $0x140] sm:$0xff]  ;;  %v683_v52 = vld [vmem:[%s2303_s7 + $0x8] sm:$0xff] }
  0x60   : > { %1619 = vmatpush3.bf16.msra.mxu0 %v1728_v7  ;;  %1630 = vmatprep.subr.bf16.mxu1 %v1909_v3  ;;  %v726_v59 = vld [vmem:[%s2303_s7 + $0x160] sm:$0xff] }
  0x61   : > { %1620 = vmatprep.subr.bf16.mxu0 %v1909_v3  ;;  %v1578_v60 = vcombine.high %v722_v58, %v726_v59  ;;  %v1577_v61 = vcombine.low %v722_v58, %v726_v59  ;;  %v714_v62 = vld [vmem:[%s2303_s7 + $0x100] sm:$0xff]  ;;  %v740_v58 = vld [vmem:[%s2303_s7 + $0x1d0] sm:$0xff] }
  0x62   : > { %1631 = vmatpush3.bf16.msra.mxu1 %v1732_v44  ;;  %v718_v63 = vld [vmem:[%s2303_s7 + $0x120] sm:$0xff]  ;;  %v691_v44 = vld [vmem:[%s2303_s7 + $0x48] sm:$0xff]  ;;  %v744_v59 = vld [vmem:[%s2303_s7 + $0x1f0] sm:$0xff] }
  0x63   : > { %1725 = vset.pattern.permute.xlu1 %v1910_v8  ;;  %1724 = vset.pattern.permute.xlu0 %v1910_v8  ;;  %v1570_v0 = vcombine.high %v714_v62, %v718_v63  ;;  %v710_v4 = vld [vmem:[%s2303_s7 + $0xe0] sm:$0xff]  ;;  %v1547_v48 = vcombine.low %v691_v44, %v695_v46 }
  0x64   : > { %487 = vperm.xlu1 %1725, %v447_v5   ;;  %483 = vperm.xlu0 %1724, %v446_v2   ;;  %v1569_v2 = vcombine.low %v714_v62, %v718_v63  ;;  %v698_v7 = vld [vmem:[%s2303_s7 + $0x80] sm:$0xff]  ;;  %v745_v62 = vld [vmem:[%s2303_s7 + $0x1f8] sm:$0xff]  ;;  %v1597_v63 = vcombine.low %v740_v58, %v744_v59 }
  0x65   : > { %1621 = vmatpush3.bf16.msra.mxu0 %v1729_v9  ;;  %1632 = vmatprep.subr.bf16.mxu1 %v1909_v3  ;;  %v706_v3 = vld [vmem:[%s2303_s7 + $0xc0] sm:$0xff] }
  0x66   : > { %1633 = vmatpush3.bf16.msra.mxu1 %v1733_v45  ;;  %1067 = vmatprep.subr.bf16.mxu0 %v1594_v50  ;;  %v1562_v5 = vcombine.high %v706_v3, %v710_v4  ;;  %v1561_v6 = vcombine.low %v706_v3, %v710_v4  ;;  %v702_v8 = vld [vmem:[%s2303_s7 + $0xa0] sm:$0xff] }
  0x67   : > { %1110 = vmatprep.subr.bf16.mxu1 %v1596_v55  ;;  %v1554_v9 = vcombine.high %v698_v7, %v702_v8  ;;  %v1553_v10 = vcombine.low %v698_v7, %v702_v8  ;;  %v694_v43 = vld [vmem:[%s2303_s7 + $0x60] sm:$0xff] }
  0x68   : > { %v682_v50 = vld [vmem:[%s2303_s7] sm:$0xff] }
  0x69   : > { %v686_v51 = vld [vmem:[%s2303_s7 + $0x20] sm:$0xff] }
  0x6a   : > { %v1538_v53 = vcombine.high %v682_v50, %v686_v51  ;;  %v1537_v55 = vcombine.low %v682_v50, %v686_v51  ;;  %v1531_v3 = vld [vmem:[#allocation9] ss:$0 sm:$0xff]  ;;  %v692_v51 = vld [vmem:[%s2303_s7 + $0x50] sm:$0xff] }
  0xd6   : > { %v468_v17 = vpop.permute.xlu1 %467  ;;  %v453_v18 = vpop.permute.xlu0 %452 }
  0xd7   : > { %v478_v25 = vmul.f32 %v477_v20, %v468_v17  ;;  %v464_v26 = vmul.f32 %v463_v21, %v453_v18 }
  0xd9   : > { %v480_v31 = vadd.f32 %v478_v25, %v464_v26  ;;  %v723_v25 = vld [vmem:[%s2303_s7 + $0x148] sm:$0xff] }
  0xda   : > { %v472_v22 = vpop.permute.xlu1 %471  ;;  %v458_v23 = vpop.permute.xlu0 %457  ;;  %v727_v26 = vld [vmem:[%s2303_s7 + $0x168] sm:$0xff] }
  0xdb   : > { %v479_v27 = vmul.f32 %v477_v20, %v472_v22  ;;  %v465_v28 = vmul.f32 %v463_v21, %v458_v23  ;;  %v735_v20 = vld [vmem:[%s2303_s7 + $0x1a8] sm:$0xff] }
  0xdd   : > { %v481_v32 = vadd.f32 %v479_v27, %v465_v28  ;;  %v1587_v27 = vcombine.low %v731_v19, %v735_v20  ;;  %v1580_v28 = vcombine.high %v723_v25, %v727_v26 }
  0xdf   : > { %v488_v29 = vpop.permute.xlu1 %487  ;;  %v484_v30 = vpop.permute.xlu0 %483 }
  0xe0   : > { %v495_v33 = vmul.f32 %v493_v24, %v488_v29  ;;  %v494_v34 = vmul.f32 %v493_v24, %v484_v30  ;;  %v1588_v24 = vcombine.high %v731_v19, %v735_v20  ;;  %v715_v29 = vld [vmem:[%s2303_s7 + $0x108] sm:$0xff]  ;;  %v724_v20 = vld [vmem:[%s2303_s7 + $0x150] sm:$0xff] }
  0xe1   : > { %v719_v30 = vld [vmem:[%s2303_s7 + $0x128] sm:$0xff] }
  0xe2   : > { %v497_v36 = vadd.f32 %v495_v33, %v481_v32  ;;  %v496_v37 = vadd.f32 %v494_v34, %v480_v31  ;;  %v1579_v31 = vcombine.low %v723_v25, %v727_v26  ;;  %v1572_v32 = vcombine.high %v715_v29, %v719_v30  ;;  %v707_v33 = vld [vmem:[%s2303_s7 + $0xc8] sm:$0xff] }
  0xe3   : > { %v711_v34 = vld [vmem:[%s2303_s7 + $0xe8] sm:$0xff] }
  0xe4   : > { %v506_v38 = vadd.f32 %v1524_v35, %v497_v36  ;;  %v505_v39 = vadd.f32 %v1524_v35, %v496_v37  ;;  %v1571_v35 = vcombine.low %v715_v29, %v719_v30  ;;  %v1564_v36 = vcombine.high %v707_v33, %v711_v34  ;;  %v699_v37 = vld [vmem:[%s2303_s7 + $0x88] sm:$0xff]  ;;  %v720_v29 = vld [vmem:[%s2303_s7 + $0x130] sm:$0xff]  ;;  %v717_v30 = vld [vmem:[%s2303_s7 + $0x118] sm:$0xff] }
  0xe6   : > { %v508_v40 = vmax.f32 %v506_v38, 0.0  ;;  %v507_v41 = vmax.f32 %v505_v39, 0.0  ;;  %v703_v38 = vld [vmem:[%s2303_s7 + $0xa8] sm:$0xff]  ;;  %v1563_v39 = vcombine.low %v707_v33, %v711_v34 }
  0xe8   : > { %v517_v42 = vpack.c.bf16 %v508_v40, %v507_v41  ;;  %v1556_v40 = vcombine.high %v699_v37, %v703_v38  ;;  %v1555_v41 = vcombine.low %v699_v37, %v703_v38  ;;  %v712_v37 = vld [vmem:[%s2303_s7 + $0xf0] sm:$0xff]  ;;  %v713_v38 = vld [vmem:[%s2303_s7 + $0xf8] sm:$0xff] }
  0xea   : > { %1623 = vmatmul.mubr.msk.bf16.vlgmr.msra.gmra.mxu0 %vm549_vm1, %v517_v42  ;;  %v690_v42 = vld [vmem:[%s2303_s7 + $0x40] sm:$0xff] }
  0xeb   : > { %1099 = vmatprep.mubr.bf16.mxu0 %v1908_v1  ;;  %1068 = vmatpush1.bf16.msra.mxu0 %v1593_v49  ;;  %v1546_v45 = vcombine.high %v690_v42, %v694_v43  ;;  %v1545_v47 = vcombine.low %v690_v42, %v694_v43  ;;  %v1548_v49 = vcombine.high %v691_v44, %v695_v46  ;;  %v700_v43 = vld [vmem:[%s2303_s7 + $0x90] sm:$0xff]  ;;  %v705_v46 = vld [vmem:[%s2303_s7 + $0xb8] sm:$0xff] }
  0xec   : > { %1069 = vmatprep.subr.bf16.mxu0 %v1586_v56  ;;  %v704_v44 = vld [vmem:[%s2303_s7 + $0xb0] sm:$0xff] }
  0xef   : > { %1070 = vmatpush1.bf16.msra.mxu0 %v1585_v57 }
  0xf0   : > { %1071 = vmatprep.subr.bf16.mxu0 %v1578_v60  ;;  %v741_v60 = vld [vmem:[%s2303_s7 + $0x1d8] sm:$0xff] }
  0xf3   : > { %1072 = vmatpush1.bf16.msra.mxu0 %v1577_v61  ;;  %v1598_v61 = vcombine.high %v740_v58, %v744_v59  ;;  %v684_v59 = vld [vmem:[%s2303_s7 + $0x10] sm:$0xff] }
  0xf4   : > { %1073 = vmatprep.subr.bf16.mxu0 %v1570_v0  ;;  %v1599_v0 = vcombine.low %v741_v60, %v745_v62 }
  0xf7   : > { %1074 = vmatpush1.bf16.msra.mxu0 %v1569_v2  ;;  %v1600_v2 = vcombine.high %v741_v60, %v745_v62  ;;  %v688_v60 = vld [vmem:[%s2303_s7 + $0x30] sm:$0xff]  ;;  %v689_v62 = vld [vmem:[%s2303_s7 + $0x38] sm:$0xff] }
  0xf8   : > { %1075 = vmatprep.subr.bf16.mxu0 %v1562_v5 }
  0xfb   : > { %1076 = vmatpush1.bf16.msra.mxu0 %v1561_v6 }
  0xfc   : > { %1077 = vmatprep.subr.bf16.mxu0 %v1554_v9  ;;  %v732_v9 = vld [vmem:[%s2303_s7 + $0x190] sm:$0xff] }
  0xff   : > { %1078 = vmatpush1.bf16.msra.mxu0 %v1553_v10 }
 0x100   : > { %1079 = vmatprep.subr.bf16.mxu0 %v1546_v45  ;;  %v701_v45 = vld [vmem:[%s2303_s7 + $0x98] sm:$0xff] }
 0x101   : > { %v1560_v50 = vcombine.high %v701_v45, %v705_v46 }
 0x103   : > { %1080 = vmatpush1.bf16.msra.mxu0 %v1545_v47 }
 0x104   : > { %1081 = vmatprep.subr.bf16.mxu0 %v1538_v53  ;;  %v693_v53 = vld [vmem:[%s2303_s7 + $0x58] sm:$0xff] }
 0x107   : > { %1082 = vmatpush1.bf16.msra.mxu0 %v1537_v55  ;;  %v1557_v55 = vcombine.low %v700_v43, %v704_v44 }
 0x108   : > { %1153 = vmatprep.subr.bf16.mxu0 %v1598_v61  ;;  %v685_v61 = vld [vmem:[%s2303_s7 + $0x18] sm:$0xff] }
 0x1aa   : > { %v587_v13 = vpop.f32.mrf.mxu0 }
 0x1ab   : > { %v588_v15 = vadd.f32 %v1525_v11, %v587_v13  ;;  %v733_v13 = vld [vmem:[%s2303_s7 + $0x198] sm:$0xff] }
 0x1ac   : > { %v1624_v14 = vpop.f32.mrf.mxu0 }
 0x1ad   : > { %v594_v21 = vmax.f32 %v588_v15, 0.0  ;;  %v737_v14 = vld [vmem:[%s2303_s7 + $0x1b8] sm:$0xff] }
 0x1ae   : > { %v590_v16 = vpop.f32.mrf.mxu0  ;;  %v1592_v19 = vcombine.high %v733_v13, %v737_v14  ;;  %v1591_v25 = vcombine.low %v733_v13, %v737_v14 }
 0x1af   : > { %v591_v17 = vadd.f32 %v1525_v11, %v590_v16  ;;  %v736_v11 = vld [vmem:[%s2303_s7 + $0x1b0] sm:$0xff] }
 0x1b0   : > { %v1625_v18 = vpop.f32.mrf.mxu0 }
 0x1b1   : > { %v595_v22 = vmax.f32 %v591_v17, 0.0  ;;  %v1590_v18 = vcombine.high %v732_v9, %v736_v11 }
 0x1b3   : > { %v604_v23 = vpack.c.bf16 %v595_v22, %v594_v21  ;;  %v728_v21 = vld [vmem:[%s2303_s7 + $0x170] sm:$0xff]  ;;  %v725_v22 = vld [vmem:[%s2303_s7 + $0x158] sm:$0xff] }
 0x1b4   : > { %v1582_v26 = vcombine.high %v724_v20, %v728_v21 }
 0x1b5   : > { %1635 = vmatmul.mubr.msk.bf16.vlgmr.msra.gmra.mxu1 %vm549_vm1, %v604_v23  ;;  %v729_v23 = vld [vmem:[%s2303_s7 + $0x178] sm:$0xff] }
 0x1b6   : > { %1111 = vmatpush1.bf16.msra.mxu1 %v1595_v54  ;;  %1142 = vmatprep.mubr.bf16.mxu1 %v1908_v1  ;;  %v687_v54 = vld [vmem:[%s2303_s7 + $0x28] sm:$0xff]  ;;  %v1583_v33 = vcombine.low %v725_v22, %v729_v23 }
 0x1b7   : > { %1112 = vmatprep.subr.bf16.mxu1 %v1588_v24  ;;  %v1539_v56 = vcombine.low %v683_v52, %v687_v54  ;;  %v1540_v57 = vcombine.high %v683_v52, %v687_v54  ;;  %v1589_v24 = vcombine.low %v732_v9, %v736_v11  ;;  %v696_v52 = vld [vmem:[%s2303_s7 + $0x70] sm:$0xff]  ;;  %v697_v54 = vld [vmem:[%s2303_s7 + $0x78] sm:$0xff] }
 0x1b8   : > { %v1552_v58 = vcombine.high %v693_v53, %v697_v54 }
 0x1ba   : > { %1113 = vmatpush1.bf16.msra.mxu1 %v1587_v27  ;;  %v1584_v27 = vcombine.high %v725_v22, %v729_v23 }
 0x1bb   : > { %1114 = vmatprep.subr.bf16.mxu1 %v1580_v28  ;;  %v716_v28 = vld [vmem:[%s2303_s7 + $0x110] sm:$0xff] }
 0x1bc   : > { %v1574_v34 = vcombine.high %v716_v28, %v720_v29 }
 0x1be   : > { %1115 = vmatpush1.bf16.msra.mxu1 %v1579_v31  ;;  %v721_v31 = vld [vmem:[%s2303_s7 + $0x138] sm:$0xff] }
 0x1bf   : > { %1116 = vmatprep.subr.bf16.mxu1 %v1572_v32  ;;  %v1581_v32 = vcombine.low %v724_v20, %v728_v21 }
 0x1c2   : > { %1117 = vmatpush1.bf16.msra.mxu1 %v1571_v35  ;;  %v1576_v35 = vcombine.high %v717_v30, %v721_v31 }
 0x1c3   : > { %1118 = vmatprep.subr.bf16.mxu1 %v1564_v36  ;;  %v708_v36 = vld [vmem:[%s2303_s7 + $0xd0] sm:$0xff] }
 0x1c4   : > { %v1565_v47 = vcombine.low %v708_v36, %v712_v37 }
 0x1c6   : > { %1119 = vmatpush1.bf16.msra.mxu1 %v1563_v39  ;;  %v1573_v39 = vcombine.low %v716_v28, %v720_v29 }
 0x1c7   : > { %1120 = vmatprep.subr.bf16.mxu1 %v1556_v40  ;;  %v1575_v40 = vcombine.low %v717_v30, %v721_v31 }
 0x1ca   : > { %1121 = vmatpush1.bf16.msra.mxu1 %v1555_v41  ;;  %v1566_v41 = vcombine.high %v708_v36, %v712_v37 }
 0x1cb   : > { %1122 = vmatprep.subr.bf16.mxu1 %v1548_v49  ;;  %v1558_v49 = vcombine.high %v700_v43, %v704_v44 }
 0x1ce   : > { %1123 = vmatpush1.bf16.msra.mxu1 %v1547_v48 }
 0x1cf   : > { %1124 = vmatprep.subr.bf16.mxu1 %v1540_v57  ;;  %v1550_v57 = vcombine.high %v692_v51, %v696_v52 }
 0x1d2   : > { %1125 = vmatpush1.bf16.msra.mxu1 %v1539_v56  ;;  %v1559_v56 = vcombine.low %v701_v45, %v705_v46 }
 0x1d3   : > { %1196 = vmatprep.subr.bf16.mxu1 %v1600_v2  ;;  %v1542_v2 = vcombine.high %v684_v59, %v688_v60 }
 0x275   : > { %v673_v4 = vpop.f32.mrf.mxu1 }
 0x276   : > { %v674_v6 = vadd.f32 %v1531_v3, %v673_v4  ;;  %v1541_v4 = vcombine.low %v684_v59, %v688_v60 }
 0x277   : > { %v1636_v5 = vpop.f32.mrf.mxu1 }
 0x278   : > { %v680_v15 = vmax.f32 %v674_v6, 0.0  ;;  %v1543_v5 = vcombine.low %v685_v61, %v689_v62 }
 0x279   : > { %v676_v7 = vpop.f32.mrf.mxu1 }
 0x27a   : > { %v677_v8 = vadd.f32 %v1531_v3, %v676_v7  ;;  %v1544_v3 = vcombine.high %v685_v61, %v689_v62 }
 0x27b   : > { %v1637_v10 = vpop.f32.mrf.mxu1 }
 0x27c   : > { %v681_v16 = vmax.f32 %v677_v8, 0.0 }
 0x27e   : > { %v2202_v17 = vpack.c.bf16 %v681_v16, %v680_v15 }
 0x280   : > { %1100 = vmatmul.mubr.bf16.vlgmr.msra.gmra.mxu0 %v2202_v17  ;;  %1143 = vmatmul.mubr.bf16.vlgmr.msra.gmra.mxu1 %v2202_v17 }
 0x281   : > { %1154 = vmatpush1.bf16.msra.mxu0 %v1597_v63  ;;  %1197 = vmatpush1.bf16.msra.mxu1 %v1599_v0  ;;  %v1549_v63 = vcombine.low %v692_v51, %v696_v52  ;;  %v1551_v0 = vcombine.low %v693_v53, %v697_v54 }
 0x282   : > { %1155 = vmatprep.subr.bf16.mxu0 %v1590_v18  ;;  %1198 = vmatprep.subr.bf16.mxu1 %v1592_v19 }
 0x283   : > { %1185 = vmatprep.mubr.bf16.mxu0 %v1908_v1  ;;  %1228 = vmatprep.mubr.bf16.mxu1 %v1908_v1  ;;  %v709_v1 = vld [vmem:[%s2303_s7 + $0xd8] sm:$0xff] }
 0x284   : > { %v1568_v42 = vcombine.high %v709_v1, %v713_v38  ;;  %v1567_v48 = vcombine.low %v709_v1, %v713_v38 }
 0x285   : > { %1156 = vmatpush1.bf16.msra.mxu0 %v1589_v24  ;;  %1199 = vmatpush1.bf16.msra.mxu1 %v1591_v25 }
 0x286   : > { %1157 = vmatprep.subr.bf16.mxu0 %v1582_v26  ;;  %1200 = vmatprep.subr.bf16.mxu1 %v1584_v27 }
 0x289   : > { %1158 = vmatpush1.bf16.msra.mxu0 %v1581_v32  ;;  %1201 = vmatpush1.bf16.msra.mxu1 %v1583_v33 }
 0x28a   : > { %1159 = vmatprep.subr.bf16.mxu0 %v1574_v34  ;;  %1202 = vmatprep.subr.bf16.mxu1 %v1576_v35 }
 0x28d   : > { %1160 = vmatpush1.bf16.msra.mxu0 %v1573_v39  ;;  %1203 = vmatpush1.bf16.msra.mxu1 %v1575_v40 }
 0x28e   : > { %1161 = vmatprep.subr.bf16.mxu0 %v1566_v41  ;;  %1204 = vmatprep.subr.bf16.mxu1 %v1568_v42  ;;  %v1912_v42 = vmov 1966171168  }
 0x28f   : > { %v1309_v43 = vunpack.c.l.s4 %v1912_v42 }
 0x291   : > { %1162 = vmatpush1.bf16.msra.mxu0 %v1565_v47  ;;  %1205 = vmatpush1.bf16.msra.mxu1 %v1567_v48 }
 0x292   : > { %1163 = vmatprep.subr.bf16.mxu0 %v1558_v49  ;;  %1206 = vmatprep.subr.bf16.mxu1 %v1560_v50 }
 0x295   : > { %1164 = vmatpush1.bf16.msra.mxu0 %v1557_v55  ;;  %1207 = vmatpush1.bf16.msra.mxu1 %v1559_v56 }
 0x296   : > { %1165 = vmatprep.subr.bf16.mxu0 %v1550_v57  ;;  %1208 = vmatprep.subr.bf16.mxu1 %v1552_v58  ;;  %v1310_v58 = vunpack.c.0.s8 %v1309_v43 }
 0x299   : > { %1166 = vmatpush1.bf16.msra.mxu0 %v1549_v63  ;;  %1209 = vmatpush1.bf16.msra.mxu1 %v1551_v0 }
 0x29a   : > { %1167 = vmatprep.subr.bf16.mxu0 %v1542_v2  ;;  %1210 = vmatprep.subr.bf16.mxu1 %v1544_v3 }
 0x29d   : > { %1168 = vmatpush1.bf16.msra.mxu0 %v1541_v4  ;;  %1211 = vmatpush1.bf16.msra.mxu1 %v1543_v5 }
 0x2a0   : > { %1186 = vmatmul.mubr.bf16.vlgmr.msra.gmra.mxu0 %v2202_v17  ;;  %1229 = vmatmul.mubr.bf16.vlgmr.msra.gmra.mxu1 %v2202_v17 }
 0x340   : > { %v1101_v6 = vpop.f32.mrf.mxu0  ;;  %v1144_v7 = vpop.f32.mrf.mxu1 }
 0x342   : > { %v1103_v8 = vpop.f32.mrf.mxu0  ;;  %v1146_v9 = vpop.f32.mrf.mxu1 }
 0x344   : > { %v1105_v10 = vpop.f32.mrf.mxu0  ;;  %v1148_v11 = vpop.f32.mrf.mxu1 }
 0x345   : > { %v1240_v18 = vmax.f32 %v1101_v6, %v1105_v10  ;;  %v1254_v19 = vmax.f32 %v1144_v7, %v1148_v11 }
 0x346   : > { %v1107_v13 = vpop.f32.mrf.mxu0  ;;  %v1150_v14 = vpop.f32.mrf.mxu1 }
 0x347   : > { %v1247_v15 = vmax.f32 %v1103_v8, %v1107_v13  ;;  %v1261_v16 = vmax.f32 %v1146_v9, %v1150_v14  ;;  %v1241_v22 = vrot.slane %v1240_v18, 4  ;;  %v1255_v23 = vrot.slane %v1254_v19, 4 }
 0x348   : > { %v1313_v8 = vsub.s32 %v1310_v58, %v2071_v12 }
 0x349   : > { %v1248_v20 = vrot.slane %v1247_v15, 4  ;;  %v1262_v21 = vrot.slane %v1261_v16, 4  ;;  %v1242_v26 = vmax.f32 %v1240_v18, %v1241_v22  ;;  %v1256_v17 = vmax.f32 %v1254_v19, %v1255_v23 }
 0x34b   : > { %v1249_v24 = vmax.f32 %v1247_v15, %v1248_v20  ;;  %v1263_v25 = vmax.f32 %v1261_v16, %v1262_v21  ;;  %v1243_v29 = vrot.slane %v1242_v26, 2  ;;  %v1257_v30 = vrot.slane %v1256_v17, 2 }
 0x34d   : > { %v1250_v27 = vrot.slane %v1249_v24, 2  ;;  %v1264_v28 = vrot.slane %v1263_v25, 2  ;;  %v1244_v37 = vmax.f32 %v1242_v26, %v1243_v29  ;;  %v1258_v1 = vmax.f32 %v1256_v17, %v1257_v30 }
 0x34f   : > { %v1251_v33 = vmax.f32 %v1249_v24, %v1250_v27  ;;  %v1265_v34 = vmax.f32 %v1263_v25, %v1264_v28  ;;  %v1245_v52 = vrot.slane %v1244_v37, 1  ;;  %v1259_v53 = vrot.slane %v1258_v1, 1 }
 0x351   : > { %v1252_v44 = vrot.slane %v1251_v33, 1  ;;  %v1266_v45 = vrot.slane %v1265_v34, 1  ;;  %v1246_v2 = vmax.f32 %v1244_v37, %v1245_v52  ;;  %v1260_v3 = vmax.f32 %v1258_v1, %v1259_v53 }
 0x353   : > { %v1253_v59 = vmax.f32 %v1251_v33, %v1252_v44  ;;  %v1267_v60 = vmax.f32 %v1265_v34, %v1266_v45 }
 0x355   : > { %v1304_v9 = vcombine.low %v1246_v2, %v1253_v59  ;;  %v1305_v10 = vcombine.low %v1260_v3, %v1267_v60 }
 0x357   : > { %v1314_v19 = vrot.slane %v1304_v9, %v1313_v8  ;;  %v1321_v20 = vrot.slane %v1305_v10, %v1313_v8 }
 0x359   : > { %v1336_v17 = vcombine.low %v1314_v19, %v1321_v20 }
 0x35b   : > { %v1344_v29 = vrot.slane %v1336_v17, %v1313_v8 }
 0x360   : > { %v1187_v31 = vpop.f32.mrf.mxu0  ;;  %v1230_v32 = vpop.f32.mrf.mxu1 }
 0x362   : > { %v1189_v35 = vpop.f32.mrf.mxu0  ;;  %v1232_v36 = vpop.f32.mrf.mxu1 }
 0x364   : > { %v1191_v38 = vpop.f32.mrf.mxu0  ;;  %v1234_v39 = vpop.f32.mrf.mxu1 }
 0x365   : > { %v1268_v40 = vmax.f32 %v1187_v31, %v1191_v38  ;;  %v1282_v41 = vmax.f32 %v1230_v32, %v1234_v39 }
 0x366   : > { %v1193_v46 = vpop.f32.mrf.mxu0  ;;  %v1236_v47 = vpop.f32.mrf.mxu1 }
 0x367   : > { %v1269_v48 = vrot.slane %v1268_v40, 4  ;;  %v1283_v49 = vrot.slane %v1282_v41, 4  ;;  %v1275_v50 = vmax.f32 %v1189_v35, %v1193_v46  ;;  %v1289_v51 = vmax.f32 %v1232_v36, %v1236_v47 }
 0x369   : > { %v1270_v54 = vmax.f32 %v1268_v40, %v1269_v48  ;;  %v1284_v55 = vmax.f32 %v1282_v41, %v1283_v49  ;;  %v1276_v56 = vrot.slane %v1275_v50, 4  ;;  %v1290_v57 = vrot.slane %v1289_v51, 4 }
 0x36b   : > { %v1271_v61 = vrot.slane %v1270_v54, 2  ;;  %v1285_v62 = vrot.slane %v1284_v55, 2  ;;  %v1277_v63 = vmax.f32 %v1275_v50, %v1276_v56  ;;  %v1291_v0 = vmax.f32 %v1289_v51, %v1290_v57 }
 0x36d   : > { %v1272_v4 = vmax.f32 %v1270_v54, %v1271_v61  ;;  %v1286_v5 = vmax.f32 %v1284_v55, %v1285_v62  ;;  %v1278_v6 = vrot.slane %v1277_v63, 2  ;;  %v1292_v7 = vrot.slane %v1291_v0, 2 }
 0x36f   : > { %v1273_v11 = vrot.slane %v1272_v4, 1  ;;  %v1287_v13 = vrot.slane %v1286_v5, 1  ;;  %v1279_v14 = vmax.f32 %v1277_v63, %v1278_v6  ;;  %v1293_v15 = vmax.f32 %v1291_v0, %v1292_v7 }
 0x371   : > { %v1280_v16 = vrot.slane %v1279_v14, 1  ;;  %v1294_v18 = vrot.slane %v1293_v15, 1  ;;  %v1274_v21 = vmax.f32 %v1272_v4, %v1273_v11  ;;  %v1288_v22 = vmax.f32 %v1286_v5, %v1287_v13 }
 0x373   : > { %v1281_v23 = vmax.f32 %v1279_v14, %v1280_v16  ;;  %v1295_v24 = vmax.f32 %v1293_v15, %v1294_v18 }
 0x375   : > { %v1306_v25 = vcombine.low %v1274_v21, %v1281_v23  ;;  %v1307_v26 = vcombine.low %v1288_v22, %v1295_v24 }
 0x377   : > { %v1328_v27 = vrot.slane %v1306_v25, %v1313_v8  ;;  %v1335_v12 = vrot.slane %v1307_v26, %v1313_v8 }
 0x379   : > { %v1337_v28 = vcombine.low %v1328_v27, %v1335_v12 }
 0x37b   : > { %v1351_v30 = vrot.slane %v1337_v28, %v1313_v8 }
 0x37d   : > { %v1352_v31 = vcombine.low %v1344_v29, %v1351_v30 }
 0x37f   : > { %1355 = vst [vmem:[%s439_s25] sm:$0xff] %v1352_v31 }
 0x380 PF: > { %s21_s29 = sadd.s32 1, %s1898_s29   ;;  %s2312_s27 = smov %s1894_s28 }
 0x381   : > { %p18_p5 = scmp.ge.s32.totalorder %s21_s29, 4   ;;  %s2313_s28 = smov %s2315_s16 }
 0x383   :  { %20 = sbr.rel (!%p18_p5) target bundleno = 4 (0x4), region = 110 }
 0x388   :  { %1383 = vsyncpa [#allocation3], 1 }
 0x389   :  { %1385 = vsyncpa [#allocation3 + $0x1], 1 }
 0x38a   :  { %1386 = vsyncpa [#allocation5], 1 }
 0x38b   :  { %1387 = vsyncpa [#allocation8], 1 }

// kernel: pointnet_forward.7
= control target key start
LH: loop header
LB: loop body
LE: loop exit
PB: predicated region body
PF: predicated region fallthrough
CT: control target
= control target key end

     0   :  { %12 = vsyncpa [#allocation3], 0  ;;  %s3805_s0 = inlined_call_operand.vmem [shape: f32[8,1024], index: 0, kind: input, shape index: {}]   ;;  %s3806_s1 = inlined_call_operand.hbm [shape: bf16[1024,512], index: 1, kind: input, shape index: {}]   ;;  %s3807_s2 = inlined_call_operand.hbm [shape: f32[1,512], index: 2, kind: input, shape index: {}]   ;;  %s3808_s3 = inlined_call_operand.hbm [shape: bf16[512,256], index: 3, kind: input, shape index: {}]   ;;  %s3809_s4 = inlined_call_operand.hbm [shape: f32[1,256], index: 4, kind: input, shape index: {}]   ;;  %s3810_s5 = inlined_call_operand.vmem [shape: bf16[256,9], index: 5, kind: input, shape index: {}]   ;;  %s3811_s6 = inlined_call_operand.vmem [shape: f32[1,9], index: 6, kind: input, shape index: {}]   ;;  %s3812_s7 = inlined_call_operand.vmem [shape: f32[8,9], index: 7, kind: output, shape index: {}]  }
   0x1   :  { %13 = vsyncpa [#allocation5], 0 }
   0x2   :  { %14 = vsyncpa [#allocation8], 0  ;;  %s3603_s24 = smov [#allocation4]   ;;  %s3604_s26 = smov [#allocation2]  }
   0x3   :  { %s35_s25 = sshll.u32 %s3603_s24, 4  ;;  %s22_s27 = sshll.u32 %s3604_s26, 4  ;;  %s36_s25 = int_to_ptr.vmem [resolvable:$true] %s35_s25  ;;  %s23_s27 = int_to_ptr.vmem [resolvable:$true] %s22_s27 }
   0x4   :  { %s3525_s28 = scalar_lea.vmem %s36_s25, 64  ;;  %p3530_p1 = scmp.lt.s32.totalorder %s36_s25, %s36_s25 }
   0x5   :  { %p3526_p0 = scmp.ne.s32.totalorder %s36_s25, %s3525_s28  ;;  %p3531_p2 = scmp.lt.s32.totalorder %s3525_s28, %s3525_s28 }
   0x7   :  { %p3532_p3 = por %p3531_p2, %p3530_p1 }
   0x9   :  { %p3533_p4 = pnand %p3532_p3, %p3526_p0 }
   0xb   :  { %3536 = shalt.err (!%p3533_p4)
}
   0xc   :  { %38 = dma.hbm_to_vmem [thread:$0]  %s3807_s2, 64, %s36_s25, [#allocation5]  }
   0xd   :  { %s3545_s8 = scalar_lea.vmem %s23_s27, 32768  ;;  %p3550_p6 = scmp.lt.s32.totalorder %s23_s27, %s23_s27 }
   0xe   :  { %p3546_p5 = scmp.ne.s32.totalorder %s23_s27, %s3545_s8  ;;  %p3551_p7 = scmp.lt.s32.totalorder %s3545_s8, %s3545_s8 }
  0x10   :  { %p3552_p8 = por %p3551_p7, %p3550_p6 }
  0x12   :  { %p3553_p9 = pnand %p3552_p8, %p3546_p5 }
  0x14   :  { %3556 = shalt.err (!%p3553_p9)
}
  0x15   :  { %s3605_s9 = smov 256   ;;  %s3606_s10 = smov 16  }
  0x16   :  { %28 = dma.hbm_to_vmem [thread:$0]  %s3806_s1, 32768, %s23_s27, [#allocation3], %s3605_s9, %s3605_s9, %s3606_s10  }
  0x17   :  { %s3607_s13 = smov [#allocation6]  }
  0x18   :  { %s44_s14 = sshll.u32 %s3607_s13, 4  ;;  %s45_s14 = int_to_ptr.vmem [resolvable:$true] %s44_s14 }
  0x19   :  { %s3565_s15 = scalar_lea.vmem %s45_s14, 8192  ;;  %p3570_p11 = scmp.lt.s32.totalorder %s45_s14, %s45_s14 }
  0x1a   :  { %p3566_p10 = scmp.ne.s32.totalorder %s45_s14, %s3565_s15  ;;  %p3571_p12 = scmp.lt.s32.totalorder %s3565_s15, %s3565_s15 }
  0x1c   :  { %p3572_p13 = por %p3571_p12, %p3570_p11 }
  0x1e   :  { %p3573_p0 = pnand %p3572_p13, %p3566_p10 }
  0x20   :  { %3576 = shalt.err (!%p3573_p0)
}
  0x21   :  { %s3608_s2 = smov 128   ;;  %s3609_s16 = smov 8  }
  0x22   :  { %50 = dma.hbm_to_vmem [thread:$0]  %s3808_s3, 8192, %s45_s14, [#allocation5], %s3608_s2, %s3608_s2, %s3609_s16  }
  0x23   :  { %s3610_s19 = smov [#allocation7]  }
  0x24   :  { %s57_s20 = sshll.u32 %s3610_s19, 4  ;;  %s58_s20 = int_to_ptr.vmem [resolvable:$true] %s57_s20 }
  0x25   :  { %s3585_s1 = scalar_lea.vmem %s58_s20, 32  ;;  %p3590_p2 = scmp.lt.s32.totalorder %s58_s20, %s58_s20 }
  0x26   :  { %p3586_p1 = scmp.ne.s32.totalorder %s58_s20, %s3585_s1  ;;  %p3591_p3 = scmp.lt.s32.totalorder %s3585_s1, %s3585_s1 }
  0x28   :  { %p3592_p4 = por %p3591_p3, %p3590_p2 }
  0x2a   :  { %p3593_p5 = pnand %p3592_p4, %p3586_p1 }
  0x2c   :  { %3596 = shalt.err (!%p3593_p5)
}
  0x2d   :  { %60 = dma.hbm_to_vmem [thread:$0]  %s3809_s4, 32, %s58_s20, [#allocation8]  }
  0x2e   :  { %3597 = dma.done.wait [#allocation3], 32768  }
  0x2f   :  { %3598 = vsyncadd [#allocation3], 4294934528 }
  0x30   :  { %3599 = dma.done.wait [#allocation5], 8256  }
  0x31   :  { %3600 = vsyncadd [#allocation5], 4294959040 }
  0x32   :  { %3601 = dma.done.wait [#allocation8], 32  }
  0x33   :  { %3602 = vsyncadd [#allocation8], 4294967264  ;;  %v3021_v0 = vld [vmem:[#allocation2 + $0xe4] ss:$16 sps:$4 sm:$0xff]   ;;  %v3025_v2 = vld [vmem:[#allocation2 + $0xe0] ss:$16 sps:$4 sm:$0xff]  }
  0x34   :  { %v3023_v1 = vld [vmem:[#allocation2 + $0x2e4] ss:$16 sps:$4 sm:$0xff]   ;;  %1652 = vmatprep.subr.bf16.mxu0 %v3021_v0  ;;  %v3026_v3 = vld [vmem:[#allocation2 + $0x2e0] ss:$16 sps:$4 sm:$0xff]   ;;  %v79_v46 = vld [vmem:[%s3805_s0 + $0x8] sm:$0xff]  ;;  %vm2645_vm0 = vcmask 72704  }
  0x35   :  { %1693 = vmatprep.subr.bf16.mxu1 %v3023_v1  ;;  %v3027_v4 = vld [vmem:[#allocation2 + $0xc4] ss:$16 sps:$4 sm:$0xff]   ;;  %1653 = vmatpush1.bf16.msra.mxu0 %v3025_v2  ;;  %v3031_v6 = vld [vmem:[#allocation2 + $0xc0] ss:$16 sps:$4 sm:$0xff]   ;;  %v3666_v49 = vpack.c.bf16 %v79_v46, %v79_v46  ;;  %v81_v50 = vld [vmem:[%s3805_s0 + $0x18] sm:$0xff] }
  0x36   :  { %1694 = vmatpush1.bf16.msra.mxu1 %v3026_v3  ;;  %v3029_v5 = vld [vmem:[#allocation2 + $0x2c4] ss:$16 sps:$4 sm:$0xff]   ;;  %1654 = vmatprep.subr.bf16.mxu0 %v3027_v4  ;;  %v3032_v7 = vld [vmem:[#allocation2 + $0x2c0] ss:$16 sps:$4 sm:$0xff]   ;;  %v3671_v52 = vpack.c.bf16 %v81_v50, %v81_v50 }
  0x37   :  { %1695 = vmatprep.subr.bf16.mxu1 %v3029_v5  ;;  %v3033_v8 = vld [vmem:[#allocation2 + $0xa4] ss:$16 sps:$4 sm:$0xff]   ;;  %v3037_v10 = vld [vmem:[#allocation2 + $0xa0] ss:$16 sps:$4 sm:$0xff]   ;;  %1684 = vmatprep.mubr.bf16.mxu0 %v3666_v49 }
  0x38   :  { %v3035_v9 = vld [vmem:[#allocation2 + $0x2a4] ss:$16 sps:$4 sm:$0xff]   ;;  %v3038_v11 = vld [vmem:[#allocation2 + $0x2a0] ss:$16 sps:$4 sm:$0xff]   ;;  %1725 = vmatprep.mubr.bf16.mxu1 %v3671_v52 }
  0x39   :  { %1655 = vmatpush1.bf16.msra.mxu0 %v3031_v6  ;;  %v3039_v12 = vld [vmem:[#allocation2 + $0x84] ss:$16 sps:$4 sm:$0xff]   ;;  %v3043_v14 = vld [vmem:[#allocation2 + $0x80] ss:$16 sps:$4 sm:$0xff]  }
  0x3a   :  { %1696 = vmatpush1.bf16.msra.mxu1 %v3032_v7  ;;  %1656 = vmatprep.subr.bf16.mxu0 %v3033_v8  ;;  %v3041_v13 = vld [vmem:[#allocation2 + $0x284] ss:$16 sps:$4 sm:$0xff]   ;;  %v3044_v15 = vld [vmem:[#allocation2 + $0x280] ss:$16 sps:$4 sm:$0xff]  }
  0x3b   :  { %1697 = vmatprep.subr.bf16.mxu1 %v3035_v9  ;;  %v3045_v16 = vld [vmem:[#allocation2 + $0x64] ss:$16 sps:$4 sm:$0xff]   ;;  %v3049_v18 = vld [vmem:[#allocation2 + $0x60] ss:$16 sps:$4 sm:$0xff]  }
  0x3c   :  { %v3047_v17 = vld [vmem:[#allocation2 + $0x264] ss:$16 sps:$4 sm:$0xff]   ;;  %v3050_v19 = vld [vmem:[#allocation2 + $0x260] ss:$16 sps:$4 sm:$0xff]  }
  0x3d   :  { %1657 = vmatpush1.bf16.msra.mxu0 %v3037_v10  ;;  %v3051_v20 = vld [vmem:[#allocation2 + $0x44] ss:$16 sps:$4 sm:$0xff]   ;;  %v3055_v22 = vld [vmem:[#allocation2 + $0x40] ss:$16 sps:$4 sm:$0xff]  }
  0x3e   :  { %1698 = vmatpush1.bf16.msra.mxu1 %v3038_v11  ;;  %1658 = vmatprep.subr.bf16.mxu0 %v3039_v12  ;;  %v3053_v21 = vld [vmem:[#allocation2 + $0x244] ss:$16 sps:$4 sm:$0xff]   ;;  %v3056_v23 = vld [vmem:[#allocation2 + $0x240] ss:$16 sps:$4 sm:$0xff]  }
  0x3f   :  { %1699 = vmatprep.subr.bf16.mxu1 %v3041_v13  ;;  %v3057_v24 = vld [vmem:[#allocation2 + $0x24] ss:$16 sps:$4 sm:$0xff]   ;;  %v3061_v26 = vld [vmem:[#allocation2 + $0x20] ss:$16 sps:$4 sm:$0xff]  }
  0x40   :  { %v3059_v25 = vld [vmem:[#allocation2 + $0x224] ss:$16 sps:$4 sm:$0xff]   ;;  %v3062_v27 = vld [vmem:[#allocation2 + $0x220] ss:$16 sps:$4 sm:$0xff]  }
  0x41   :  { %1659 = vmatpush1.bf16.msra.mxu0 %v3043_v14  ;;  %v3063_v28 = vld [vmem:[#allocation2 + $0x4] ss:$16 sps:$4 sm:$0xff]   ;;  %v3067_v30 = vld [vmem:[#allocation2] ss:$16 sps:$4 sm:$0xff]  }
  0x42   :  { %1700 = vmatpush1.bf16.msra.mxu1 %v3044_v15  ;;  %1660 = vmatprep.subr.bf16.mxu0 %v3045_v16  ;;  %v3065_v29 = vld [vmem:[#allocation2 + $0x204] ss:$16 sps:$4 sm:$0xff]   ;;  %v3068_v31 = vld [vmem:[#allocation2 + $0x200] ss:$16 sps:$4 sm:$0xff]  }
  0x43   :  { %1701 = vmatprep.subr.bf16.mxu1 %v3047_v17  ;;  %v3069_v32 = vld [vmem:[#allocation2 + $0x1e4] ss:$16 sps:$4 sm:$0xff]   ;;  %v3073_v34 = vld [vmem:[#allocation2 + $0x1e0] ss:$16 sps:$4 sm:$0xff]  }
  0x44   :  { %v3071_v33 = vld [vmem:[#allocation2 + $0x3e4] ss:$16 sps:$4 sm:$0xff]   ;;  %v3074_v35 = vld [vmem:[#allocation2 + $0x3e0] ss:$16 sps:$4 sm:$0xff]  }
  0x45   :  { %1661 = vmatpush1.bf16.msra.mxu0 %v3049_v18  ;;  %v3075_v36 = vld [vmem:[#allocation2 + $0x1c4] ss:$16 sps:$4 sm:$0xff]   ;;  %v3079_v38 = vld [vmem:[#allocation2 + $0x1c0] ss:$16 sps:$4 sm:$0xff]  }
  0x46   :  { %1702 = vmatpush1.bf16.msra.mxu1 %v3050_v19  ;;  %1662 = vmatprep.subr.bf16.mxu0 %v3051_v20  ;;  %v3077_v37 = vld [vmem:[#allocation2 + $0x3c4] ss:$16 sps:$4 sm:$0xff]   ;;  %v3080_v39 = vld [vmem:[#allocation2 + $0x3c0] ss:$16 sps:$4 sm:$0xff]  }
  0x47   :  { %1703 = vmatprep.subr.bf16.mxu1 %v3053_v21  ;;  %v3081_v40 = vld [vmem:[#allocation2 + $0x1a4] ss:$16 sps:$4 sm:$0xff]   ;;  %v3085_v42 = vld [vmem:[#allocation2 + $0x1a0] ss:$16 sps:$4 sm:$0xff]  }
  0x48   :  { %v3083_v41 = vld [vmem:[#allocation2 + $0x3a4] ss:$16 sps:$4 sm:$0xff]   ;;  %v3086_v43 = vld [vmem:[#allocation2 + $0x3a0] ss:$16 sps:$4 sm:$0xff]  }
  0x49   :  { %1663 = vmatpush1.bf16.msra.mxu0 %v3055_v22  ;;  %v3087_v44 = vld [vmem:[#allocation2 + $0x184] ss:$16 sps:$4 sm:$0xff]   ;;  %v3091_v47 = vld [vmem:[#allocation2 + $0x180] ss:$16 sps:$4 sm:$0xff]  }
  0x4a   :  { %1704 = vmatpush1.bf16.msra.mxu1 %v3056_v23  ;;  %1664 = vmatprep.subr.bf16.mxu0 %v3057_v24  ;;  %v3089_v45 = vld [vmem:[#allocation2 + $0x384] ss:$16 sps:$4 sm:$0xff]   ;;  %v3092_v48 = vld [vmem:[#allocation2 + $0x380] ss:$16 sps:$4 sm:$0xff]  }
  0x4b   :  { %1705 = vmatprep.subr.bf16.mxu1 %v3059_v25  ;;  %v3093_v51 = vld [vmem:[#allocation2 + $0x164] ss:$16 sps:$4 sm:$0xff]   ;;  %v3097_v54 = vld [vmem:[#allocation2 + $0x160] ss:$16 sps:$4 sm:$0xff]  }
  0x4c   :  { %v3095_v53 = vld [vmem:[#allocation2 + $0x364] ss:$16 sps:$4 sm:$0xff]   ;;  %v3098_v55 = vld [vmem:[#allocation2 + $0x360] ss:$16 sps:$4 sm:$0xff]  }
  0x4d   :  { %1665 = vmatpush1.bf16.msra.mxu0 %v3061_v26  ;;  %v3099_v56 = vld [vmem:[#allocation2 + $0x144] ss:$16 sps:$4 sm:$0xff]   ;;  %v3103_v58 = vld [vmem:[#allocation2 + $0x140] ss:$16 sps:$4 sm:$0xff]  }
  0x4e   :  { %1706 = vmatpush1.bf16.msra.mxu1 %v3062_v27  ;;  %1666 = vmatprep.subr.bf16.mxu0 %v3063_v28  ;;  %v3101_v57 = vld [vmem:[#allocation2 + $0x344] ss:$16 sps:$4 sm:$0xff]   ;;  %v3104_v59 = vld [vmem:[#allocation2 + $0x340] ss:$16 sps:$4 sm:$0xff]  }
  0x4f   :  { %1707 = vmatprep.subr.bf16.mxu1 %v3065_v29  ;;  %v3105_v60 = vld [vmem:[#allocation2 + $0x124] ss:$16 sps:$4 sm:$0xff]   ;;  %v3109_v62 = vld [vmem:[#allocation2 + $0x120] ss:$16 sps:$4 sm:$0xff]  }
  0x50   :  { %v3107_v61 = vld [vmem:[#allocation2 + $0x324] ss:$16 sps:$4 sm:$0xff]   ;;  %v3110_v63 = vld [vmem:[#allocation2 + $0x320] ss:$16 sps:$4 sm:$0xff]  }
  0x51   :  { %1667 = vmatpush1.bf16.msra.mxu0 %v3067_v30  ;;  %v3111_v0 = vld [vmem:[#allocation2 + $0x104] ss:$16 sps:$4 sm:$0xff]   ;;  %v3115_v2 = vld [vmem:[#allocation2 + $0x100] ss:$16 sps:$4 sm:$0xff]  }
  0x52   :  { %1708 = vmatpush1.bf16.msra.mxu1 %v3068_v31  ;;  %1668 = vmatprep.subr.bf16.mxu0 %v3069_v32  ;;  %v3113_v1 = vld [vmem:[#allocation2 + $0x304] ss:$16 sps:$4 sm:$0xff]   ;;  %v3116_v3 = vld [vmem:[#allocation2 + $0x300] ss:$16 sps:$4 sm:$0xff]  }
  0x53   :  { %1709 = vmatprep.subr.bf16.mxu1 %v3071_v33  ;;  %v78_v4 = vld [vmem:[%s3805_s0] sm:$0xff]  ;;  %v80_v5 = vld [vmem:[%s3805_s0 + $0x10] sm:$0xff] }
  0x54   :  { %v3119_v6 = vld [vmem:[#allocation2 + $0x4e4] ss:$16 sps:$4 sm:$0xff]   ;;  %v3681_v8 = vpack.c.bf16 %v78_v4, %v78_v4  ;;  %v3683_v9 = vpack.c.bf16 %v80_v5, %v80_v5  ;;  %v3117_v10 = vld [vmem:[#allocation2 + $0x4e0] ss:$16 sps:$4 sm:$0xff]  }
  0x55   :  { %1669 = vmatpush2.bf16.msra.mxu0 %v3073_v34  ;;  %v3122_v7 = vld [vmem:[#allocation2 + $0x6e4] ss:$16 sps:$4 sm:$0xff]   ;;  %v3120_v11 = vld [vmem:[#allocation2 + $0x6e0] ss:$16 sps:$4 sm:$0xff]   ;;  %v83_v34 = vld [vmem:[%s3805_s0 + $0x28] sm:$0xff] }
  0x56   :  { %1710 = vmatpush2.bf16.msra.mxu1 %v3074_v35  ;;  %1670 = vmatprep.subr.bf16.mxu0 %v3075_v36  ;;  %v3125_v12 = vld [vmem:[#allocation2 + $0x4c4] ss:$16 sps:$4 sm:$0xff]   ;;  %v3123_v14 = vld [vmem:[#allocation2 + $0x4c0] ss:$16 sps:$4 sm:$0xff]  }
  0x57   :  { %1711 = vmatprep.subr.bf16.mxu1 %v3077_v37  ;;  %v3128_v13 = vld [vmem:[#allocation2 + $0x6c4] ss:$16 sps:$4 sm:$0xff]   ;;  %v3126_v15 = vld [vmem:[#allocation2 + $0x6c0] ss:$16 sps:$4 sm:$0xff]   ;;  %v3690_v37 = vpack.c.bf16 %v83_v34, %v83_v34  ;;  %v3231_v34 = vld [vmem:[#allocation2 + $0x88] ss:$16 sps:$4 sm:$0xff]  }
  0x58   :  { %v3131_v16 = vld [vmem:[#allocation2 + $0x4a4] ss:$16 sps:$4 sm:$0xff]   ;;  %v3129_v18 = vld [vmem:[#allocation2 + $0x4a0] ss:$16 sps:$4 sm:$0xff]  }
  0x59   :  { %1671 = vmatpush2.bf16.msra.mxu0 %v3079_v38  ;;  %v3134_v17 = vld [vmem:[#allocation2 + $0x6a4] ss:$16 sps:$4 sm:$0xff]   ;;  %v3132_v19 = vld [vmem:[#allocation2 + $0x6a0] ss:$16 sps:$4 sm:$0xff]   ;;  %v85_v38 = vld [vmem:[%s3805_s0 + $0x38] sm:$0xff] }
  0x5a   :  { %1712 = vmatpush2.bf16.msra.mxu1 %v3080_v39  ;;  %1672 = vmatprep.subr.bf16.mxu0 %v3081_v40  ;;  %v3137_v20 = vld [vmem:[#allocation2 + $0x484] ss:$16 sps:$4 sm:$0xff]   ;;  %v3135_v22 = vld [vmem:[#allocation2 + $0x480] ss:$16 sps:$4 sm:$0xff]   ;;  %v3695_v40 = vpack.c.bf16 %v85_v38, %v85_v38  ;;  %v3242_v38 = vld [vmem:[#allocation2 + $0x26c] ss:$16 sps:$4 sm:$0xff]  }
  0x5b   :  { %1713 = vmatprep.subr.bf16.mxu1 %v3083_v41  ;;  %v3140_v21 = vld [vmem:[#allocation2 + $0x684] ss:$16 sps:$4 sm:$0xff]   ;;  %v3138_v23 = vld [vmem:[#allocation2 + $0x680] ss:$16 sps:$4 sm:$0xff]  }
  0x5c   :  { %v3143_v24 = vld [vmem:[#allocation2 + $0x464] ss:$16 sps:$4 sm:$0xff]   ;;  %v3141_v26 = vld [vmem:[#allocation2 + $0x460] ss:$16 sps:$4 sm:$0xff]  }
  0x5d   :  { %1673 = vmatpush2.bf16.msra.mxu0 %v3085_v42  ;;  %v3146_v25 = vld [vmem:[#allocation2 + $0x664] ss:$16 sps:$4 sm:$0xff]   ;;  %v3144_v27 = vld [vmem:[#allocation2 + $0x660] ss:$16 sps:$4 sm:$0xff]  }
  0x5e   :  { %1714 = vmatpush2.bf16.msra.mxu1 %v3086_v43  ;;  %1674 = vmatprep.subr.bf16.mxu0 %v3087_v44  ;;  %v3149_v28 = vld [vmem:[#allocation2 + $0x444] ss:$16 sps:$4 sm:$0xff]   ;;  %v3147_v30 = vld [vmem:[#allocation2 + $0x440] ss:$16 sps:$4 sm:$0xff]  }
  0x5f   :  { %1715 = vmatprep.subr.bf16.mxu1 %v3089_v45  ;;  %v3152_v29 = vld [vmem:[#allocation2 + $0x644] ss:$16 sps:$4 sm:$0xff]   ;;  %v3150_v31 = vld [vmem:[#allocation2 + $0x640] ss:$16 sps:$4 sm:$0xff]  }
  0x60   :  { %v3155_v32 = vld [vmem:[#allocation2 + $0x424] ss:$16 sps:$4 sm:$0xff]   ;;  %v3153_v35 = vld [vmem:[#allocation2 + $0x420] ss:$16 sps:$4 sm:$0xff]  }
  0x61   :  { %1675 = vmatpush2.bf16.msra.mxu0 %v3091_v47  ;;  %v3158_v33 = vld [vmem:[#allocation2 + $0x624] ss:$16 sps:$4 sm:$0xff]   ;;  %v3156_v36 = vld [vmem:[#allocation2 + $0x620] ss:$16 sps:$4 sm:$0xff]  }
  0x62   :  { %1716 = vmatpush2.bf16.msra.mxu1 %v3092_v48  ;;  %1676 = vmatprep.subr.bf16.mxu0 %v3093_v51  ;;  %v3161_v39 = vld [vmem:[#allocation2 + $0x404] ss:$16 sps:$4 sm:$0xff]   ;;  %v3159_v42 = vld [vmem:[#allocation2 + $0x400] ss:$16 sps:$4 sm:$0xff]  }
  0x63   :  { %1717 = vmatprep.subr.bf16.mxu1 %v3095_v53  ;;  %v3164_v41 = vld [vmem:[#allocation2 + $0x604] ss:$16 sps:$4 sm:$0xff]   ;;  %v3162_v43 = vld [vmem:[#allocation2 + $0x600] ss:$16 sps:$4 sm:$0xff]  }
  0x64   :  { %v3167_v44 = vld [vmem:[#allocation2 + $0x5e4] ss:$16 sps:$4 sm:$0xff]   ;;  %v3165_v46 = vld [vmem:[#allocation2 + $0x5e0] ss:$16 sps:$4 sm:$0xff]  }
  0x65   :  { %1677 = vmatpush2.bf16.msra.mxu0 %v3097_v54  ;;  %v3170_v45 = vld [vmem:[#allocation2 + $0x7e4] ss:$16 sps:$4 sm:$0xff]   ;;  %v3168_v47 = vld [vmem:[#allocation2 + $0x7e0] ss:$16 sps:$4 sm:$0xff]  }
  0x66   :  { %1718 = vmatpush2.bf16.msra.mxu1 %v3098_v55  ;;  %1678 = vmatprep.subr.bf16.mxu0 %v3099_v56  ;;  %v3173_v48 = vld [vmem:[#allocation2 + $0x5c4] ss:$16 sps:$4 sm:$0xff]   ;;  %v3171_v51 = vld [vmem:[#allocation2 + $0x5c0] ss:$16 sps:$4 sm:$0xff]  }
  0x67   :  { %1719 = vmatprep.subr.bf16.mxu1 %v3101_v57  ;;  %v3176_v50 = vld [vmem:[#allocation2 + $0x7c4] ss:$16 sps:$4 sm:$0xff]   ;;  %v3174_v53 = vld [vmem:[#allocation2 + $0x7c0] ss:$16 sps:$4 sm:$0xff]  }
  0x68   :  { %v3179_v54 = vld [vmem:[#allocation2 + $0x5a4] ss:$16 sps:$4 sm:$0xff]   ;;  %v3177_v56 = vld [vmem:[#allocation2 + $0x5a0] ss:$16 sps:$4 sm:$0xff]  }
  0x69   :  { %1679 = vmatpush2.bf16.msra.mxu0 %v3103_v58  ;;  %v3182_v55 = vld [vmem:[#allocation2 + $0x7a4] ss:$16 sps:$4 sm:$0xff]   ;;  %v3180_v57 = vld [vmem:[#allocation2 + $0x7a0] ss:$16 sps:$4 sm:$0xff]  }
  0x6a   :  { %1720 = vmatpush2.bf16.msra.mxu1 %v3104_v59  ;;  %1680 = vmatprep.subr.bf16.mxu0 %v3105_v60  ;;  %v3185_v58 = vld [vmem:[#allocation2 + $0x584] ss:$16 sps:$4 sm:$0xff]   ;;  %v3183_v60 = vld [vmem:[#allocation2 + $0x580] ss:$16 sps:$4 sm:$0xff]  }
  0x6b   :  { %1721 = vmatprep.subr.bf16.mxu1 %v3107_v61  ;;  %v3188_v59 = vld [vmem:[#allocation2 + $0x784] ss:$16 sps:$4 sm:$0xff]   ;;  %v3186_v61 = vld [vmem:[#allocation2 + $0x780] ss:$16 sps:$4 sm:$0xff]  }
  0x6c   :  { %v3195_v4 = vld [vmem:[#allocation2 + $0x540] ss:$16 sps:$4 sm:$0xff]  }
  0x6d   :  { %1681 = vmatpush2.bf16.msra.mxu0 %v3109_v62  ;;  %v3191_v62 = vld [vmem:[#allocation2 + $0x564] ss:$16 sps:$4 sm:$0xff]   ;;  %v3198_v5 = vld [vmem:[#allocation2 + $0x740] ss:$16 sps:$4 sm:$0xff]  }
  0x6e   :  { %1722 = vmatpush2.bf16.msra.mxu1 %v3110_v63  ;;  %1682 = vmatprep.subr.bf16.mxu0 %v3111_v0  ;;  %v3194_v63 = vld [vmem:[#allocation2 + $0x764] ss:$16 sps:$4 sm:$0xff]   ;;  %v3189_v0 = vld [vmem:[#allocation2 + $0x560] ss:$16 sps:$4 sm:$0xff]  }
  0x6f   :  { %1723 = vmatprep.subr.bf16.mxu1 %v3113_v1  ;;  %v3192_v1 = vld [vmem:[#allocation2 + $0x760] ss:$16 sps:$4 sm:$0xff]  }
  0x71   :  { %1683 = vmatpush2.bf16.msra.mxu0 %v3115_v2  ;;  %v3197_v2 = vld [vmem:[#allocation2 + $0x544] ss:$16 sps:$4 sm:$0xff]  }
  0x72   :  { %1724 = vmatpush2.bf16.msra.mxu1 %v3116_v3  ;;  %1734 = vmatprep.subr.bf16.mxu0 %v3119_v6  ;;  %v3200_v3 = vld [vmem:[#allocation2 + $0x744] ss:$16 sps:$4 sm:$0xff]  }
  0x73   :  { %1775 = vmatprep.subr.bf16.mxu1 %v3122_v7  ;;  %v3203_v6 = vld [vmem:[#allocation2 + $0x524] ss:$16 sps:$4 sm:$0xff]  }
  0x74   :  { %1685 = vmatmul.mubr.bf16.vlgmr.msra.gmra.mxu0 %v3681_v8  ;;  %v3206_v7 = vld [vmem:[#allocation2 + $0x724] ss:$16 sps:$4 sm:$0xff]  }
  0x75   :  { %1726 = vmatmul.mubr.bf16.vlgmr.msra.gmra.mxu1 %v3683_v9  ;;  %1735 = vmatpush1.bf16.msra.mxu0 %v3117_v10  ;;  %v3201_v10 = vld [vmem:[#allocation2 + $0x520] ss:$16 sps:$4 sm:$0xff]  }
  0x76   :  { %1776 = vmatpush1.bf16.msra.mxu1 %v3120_v11  ;;  %1736 = vmatprep.subr.bf16.mxu0 %v3125_v12  ;;  %v3204_v11 = vld [vmem:[#allocation2 + $0x720] ss:$16 sps:$4 sm:$0xff]   ;;  %v3209_v12 = vld [vmem:[#allocation2 + $0x504] ss:$16 sps:$4 sm:$0xff]  }
  0x77   :  { %1777 = vmatprep.subr.bf16.mxu1 %v3128_v13  ;;  %1766 = vmatprep.mubr.bf16.mxu0 %v3690_v37  ;;  %v3212_v13 = vld [vmem:[#allocation2 + $0x704] ss:$16 sps:$4 sm:$0xff]  }
  0x78   :  { %1807 = vmatprep.mubr.bf16.mxu1 %v3695_v40 }
  0x79   :  { %1737 = vmatpush1.bf16.msra.mxu0 %v3123_v14  ;;  %v3207_v14 = vld [vmem:[#allocation2 + $0x500] ss:$16 sps:$4 sm:$0xff]  }
  0x7a   :  { %1778 = vmatpush1.bf16.msra.mxu1 %v3126_v15  ;;  %1738 = vmatprep.subr.bf16.mxu0 %v3131_v16  ;;  %v3210_v15 = vld [vmem:[#allocation2 + $0x700] ss:$16 sps:$4 sm:$0xff]  }
  0x7b   :  { %1779 = vmatprep.subr.bf16.mxu1 %v3134_v17  ;;  %v82_v16 = vld [vmem:[%s3805_s0 + $0x20] sm:$0xff]  ;;  %v84_v17 = vld [vmem:[%s3805_s0 + $0x30] sm:$0xff] }
  0x7d   :  { %1739 = vmatpush1.bf16.msra.mxu0 %v3129_v18  ;;  %v3215_v18 = vld [vmem:[#allocation2 + $0xec] ss:$16 sps:$4 sm:$0xff]  }
  0x7e   :  { %1780 = vmatpush1.bf16.msra.mxu1 %v3132_v19  ;;  %1740 = vmatprep.subr.bf16.mxu0 %v3137_v20  ;;  %v3218_v19 = vld [vmem:[#allocation2 + $0x2ec] ss:$16 sps:$4 sm:$0xff]   ;;  %v3705_v20 = vpack.c.bf16 %v82_v16, %v82_v16 }
  0x7f   :  { %1781 = vmatprep.subr.bf16.mxu1 %v3140_v21  ;;  %v3707_v21 = vpack.c.bf16 %v84_v17, %v84_v17  ;;  %v3299_v16 = vld [vmem:[#allocation2 + $0x12c] ss:$16 sps:$4 sm:$0xff]  }
  0x80   :  { %v3302_v17 = vld [vmem:[#allocation2 + $0x32c] ss:$16 sps:$4 sm:$0xff]  }
  0x81   :  { %1741 = vmatpush1.bf16.msra.mxu0 %v3135_v22  ;;  %v3213_v22 = vld [vmem:[#allocation2 + $0xe8] ss:$16 sps:$4 sm:$0xff]  }
  0x82   :  { %1782 = vmatpush1.bf16.msra.mxu1 %v3138_v23  ;;  %1742 = vmatprep.subr.bf16.mxu0 %v3143_v24  ;;  %v3216_v23 = vld [vmem:[#allocation2 + $0x2e8] ss:$16 sps:$4 sm:$0xff]   ;;  %v3221_v24 = vld [vmem:[#allocation2 + $0xcc] ss:$16 sps:$4 sm:$0xff]  }
  0x83   :  { %1783 = vmatprep.subr.bf16.mxu1 %v3146_v25  ;;  %v3224_v25 = vld [vmem:[#allocation2 + $0x2cc] ss:$16 sps:$4 sm:$0xff]  }
  0x85   :  { %1743 = vmatpush1.bf16.msra.mxu0 %v3141_v26  ;;  %v3219_v26 = vld [vmem:[#allocation2 + $0xc8] ss:$16 sps:$4 sm:$0xff]  }
  0x86   :  { %1784 = vmatpush1.bf16.msra.mxu1 %v3144_v27  ;;  %1744 = vmatprep.subr.bf16.mxu0 %v3149_v28  ;;  %v3222_v27 = vld [vmem:[#allocation2 + $0x2c8] ss:$16 sps:$4 sm:$0xff]   ;;  %v3227_v28 = vld [vmem:[#allocation2 + $0xac] ss:$16 sps:$4 sm:$0xff]  }
  0x87   :  { %1785 = vmatprep.subr.bf16.mxu1 %v3152_v29  ;;  %v3230_v29 = vld [vmem:[#allocation2 + $0x2ac] ss:$16 sps:$4 sm:$0xff]  }
  0x89   :  { %1745 = vmatpush1.bf16.msra.mxu0 %v3147_v30  ;;  %v3225_v30 = vld [vmem:[#allocation2 + $0xa8] ss:$16 sps:$4 sm:$0xff]  }
  0x8a   :  { %1786 = vmatpush1.bf16.msra.mxu1 %v3150_v31  ;;  %1746 = vmatprep.subr.bf16.mxu0 %v3155_v32  ;;  %v3228_v31 = vld [vmem:[#allocation2 + $0x2a8] ss:$16 sps:$4 sm:$0xff]   ;;  %v3233_v32 = vld [vmem:[#allocation2 + $0x8c] ss:$16 sps:$4 sm:$0xff]  }
  0x8b   :  { %1787 = vmatprep.subr.bf16.mxu1 %v3158_v33  ;;  %v3236_v33 = vld [vmem:[#allocation2 + $0x28c] ss:$16 sps:$4 sm:$0xff]  }
  0x8d   :  { %1747 = vmatpush1.bf16.msra.mxu0 %v3153_v35  ;;  %v3234_v35 = vld [vmem:[#allocation2 + $0x288] ss:$16 sps:$4 sm:$0xff]  }
  0x8e   :  { %1788 = vmatpush1.bf16.msra.mxu1 %v3156_v36  ;;  %1748 = vmatprep.subr.bf16.mxu0 %v3161_v39  ;;  %v3239_v36 = vld [vmem:[#allocation2 + $0x6c] ss:$16 sps:$4 sm:$0xff]   ;;  %v3237_v39 = vld [vmem:[#allocation2 + $0x68] ss:$16 sps:$4 sm:$0xff]  }
  0x8f   :  { %1789 = vmatprep.subr.bf16.mxu1 %v3164_v41  ;;  %v3248_v41 = vld [vmem:[#allocation2 + $0x24c] ss:$16 sps:$4 sm:$0xff]  }
  0x91   :  { %1749 = vmatpush1.bf16.msra.mxu0 %v3159_v42  ;;  %v3243_v42 = vld [vmem:[#allocation2 + $0x48] ss:$16 sps:$4 sm:$0xff]  }
  0x92   :  { %1790 = vmatpush1.bf16.msra.mxu1 %v3162_v43  ;;  %1750 = vmatprep.subr.bf16.mxu0 %v3167_v44  ;;  %v3246_v43 = vld [vmem:[#allocation2 + $0x248] ss:$16 sps:$4 sm:$0xff]   ;;  %v3251_v44 = vld [vmem:[#allocation2 + $0x2c] ss:$16 sps:$4 sm:$0xff]  }
  0x93   :  { %1791 = vmatprep.subr.bf16.mxu1 %v3170_v45  ;;  %v3254_v45 = vld [vmem:[#allocation2 + $0x22c] ss:$16 sps:$4 sm:$0xff]  }
  0x95   :  { %1751 = vmatpush2.bf16.msra.mxu0 %v3165_v46  ;;  %v3249_v46 = vld [vmem:[#allocation2 + $0x28] ss:$16 sps:$4 sm:$0xff]  }
  0x96   :  { %1792 = vmatpush2.bf16.msra.mxu1 %v3168_v47  ;;  %1752 = vmatprep.subr.bf16.mxu0 %v3173_v48  ;;  %v3252_v47 = vld [vmem:[#allocation2 + $0x228] ss:$16 sps:$4 sm:$0xff]   ;;  %v3257_v48 = vld [vmem:[#allocation2 + $0xc] ss:$16 sps:$4 sm:$0xff]  }
  0x97   :  { %1793 = vmatprep.subr.bf16.mxu1 %v3176_v50  ;;  %v3260_v50 = vld [vmem:[#allocation2 + $0x20c] ss:$16 sps:$4 sm:$0xff]  }
  0x99   :  { %1753 = vmatpush2.bf16.msra.mxu0 %v3171_v51  ;;  %v3255_v51 = vld [vmem:[#allocation2 + $0x8] ss:$16 sps:$4 sm:$0xff]  }
  0x9a   :  { %1794 = vmatpush2.bf16.msra.mxu1 %v3174_v53  ;;  %1754 = vmatprep.subr.bf16.mxu0 %v3179_v54  ;;  %v3258_v53 = vld [vmem:[#allocation2 + $0x208] ss:$16 sps:$4 sm:$0xff]   ;;  %v3263_v54 = vld [vmem:[#allocation2 + $0x1ec] ss:$16 sps:$4 sm:$0xff]  }
  0x9b   :  { %1795 = vmatprep.subr.bf16.mxu1 %v3182_v55  ;;  %v3266_v55 = vld [vmem:[#allocation2 + $0x3ec] ss:$16 sps:$4 sm:$0xff]  }
  0x9d   :  { %1755 = vmatpush2.bf16.msra.mxu0 %v3177_v56  ;;  %v3261_v56 = vld [vmem:[#allocation2 + $0x1e8] ss:$16 sps:$4 sm:$0xff]  }
  0x9e   :  { %1796 = vmatpush2.bf16.msra.mxu1 %v3180_v57  ;;  %1756 = vmatprep.subr.bf16.mxu0 %v3185_v58  ;;  %v3264_v57 = vld [vmem:[#allocation2 + $0x3e8] ss:$16 sps:$4 sm:$0xff]   ;;  %v3269_v58 = vld [vmem:[#allocation2 + $0x1cc] ss:$16 sps:$4 sm:$0xff]  }
  0x9f   :  { %1797 = vmatprep.subr.bf16.mxu1 %v3188_v59  ;;  %v3272_v59 = vld [vmem:[#allocation2 + $0x3cc] ss:$16 sps:$4 sm:$0xff]  }
  0xa1   :  { %1757 = vmatpush2.bf16.msra.mxu0 %v3183_v60  ;;  %v3267_v60 = vld [vmem:[#allocation2 + $0x1c8] ss:$16 sps:$4 sm:$0xff]  }
  0xa2   :  { %1798 = vmatpush2.bf16.msra.mxu1 %v3186_v61  ;;  %1758 = vmatprep.subr.bf16.mxu0 %v3191_v62  ;;  %v3270_v61 = vld [vmem:[#allocation2 + $0x3c8] ss:$16 sps:$4 sm:$0xff]   ;;  %v3275_v62 = vld [vmem:[#allocation2 + $0x1ac] ss:$16 sps:$4 sm:$0xff]  }
  0xa3   :  { %1799 = vmatprep.subr.bf16.mxu1 %v3194_v63  ;;  %v3278_v63 = vld [vmem:[#allocation2 + $0x3ac] ss:$16 sps:$4 sm:$0xff]  }
  0xa5   :  { %1759 = vmatpush2.bf16.msra.mxu0 %v3189_v0  ;;  %v3273_v0 = vld [vmem:[#allocation2 + $0x1a8] ss:$16 sps:$4 sm:$0xff]  }
  0xa6   :  { %1800 = vmatpush2.bf16.msra.mxu1 %v3192_v1  ;;  %1760 = vmatprep.subr.bf16.mxu0 %v3197_v2  ;;  %v3276_v1 = vld [vmem:[#allocation2 + $0x3a8] ss:$16 sps:$4 sm:$0xff]   ;;  %v3281_v2 = vld [vmem:[#allocation2 + $0x18c] ss:$16 sps:$4 sm:$0xff]  }
  0xa7   :  { %1801 = vmatprep.subr.bf16.mxu1 %v3200_v3  ;;  %v3284_v3 = vld [vmem:[#allocation2 + $0x38c] ss:$16 sps:$4 sm:$0xff]  }
  0xa9   :  { %1761 = vmatpush2.bf16.msra.mxu0 %v3195_v4  ;;  %v3279_v4 = vld [vmem:[#allocation2 + $0x188] ss:$16 sps:$4 sm:$0xff]  }
  0xaa   :  { %1802 = vmatpush2.bf16.msra.mxu1 %v3198_v5  ;;  %1762 = vmatprep.subr.bf16.mxu0 %v3203_v6  ;;  %v3282_v5 = vld [vmem:[#allocation2 + $0x388] ss:$16 sps:$4 sm:$0xff]   ;;  %v3287_v6 = vld [vmem:[#allocation2 + $0x16c] ss:$16 sps:$4 sm:$0xff]  }
  0xab   :  { %1803 = vmatprep.subr.bf16.mxu1 %v3206_v7  ;;  %v3290_v7 = vld [vmem:[#allocation2 + $0x36c] ss:$16 sps:$4 sm:$0xff]  }
  0xad   :  { %1763 = vmatpush2.bf16.msra.mxu0 %v3201_v10  ;;  %v3285_v10 = vld [vmem:[#allocation2 + $0x168] ss:$16 sps:$4 sm:$0xff]  }
  0xae   :  { %1804 = vmatpush2.bf16.msra.mxu1 %v3204_v11  ;;  %1764 = vmatprep.subr.bf16.mxu0 %v3209_v12  ;;  %v3288_v11 = vld [vmem:[#allocation2 + $0x368] ss:$16 sps:$4 sm:$0xff]   ;;  %v3293_v12 = vld [vmem:[#allocation2 + $0x14c] ss:$16 sps:$4 sm:$0xff]  }
  0xaf   :  { %1805 = vmatprep.subr.bf16.mxu1 %v3212_v13  ;;  %v3296_v13 = vld [vmem:[#allocation2 + $0x34c] ss:$16 sps:$4 sm:$0xff]  }
  0xb1   :  { %1765 = vmatpush2.bf16.msra.mxu0 %v3207_v14  ;;  %v3291_v14 = vld [vmem:[#allocation2 + $0x148] ss:$16 sps:$4 sm:$0xff]  }
  0xb2   :  { %1806 = vmatpush2.bf16.msra.mxu1 %v3210_v15  ;;  %1816 = vmatprep.subr.bf16.mxu0 %v3215_v18  ;;  %v3294_v15 = vld [vmem:[#allocation2 + $0x348] ss:$16 sps:$4 sm:$0xff]  }
  0xb3   :  { %1857 = vmatprep.subr.bf16.mxu1 %v3218_v19  ;;  %v3297_v18 = vld [vmem:[#allocation2 + $0x128] ss:$16 sps:$4 sm:$0xff]  }
  0xb4   :  { %1767 = vmatmul.mubr.bf16.vlgmr.msra.gmra.mxu0 %v3705_v20  ;;  %v3300_v19 = vld [vmem:[#allocation2 + $0x328] ss:$16 sps:$4 sm:$0xff]  }
  0xb5   :  { %1808 = vmatmul.mubr.bf16.vlgmr.msra.gmra.mxu1 %v3707_v21  ;;  %1817 = vmatpush1.bf16.msra.mxu0 %v3213_v22  ;;  %v3305_v22 = vld [vmem:[#allocation2 + $0x10c] ss:$16 sps:$4 sm:$0xff]  }
  0xb6   :  { %1858 = vmatpush1.bf16.msra.mxu1 %v3216_v23  ;;  %1818 = vmatprep.subr.bf16.mxu0 %v3221_v24  ;;  %v3308_v23 = vld [vmem:[#allocation2 + $0x30c] ss:$16 sps:$4 sm:$0xff]   ;;  %v3303_v24 = vld [vmem:[#allocation2 + $0x108] ss:$16 sps:$4 sm:$0xff]  }
  0xb7   :  { %1859 = vmatprep.subr.bf16.mxu1 %v3224_v25  ;;  %1848 = vmatprep.mubr.bf16.mxu0 %v3666_v49  ;;  %v3240_v49 = vld [vmem:[#allocation2 + $0x268] ss:$16 sps:$4 sm:$0xff]  }
  0xb8   :  { %1889 = vmatprep.mubr.bf16.mxu1 %v3671_v52  ;;  %v3245_v52 = vld [vmem:[#allocation2 + $0x4c] ss:$16 sps:$4 sm:$0xff]   ;;  %v3306_v25 = vld [vmem:[#allocation2 + $0x308] ss:$16 sps:$4 sm:$0xff]  }
  0xb9   :  { %1819 = vmatpush1.bf16.msra.mxu0 %v3219_v26  ;;  %v3311_v26 = vld [vmem:[#allocation2 + $0x4ec] ss:$16 sps:$4 sm:$0xff]  }
  0xba   :  { %1860 = vmatpush1.bf16.msra.mxu1 %v3222_v27  ;;  %1820 = vmatprep.subr.bf16.mxu0 %v3227_v28  ;;  %v3314_v27 = vld [vmem:[#allocation2 + $0x6ec] ss:$16 sps:$4 sm:$0xff]   ;;  %v3309_v28 = vld [vmem:[#allocation2 + $0x4e8] ss:$16 sps:$4 sm:$0xff]  }
  0xbb   :  { %1861 = vmatprep.subr.bf16.mxu1 %v3230_v29  ;;  %v3312_v29 = vld [vmem:[#allocation2 + $0x6e8] ss:$16 sps:$4 sm:$0xff]  }
  0xbd   :  { %1821 = vmatpush1.bf16.msra.mxu0 %v3225_v30  ;;  %v3317_v30 = vld [vmem:[#allocation2 + $0x4cc] ss:$16 sps:$4 sm:$0xff]  }
  0xbe   :  { %1862 = vmatpush1.bf16.msra.mxu1 %v3228_v31  ;;  %1822 = vmatprep.subr.bf16.mxu0 %v3233_v32  ;;  %v3320_v31 = vld [vmem:[#allocation2 + $0x6cc] ss:$16 sps:$4 sm:$0xff]   ;;  %v3315_v32 = vld [vmem:[#allocation2 + $0x4c8] ss:$16 sps:$4 sm:$0xff]  }
  0xbf   :  { %1863 = vmatprep.subr.bf16.mxu1 %v3236_v33  ;;  %v3318_v33 = vld [vmem:[#allocation2 + $0x6c8] ss:$16 sps:$4 sm:$0xff]  }
  0xc1   :  { %1823 = vmatpush1.bf16.msra.mxu0 %v3231_v34  ;;  %v3323_v34 = vld [vmem:[#allocation2 + $0x4ac] ss:$16 sps:$4 sm:$0xff]  }
  0xc2   :  { %1864 = vmatpush1.bf16.msra.mxu1 %v3234_v35  ;;  %1824 = vmatprep.subr.bf16.mxu0 %v3239_v36  ;;  %v3326_v35 = vld [vmem:[#allocation2 + $0x6ac] ss:$16 sps:$4 sm:$0xff]   ;;  %v3321_v36 = vld [vmem:[#allocation2 + $0x4a8] ss:$16 sps:$4 sm:$0xff]  }
  0xc3   :  { %1865 = vmatprep.subr.bf16.mxu1 %v3242_v38  ;;  %v3324_v38 = vld [vmem:[#allocation2 + $0x6a8] ss:$16 sps:$4 sm:$0xff]  }
  0xc5   :  { %1825 = vmatpush1.bf16.msra.mxu0 %v3237_v39  ;;  %v3329_v39 = vld [vmem:[#allocation2 + $0x48c] ss:$16 sps:$4 sm:$0xff]  }
  0xc6   :  { %1866 = vmatpush1.bf16.msra.mxu1 %v3240_v49  ;;  %1826 = vmatprep.subr.bf16.mxu0 %v3245_v52  ;;  %v3327_v49 = vld [vmem:[#allocation2 + $0x488] ss:$16 sps:$4 sm:$0xff]   ;;  %v3335_v52 = vld [vmem:[#allocation2 + $0x46c] ss:$16 sps:$4 sm:$0xff]  }
  0xc7   :  { %1867 = vmatprep.subr.bf16.mxu1 %v3248_v41  ;;  %v3338_v41 = vld [vmem:[#allocation2 + $0x66c] ss:$16 sps:$4 sm:$0xff]  }
  0xc9   :  { %1827 = vmatpush1.bf16.msra.mxu0 %v3243_v42  ;;  %v3333_v42 = vld [vmem:[#allocation2 + $0x468] ss:$16 sps:$4 sm:$0xff]  }
  0xca   :  { %1868 = vmatpush1.bf16.msra.mxu1 %v3246_v43  ;;  %1828 = vmatprep.subr.bf16.mxu0 %v3251_v44  ;;  %v3336_v43 = vld [vmem:[#allocation2 + $0x668] ss:$16 sps:$4 sm:$0xff]   ;;  %v3341_v44 = vld [vmem:[#allocation2 + $0x44c] ss:$16 sps:$4 sm:$0xff]  }
  0xcb   :  { %1869 = vmatprep.subr.bf16.mxu1 %v3254_v45  ;;  %v3342_v45 = vld [vmem:[#allocation2 + $0x648] ss:$16 sps:$4 sm:$0xff]  }
  0xcd   :  { %1829 = vmatpush1.bf16.msra.mxu0 %v3249_v46  ;;  %v3347_v46 = vld [vmem:[#allocation2 + $0x42c] ss:$16 sps:$4 sm:$0xff]  }
  0xce   :  { %1870 = vmatpush1.bf16.msra.mxu1 %v3252_v47  ;;  %1830 = vmatprep.subr.bf16.mxu0 %v3257_v48  ;;  %v3350_v47 = vld [vmem:[#allocation2 + $0x62c] ss:$16 sps:$4 sm:$0xff]   ;;  %v3345_v48 = vld [vmem:[#allocation2 + $0x428] ss:$16 sps:$4 sm:$0xff]  }
  0xcf   :  { %1871 = vmatprep.subr.bf16.mxu1 %v3260_v50  ;;  %v3348_v50 = vld [vmem:[#allocation2 + $0x628] ss:$16 sps:$4 sm:$0xff]  }
  0xd1   :  { %1831 = vmatpush1.bf16.msra.mxu0 %v3255_v51  ;;  %v3353_v51 = vld [vmem:[#allocation2 + $0x40c] ss:$16 sps:$4 sm:$0xff]  }
  0xd2   :  { %1872 = vmatpush1.bf16.msra.mxu1 %v3258_v53  ;;  %1832 = vmatprep.subr.bf16.mxu0 %v3263_v54  ;;  %v3356_v53 = vld [vmem:[#allocation2 + $0x60c] ss:$16 sps:$4 sm:$0xff]   ;;  %v3351_v54 = vld [vmem:[#allocation2 + $0x408] ss:$16 sps:$4 sm:$0xff]  }
  0xd3   :  { %1873 = vmatprep.subr.bf16.mxu1 %v3266_v55  ;;  %v3354_v55 = vld [vmem:[#allocation2 + $0x608] ss:$16 sps:$4 sm:$0xff]  }
  0xd5   :  { %1833 = vmatpush2.bf16.msra.mxu0 %v3261_v56  ;;  %v3359_v56 = vld [vmem:[#allocation2 + $0x5ec] ss:$16 sps:$4 sm:$0xff]  }
  0xd6   :  { %1874 = vmatpush2.bf16.msra.mxu1 %v3264_v57  ;;  %1834 = vmatprep.subr.bf16.mxu0 %v3269_v58  ;;  %v3362_v57 = vld [vmem:[#allocation2 + $0x7ec] ss:$16 sps:$4 sm:$0xff]   ;;  %v3357_v58 = vld [vmem:[#allocation2 + $0x5e8] ss:$16 sps:$4 sm:$0xff]  }
  0xd7   :  { %1875 = vmatprep.subr.bf16.mxu1 %v3272_v59  ;;  %v3360_v59 = vld [vmem:[#allocation2 + $0x7e8] ss:$16 sps:$4 sm:$0xff]  }
  0xd9   :  { %1835 = vmatpush2.bf16.msra.mxu0 %v3267_v60  ;;  %v3365_v60 = vld [vmem:[#allocation2 + $0x5cc] ss:$16 sps:$4 sm:$0xff]  }
  0xda   :  { %1876 = vmatpush2.bf16.msra.mxu1 %v3270_v61  ;;  %1836 = vmatprep.subr.bf16.mxu0 %v3275_v62  ;;  %v3368_v61 = vld [vmem:[#allocation2 + $0x7cc] ss:$16 sps:$4 sm:$0xff]   ;;  %v3363_v62 = vld [vmem:[#allocation2 + $0x5c8] ss:$16 sps:$4 sm:$0xff]  }
  0xdb   :  { %1877 = vmatprep.subr.bf16.mxu1 %v3278_v63  ;;  %v3366_v63 = vld [vmem:[#allocation2 + $0x7c8] ss:$16 sps:$4 sm:$0xff]  }
  0xdd   :  { %1837 = vmatpush2.bf16.msra.mxu0 %v3273_v0  ;;  %v3371_v0 = vld [vmem:[#allocation2 + $0x5ac] ss:$16 sps:$4 sm:$0xff]  }
  0xde   :  { %1878 = vmatpush2.bf16.msra.mxu1 %v3276_v1  ;;  %1838 = vmatprep.subr.bf16.mxu0 %v3281_v2  ;;  %v3374_v1 = vld [vmem:[#allocation2 + $0x7ac] ss:$16 sps:$4 sm:$0xff]   ;;  %v3369_v2 = vld [vmem:[#allocation2 + $0x5a8] ss:$16 sps:$4 sm:$0xff]  }
  0xdf   :  { %1879 = vmatprep.subr.bf16.mxu1 %v3284_v3  ;;  %v3372_v3 = vld [vmem:[#allocation2 + $0x7a8] ss:$16 sps:$4 sm:$0xff]  }
  0xe1   :  { %1839 = vmatpush2.bf16.msra.mxu0 %v3279_v4  ;;  %v3377_v4 = vld [vmem:[#allocation2 + $0x58c] ss:$16 sps:$4 sm:$0xff]  }
  0xe2   :  { %1880 = vmatpush2.bf16.msra.mxu1 %v3282_v5  ;;  %1840 = vmatprep.subr.bf16.mxu0 %v3287_v6  ;;  %v3380_v5 = vld [vmem:[#allocation2 + $0x78c] ss:$16 sps:$4 sm:$0xff]   ;;  %v3375_v6 = vld [vmem:[#allocation2 + $0x588] ss:$16 sps:$4 sm:$0xff]  }
  0xe3   :  { %1881 = vmatprep.subr.bf16.mxu1 %v3290_v7  ;;  %v3378_v7 = vld [vmem:[#allocation2 + $0x788] ss:$16 sps:$4 sm:$0xff]  }
  0xe5   :  { %1841 = vmatpush2.bf16.msra.mxu0 %v3285_v10  ;;  %v3383_v10 = vld [vmem:[#allocation2 + $0x56c] ss:$16 sps:$4 sm:$0xff]  }
  0xe6   :  { %1882 = vmatpush2.bf16.msra.mxu1 %v3288_v11  ;;  %1842 = vmatprep.subr.bf16.mxu0 %v3293_v12  ;;  %v3386_v11 = vld [vmem:[#allocation2 + $0x76c] ss:$16 sps:$4 sm:$0xff]   ;;  %v3381_v12 = vld [vmem:[#allocation2 + $0x568] ss:$16 sps:$4 sm:$0xff]  }
  0xe7   :  { %1883 = vmatprep.subr.bf16.mxu1 %v3296_v13  ;;  %v3384_v13 = vld [vmem:[#allocation2 + $0x768] ss:$16 sps:$4 sm:$0xff]  }
  0xe9   :  { %1843 = vmatpush2.bf16.msra.mxu0 %v3291_v14  ;;  %v3389_v14 = vld [vmem:[#allocation2 + $0x54c] ss:$16 sps:$4 sm:$0xff]  }
  0xea   :  { %1884 = vmatpush2.bf16.msra.mxu1 %v3294_v15  ;;  %1844 = vmatprep.subr.bf16.mxu0 %v3299_v16  ;;  %v3392_v15 = vld [vmem:[#allocation2 + $0x74c] ss:$16 sps:$4 sm:$0xff]   ;;  %v3387_v16 = vld [vmem:[#allocation2 + $0x548] ss:$16 sps:$4 sm:$0xff]  }
  0xeb   :  { %1885 = vmatprep.subr.bf16.mxu1 %v3302_v17  ;;  %v3390_v17 = vld [vmem:[#allocation2 + $0x748] ss:$16 sps:$4 sm:$0xff]  }
  0xed   :  { %1845 = vmatpush2.bf16.msra.mxu0 %v3297_v18  ;;  %v3395_v18 = vld [vmem:[#allocation2 + $0x52c] ss:$16 sps:$4 sm:$0xff]  }
  0xee   :  { %1886 = vmatpush2.bf16.msra.mxu1 %v3300_v19  ;;  %1846 = vmatprep.subr.bf16.mxu0 %v3305_v22  ;;  %v3398_v19 = vld [vmem:[#allocation2 + $0x72c] ss:$16 sps:$4 sm:$0xff]   ;;  %v3393_v22 = vld [vmem:[#allocation2 + $0x528] ss:$16 sps:$4 sm:$0xff]  }
  0xef   :  { %1887 = vmatprep.subr.bf16.mxu1 %v3308_v23  ;;  %v3396_v23 = vld [vmem:[#allocation2 + $0x728] ss:$16 sps:$4 sm:$0xff]  }
  0xf1   :  { %1847 = vmatpush2.bf16.msra.mxu0 %v3303_v24  ;;  %v3401_v24 = vld [vmem:[#allocation2 + $0x50c] ss:$16 sps:$4 sm:$0xff]  }
  0xf2   :  { %1888 = vmatpush2.bf16.msra.mxu1 %v3306_v25  ;;  %1898 = vmatprep.subr.bf16.mxu0 %v3311_v26  ;;  %v3404_v25 = vld [vmem:[#allocation2 + $0x70c] ss:$16 sps:$4 sm:$0xff]   ;;  %v3399_v26 = vld [vmem:[#allocation2 + $0x508] ss:$16 sps:$4 sm:$0xff]  }
  0xf3   :  { %1939 = vmatprep.subr.bf16.mxu1 %v3314_v27  ;;  %v3402_v27 = vld [vmem:[#allocation2 + $0x708] ss:$16 sps:$4 sm:$0xff]  }
  0xf4   :  { %1849 = vmatmul.mubr.bf16.vlgmr.msra.gmra.mxu0 %v3681_v8  ;;  %v3332_v8 = vld [vmem:[#allocation2 + $0x68c] ss:$16 sps:$4 sm:$0xff]  }
  0xf5   :  { %1890 = vmatmul.mubr.bf16.vlgmr.msra.gmra.mxu1 %v3683_v9  ;;  %1899 = vmatpush1.bf16.msra.mxu0 %v3309_v28  ;;  %v3330_v9 = vld [vmem:[#allocation2 + $0x688] ss:$16 sps:$4 sm:$0xff]  }
  0xf6   :  { %1940 = vmatpush1.bf16.msra.mxu1 %v3312_v29  ;;  %1900 = vmatprep.subr.bf16.mxu0 %v3317_v30  ;;  %v3407_v28 = vld [vmem:[#allocation6 + $0x74] ss:$8 sps:$4 sm:$0xff]   ;;  %v3405_v29 = vld [vmem:[#allocation6 + $0x70] ss:$8 sps:$4 sm:$0xff]   ;;  %v3410_v30 = vld [vmem:[#allocation6 + $0x64] ss:$8 sps:$4 sm:$0xff]  }
  0xf7   :  { %1941 = vmatprep.subr.bf16.mxu1 %v3320_v31  ;;  %1930 = vmatprep.mubr.bf16.mxu0 %v3690_v37  ;;  %v3344_v37 = vld [vmem:[#allocation2 + $0x64c] ss:$16 sps:$4 sm:$0xff]  }
  0xf8   :  { %1971 = vmatprep.mubr.bf16.mxu1 %v3695_v40  ;;  %v3339_v40 = vld [vmem:[#allocation2 + $0x448] ss:$16 sps:$4 sm:$0xff]  }
  0xf9   :  { %1901 = vmatpush1.bf16.msra.mxu0 %v3315_v32 }
  0xfa   :  { %1942 = vmatpush1.bf16.msra.mxu1 %v3318_v33  ;;  %1902 = vmatprep.subr.bf16.mxu0 %v3323_v34  ;;  %v3408_v33 = vld [vmem:[#allocation6 + $0x60] ss:$8 sps:$4 sm:$0xff]  }
  0xfb   :  { %1943 = vmatprep.subr.bf16.mxu1 %v3326_v35 }
  0xfd   :  { %1903 = vmatpush1.bf16.msra.mxu0 %v3321_v36  ;;  %v3413_v36 = vld [vmem:[#allocation6 + $0x54] ss:$8 sps:$4 sm:$0xff]  }
  0xfe   :  { %1944 = vmatpush1.bf16.msra.mxu1 %v3324_v38  ;;  %1904 = vmatprep.subr.bf16.mxu0 %v3329_v39 }
  0xff   :  { %1945 = vmatprep.subr.bf16.mxu1 %v3332_v8  ;;  %v3411_v8 = vld [vmem:[#allocation6 + $0x50] ss:$8 sps:$4 sm:$0xff]  }
 0x101   :  { %1905 = vmatpush1.bf16.msra.mxu0 %v3327_v49 }
 0x102   :  { %1946 = vmatpush1.bf16.msra.mxu1 %v3330_v9  ;;  %1906 = vmatprep.subr.bf16.mxu0 %v3335_v52  ;;  %v3416_v52 = vld [vmem:[#allocation6 + $0x44] ss:$8 sps:$4 sm:$0xff]  }
 0x103   :  { %1947 = vmatprep.subr.bf16.mxu1 %v3338_v41  ;;  %v3453_v41 = vld [vmem:[#allocation6 + $0x170] ss:$8 sps:$4 sm:$0xff]  }
 0x105   :  { %1907 = vmatpush1.bf16.msra.mxu0 %v3333_v42  ;;  %v3458_v42 = vld [vmem:[#allocation6 + $0x164] ss:$8 sps:$4 sm:$0xff]  }
 0x106   :  { %1948 = vmatpush1.bf16.msra.mxu1 %v3336_v43  ;;  %1908 = vmatprep.subr.bf16.mxu0 %v3341_v44  ;;  %v3456_v43 = vld [vmem:[#allocation6 + $0x160] ss:$8 sps:$4 sm:$0xff]   ;;  %v3419_v44 = vld [vmem:[#allocation6 + $0x34] ss:$8 sps:$4 sm:$0xff]  }
 0x107   :  { %1949 = vmatprep.subr.bf16.mxu1 %v3344_v37  ;;  %v3461_v37 = vld [vmem:[#allocation6 + $0x154] ss:$8 sps:$4 sm:$0xff]  }
 0x109   :  { %1909 = vmatpush1.bf16.msra.mxu0 %v3339_v40  ;;  %v3417_v40 = vld [vmem:[#allocation6 + $0x30] ss:$8 sps:$4 sm:$0xff]  }
 0x10a   :  { %1950 = vmatpush1.bf16.msra.mxu1 %v3342_v45  ;;  %1910 = vmatprep.subr.bf16.mxu0 %v3347_v46  ;;  %v3459_v45 = vld [vmem:[#allocation6 + $0x150] ss:$8 sps:$4 sm:$0xff]   ;;  %v3422_v46 = vld [vmem:[#allocation6 + $0x24] ss:$8 sps:$4 sm:$0xff]  }
 0x10b   :  { %1951 = vmatprep.subr.bf16.mxu1 %v3350_v47  ;;  %v3464_v47 = vld [vmem:[#allocation6 + $0x144] ss:$8 sps:$4 sm:$0xff]  }
 0x10d   :  { %1911 = vmatpush1.bf16.msra.mxu0 %v3345_v48  ;;  %v3420_v48 = vld [vmem:[#allocation6 + $0x20] ss:$8 sps:$4 sm:$0xff]  }
 0x10e   :  { %1952 = vmatpush1.bf16.msra.mxu1 %v3348_v50  ;;  %1912 = vmatprep.subr.bf16.mxu0 %v3353_v51  ;;  %v3462_v50 = vld [vmem:[#allocation6 + $0x140] ss:$8 sps:$4 sm:$0xff]   ;;  %v3425_v51 = vld [vmem:[#allocation6 + $0x14] ss:$8 sps:$4 sm:$0xff]  }
 0x10f   :  { %1953 = vmatprep.subr.bf16.mxu1 %v3356_v53  ;;  %v3467_v53 = vld [vmem:[#allocation6 + $0x134] ss:$8 sps:$4 sm:$0xff]  }
 0x111   :  { %1913 = vmatpush1.bf16.msra.mxu0 %v3351_v54  ;;  %v3423_v54 = vld [vmem:[#allocation6 + $0x10] ss:$8 sps:$4 sm:$0xff]  }
 0x112   :  { %1954 = vmatpush1.bf16.msra.mxu1 %v3354_v55  ;;  %1914 = vmatprep.subr.bf16.mxu0 %v3359_v56  ;;  %v3465_v55 = vld [vmem:[#allocation6 + $0x130] ss:$8 sps:$4 sm:$0xff]   ;;  %v3428_v56 = vld [vmem:[#allocation6 + $0x4] ss:$8 sps:$4 sm:$0xff]  }
 0x113   :  { %1955 = vmatprep.subr.bf16.mxu1 %v3362_v57  ;;  %v3470_v57 = vld [vmem:[#allocation6 + $0x124] ss:$8 sps:$4 sm:$0xff]  }
 0x115   :  { %1915 = vmatpush2.bf16.msra.mxu0 %v3357_v58  ;;  %v3426_v58 = vld [vmem:[#allocation6] ss:$8 sps:$4 sm:$0xff]  }
 0x116   :  { %1956 = vmatpush2.bf16.msra.mxu1 %v3360_v59  ;;  %1916 = vmatprep.subr.bf16.mxu0 %v3365_v60  ;;  %v3468_v59 = vld [vmem:[#allocation6 + $0x120] ss:$8 sps:$4 sm:$0xff]   ;;  %v3431_v60 = vld [vmem:[#allocation6 + $0xf4] ss:$8 sps:$4 sm:$0xff]  }
 0x117   :  { %1957 = vmatprep.subr.bf16.mxu1 %v3368_v61  ;;  %v3473_v61 = vld [vmem:[#allocation6 + $0x114] ss:$8 sps:$4 sm:$0xff]  }
 0x119   :  { %1917 = vmatpush2.bf16.msra.mxu0 %v3363_v62  ;;  %v3429_v62 = vld [vmem:[#allocation6 + $0xf0] ss:$8 sps:$4 sm:$0xff]  }
 0x11a   :  { %1958 = vmatpush2.bf16.msra.mxu1 %v3366_v63  ;;  %1918 = vmatprep.subr.bf16.mxu0 %v3371_v0  ;;  %v3471_v63 = vld [vmem:[#allocation6 + $0x110] ss:$8 sps:$4 sm:$0xff]   ;;  %v3434_v0 = vld [vmem:[#allocation6 + $0xe4] ss:$8 sps:$4 sm:$0xff]  }
 0x11b   :  { %1959 = vmatprep.subr.bf16.mxu1 %v3374_v1  ;;  %v3476_v1 = vld [vmem:[#allocation6 + $0x104] ss:$8 sps:$4 sm:$0xff]  }
 0x11d   :  { %1919 = vmatpush2.bf16.msra.mxu0 %v3369_v2  ;;  %v3432_v2 = vld [vmem:[#allocation6 + $0xe0] ss:$8 sps:$4 sm:$0xff]  }
 0x11e   :  { %1960 = vmatpush2.bf16.msra.mxu1 %v3372_v3  ;;  %1920 = vmatprep.subr.bf16.mxu0 %v3377_v4  ;;  %v3474_v3 = vld [vmem:[#allocation6 + $0x100] ss:$8 sps:$4 sm:$0xff]   ;;  %v3437_v4 = vld [vmem:[#allocation6 + $0xd4] ss:$8 sps:$4 sm:$0xff]  }
 0x11f   :  { %1961 = vmatprep.subr.bf16.mxu1 %v3380_v5  ;;  %v3479_v5 = vld [vmem:[#allocation6 + $0x1f4] ss:$8 sps:$4 sm:$0xff]  }
 0x121   :  { %1921 = vmatpush2.bf16.msra.mxu0 %v3375_v6  ;;  %v3435_v6 = vld [vmem:[#allocation6 + $0xd0] ss:$8 sps:$4 sm:$0xff]  }
 0x122   :  { %1962 = vmatpush2.bf16.msra.mxu1 %v3378_v7  ;;  %1922 = vmatprep.subr.bf16.mxu0 %v3383_v10  ;;  %v3477_v7 = vld [vmem:[#allocation6 + $0x1f0] ss:$8 sps:$4 sm:$0xff]   ;;  %v3440_v10 = vld [vmem:[#allocation6 + $0xc4] ss:$8 sps:$4 sm:$0xff]  }
 0x123   :  { %1963 = vmatprep.subr.bf16.mxu1 %v3386_v11  ;;  %v3482_v11 = vld [vmem:[#allocation6 + $0x1e4] ss:$8 sps:$4 sm:$0xff]  }
 0x125   :  { %1923 = vmatpush2.bf16.msra.mxu0 %v3381_v12  ;;  %v3438_v12 = vld [vmem:[#allocation6 + $0xc0] ss:$8 sps:$4 sm:$0xff]  }
 0x126   :  { %1964 = vmatpush2.bf16.msra.mxu1 %v3384_v13  ;;  %1924 = vmatprep.subr.bf16.mxu0 %v3389_v14  ;;  %v3480_v13 = vld [vmem:[#allocation6 + $0x1e0] ss:$8 sps:$4 sm:$0xff]   ;;  %v3443_v14 = vld [vmem:[#allocation6 + $0xb4] ss:$8 sps:$4 sm:$0xff]  }
 0x127   :  { %1965 = vmatprep.subr.bf16.mxu1 %v3392_v15  ;;  %v3485_v15 = vld [vmem:[#allocation6 + $0x1d4] ss:$8 sps:$4 sm:$0xff]  }
 0x129   :  { %1925 = vmatpush2.bf16.msra.mxu0 %v3387_v16  ;;  %v352_v16 = vlaneseq }
 0x12a   :  { %1966 = vmatpush2.bf16.msra.mxu1 %v3390_v17  ;;  %1926 = vmatprep.subr.bf16.mxu0 %v3395_v18  ;;  %v3441_v17 = vld [vmem:[#allocation6 + $0xb0] ss:$8 sps:$4 sm:$0xff]  }
 0x12b   :  { %1967 = vmatprep.subr.bf16.mxu1 %v3398_v19  ;;  %v3483_v18 = vld [vmem:[#allocation6 + $0x1d0] ss:$8 sps:$4 sm:$0xff]   ;;  %v3446_v19 = vld [vmem:[#allocation6 + $0xa4] ss:$8 sps:$4 sm:$0xff]  }
 0x12d   :  { %1927 = vmatpush2.bf16.msra.mxu0 %v3393_v22  ;;  %v3488_v22 = vld [vmem:[#allocation6 + $0x1c4] ss:$8 sps:$4 sm:$0xff]  }
 0x12e   :  { %1968 = vmatpush2.bf16.msra.mxu1 %v3396_v23  ;;  %1928 = vmatprep.subr.bf16.mxu0 %v3401_v24  ;;  %v3727_v23 = vshrl.u32 %v352_v16, 7  ;;  %v3444_v24 = vld [vmem:[#allocation6 + $0xa0] ss:$8 sps:$4 sm:$0xff]   ;;  %v3512_v16 = vld [vmem:[%s3810_s5 + $0x10] sm:$0xff]  }
 0x12f   :  { %1969 = vmatprep.subr.bf16.mxu1 %v3404_v25  ;;  %v3486_v25 = vld [vmem:[#allocation6 + $0x1c0] ss:$8 sps:$4 sm:$0xff]  }
 0x131   :  { %1929 = vmatpush2.bf16.msra.mxu0 %v3399_v26  ;;  %v3449_v26 = vld [vmem:[#allocation6 + $0x94] ss:$8 sps:$4 sm:$0xff]  }
 0x132   :  { %1970 = vmatpush2.bf16.msra.mxu1 %v3402_v27  ;;  %2384 = vmatprep.subr.bf16.mxu0 %v3407_v28  ;;  %v3491_v27 = vld [vmem:[#allocation6 + $0x1b4] ss:$8 sps:$4 sm:$0xff]   ;;  %v354_v28 = vsub.s32 0, %v3727_v23 }
 0x134   :  { %v3717_v31 = vpop.f32.mrf.mxu0  ;;  %1931 = vmatmul.mubr.bf16.vlgmr.msra.gmra.mxu0 %v3705_v20  ;;  %v3455_v20 = vld [vmem:[#allocation6 + $0x174] ss:$8 sps:$4 sm:$0xff]  }
 0x135   :  { %v3719_v32 = vpop.f32.mrf.mxu1  ;;  %1972 = vmatmul.mubr.bf16.vlgmr.msra.gmra.mxu1 %v3707_v21  ;;  %2385 = vmatpush1.bf16.msra.mxu0 %v3405_v29  ;;  %v3414_v21 = vld [vmem:[#allocation6 + $0x40] ss:$8 sps:$4 sm:$0xff]   ;;  %v3730_v29 = vld [vmem:[#allocation4] sm:$0xf] }
 0x136   :  { %v3723_v34 = vpop.f32.mrf.mxu0  ;;  %2386 = vmatprep.subr.bf16.mxu0 %v3410_v30  ;;  %2425 = vmatprep.subr.bf16.mxu1 %v3455_v20  ;;  %v358_v30 = vsub.s32 1, %v3727_v23 }
 0x137   :  { %v3725_v35 = vpop.f32.mrf.mxu1  ;;  %2426 = vmatpush1.bf16.msra.mxu1 %v3453_v41  ;;  %v3494_v41 = vld [vmem:[#allocation6 + $0x1a4] ss:$8 sps:$4 sm:$0xff]  }
 0x138   :  { %v1690_v38 = vpop.f32.mrf.mxu0  ;;  %2427 = vmatprep.subr.bf16.mxu1 %v3458_v42  ;;  %v3492_v42 = vld [vmem:[#allocation6 + $0x1a0] ss:$8 sps:$4 sm:$0xff]  }
 0x139   :  { %v1731_v39 = vpop.f32.mrf.mxu1  ;;  %2387 = vmatpush1.bf16.msra.mxu0 %v3408_v33  ;;  %v3447_v33 = vld [vmem:[#allocation6 + $0x90] ss:$8 sps:$4 sm:$0xff]   ;;  %v3452_v38 = vld [vmem:[#allocation6 + $0x84] ss:$8 sps:$4 sm:$0xff]  }
 0x13a   :  { %v1691_v49 = vpop.f32.mrf.mxu0  ;;  %2388 = vmatprep.subr.bf16.mxu0 %v3413_v36  ;;  %v3489_v36 = vld [vmem:[#allocation6 + $0x1b0] ss:$8 sps:$4 sm:$0xff]   ;;  %v355_v39 = vrot.slane %v3730_v29, %v354_v28 }
 0x13b   :  { %v1732_v9 = vpop.f32.mrf.mxu1  ;;  %2428 = vmatpush1.bf16.msra.mxu1 %v3456_v43  ;;  %v3450_v49 = vld [vmem:[#allocation6 + $0x80] ss:$8 sps:$4 sm:$0xff]  }
 0x13c   :  { %2429 = vmatprep.subr.bf16.mxu1 %v3461_v37  ;;  %v1687_v9 = vadd.f32 %v3717_v31, %v355_v39  ;;  %v3495_v31 = vld [vmem:[#allocation6 + $0x190] ss:$8 sps:$4 sm:$0xff]  }
 0x13d   :  { %2389 = vmatpush1.bf16.msra.mxu0 %v3411_v8  ;;  %v359_v8 = vrot.slane %v3730_v29, %v358_v30 }
 0x13e   :  { %2390 = vmatprep.subr.bf16.mxu0 %v3416_v52  ;;  %v1728_v20 = vadd.f32 %v3719_v32, %v1687_v9 }
 0x13f   :  { %2430 = vmatpush1.bf16.msra.mxu1 %v3459_v45  ;;  %v1689_v52 = vadd.f32 %v3723_v34, %v359_v8 }
 0x140   :  { %2431 = vmatprep.subr.bf16.mxu1 %v3464_v47 }
 0x141   :  { %2391 = vmatpush1.bf16.msra.mxu0 %v3414_v21 }
 0x142   :  { %2392 = vmatprep.subr.bf16.mxu0 %v3419_v44  ;;  %v1730_v44 = vadd.f32 %v3725_v35, %v1689_v52 }
 0x143   :  { %2432 = vmatpush1.bf16.msra.mxu1 %v3462_v50 }
 0x144   :  { %2433 = vmatprep.subr.bf16.mxu1 %v3467_v53 }
 0x145   :  { %2393 = vmatpush1.bf16.msra.mxu0 %v3417_v40 }
 0x146   :  { %2394 = vmatprep.subr.bf16.mxu0 %v3422_v46  ;;  %v3497_v46 = vld [vmem:[#allocation6 + $0x194] ss:$8 sps:$4 sm:$0xff]  }
 0x147   :  { %2434 = vmatpush1.bf16.msra.mxu1 %v3465_v55  ;;  %v3500_v55 = vld [vmem:[#allocation6 + $0x184] ss:$8 sps:$4 sm:$0xff]  }
 0x148   :  { %2435 = vmatprep.subr.bf16.mxu1 %v3470_v57  ;;  %v3498_v57 = vld [vmem:[#allocation6 + $0x180] ss:$8 sps:$4 sm:$0xff]  }
 0x149   :  { %2395 = vmatpush1.bf16.msra.mxu0 %v3420_v48 }
 0x14a   :  { %2396 = vmatprep.subr.bf16.mxu0 %v3425_v51 }
 0x14b   :  { %2436 = vmatpush1.bf16.msra.mxu1 %v3468_v59 }
 0x14c   :  { %2437 = vmatprep.subr.bf16.mxu1 %v3473_v61 }
 0x14d   :  { %2397 = vmatpush1.bf16.msra.mxu0 %v3423_v54 }
 0x14e   :  { %2398 = vmatprep.subr.bf16.mxu0 %v3428_v56 }
 0x14f   :  { %2438 = vmatpush1.bf16.msra.mxu1 %v3471_v63 }
 0x150   :  { %2439 = vmatprep.subr.bf16.mxu1 %v3476_v1 }
 0x151   :  { %2399 = vmatpush1.bf16.msra.mxu0 %v3426_v58 }
 0x152   :  { %2400 = vmatprep.subr.bf16.mxu0 %v3431_v60 }
 0x153   :  { %2440 = vmatpush1.bf16.msra.mxu1 %v3474_v3  ;;  %v3501_v3 = vld [vmem:[%s3810_s5 + $0x78] sm:$0xff]  }
 0x154   :  { %2441 = vmatprep.subr.bf16.mxu1 %v3479_v5  ;;  %v3503_v5 = vld [vmem:[%s3810_s5 + $0x70] sm:$0xff]  }
 0x155   :  { %2401 = vmatpush2.bf16.msra.mxu0 %v3429_v62 }
 0x156   :  { %2402 = vmatprep.subr.bf16.mxu0 %v3434_v0 }
 0x157   :  { %2442 = vmatpush2.bf16.msra.mxu1 %v3477_v7  ;;  %v3505_v7 = vld [vmem:[%s3810_s5 + $0x68] sm:$0xff]  }
 0x158   :  { %2443 = vmatprep.subr.bf16.mxu1 %v3482_v11  ;;  %v3507_v11 = vld [vmem:[%s3810_s5 + $0x60] sm:$0xff]  }
 0x159   :  { %2403 = vmatpush2.bf16.msra.mxu0 %v3432_v2 }
 0x15a   :  { %2404 = vmatprep.subr.bf16.mxu0 %v3437_v4  ;;  %v3502_v4 = vld [vmem:[%s3810_s5 + $0x38] sm:$0xff]  }
 0x15b   :  { %2444 = vmatpush2.bf16.msra.mxu1 %v3480_v13  ;;  %v3509_v13 = vld [vmem:[%s3810_s5 + $0x58] sm:$0xff]  }
 0x15c   :  { %2445 = vmatprep.subr.bf16.mxu1 %v3485_v15  ;;  %v3511_v15 = vld [vmem:[%s3810_s5 + $0x50] sm:$0xff]  }
 0x15d   :  { %2405 = vmatpush2.bf16.msra.mxu0 %v3435_v6  ;;  %v3504_v6 = vld [vmem:[%s3810_s5 + $0x30] sm:$0xff]  }
 0x15e   :  { %2406 = vmatprep.subr.bf16.mxu0 %v3440_v10  ;;  %v3506_v10 = vld [vmem:[%s3810_s5 + $0x28] sm:$0xff]  }
 0x15f   :  { %2446 = vmatpush2.bf16.msra.mxu1 %v3483_v18  ;;  %v366_v18 = vsub.s32 3, %v3727_v23 }
 0x160   :  { %2447 = vmatprep.subr.bf16.mxu1 %v3488_v22 }
 0x161   :  { %2407 = vmatpush2.bf16.msra.mxu0 %v3438_v12  ;;  %v3508_v12 = vld [vmem:[%s3810_s5 + $0x20] sm:$0xff]   ;;  %v367_v22 = vrot.slane %v3730_v29, %v366_v18 }
 0x162   :  { %2408 = vmatprep.subr.bf16.mxu0 %v3443_v14  ;;  %v3510_v14 = vld [vmem:[%s3810_s5 + $0x18] sm:$0xff]  }
 0x163   :  { %2448 = vmatpush2.bf16.msra.mxu1 %v3486_v25 }
 0x164   :  { %2449 = vmatprep.subr.bf16.mxu1 %v3491_v27 }
 0x165   :  { %2409 = vmatpush2.bf16.msra.mxu0 %v3441_v17  ;;  %v362_v17 = vsub.s32 2, %v3727_v23  ;;  %v2974_v23 = vld [vmem:[%s3811_s6] ss:$0 sm:$0xff] }
 0x166   :  { %2410 = vmatprep.subr.bf16.mxu0 %v3446_v19 }
 0x167   :  { %2450 = vmatpush2.bf16.msra.mxu1 %v3489_v36  ;;  %v363_v19 = vrot.slane %v3730_v29, %v362_v17 }
 0x168   :  { %2451 = vmatprep.subr.bf16.mxu1 %v3494_v41 }
 0x169   :  { %2411 = vmatpush2.bf16.msra.mxu0 %v3444_v24 }
 0x16a   :  { %2412 = vmatprep.subr.bf16.mxu0 %v3449_v26 }
 0x16b   :  { %2452 = vmatpush2.bf16.msra.mxu1 %v3492_v42 }
 0x16c   :  { %2453 = vmatprep.subr.bf16.mxu1 %v3497_v46  ;;  %v3514_v46 = vld [vmem:[%s3810_s5 + $0x8] sm:$0xff]  }
 0x16d   :  { %2413 = vmatpush2.bf16.msra.mxu0 %v3447_v33 }
 0x16e   :  { %2414 = vmatprep.subr.bf16.mxu0 %v3452_v38 }
 0x16f   :  { %2454 = vmatpush2.bf16.msra.mxu1 %v3495_v31  ;;  %v3515_v31 = vld [vmem:[%s3810_s5 + $0x40] sm:$0xff]  }
 0x170   :  { %2455 = vmatprep.subr.bf16.mxu1 %v3500_v55 }
 0x171   :  { %2415 = vmatpush2.bf16.msra.mxu0 %v3450_v49 }
 0x172   :  { %2991 = vmatprep.subr.bf16.mxu0 %v3501_v3 }
 0x173   :  { %2456 = vmatpush2.bf16.msra.mxu1 %v3498_v57 }
 0x174   :  { %v1768_v21 = vpop.f32.mrf.mxu0 }
 0x175   :  { %v1809_v43 = vpop.f32.mrf.mxu1  ;;  %v1769_v37 = vadd.f32 %v1768_v21, %v1728_v20 }
 0x176   :  { %v1770_v40 = vpop.f32.mrf.mxu0 }
 0x177   :  { %v1811_v45 = vpop.f32.mrf.mxu1  ;;  %v1810_v47 = vadd.f32 %v1809_v43, %v1769_v37  ;;  %v1771_v48 = vadd.f32 %v1770_v40, %v1730_v44 }
 0x178   :  { %v1772_v50 = vpop.f32.mrf.mxu0 }
 0x179   :  { %v1813_v34 = vpop.f32.mrf.mxu1  ;;  %v1812_v51 = vadd.f32 %v1811_v45, %v1771_v48  ;;  %v1980_v32 = vmax.f32 %v1810_v47, 0.0  ;;  %v3513_v45 = vld [vmem:[%s3810_s5 + $0x48] sm:$0xff]   ;;  %v3516_v50 = vld [vmem:[%s3810_s5] sm:$0xff]  }
 0x17a   :  { %v1773_v53 = vpop.f32.mrf.mxu0 }
 0x17b   :  { %v1814_v54 = vpop.f32.mrf.mxu1  ;;  %v1981_v56 = vmax.f32 %v1812_v51, 0.0  ;;  %v1984_v58 = vpack.c.bf16 %v1980_v32, %v1980_v32  ;;  %v2052_v51 = vld [vmem:[#allocation7] sm:$0x3] }
 0x17c   :  { %v2057_v32 = vrot.slane %v2052_v51, %v354_v28  ;;  %v2061_v53 = vrot.slane %v2052_v51, %v358_v30 }
 0x17d   :  { %v1985_v35 = vpack.c.bf16 %v1981_v56, %v1981_v56 }
 0x17f   :  { %2416 = vmatprep.mubr.bf16.mxu0 %v1985_v35 }
 0x180   :  { %2417 = vmatmul.mubr.bf16.vlgmr.msra.gmra.mxu0 %v1984_v58 }
 0x181   :  { %2992 = vmatpush3.bf16.msra.mxu0 %v3502_v4 }
 0x182   :  { %2993 = vmatprep.subr.bf16.mxu0 %v3503_v5 }
 0x185   :  { %2994 = vmatpush3.bf16.msra.mxu0 %v3504_v6 }
 0x186   :  { %2995 = vmatprep.subr.bf16.mxu0 %v3505_v7 }
 0x189   :  { %2996 = vmatpush3.bf16.msra.mxu0 %v3506_v10 }
 0x18a   :  { %2997 = vmatprep.subr.bf16.mxu0 %v3507_v11 }
 0x18d   :  { %2998 = vmatpush3.bf16.msra.mxu0 %v3508_v12 }
 0x18e   :  { %2999 = vmatprep.subr.bf16.mxu0 %v3509_v13 }
 0x191   :  { %3000 = vmatpush3.bf16.msra.mxu0 %v3510_v14 }
 0x192   :  { %3001 = vmatprep.subr.bf16.mxu0 %v3511_v15 }
 0x195   :  { %3002 = vmatpush3.bf16.msra.mxu0 %v3512_v16 }
 0x196   :  { %3003 = vmatprep.subr.bf16.mxu0 %v3513_v45 }
 0x199   :  { %3004 = vmatpush3.bf16.msra.mxu0 %v3514_v46 }
 0x19a   :  { %3005 = vmatprep.subr.bf16.mxu0 %v3515_v31 }
 0x19d   :  { %3006 = vmatpush3.bf16.msra.mxu0 %v3516_v50 }
 0x1b4   :  { %v1850_v59 = vpop.f32.mrf.mxu0 }
 0x1b5   :  { %v1891_v60 = vpop.f32.mrf.mxu1  ;;  %v1851_v24 = vadd.f32 %v1850_v59, %v363_v19 }
 0x1b6   :  { %v1852_v61 = vpop.f32.mrf.mxu0 }
 0x1b7   :  { %v1893_v62 = vpop.f32.mrf.mxu1  ;;  %v1853_v25 = vadd.f32 %v1852_v61, %v367_v22  ;;  %v1892_v26 = vadd.f32 %v1891_v60, %v1851_v24 }
 0x1b8   :  { %v1854_v63 = vpop.f32.mrf.mxu0 }
 0x1b9   :  { %v1895_v0 = vpop.f32.mrf.mxu1  ;;  %v1894_v36 = vadd.f32 %v1893_v62, %v1853_v25 }
 0x1ba   :  { %v1855_v1 = vpop.f32.mrf.mxu0 }
 0x1bb   :  { %v1896_v2 = vpop.f32.mrf.mxu1 }
 0x1f4   :  { %v1932_v27 = vpop.f32.mrf.mxu0 }
 0x1f5   :  { %v1973_v33 = vpop.f32.mrf.mxu1  ;;  %v1933_v38 = vadd.f32 %v1932_v27, %v1892_v26 }
 0x1f6   :  { %v1934_v39 = vpop.f32.mrf.mxu0 }
 0x1f7   :  { %v1975_v8 = vpop.f32.mrf.mxu1  ;;  %v1974_v49 = vadd.f32 %v1973_v33, %v1933_v38  ;;  %v1935_v9 = vadd.f32 %v1934_v39, %v1894_v36 }
 0x1f8   :  { %v1936_v52 = vpop.f32.mrf.mxu0 }
 0x1f9   :  { %v1977_v41 = vpop.f32.mrf.mxu1  ;;  %v1976_v20 = vadd.f32 %v1975_v8, %v1935_v9  ;;  %v1982_v42 = vmax.f32 %v1974_v49, 0.0 }
 0x1fa   :  { %v1937_v21 = vpop.f32.mrf.mxu0 }
 0x1fb   :  { %v1978_v43 = vpop.f32.mrf.mxu1  ;;  %v1983_v44 = vmax.f32 %v1976_v20, 0.0  ;;  %v1986_v29 = vpack.c.bf16 %v1982_v42, %v1982_v42 }
 0x1fd   :  { %v1987_v37 = vpack.c.bf16 %v1983_v44, %v1983_v44 }
 0x1ff   :  { %2457 = vmatprep.mubr.bf16.mxu1 %v1987_v37 }
 0x200   :  { %2458 = vmatmul.mubr.bf16.vlgmr.msra.gmra.mxu1 %v1986_v29 }
 0x240   :  { %v2418_v40 = vpop.f32.mrf.mxu0 }
 0x241   :  { %v2419_v54 = vadd.f32 %v2418_v40, %v2057_v32 }
 0x242   :  { %v2420_v47 = vpop.f32.mrf.mxu0 }
 0x243   :  { %v2421_v56 = vadd.f32 %v2420_v47, %v2061_v53 }
 0x244   :  { %v2422_v48 = vpop.f32.mrf.mxu0 }
 0x246   :  { %v2423_v34 = vpop.f32.mrf.mxu0 }
 0x2c0   :  { %v2459_v55 = vpop.f32.mrf.mxu1 }
 0x2c1   :  { %v2460_v57 = vadd.f32 %v2459_v55, %v2419_v54 }
 0x2c2   :  { %v2461_v35 = vpop.f32.mrf.mxu1 }
 0x2c3   :  { %v2462_v58 = vadd.f32 %v2461_v35, %v2421_v56  ;;  %v2466_v59 = vmax.f32 %v2460_v57, 0.0 }
 0x2c4   :  { %v2463_v60 = vpop.f32.mrf.mxu1 }
 0x2c5   :  { %v2467_v61 = vmax.f32 %v2462_v58, 0.0  ;;  %v2468_v0 = vpack.c.bf16 %v2466_v59, %v2466_v59 }
 0x2c6   :  { %v2464_v62 = vpop.f32.mrf.mxu1 }
 0x2c7   :  { %v2469_v63 = vpack.c.bf16 %v2467_v61, %v2467_v61 }
 0x2c9   :  { %2637 = vmatprep.mubr.bf16.mxu0 %v2469_v63 }
 0x2ca   :  { %2638 = vmatmul.mubr.bf16.vlgmr.msra.gmra.mxu0 %v2468_v0 }
 0x38a   :  { %v3007_v1 = vpop.f32.mrf.mxu0 }
 0x38c   :  { %v3008_v28 = vpop.f32.mrf.mxu0 }
 0x38d   :  { %v3009_v30 = vadd.f32 %v3008_v28, %v3007_v1 }
 0x38e   :  { %v3010_v2 = vpop.f32.mrf.mxu0 }
 0x38f   :  { %v2640_v3 = vadd.f32 %v3009_v30, %v2974_v23 }
 0x390   :  { %v3011_v4 = vpop.f32.mrf.mxu0 }
 0x391   :  { %2646 = vst.msk [vmem:[%s3812_s7] sm:$0xff] %vm2645_vm0, %v2640_v3 }
 0x392   :  { %2651 = vsyncpa [#allocation3], 1 }
 0x393   :  { %2652 = vsyncpa [#allocation5], 1 }
 0x394   :  { %2653 = vsyncpa [#allocation8], 1 }

// kernel: pointnet_forward.9
= control target key start
LH: loop header
LB: loop body
LE: loop exit
PB: predicated region body
PF: predicated region fallthrough
CT: control target
= control target key end

     0   :  { %12 = vsyncpa [#allocation3], 0  ;;  %s5838_s0 = inlined_call_operand.vmem [shape: f32[8,1024], index: 0, kind: input, shape index: {}]   ;;  %s5839_s1 = inlined_call_operand.hbm [shape: bf16[1024,512], index: 1, kind: input, shape index: {}]   ;;  %s5840_s2 = inlined_call_operand.vmem [shape: f32[1,512], index: 2, kind: input, shape index: {}]   ;;  %s5841_s3 = inlined_call_operand.hbm [shape: bf16[512,256], index: 3, kind: input, shape index: {}]   ;;  %s5842_s4 = inlined_call_operand.vmem [shape: f32[1,256], index: 4, kind: input, shape index: {}]   ;;  %s5843_s5 = inlined_call_operand.vmem [shape: bf16[256,4096], index: 5, kind: input, shape index: {}]   ;;  %s5844_s6 = inlined_call_operand.vmem [shape: f32[1,4096], index: 6, kind: input, shape index: {}]   ;;  %s5845_s7 = inlined_call_operand.vmem [shape: f32[8,4096], index: 7, kind: output, shape index: {}]  }
   0x1   :  { %13 = vsyncpa [#allocation5], 0  ;;  %s5197_s24 = smov 0   ;;  %s5199_s25 = smov 0  }
   0x2   :  { %s5201_s26 = smov 0  }
   0x3 LB: > { %s4071_s27 = sadd.s32 4294967295, %s5149_s26   ;;  %s5214_s28 = sadd.s32 1, %s5149_s26   ;;  %s5149_s26 = sphi %s5201_s26, %s5855_s26   ;;  %s5145_s25 = sphi %s5199_s25, %s5854_s25   ;;  %s5141_s24 = sphi %s5197_s24, %s5853_s24  }
   0x4   : > { %s128_s29 = ssub.s32 %s5149_s26, %s5214_s28  ;;  %s131_s30 = sadd.s32 1, %s5145_s25 }
   0x5   : > { %p129_p0 = scmp.eq.s32.totalorder %s128_s29, 0  ;;  %p138_p1 = scmp.ne.s32.totalorder %s5145_s25, %s5141_s24 }
   0x6   : > { %p139_p2 = scmp.eq.s32.totalorder %s5149_s26, 0  ;;  %p4073_p3 = scmp.ge.s32.totalorder %s5149_s26, 1 }
   0x7   : > { %s5224_s8 = scalar_select %p129_p0, %s5145_s25, %s131_s30  }
   0x8   : > { %p5226_p4 = por %p139_p2, %p138_p1  ;;  %p207_p5 = scmp.lt.s32.totalorder %s5149_s26, 5 }
   0x9   : > { %p5233_p6 = scmp.eq.s32.totalorder %s4071_s27, 0  ;;  %s5151_s12 = smov [#allocation2]  }
   0xa   : > { %p5237_p7 = pnand %p4073_p3, %p207_p5  ;;  %s222_s13 = sshll.u32 %s5151_s12, 4  ;;  %s223_s13 = int_to_ptr.vmem [resolvable:$true] %s222_s13 }
   0xb   : > { %s5849_s10 = scalar_select %p5233_p6, 1, 0 }
   0xc   : > { %p4546_p8 = pneg %p5237_p7  ;;  %s5152_s15 = smov [#allocation4]  }
   0xd   : > { %s238_s16 = sshll.u32 %s5152_s15, 4  ;;  %s5078_s17 = scalar_lea.vmem %s223_s13, 32768  ;;  %s239_s16 = int_to_ptr.vmem [resolvable:$true] %s238_s16 }
   0xe   : > { %p5245_p9 = pnand %p5233_p6, %p4546_p8  ;;  %p5079_p11 = scmp.ne.s32.totalorder %s223_s13, %s5078_s17 }
   0xf   : > { %p5086_p0 = scmp.lt.s32.totalorder %s223_s13, %s223_s13  ;;  %p5087_p1 = scmp.lt.s32.totalorder %s5078_s17, %s5078_s17 }
  0x10   : > { %p5069_p10 = pneg %p5245_p9 }
  0x11   : > { %p5088_p2 = por %p5087_p1, %p5086_p0 }
  0x12   : > { %p5081_p12 = pnand %p5079_p11, %p5069_p10 }
  0x14   : > { %p5082_p13 = pneg %p5081_p12 }
  0x16   : > { %p5089_p3 = pnand %p5088_p2, %p5082_p13 }
  0x18   : > { %5092 = shalt.err (!%p5089_p3)
}
  0x19   : > { %s5153_s18 = smov 256   ;;  %s5154_s19 = smov 16  }
  0x1a   : > { %4549 = dma.hbm_to_vmem [thread:$0]  (!%p5245_p9), %s5839_s1, 32768, %s223_s13, [#allocation3], %s5153_s18, %s5153_s18, %s5154_s19  }
  0x1b   : > { %s5104_s22 = scalar_lea.vmem %s239_s16, 8192  ;;  %p5112_p12 = scmp.lt.s32.totalorder %s239_s16, %s239_s16 }
  0x1c   : > { %p5105_p5 = scmp.ne.s32.totalorder %s239_s16, %s5104_s22  ;;  %p5113_p6 = scmp.lt.s32.totalorder %s5104_s22, %s5104_s22 }
  0x1e   : > { %p5107_p8 = pnand %p5105_p5, %p5069_p10  ;;  %p5114_p0 = por %p5113_p6, %p5112_p12 }
  0x20   : > { %p5108_p11 = pneg %p5107_p8 }
  0x22   : > { %p5115_p13 = pnand %p5114_p0, %p5108_p11 }
  0x24   : > { %5118 = shalt.err (!%p5115_p13)
}
  0x25   : > { %s5155_s23 = smov 128   ;;  %s5156_s29 = smov 8  }
  0x26   : > { %4552 = dma.hbm_to_vmem [thread:$0]  (!%p5245_p9), %s5841_s3, 8192, %s239_s16, [#allocation5], %s5155_s23, %s5155_s23, %s5156_s29  }
  0x27   : > { %p4076_p1 = scmp.ge.s32.totalorder %s5149_s26, 4 }
  0x29   : > { %251 = sbr.rel (%p4076_p1) target bundleno = 114 (0x72), region = 36 }
  0x2e   : > { %254 = sbr.rel (!%p5226_p4) target bundleno = 114 (0x72), region = 40  ;;  %s256_s13 = sand.u32 (%p5226_p4), 1, %s5145_s25  }
  0x2f   : > { %s4537_s15 = sshll.u32 (%p5226_p4), %s5149_s26, 5  ;;  %s4077_s17 = sshll.u32 (%p5226_p4), %s256_s13, 10 }
  0x30   : > { %s5275_s20 = scalar_lea.vmem (%p5226_p4), %s5843_s5, %s4537_s15  ;;  %s5280_s9 = scalar_lea.vmem (%p5226_p4), [#allocation6], %s4077_s17 }
  0x31   : > { %v274_v0 = vld [vmem:[%s5275_s20] sm:$0xff] (%p5226_p4)  ;;  %v276_v1 = vld [vmem:[%s5275_s20 + $0x8] sm:$0xff] (%p5226_p4)  ;;  %v278_v2 = vld [vmem:[%s5275_s20 + $0x10] sm:$0xff] (%p5226_p4) }
  0x32   : > { %275 = vst [vmem:[%s5280_s9] sm:$0xff] (%p5226_p4), %v274_v0  ;;  %277 = vst [vmem:[%s5280_s9 + $0x8] sm:$0xff] (%p5226_p4), %v276_v1  ;;  %v280_v3 = vld [vmem:[%s5275_s20 + $0x18] sm:$0xff] (%p5226_p4)  ;;  %v282_v4 = vld [vmem:[%s5275_s20 + $0x80] sm:$0xff] (%p5226_p4) }
  0x33   : > { %279 = vst [vmem:[%s5280_s9 + $0x10] sm:$0xff] %v278_v2  ;;  %v284_v5 = vld [vmem:[%s5275_s20 + $0x88] sm:$0xff]  ;;  %281 = vst [vmem:[%s5280_s9 + $0x18] sm:$0xff] %v280_v3  ;;  %v286_v6 = vld [vmem:[%s5275_s20 + $0x90] sm:$0xff] }
  0x34   : > { %283 = vst [vmem:[%s5280_s9 + $0x20] sm:$0xff] %v282_v4  ;;  %285 = vst [vmem:[%s5280_s9 + $0x28] sm:$0xff] %v284_v5  ;;  %v288_v7 = vld [vmem:[%s5275_s20 + $0x98] sm:$0xff]  ;;  %v290_v8 = vld [vmem:[%s5275_s20 + $0x100] sm:$0xff] }
  0x35   : > { %287 = vst [vmem:[%s5280_s9 + $0x30] sm:$0xff] %v286_v6  ;;  %289 = vst [vmem:[%s5280_s9 + $0x38] sm:$0xff] %v288_v7  ;;  %v292_v9 = vld [vmem:[%s5275_s20 + $0x108] sm:$0xff]  ;;  %v294_v10 = vld [vmem:[%s5275_s20 + $0x110] sm:$0xff] }
  0x36   : > { %291 = vst [vmem:[%s5280_s9 + $0x40] sm:$0xff] %v290_v8  ;;  %v296_v11 = vld [vmem:[%s5275_s20 + $0x118] sm:$0xff]  ;;  %293 = vst [vmem:[%s5280_s9 + $0x48] sm:$0xff] %v292_v9  ;;  %v298_v12 = vld [vmem:[%s5275_s20 + $0x180] sm:$0xff] }
  0x37   : > { %295 = vst [vmem:[%s5280_s9 + $0x50] sm:$0xff] %v294_v10  ;;  %297 = vst [vmem:[%s5280_s9 + $0x58] sm:$0xff] %v296_v11  ;;  %v300_v13 = vld [vmem:[%s5275_s20 + $0x188] sm:$0xff]  ;;  %v302_v14 = vld [vmem:[%s5275_s20 + $0x190] sm:$0xff] }
  0x38   : > { %299 = vst [vmem:[%s5280_s9 + $0x60] sm:$0xff] %v298_v12  ;;  %301 = vst [vmem:[%s5280_s9 + $0x68] sm:$0xff] %v300_v13  ;;  %v304_v15 = vld [vmem:[%s5275_s20 + $0x198] sm:$0xff]  ;;  %v306_v16 = vld [vmem:[%s5275_s20 + $0x200] sm:$0xff] }
  0x39   : > { %303 = vst [vmem:[%s5280_s9 + $0x70] sm:$0xff] %v302_v14  ;;  %v308_v17 = vld [vmem:[%s5275_s20 + $0x208] sm:$0xff]  ;;  %305 = vst [vmem:[%s5280_s9 + $0x78] sm:$0xff] %v304_v15  ;;  %v310_v18 = vld [vmem:[%s5275_s20 + $0x210] sm:$0xff] }
  0x3a   : > { %307 = vst [vmem:[%s5280_s9 + $0x80] sm:$0xff] %v306_v16  ;;  %309 = vst [vmem:[%s5280_s9 + $0x88] sm:$0xff] %v308_v17  ;;  %v312_v19 = vld [vmem:[%s5275_s20 + $0x218] sm:$0xff]  ;;  %v314_v20 = vld [vmem:[%s5275_s20 + $0x280] sm:$0xff] }
  0x3b   : > { %311 = vst [vmem:[%s5280_s9 + $0x90] sm:$0xff] %v310_v18  ;;  %313 = vst [vmem:[%s5280_s9 + $0x98] sm:$0xff] %v312_v19  ;;  %v316_v21 = vld [vmem:[%s5275_s20 + $0x288] sm:$0xff]  ;;  %v318_v22 = vld [vmem:[%s5275_s20 + $0x290] sm:$0xff] }
  0x3c   : > { %315 = vst [vmem:[%s5280_s9 + $0xa0] sm:$0xff] %v314_v20  ;;  %v320_v23 = vld [vmem:[%s5275_s20 + $0x298] sm:$0xff]  ;;  %317 = vst [vmem:[%s5280_s9 + $0xa8] sm:$0xff] %v316_v21  ;;  %v322_v24 = vld [vmem:[%s5275_s20 + $0x300] sm:$0xff] }
  0x3d   : > { %319 = vst [vmem:[%s5280_s9 + $0xb0] sm:$0xff] %v318_v22  ;;  %321 = vst [vmem:[%s5280_s9 + $0xb8] sm:$0xff] %v320_v23  ;;  %v324_v25 = vld [vmem:[%s5275_s20 + $0x308] sm:$0xff]  ;;  %v326_v26 = vld [vmem:[%s5275_s20 + $0x310] sm:$0xff] }
  0x3e   : > { %323 = vst [vmem:[%s5280_s9 + $0xc0] sm:$0xff] %v322_v24  ;;  %325 = vst [vmem:[%s5280_s9 + $0xc8] sm:$0xff] %v324_v25  ;;  %v328_v27 = vld [vmem:[%s5275_s20 + $0x318] sm:$0xff]  ;;  %v330_v28 = vld [vmem:[%s5275_s20 + $0x380] sm:$0xff] }
  0x3f   : > { %327 = vst [vmem:[%s5280_s9 + $0xd0] sm:$0xff] %v326_v26  ;;  %v332_v29 = vld [vmem:[%s5275_s20 + $0x388] sm:$0xff]  ;;  %329 = vst [vmem:[%s5280_s9 + $0xd8] sm:$0xff] %v328_v27  ;;  %v334_v30 = vld [vmem:[%s5275_s20 + $0x390] sm:$0xff] }
  0x40   : > { %331 = vst [vmem:[%s5280_s9 + $0xe0] sm:$0xff] %v330_v28  ;;  %333 = vst [vmem:[%s5280_s9 + $0xe8] sm:$0xff] %v332_v29  ;;  %v336_v31 = vld [vmem:[%s5275_s20 + $0x398] sm:$0xff]  ;;  %v338_v32 = vld [vmem:[%s5275_s20 + $0x400] sm:$0xff] }
  0x41   : > { %335 = vst [vmem:[%s5280_s9 + $0xf0] sm:$0xff] %v334_v30  ;;  %337 = vst [vmem:[%s5280_s9 + $0xf8] sm:$0xff] %v336_v31  ;;  %v340_v33 = vld [vmem:[%s5275_s20 + $0x408] sm:$0xff]  ;;  %v342_v34 = vld [vmem:[%s5275_s20 + $0x410] sm:$0xff] }
  0x42   : > { %339 = vst [vmem:[%s5280_s9 + $0x100] sm:$0xff] %v338_v32  ;;  %v344_v35 = vld [vmem:[%s5275_s20 + $0x418] sm:$0xff]  ;;  %341 = vst [vmem:[%s5280_s9 + $0x108] sm:$0xff] %v340_v33  ;;  %v346_v36 = vld [vmem:[%s5275_s20 + $0x480] sm:$0xff] }
  0x43   : > { %343 = vst [vmem:[%s5280_s9 + $0x110] sm:$0xff] %v342_v34  ;;  %345 = vst [vmem:[%s5280_s9 + $0x118] sm:$0xff] %v344_v35  ;;  %v348_v37 = vld [vmem:[%s5275_s20 + $0x488] sm:$0xff]  ;;  %v350_v38 = vld [vmem:[%s5275_s20 + $0x490] sm:$0xff] }
  0x44   : > { %347 = vst [vmem:[%s5280_s9 + $0x120] sm:$0xff] %v346_v36  ;;  %349 = vst [vmem:[%s5280_s9 + $0x128] sm:$0xff] %v348_v37  ;;  %v352_v39 = vld [vmem:[%s5275_s20 + $0x498] sm:$0xff]  ;;  %v354_v40 = vld [vmem:[%s5275_s20 + $0x500] sm:$0xff] }
  0x45   : > { %351 = vst [vmem:[%s5280_s9 + $0x130] sm:$0xff] %v350_v38  ;;  %v356_v41 = vld [vmem:[%s5275_s20 + $0x508] sm:$0xff]  ;;  %353 = vst [vmem:[%s5280_s9 + $0x138] sm:$0xff] %v352_v39  ;;  %v358_v42 = vld [vmem:[%s5275_s20 + $0x510] sm:$0xff] }
  0x46   : > { %355 = vst [vmem:[%s5280_s9 + $0x140] sm:$0xff] %v354_v40  ;;  %357 = vst [vmem:[%s5280_s9 + $0x148] sm:$0xff] %v356_v41  ;;  %v360_v43 = vld [vmem:[%s5275_s20 + $0x518] sm:$0xff]  ;;  %v362_v44 = vld [vmem:[%s5275_s20 + $0x580] sm:$0xff] }
  0x47   : > { %359 = vst [vmem:[%s5280_s9 + $0x150] sm:$0xff] %v358_v42  ;;  %361 = vst [vmem:[%s5280_s9 + $0x158] sm:$0xff] %v360_v43  ;;  %v364_v45 = vld [vmem:[%s5275_s20 + $0x588] sm:$0xff]  ;;  %v366_v46 = vld [vmem:[%s5275_s20 + $0x590] sm:$0xff] }
  0x48   : > { %363 = vst [vmem:[%s5280_s9 + $0x160] sm:$0xff] %v362_v44  ;;  %v368_v47 = vld [vmem:[%s5275_s20 + $0x598] sm:$0xff]  ;;  %365 = vst [vmem:[%s5280_s9 + $0x168] sm:$0xff] %v364_v45  ;;  %v370_v48 = vld [vmem:[%s5275_s20 + $0x600] sm:$0xff] }
  0x49   : > { %367 = vst [vmem:[%s5280_s9 + $0x170] sm:$0xff] %v366_v46  ;;  %369 = vst [vmem:[%s5280_s9 + $0x178] sm:$0xff] %v368_v47  ;;  %v372_v49 = vld [vmem:[%s5275_s20 + $0x608] sm:$0xff]  ;;  %v374_v50 = vld [vmem:[%s5275_s20 + $0x610] sm:$0xff] }
  0x4a   : > { %371 = vst [vmem:[%s5280_s9 + $0x180] sm:$0xff] %v370_v48  ;;  %373 = vst [vmem:[%s5280_s9 + $0x188] sm:$0xff] %v372_v49  ;;  %v376_v51 = vld [vmem:[%s5275_s20 + $0x618] sm:$0xff]  ;;  %v378_v52 = vld [vmem:[%s5275_s20 + $0x680] sm:$0xff] }
  0x4b   : > { %375 = vst [vmem:[%s5280_s9 + $0x190] sm:$0xff] %v374_v50  ;;  %v380_v53 = vld [vmem:[%s5275_s20 + $0x688] sm:$0xff]  ;;  %377 = vst [vmem:[%s5280_s9 + $0x198] sm:$0xff] %v376_v51  ;;  %v382_v54 = vld [vmem:[%s5275_s20 + $0x690] sm:$0xff] }
  0x4c   : > { %379 = vst [vmem:[%s5280_s9 + $0x1a0] sm:$0xff] %v378_v52  ;;  %381 = vst [vmem:[%s5280_s9 + $0x1a8] sm:$0xff] %v380_v53  ;;  %v384_v55 = vld [vmem:[%s5275_s20 + $0x698] sm:$0xff]  ;;  %v386_v56 = vld [vmem:[%s5275_s20 + $0x700] sm:$0xff] }
  0x4d   : > { %383 = vst [vmem:[%s5280_s9 + $0x1b0] sm:$0xff] %v382_v54  ;;  %385 = vst [vmem:[%s5280_s9 + $0x1b8] sm:$0xff] %v384_v55  ;;  %v388_v57 = vld [vmem:[%s5275_s20 + $0x708] sm:$0xff]  ;;  %v390_v58 = vld [vmem:[%s5275_s20 + $0x710] sm:$0xff] }
  0x4e   : > { %387 = vst [vmem:[%s5280_s9 + $0x1c0] sm:$0xff] %v386_v56  ;;  %v392_v59 = vld [vmem:[%s5275_s20 + $0x718] sm:$0xff]  ;;  %389 = vst [vmem:[%s5280_s9 + $0x1c8] sm:$0xff] %v388_v57  ;;  %v394_v60 = vld [vmem:[%s5275_s20 + $0x780] sm:$0xff] }
  0x4f   : > { %391 = vst [vmem:[%s5280_s9 + $0x1d0] sm:$0xff] %v390_v58  ;;  %393 = vst [vmem:[%s5280_s9 + $0x1d8] sm:$0xff] %v392_v59  ;;  %v396_v61 = vld [vmem:[%s5275_s20 + $0x788] sm:$0xff]  ;;  %v398_v62 = vld [vmem:[%s5275_s20 + $0x790] sm:$0xff] }
  0x50   : > { %395 = vst [vmem:[%s5280_s9 + $0x1e0] sm:$0xff] %v394_v60  ;;  %397 = vst [vmem:[%s5280_s9 + $0x1e8] sm:$0xff] %v396_v61  ;;  %v400_v63 = vld [vmem:[%s5275_s20 + $0x798] sm:$0xff]  ;;  %v402_v0 = vld [vmem:[%s5275_s20 + $0x800] sm:$0xff] }
  0x51   : > { %399 = vst [vmem:[%s5280_s9 + $0x1f0] sm:$0xff] %v398_v62  ;;  %v404_v1 = vld [vmem:[%s5275_s20 + $0x808] sm:$0xff]  ;;  %401 = vst [vmem:[%s5280_s9 + $0x1f8] sm:$0xff] %v400_v63  ;;  %v406_v2 = vld [vmem:[%s5275_s20 + $0x810] sm:$0xff] }
  0x52   : > { %403 = vst [vmem:[%s5280_s9 + $0x200] sm:$0xff] %v402_v0  ;;  %405 = vst [vmem:[%s5280_s9 + $0x208] sm:$0xff] %v404_v1  ;;  %v408_v3 = vld [vmem:[%s5275_s20 + $0x818] sm:$0xff]  ;;  %v410_v4 = vld [vmem:[%s5275_s20 + $0x880] sm:$0xff] }
  0x53   : > { %407 = vst [vmem:[%s5280_s9 + $0x210] sm:$0xff] %v406_v2  ;;  %409 = vst [vmem:[%s5280_s9 + $0x218] sm:$0xff] %v408_v3  ;;  %v412_v5 = vld [vmem:[%s5275_s20 + $0x888] sm:$0xff]  ;;  %v414_v6 = vld [vmem:[%s5275_s20 + $0x890] sm:$0xff] }
  0x54   : > { %411 = vst [vmem:[%s5280_s9 + $0x220] sm:$0xff] %v410_v4  ;;  %v416_v7 = vld [vmem:[%s5275_s20 + $0x898] sm:$0xff]  ;;  %413 = vst [vmem:[%s5280_s9 + $0x228] sm:$0xff] %v412_v5  ;;  %v418_v8 = vld [vmem:[%s5275_s20 + $0x900] sm:$0xff] }
  0x55   : > { %415 = vst [vmem:[%s5280_s9 + $0x230] sm:$0xff] %v414_v6  ;;  %417 = vst [vmem:[%s5280_s9 + $0x238] sm:$0xff] %v416_v7  ;;  %v420_v9 = vld [vmem:[%s5275_s20 + $0x908] sm:$0xff]  ;;  %v422_v10 = vld [vmem:[%s5275_s20 + $0x910] sm:$0xff] }
  0x56   : > { %419 = vst [vmem:[%s5280_s9 + $0x240] sm:$0xff] %v418_v8  ;;  %421 = vst [vmem:[%s5280_s9 + $0x248] sm:$0xff] %v420_v9  ;;  %v424_v11 = vld [vmem:[%s5275_s20 + $0x918] sm:$0xff]  ;;  %v426_v12 = vld [vmem:[%s5275_s20 + $0x980] sm:$0xff] }
  0x57   : > { %423 = vst [vmem:[%s5280_s9 + $0x250] sm:$0xff] %v422_v10  ;;  %v428_v13 = vld [vmem:[%s5275_s20 + $0x988] sm:$0xff]  ;;  %425 = vst [vmem:[%s5280_s9 + $0x258] sm:$0xff] %v424_v11  ;;  %v430_v14 = vld [vmem:[%s5275_s20 + $0x990] sm:$0xff] }
  0x58   : > { %427 = vst [vmem:[%s5280_s9 + $0x260] sm:$0xff] %v426_v12  ;;  %429 = vst [vmem:[%s5280_s9 + $0x268] sm:$0xff] %v428_v13  ;;  %v432_v15 = vld [vmem:[%s5275_s20 + $0x998] sm:$0xff]  ;;  %v434_v16 = vld [vmem:[%s5275_s20 + $0xa00] sm:$0xff] }
  0x59   : > { %431 = vst [vmem:[%s5280_s9 + $0x270] sm:$0xff] %v430_v14  ;;  %433 = vst [vmem:[%s5280_s9 + $0x278] sm:$0xff] %v432_v15  ;;  %v436_v17 = vld [vmem:[%s5275_s20 + $0xa08] sm:$0xff]  ;;  %v438_v18 = vld [vmem:[%s5275_s20 + $0xa10] sm:$0xff] }
  0x5a   : > { %435 = vst [vmem:[%s5280_s9 + $0x280] sm:$0xff] %v434_v16  ;;  %v440_v19 = vld [vmem:[%s5275_s20 + $0xa18] sm:$0xff]  ;;  %437 = vst [vmem:[%s5280_s9 + $0x288] sm:$0xff] %v436_v17  ;;  %v442_v20 = vld [vmem:[%s5275_s20 + $0xa80] sm:$0xff] }
  0x5b   : > { %439 = vst [vmem:[%s5280_s9 + $0x290] sm:$0xff] %v438_v18  ;;  %441 = vst [vmem:[%s5280_s9 + $0x298] sm:$0xff] %v440_v19  ;;  %v444_v21 = vld [vmem:[%s5275_s20 + $0xa88] sm:$0xff]  ;;  %v446_v22 = vld [vmem:[%s5275_s20 + $0xa90] sm:$0xff] }
  0x5c   : > { %443 = vst [vmem:[%s5280_s9 + $0x2a0] sm:$0xff] %v442_v20  ;;  %445 = vst [vmem:[%s5280_s9 + $0x2a8] sm:$0xff] %v444_v21  ;;  %v448_v23 = vld [vmem:[%s5275_s20 + $0xa98] sm:$0xff]  ;;  %v450_v24 = vld [vmem:[%s5275_s20 + $0xb00] sm:$0xff] }
  0x5d   : > { %447 = vst [vmem:[%s5280_s9 + $0x2b0] sm:$0xff] %v446_v22  ;;  %v452_v25 = vld [vmem:[%s5275_s20 + $0xb08] sm:$0xff]  ;;  %449 = vst [vmem:[%s5280_s9 + $0x2b8] sm:$0xff] %v448_v23  ;;  %v454_v26 = vld [vmem:[%s5275_s20 + $0xb10] sm:$0xff] }
  0x5e   : > { %451 = vst [vmem:[%s5280_s9 + $0x2c0] sm:$0xff] %v450_v24  ;;  %453 = vst [vmem:[%s5280_s9 + $0x2c8] sm:$0xff] %v452_v25  ;;  %v456_v27 = vld [vmem:[%s5275_s20 + $0xb18] sm:$0xff]  ;;  %v458_v28 = vld [vmem:[%s5275_s20 + $0xb80] sm:$0xff] }
  0x5f   : > { %455 = vst [vmem:[%s5280_s9 + $0x2d0] sm:$0xff] %v454_v26  ;;  %457 = vst [vmem:[%s5280_s9 + $0x2d8] sm:$0xff] %v456_v27  ;;  %v460_v29 = vld [vmem:[%s5275_s20 + $0xb88] sm:$0xff]  ;;  %v462_v30 = vld [vmem:[%s5275_s20 + $0xb90] sm:$0xff] }
  0x60   : > { %459 = vst [vmem:[%s5280_s9 + $0x2e0] sm:$0xff] %v458_v28  ;;  %v464_v31 = vld [vmem:[%s5275_s20 + $0xb98] sm:$0xff]  ;;  %461 = vst [vmem:[%s5280_s9 + $0x2e8] sm:$0xff] %v460_v29  ;;  %v466_v32 = vld [vmem:[%s5275_s20 + $0xc00] sm:$0xff] }
  0x61   : > { %463 = vst [vmem:[%s5280_s9 + $0x2f0] sm:$0xff] %v462_v30  ;;  %465 = vst [vmem:[%s5280_s9 + $0x2f8] sm:$0xff] %v464_v31  ;;  %v468_v33 = vld [vmem:[%s5275_s20 + $0xc08] sm:$0xff]  ;;  %v470_v34 = vld [vmem:[%s5275_s20 + $0xc10] sm:$0xff] }
  0x62   : > { %467 = vst [vmem:[%s5280_s9 + $0x300] sm:$0xff] %v466_v32  ;;  %469 = vst [vmem:[%s5280_s9 + $0x308] sm:$0xff] %v468_v33  ;;  %v472_v35 = vld [vmem:[%s5275_s20 + $0xc18] sm:$0xff]  ;;  %v474_v36 = vld [vmem:[%s5275_s20 + $0xc80] sm:$0xff] }
  0x63   : > { %471 = vst [vmem:[%s5280_s9 + $0x310] sm:$0xff] %v470_v34  ;;  %v476_v37 = vld [vmem:[%s5275_s20 + $0xc88] sm:$0xff]  ;;  %473 = vst [vmem:[%s5280_s9 + $0x318] sm:$0xff] %v472_v35  ;;  %v478_v38 = vld [vmem:[%s5275_s20 + $0xc90] sm:$0xff] }
  0x64   : > { %475 = vst [vmem:[%s5280_s9 + $0x320] sm:$0xff] %v474_v36  ;;  %477 = vst [vmem:[%s5280_s9 + $0x328] sm:$0xff] %v476_v37  ;;  %v480_v39 = vld [vmem:[%s5275_s20 + $0xc98] sm:$0xff]  ;;  %v482_v40 = vld [vmem:[%s5275_s20 + $0xd00] sm:$0xff] }
  0x65   : > { %479 = vst [vmem:[%s5280_s9 + $0x330] sm:$0xff] %v478_v38  ;;  %481 = vst [vmem:[%s5280_s9 + $0x338] sm:$0xff] %v480_v39  ;;  %v484_v41 = vld [vmem:[%s5275_s20 + $0xd08] sm:$0xff]  ;;  %v486_v42 = vld [vmem:[%s5275_s20 + $0xd10] sm:$0xff] }
  0x66   : > { %483 = vst [vmem:[%s5280_s9 + $0x340] sm:$0xff] %v482_v40  ;;  %v488_v43 = vld [vmem:[%s5275_s20 + $0xd18] sm:$0xff]  ;;  %485 = vst [vmem:[%s5280_s9 + $0x348] sm:$0xff] %v484_v41  ;;  %v490_v44 = vld [vmem:[%s5275_s20 + $0xd80] sm:$0xff] }
  0x67   : > { %487 = vst [vmem:[%s5280_s9 + $0x350] sm:$0xff] %v486_v42  ;;  %489 = vst [vmem:[%s5280_s9 + $0x358] sm:$0xff] %v488_v43  ;;  %v492_v45 = vld [vmem:[%s5275_s20 + $0xd88] sm:$0xff]  ;;  %v494_v46 = vld [vmem:[%s5275_s20 + $0xd90] sm:$0xff] }
  0x68   : > { %491 = vst [vmem:[%s5280_s9 + $0x360] sm:$0xff] %v490_v44  ;;  %493 = vst [vmem:[%s5280_s9 + $0x368] sm:$0xff] %v492_v45  ;;  %v496_v47 = vld [vmem:[%s5275_s20 + $0xd98] sm:$0xff]  ;;  %v498_v48 = vld [vmem:[%s5275_s20 + $0xe00] sm:$0xff] }
  0x69   : > { %495 = vst [vmem:[%s5280_s9 + $0x370] sm:$0xff] %v494_v46  ;;  %v500_v49 = vld [vmem:[%s5275_s20 + $0xe08] sm:$0xff]  ;;  %497 = vst [vmem:[%s5280_s9 + $0x378] sm:$0xff] %v496_v47  ;;  %v502_v50 = vld [vmem:[%s5275_s20 + $0xe10] sm:$0xff] }
  0x6a   : > { %499 = vst [vmem:[%s5280_s9 + $0x380] sm:$0xff] %v498_v48  ;;  %501 = vst [vmem:[%s5280_s9 + $0x388] sm:$0xff] %v500_v49  ;;  %v504_v51 = vld [vmem:[%s5275_s20 + $0xe18] sm:$0xff]  ;;  %v506_v52 = vld [vmem:[%s5275_s20 + $0xe80] sm:$0xff] }
  0x6b   : > { %503 = vst [vmem:[%s5280_s9 + $0x390] sm:$0xff] %v502_v50  ;;  %505 = vst [vmem:[%s5280_s9 + $0x398] sm:$0xff] %v504_v51  ;;  %v508_v53 = vld [vmem:[%s5275_s20 + $0xe88] sm:$0xff]  ;;  %v510_v54 = vld [vmem:[%s5275_s20 + $0xe90] sm:$0xff] }
  0x6c   : > { %507 = vst [vmem:[%s5280_s9 + $0x3a0] sm:$0xff] %v506_v52  ;;  %v512_v55 = vld [vmem:[%s5275_s20 + $0xe98] sm:$0xff]  ;;  %509 = vst [vmem:[%s5280_s9 + $0x3a8] sm:$0xff] %v508_v53  ;;  %v514_v56 = vld [vmem:[%s5275_s20 + $0xf00] sm:$0xff] }
  0x6d   : > { %511 = vst [vmem:[%s5280_s9 + $0x3b0] sm:$0xff] %v510_v54  ;;  %513 = vst [vmem:[%s5280_s9 + $0x3b8] sm:$0xff] %v512_v55  ;;  %v516_v57 = vld [vmem:[%s5275_s20 + $0xf08] sm:$0xff]  ;;  %v518_v58 = vld [vmem:[%s5275_s20 + $0xf10] sm:$0xff] }
  0x6e   : > { %515 = vst [vmem:[%s5280_s9 + $0x3c0] sm:$0xff] %v514_v56  ;;  %517 = vst [vmem:[%s5280_s9 + $0x3c8] sm:$0xff] %v516_v57  ;;  %v520_v59 = vld [vmem:[%s5275_s20 + $0xf18] sm:$0xff]  ;;  %v522_v60 = vld [vmem:[%s5275_s20 + $0xf80] sm:$0xff] }
  0x6f   : > { %519 = vst [vmem:[%s5280_s9 + $0x3d0] sm:$0xff] %v518_v58  ;;  %v524_v61 = vld [vmem:[%s5275_s20 + $0xf88] sm:$0xff]  ;;  %521 = vst [vmem:[%s5280_s9 + $0x3d8] sm:$0xff] %v520_v59  ;;  %v526_v62 = vld [vmem:[%s5275_s20 + $0xf90] sm:$0xff] }
  0x70   : > { %523 = vst [vmem:[%s5280_s9 + $0x3e0] sm:$0xff] %v522_v60  ;;  %525 = vst [vmem:[%s5280_s9 + $0x3e8] sm:$0xff] %v524_v61  ;;  %v528_v63 = vld [vmem:[%s5275_s20 + $0xf98] sm:$0xff] }
  0x71   : > { %527 = vst [vmem:[%s5280_s9 + $0x3f0] sm:$0xff] %v526_v62  ;;  %529 = vst [vmem:[%s5280_s9 + $0x3f8] sm:$0xff] %v528_v63 }
  0x72 PF: > { %546 = sbr.rel (%p5237_p7) target bundleno = 1048 (0x418), region = 67  ;;  %p5852_p4 = scmp.ne.s32.totalorder (!%p5237_p7), %s5849_s10, 0 }
  0x77   : > { %5132 = dma.done.wait (%p5852_p4), [#allocation3], 32768  }
  0x78   : > { %5134 = vsyncadd (%p5852_p4), [#allocation3], 4294934528 }
  0x79   : > { %5136 = dma.done.wait (%p5852_p4), [#allocation5], 8192  }
  0x7a   : > { %5138 = vsyncadd (%p5852_p4), [#allocation5], 4294959104  ;;  %v4587_v0 = vld [vmem:[#allocation2 + $0xe4] ss:$16 sps:$4 sm:$0xff]   ;;  %v4591_v2 = vld [vmem:[#allocation2 + $0xe0] ss:$16 sps:$4 sm:$0xff]  }
  0x7b   : > { %v4589_v1 = vld [vmem:[#allocation2 + $0x2e4] ss:$16 sps:$4 sm:$0xff]   ;;  %2178 = vmatprep.subr.bf16.mxu0 %v4587_v0  ;;  %v4592_v3 = vld [vmem:[#allocation2 + $0x2e0] ss:$16 sps:$4 sm:$0xff]   ;;  %v605_v46 = vld [vmem:[%s5838_s0 + $0x8] sm:$0xff]  ;;  %s557_s11 = sand.u32 1, %s5141_s24  }
  0x7c   : > { %2219 = vmatprep.subr.bf16.mxu1 %v4589_v1  ;;  %v4593_v4 = vld [vmem:[#allocation2 + $0xc4] ss:$16 sps:$4 sm:$0xff]   ;;  %2179 = vmatpush1.bf16.msra.mxu0 %v4591_v2  ;;  %v4597_v6 = vld [vmem:[#allocation2 + $0xc0] ss:$16 sps:$4 sm:$0xff]   ;;  %v5548_v49 = vpack.c.bf16 %v605_v46, %v605_v46  ;;  %v607_v50 = vld [vmem:[%s5838_s0 + $0x18] sm:$0xff]  ;;  %s4083_s14 = sshll.u32 %s557_s11, 10 }
  0x7d   : > { %2220 = vmatpush1.bf16.msra.mxu1 %v4592_v3  ;;  %v4595_v5 = vld [vmem:[#allocation2 + $0x2c4] ss:$16 sps:$4 sm:$0xff]   ;;  %2180 = vmatprep.subr.bf16.mxu0 %v4593_v4  ;;  %v4598_v7 = vld [vmem:[#allocation2 + $0x2c0] ss:$16 sps:$4 sm:$0xff]   ;;  %v5553_v52 = vpack.c.bf16 %v607_v50, %v607_v50  ;;  %s5639_s16 = scalar_lea.vmem [#allocation6], %s4083_s14  ;;  %s4084_s22 = sshll.u32 %s4071_s27, 3 }
  0x7e   : > { %2221 = vmatprep.subr.bf16.mxu1 %v4595_v5  ;;  %v4599_v8 = vld [vmem:[#allocation2 + $0xa4] ss:$16 sps:$4 sm:$0xff]   ;;  %v4603_v10 = vld [vmem:[#allocation2 + $0xa0] ss:$16 sps:$4 sm:$0xff]   ;;  %2210 = vmatprep.mubr.bf16.mxu0 %v5548_v49  ;;  %p594_p6 = scmp.lt.s32.totalorder %s4084_s22, 31 }
  0x7f   : > { %v4601_v9 = vld [vmem:[#allocation2 + $0x2a4] ss:$16 sps:$4 sm:$0xff]   ;;  %v4604_v11 = vld [vmem:[#allocation2 + $0x2a0] ss:$16 sps:$4 sm:$0xff]   ;;  %2251 = vmatprep.mubr.bf16.mxu1 %v5553_v52 }
  0x80   : > { %2181 = vmatpush1.bf16.msra.mxu0 %v4597_v6  ;;  %v4605_v12 = vld [vmem:[#allocation2 + $0x84] ss:$16 sps:$4 sm:$0xff]   ;;  %v4609_v14 = vld [vmem:[#allocation2 + $0x80] ss:$16 sps:$4 sm:$0xff]   ;;  %s5857_s22 = smov (!%p594_p6, %s4084_s22), 31 }
  0x81   : > { %2222 = vmatpush1.bf16.msra.mxu1 %v4598_v7  ;;  %2182 = vmatprep.subr.bf16.mxu0 %v4599_v8  ;;  %v4607_v13 = vld [vmem:[#allocation2 + $0x284] ss:$16 sps:$4 sm:$0xff]   ;;  %v4610_v15 = vld [vmem:[#allocation2 + $0x280] ss:$16 sps:$4 sm:$0xff]   ;;  %s596_s30 = scalar_lea.vmem %s5844_s6, %s5857_s22  ;;  %s4086_s12 = sshll.u32 %s5857_s22, 3 }
  0x82   : > { %2223 = vmatprep.subr.bf16.mxu1 %v4601_v9  ;;  %v4611_v16 = vld [vmem:[#allocation2 + $0x64] ss:$16 sps:$4 sm:$0xff]   ;;  %v4615_v18 = vld [vmem:[#allocation2 + $0x60] ss:$16 sps:$4 sm:$0xff]   ;;  %s5814_s13 = scalar_lea.vmem %s5845_s7, %s4086_s12 }
  0x83   : > { %v4613_v17 = vld [vmem:[#allocation2 + $0x264] ss:$16 sps:$4 sm:$0xff]   ;;  %v4616_v19 = vld [vmem:[#allocation2 + $0x260] ss:$16 sps:$4 sm:$0xff]  }
  0x84   : > { %2183 = vmatpush1.bf16.msra.mxu0 %v4603_v10  ;;  %v4617_v20 = vld [vmem:[#allocation2 + $0x44] ss:$16 sps:$4 sm:$0xff]   ;;  %v4621_v22 = vld [vmem:[#allocation2 + $0x40] ss:$16 sps:$4 sm:$0xff]  }
  0x85   : > { %2224 = vmatpush1.bf16.msra.mxu1 %v4604_v11  ;;  %2184 = vmatprep.subr.bf16.mxu0 %v4605_v12  ;;  %v4619_v21 = vld [vmem:[#allocation2 + $0x244] ss:$16 sps:$4 sm:$0xff]   ;;  %v4622_v23 = vld [vmem:[#allocation2 + $0x240] ss:$16 sps:$4 sm:$0xff]  }
  0x86   : > { %2225 = vmatprep.subr.bf16.mxu1 %v4607_v13  ;;  %v4623_v24 = vld [vmem:[#allocation2 + $0x24] ss:$16 sps:$4 sm:$0xff]   ;;  %v4627_v26 = vld [vmem:[#allocation2 + $0x20] ss:$16 sps:$4 sm:$0xff]  }
  0x87   : > { %v4625_v25 = vld [vmem:[#allocation2 + $0x224] ss:$16 sps:$4 sm:$0xff]   ;;  %v4628_v27 = vld [vmem:[#allocation2 + $0x220] ss:$16 sps:$4 sm:$0xff]  }
  0x88   : > { %2185 = vmatpush1.bf16.msra.mxu0 %v4609_v14  ;;  %v4629_v28 = vld [vmem:[#allocation2 + $0x4] ss:$16 sps:$4 sm:$0xff]   ;;  %v4633_v30 = vld [vmem:[#allocation2] ss:$16 sps:$4 sm:$0xff]  }
  0x89   : > { %2226 = vmatpush1.bf16.msra.mxu1 %v4610_v15  ;;  %2186 = vmatprep.subr.bf16.mxu0 %v4611_v16  ;;  %v4631_v29 = vld [vmem:[#allocation2 + $0x204] ss:$16 sps:$4 sm:$0xff]   ;;  %v4634_v31 = vld [vmem:[#allocation2 + $0x200] ss:$16 sps:$4 sm:$0xff]  }
  0x8a   : > { %2227 = vmatprep.subr.bf16.mxu1 %v4613_v17  ;;  %v4635_v32 = vld [vmem:[#allocation2 + $0x1e4] ss:$16 sps:$4 sm:$0xff]   ;;  %v4639_v34 = vld [vmem:[#allocation2 + $0x1e0] ss:$16 sps:$4 sm:$0xff]  }
  0x8b   : > { %v4637_v33 = vld [vmem:[#allocation2 + $0x3e4] ss:$16 sps:$4 sm:$0xff]   ;;  %v4640_v35 = vld [vmem:[#allocation2 + $0x3e0] ss:$16 sps:$4 sm:$0xff]  }
  0x8c   : > { %2187 = vmatpush1.bf16.msra.mxu0 %v4615_v18  ;;  %v4641_v36 = vld [vmem:[#allocation2 + $0x1c4] ss:$16 sps:$4 sm:$0xff]   ;;  %v4645_v38 = vld [vmem:[#allocation2 + $0x1c0] ss:$16 sps:$4 sm:$0xff]  }
  0x8d   : > { %2228 = vmatpush1.bf16.msra.mxu1 %v4616_v19  ;;  %2188 = vmatprep.subr.bf16.mxu0 %v4617_v20  ;;  %v4643_v37 = vld [vmem:[#allocation2 + $0x3c4] ss:$16 sps:$4 sm:$0xff]   ;;  %v4646_v39 = vld [vmem:[#allocation2 + $0x3c0] ss:$16 sps:$4 sm:$0xff]  }
  0x8e   : > { %2229 = vmatprep.subr.bf16.mxu1 %v4619_v21  ;;  %v4647_v40 = vld [vmem:[#allocation2 + $0x1a4] ss:$16 sps:$4 sm:$0xff]   ;;  %v4651_v42 = vld [vmem:[#allocation2 + $0x1a0] ss:$16 sps:$4 sm:$0xff]  }
  0x8f   : > { %v4649_v41 = vld [vmem:[#allocation2 + $0x3a4] ss:$16 sps:$4 sm:$0xff]   ;;  %v4652_v43 = vld [vmem:[#allocation2 + $0x3a0] ss:$16 sps:$4 sm:$0xff]  }
  0x90   : > { %2189 = vmatpush1.bf16.msra.mxu0 %v4621_v22  ;;  %v4653_v44 = vld [vmem:[#allocation2 + $0x184] ss:$16 sps:$4 sm:$0xff]   ;;  %v4657_v47 = vld [vmem:[#allocation2 + $0x180] ss:$16 sps:$4 sm:$0xff]  }
  0x91   : > { %2230 = vmatpush1.bf16.msra.mxu1 %v4622_v23  ;;  %2190 = vmatprep.subr.bf16.mxu0 %v4623_v24  ;;  %v4655_v45 = vld [vmem:[#allocation2 + $0x384] ss:$16 sps:$4 sm:$0xff]   ;;  %v4658_v48 = vld [vmem:[#allocation2 + $0x380] ss:$16 sps:$4 sm:$0xff]  }
  0x92   : > { %2231 = vmatprep.subr.bf16.mxu1 %v4625_v25  ;;  %v4659_v51 = vld [vmem:[#allocation2 + $0x164] ss:$16 sps:$4 sm:$0xff]   ;;  %v4663_v54 = vld [vmem:[#allocation2 + $0x160] ss:$16 sps:$4 sm:$0xff]  }
  0x93   : > { %v4661_v53 = vld [vmem:[#allocation2 + $0x364] ss:$16 sps:$4 sm:$0xff]   ;;  %v4664_v55 = vld [vmem:[#allocation2 + $0x360] ss:$16 sps:$4 sm:$0xff]  }
  0x94   : > { %2191 = vmatpush1.bf16.msra.mxu0 %v4627_v26  ;;  %v4665_v56 = vld [vmem:[#allocation2 + $0x144] ss:$16 sps:$4 sm:$0xff]   ;;  %v4669_v58 = vld [vmem:[#allocation2 + $0x140] ss:$16 sps:$4 sm:$0xff]  }
  0x95   : > { %2232 = vmatpush1.bf16.msra.mxu1 %v4628_v27  ;;  %2192 = vmatprep.subr.bf16.mxu0 %v4629_v28  ;;  %v4667_v57 = vld [vmem:[#allocation2 + $0x344] ss:$16 sps:$4 sm:$0xff]   ;;  %v4670_v59 = vld [vmem:[#allocation2 + $0x340] ss:$16 sps:$4 sm:$0xff]  }
  0x96   : > { %2233 = vmatprep.subr.bf16.mxu1 %v4631_v29  ;;  %v4671_v60 = vld [vmem:[#allocation2 + $0x124] ss:$16 sps:$4 sm:$0xff]   ;;  %v4675_v62 = vld [vmem:[#allocation2 + $0x120] ss:$16 sps:$4 sm:$0xff]  }
  0x97   : > { %v4673_v61 = vld [vmem:[#allocation2 + $0x324] ss:$16 sps:$4 sm:$0xff]   ;;  %v4676_v63 = vld [vmem:[#allocation2 + $0x320] ss:$16 sps:$4 sm:$0xff]  }
  0x98   : > { %2193 = vmatpush1.bf16.msra.mxu0 %v4633_v30  ;;  %v4677_v0 = vld [vmem:[#allocation2 + $0x104] ss:$16 sps:$4 sm:$0xff]   ;;  %v4681_v2 = vld [vmem:[#allocation2 + $0x100] ss:$16 sps:$4 sm:$0xff]  }
  0x99   : > { %2234 = vmatpush1.bf16.msra.mxu1 %v4634_v31  ;;  %2194 = vmatprep.subr.bf16.mxu0 %v4635_v32  ;;  %v4679_v1 = vld [vmem:[#allocation2 + $0x304] ss:$16 sps:$4 sm:$0xff]   ;;  %v4682_v3 = vld [vmem:[#allocation2 + $0x300] ss:$16 sps:$4 sm:$0xff]  }
  0x9a   : > { %2235 = vmatprep.subr.bf16.mxu1 %v4637_v33  ;;  %v604_v4 = vld [vmem:[%s5838_s0] sm:$0xff]  ;;  %v606_v5 = vld [vmem:[%s5838_s0 + $0x10] sm:$0xff] }
  0x9b   : > { %v4685_v6 = vld [vmem:[#allocation2 + $0x4e4] ss:$16 sps:$4 sm:$0xff]   ;;  %v5563_v8 = vpack.c.bf16 %v604_v4, %v604_v4  ;;  %v5565_v9 = vpack.c.bf16 %v606_v5, %v606_v5  ;;  %v4683_v10 = vld [vmem:[#allocation2 + $0x4e0] ss:$16 sps:$4 sm:$0xff]  }
  0x9c   : > { %2195 = vmatpush2.bf16.msra.mxu0 %v4639_v34  ;;  %v4688_v7 = vld [vmem:[#allocation2 + $0x6e4] ss:$16 sps:$4 sm:$0xff]   ;;  %v4686_v11 = vld [vmem:[#allocation2 + $0x6e0] ss:$16 sps:$4 sm:$0xff]   ;;  %v609_v34 = vld [vmem:[%s5838_s0 + $0x28] sm:$0xff] }
  0x9d   : > { %2236 = vmatpush2.bf16.msra.mxu1 %v4640_v35  ;;  %2196 = vmatprep.subr.bf16.mxu0 %v4641_v36  ;;  %v4691_v12 = vld [vmem:[#allocation2 + $0x4c4] ss:$16 sps:$4 sm:$0xff]   ;;  %v4689_v14 = vld [vmem:[#allocation2 + $0x4c0] ss:$16 sps:$4 sm:$0xff]  }
  0x9e   : > { %2237 = vmatprep.subr.bf16.mxu1 %v4643_v37  ;;  %v4694_v13 = vld [vmem:[#allocation2 + $0x6c4] ss:$16 sps:$4 sm:$0xff]   ;;  %v4692_v15 = vld [vmem:[#allocation2 + $0x6c0] ss:$16 sps:$4 sm:$0xff]   ;;  %v5572_v37 = vpack.c.bf16 %v609_v34, %v609_v34  ;;  %v4797_v34 = vld [vmem:[#allocation2 + $0x88] ss:$16 sps:$4 sm:$0xff]  }
  0x9f   : > { %v4697_v16 = vld [vmem:[#allocation2 + $0x4a4] ss:$16 sps:$4 sm:$0xff]   ;;  %v4695_v18 = vld [vmem:[#allocation2 + $0x4a0] ss:$16 sps:$4 sm:$0xff]  }
  0xa0   : > { %2197 = vmatpush2.bf16.msra.mxu0 %v4645_v38  ;;  %v4700_v17 = vld [vmem:[#allocation2 + $0x6a4] ss:$16 sps:$4 sm:$0xff]   ;;  %v4698_v19 = vld [vmem:[#allocation2 + $0x6a0] ss:$16 sps:$4 sm:$0xff]   ;;  %v611_v38 = vld [vmem:[%s5838_s0 + $0x38] sm:$0xff] }
  0xa1   : > { %2238 = vmatpush2.bf16.msra.mxu1 %v4646_v39  ;;  %2198 = vmatprep.subr.bf16.mxu0 %v4647_v40  ;;  %v4703_v20 = vld [vmem:[#allocation2 + $0x484] ss:$16 sps:$4 sm:$0xff]   ;;  %v4701_v22 = vld [vmem:[#allocation2 + $0x480] ss:$16 sps:$4 sm:$0xff]   ;;  %v5577_v40 = vpack.c.bf16 %v611_v38, %v611_v38  ;;  %v4808_v38 = vld [vmem:[#allocation2 + $0x26c] ss:$16 sps:$4 sm:$0xff]  }
  0xa2   : > { %2239 = vmatprep.subr.bf16.mxu1 %v4649_v41  ;;  %v4706_v21 = vld [vmem:[#allocation2 + $0x684] ss:$16 sps:$4 sm:$0xff]   ;;  %v4704_v23 = vld [vmem:[#allocation2 + $0x680] ss:$16 sps:$4 sm:$0xff]  }
  0xa3   : > { %v4709_v24 = vld [vmem:[#allocation2 + $0x464] ss:$16 sps:$4 sm:$0xff]   ;;  %v4707_v26 = vld [vmem:[#allocation2 + $0x460] ss:$16 sps:$4 sm:$0xff]  }
  0xa4   : > { %2199 = vmatpush2.bf16.msra.mxu0 %v4651_v42  ;;  %v4712_v25 = vld [vmem:[#allocation2 + $0x664] ss:$16 sps:$4 sm:$0xff]   ;;  %v4710_v27 = vld [vmem:[#allocation2 + $0x660] ss:$16 sps:$4 sm:$0xff]  }
  0xa5   : > { %2240 = vmatpush2.bf16.msra.mxu1 %v4652_v43  ;;  %2200 = vmatprep.subr.bf16.mxu0 %v4653_v44  ;;  %v4715_v28 = vld [vmem:[#allocation2 + $0x444] ss:$16 sps:$4 sm:$0xff]   ;;  %v4713_v30 = vld [vmem:[#allocation2 + $0x440] ss:$16 sps:$4 sm:$0xff]  }
  0xa6   : > { %2241 = vmatprep.subr.bf16.mxu1 %v4655_v45  ;;  %v4718_v29 = vld [vmem:[#allocation2 + $0x644] ss:$16 sps:$4 sm:$0xff]   ;;  %v4716_v31 = vld [vmem:[#allocation2 + $0x640] ss:$16 sps:$4 sm:$0xff]  }
  0xa7   : > { %v4721_v32 = vld [vmem:[#allocation2 + $0x424] ss:$16 sps:$4 sm:$0xff]   ;;  %v4719_v35 = vld [vmem:[#allocation2 + $0x420] ss:$16 sps:$4 sm:$0xff]  }
  0xa8   : > { %2201 = vmatpush2.bf16.msra.mxu0 %v4657_v47  ;;  %v4724_v33 = vld [vmem:[#allocation2 + $0x624] ss:$16 sps:$4 sm:$0xff]   ;;  %v4722_v36 = vld [vmem:[#allocation2 + $0x620] ss:$16 sps:$4 sm:$0xff]  }
  0xa9   : > { %2242 = vmatpush2.bf16.msra.mxu1 %v4658_v48  ;;  %2202 = vmatprep.subr.bf16.mxu0 %v4659_v51  ;;  %v4727_v39 = vld [vmem:[#allocation2 + $0x404] ss:$16 sps:$4 sm:$0xff]   ;;  %v4725_v42 = vld [vmem:[#allocation2 + $0x400] ss:$16 sps:$4 sm:$0xff]  }
  0xaa   : > { %2243 = vmatprep.subr.bf16.mxu1 %v4661_v53  ;;  %v4730_v41 = vld [vmem:[#allocation2 + $0x604] ss:$16 sps:$4 sm:$0xff]   ;;  %v4728_v43 = vld [vmem:[#allocation2 + $0x600] ss:$16 sps:$4 sm:$0xff]  }
  0xab   : > { %v4733_v44 = vld [vmem:[#allocation2 + $0x5e4] ss:$16 sps:$4 sm:$0xff]   ;;  %v4731_v46 = vld [vmem:[#allocation2 + $0x5e0] ss:$16 sps:$4 sm:$0xff]  }
  0xac   : > { %2203 = vmatpush2.bf16.msra.mxu0 %v4663_v54  ;;  %v4736_v45 = vld [vmem:[#allocation2 + $0x7e4] ss:$16 sps:$4 sm:$0xff]   ;;  %v4734_v47 = vld [vmem:[#allocation2 + $0x7e0] ss:$16 sps:$4 sm:$0xff]  }
  0xad   : > { %2244 = vmatpush2.bf16.msra.mxu1 %v4664_v55  ;;  %2204 = vmatprep.subr.bf16.mxu0 %v4665_v56  ;;  %v4739_v48 = vld [vmem:[#allocation2 + $0x5c4] ss:$16 sps:$4 sm:$0xff]   ;;  %v4737_v51 = vld [vmem:[#allocation2 + $0x5c0] ss:$16 sps:$4 sm:$0xff]  }
  0xae   : > { %2245 = vmatprep.subr.bf16.mxu1 %v4667_v57  ;;  %v4742_v50 = vld [vmem:[#allocation2 + $0x7c4] ss:$16 sps:$4 sm:$0xff]   ;;  %v4740_v53 = vld [vmem:[#allocation2 + $0x7c0] ss:$16 sps:$4 sm:$0xff]  }
  0xaf   : > { %v4745_v54 = vld [vmem:[#allocation2 + $0x5a4] ss:$16 sps:$4 sm:$0xff]   ;;  %v4743_v56 = vld [vmem:[#allocation2 + $0x5a0] ss:$16 sps:$4 sm:$0xff]  }
  0xb0   : > { %2205 = vmatpush2.bf16.msra.mxu0 %v4669_v58  ;;  %v4748_v55 = vld [vmem:[#allocation2 + $0x7a4] ss:$16 sps:$4 sm:$0xff]   ;;  %v4746_v57 = vld [vmem:[#allocation2 + $0x7a0] ss:$16 sps:$4 sm:$0xff]  }
  0xb1   : > { %2246 = vmatpush2.bf16.msra.mxu1 %v4670_v59  ;;  %2206 = vmatprep.subr.bf16.mxu0 %v4671_v60  ;;  %v4751_v58 = vld [vmem:[#allocation2 + $0x584] ss:$16 sps:$4 sm:$0xff]   ;;  %v4749_v60 = vld [vmem:[#allocation2 + $0x580] ss:$16 sps:$4 sm:$0xff]  }
  0xb2   : > { %2247 = vmatprep.subr.bf16.mxu1 %v4673_v61  ;;  %v4754_v59 = vld [vmem:[#allocation2 + $0x784] ss:$16 sps:$4 sm:$0xff]   ;;  %v4752_v61 = vld [vmem:[#allocation2 + $0x780] ss:$16 sps:$4 sm:$0xff]  }
  0xb3   : > { %v4761_v4 = vld [vmem:[#allocation2 + $0x540] ss:$16 sps:$4 sm:$0xff]  }
  0xb4   : > { %2207 = vmatpush2.bf16.msra.mxu0 %v4675_v62  ;;  %v4757_v62 = vld [vmem:[#allocation2 + $0x564] ss:$16 sps:$4 sm:$0xff]   ;;  %v4764_v5 = vld [vmem:[#allocation2 + $0x740] ss:$16 sps:$4 sm:$0xff]  }
  0xb5   : > { %2248 = vmatpush2.bf16.msra.mxu1 %v4676_v63  ;;  %2208 = vmatprep.subr.bf16.mxu0 %v4677_v0  ;;  %v4760_v63 = vld [vmem:[#allocation2 + $0x764] ss:$16 sps:$4 sm:$0xff]   ;;  %v4755_v0 = vld [vmem:[#allocation2 + $0x560] ss:$16 sps:$4 sm:$0xff]  }
  0xb6   : > { %2249 = vmatprep.subr.bf16.mxu1 %v4679_v1  ;;  %v4758_v1 = vld [vmem:[#allocation2 + $0x760] ss:$16 sps:$4 sm:$0xff]  }
  0xb8   : > { %2209 = vmatpush2.bf16.msra.mxu0 %v4681_v2  ;;  %v4763_v2 = vld [vmem:[#allocation2 + $0x544] ss:$16 sps:$4 sm:$0xff]  }
  0xb9   : > { %2250 = vmatpush2.bf16.msra.mxu1 %v4682_v3  ;;  %2260 = vmatprep.subr.bf16.mxu0 %v4685_v6  ;;  %v4766_v3 = vld [vmem:[#allocation2 + $0x744] ss:$16 sps:$4 sm:$0xff]  }
  0xba   : > { %2301 = vmatprep.subr.bf16.mxu1 %v4688_v7  ;;  %v4769_v6 = vld [vmem:[#allocation2 + $0x524] ss:$16 sps:$4 sm:$0xff]  }
  0xbb   : > { %2211 = vmatmul.mubr.bf16.vlgmr.msra.gmra.mxu0 %v5563_v8  ;;  %v4772_v7 = vld [vmem:[#allocation2 + $0x724] ss:$16 sps:$4 sm:$0xff]  }
  0xbc   : > { %2252 = vmatmul.mubr.bf16.vlgmr.msra.gmra.mxu1 %v5565_v9  ;;  %2261 = vmatpush1.bf16.msra.mxu0 %v4683_v10  ;;  %v4767_v10 = vld [vmem:[#allocation2 + $0x520] ss:$16 sps:$4 sm:$0xff]  }
  0xbd   : > { %2302 = vmatpush1.bf16.msra.mxu1 %v4686_v11  ;;  %2262 = vmatprep.subr.bf16.mxu0 %v4691_v12  ;;  %v4770_v11 = vld [vmem:[#allocation2 + $0x720] ss:$16 sps:$4 sm:$0xff]   ;;  %v4775_v12 = vld [vmem:[#allocation2 + $0x504] ss:$16 sps:$4 sm:$0xff]  }
  0xbe   : > { %2303 = vmatprep.subr.bf16.mxu1 %v4694_v13  ;;  %2292 = vmatprep.mubr.bf16.mxu0 %v5572_v37  ;;  %v4778_v13 = vld [vmem:[#allocation2 + $0x704] ss:$16 sps:$4 sm:$0xff]  }
  0xbf   : > { %2333 = vmatprep.mubr.bf16.mxu1 %v5577_v40 }
  0xc0   : > { %2263 = vmatpush1.bf16.msra.mxu0 %v4689_v14  ;;  %v4773_v14 = vld [vmem:[#allocation2 + $0x500] ss:$16 sps:$4 sm:$0xff]  }
  0xc1   : > { %2304 = vmatpush1.bf16.msra.mxu1 %v4692_v15  ;;  %2264 = vmatprep.subr.bf16.mxu0 %v4697_v16  ;;  %v4776_v15 = vld [vmem:[#allocation2 + $0x700] ss:$16 sps:$4 sm:$0xff]  }
  0xc2   : > { %2305 = vmatprep.subr.bf16.mxu1 %v4700_v17  ;;  %v608_v16 = vld [vmem:[%s5838_s0 + $0x20] sm:$0xff]  ;;  %v610_v17 = vld [vmem:[%s5838_s0 + $0x30] sm:$0xff] }
  0xc4   : > { %2265 = vmatpush1.bf16.msra.mxu0 %v4695_v18  ;;  %v4781_v18 = vld [vmem:[#allocation2 + $0xec] ss:$16 sps:$4 sm:$0xff]  }
  0xc5   : > { %2306 = vmatpush1.bf16.msra.mxu1 %v4698_v19  ;;  %2266 = vmatprep.subr.bf16.mxu0 %v4703_v20  ;;  %v4784_v19 = vld [vmem:[#allocation2 + $0x2ec] ss:$16 sps:$4 sm:$0xff]   ;;  %v5587_v20 = vpack.c.bf16 %v608_v16, %v608_v16 }
  0xc6   : > { %2307 = vmatprep.subr.bf16.mxu1 %v4706_v21  ;;  %v5589_v21 = vpack.c.bf16 %v610_v17, %v610_v17  ;;  %v4865_v16 = vld [vmem:[#allocation2 + $0x12c] ss:$16 sps:$4 sm:$0xff]  }
  0xc7   : > { %v4868_v17 = vld [vmem:[#allocation2 + $0x32c] ss:$16 sps:$4 sm:$0xff]  }
  0xc8   : > { %2267 = vmatpush1.bf16.msra.mxu0 %v4701_v22  ;;  %v4779_v22 = vld [vmem:[#allocation2 + $0xe8] ss:$16 sps:$4 sm:$0xff]  }
  0xc9   : > { %2308 = vmatpush1.bf16.msra.mxu1 %v4704_v23  ;;  %2268 = vmatprep.subr.bf16.mxu0 %v4709_v24  ;;  %v4782_v23 = vld [vmem:[#allocation2 + $0x2e8] ss:$16 sps:$4 sm:$0xff]   ;;  %v4787_v24 = vld [vmem:[#allocation2 + $0xcc] ss:$16 sps:$4 sm:$0xff]  }
  0xca   : > { %2309 = vmatprep.subr.bf16.mxu1 %v4712_v25  ;;  %v4790_v25 = vld [vmem:[#allocation2 + $0x2cc] ss:$16 sps:$4 sm:$0xff]  }
  0xcc   : > { %2269 = vmatpush1.bf16.msra.mxu0 %v4707_v26  ;;  %v4785_v26 = vld [vmem:[#allocation2 + $0xc8] ss:$16 sps:$4 sm:$0xff]  }
  0xcd   : > { %2310 = vmatpush1.bf16.msra.mxu1 %v4710_v27  ;;  %2270 = vmatprep.subr.bf16.mxu0 %v4715_v28  ;;  %v4788_v27 = vld [vmem:[#allocation2 + $0x2c8] ss:$16 sps:$4 sm:$0xff]   ;;  %v4793_v28 = vld [vmem:[#allocation2 + $0xac] ss:$16 sps:$4 sm:$0xff]  }
  0xce   : > { %2311 = vmatprep.subr.bf16.mxu1 %v4718_v29  ;;  %v4796_v29 = vld [vmem:[#allocation2 + $0x2ac] ss:$16 sps:$4 sm:$0xff]  }
  0xd0   : > { %2271 = vmatpush1.bf16.msra.mxu0 %v4713_v30  ;;  %v4791_v30 = vld [vmem:[#allocation2 + $0xa8] ss:$16 sps:$4 sm:$0xff]  }
  0xd1   : > { %2312 = vmatpush1.bf16.msra.mxu1 %v4716_v31  ;;  %2272 = vmatprep.subr.bf16.mxu0 %v4721_v32  ;;  %v4794_v31 = vld [vmem:[#allocation2 + $0x2a8] ss:$16 sps:$4 sm:$0xff]   ;;  %v4799_v32 = vld [vmem:[#allocation2 + $0x8c] ss:$16 sps:$4 sm:$0xff]  }
  0xd2   : > { %2313 = vmatprep.subr.bf16.mxu1 %v4724_v33  ;;  %v4802_v33 = vld [vmem:[#allocation2 + $0x28c] ss:$16 sps:$4 sm:$0xff]  }
  0xd4   : > { %2273 = vmatpush1.bf16.msra.mxu0 %v4719_v35  ;;  %v4800_v35 = vld [vmem:[#allocation2 + $0x288] ss:$16 sps:$4 sm:$0xff]  }
  0xd5   : > { %2314 = vmatpush1.bf16.msra.mxu1 %v4722_v36  ;;  %2274 = vmatprep.subr.bf16.mxu0 %v4727_v39  ;;  %v4805_v36 = vld [vmem:[#allocation2 + $0x6c] ss:$16 sps:$4 sm:$0xff]   ;;  %v4803_v39 = vld [vmem:[#allocation2 + $0x68] ss:$16 sps:$4 sm:$0xff]  }
  0xd6   : > { %2315 = vmatprep.subr.bf16.mxu1 %v4730_v41  ;;  %v4814_v41 = vld [vmem:[#allocation2 + $0x24c] ss:$16 sps:$4 sm:$0xff]  }
  0xd8   : > { %2275 = vmatpush1.bf16.msra.mxu0 %v4725_v42  ;;  %v4809_v42 = vld [vmem:[#allocation2 + $0x48] ss:$16 sps:$4 sm:$0xff]  }
  0xd9   : > { %2316 = vmatpush1.bf16.msra.mxu1 %v4728_v43  ;;  %2276 = vmatprep.subr.bf16.mxu0 %v4733_v44  ;;  %v4812_v43 = vld [vmem:[#allocation2 + $0x248] ss:$16 sps:$4 sm:$0xff]   ;;  %v4817_v44 = vld [vmem:[#allocation2 + $0x2c] ss:$16 sps:$4 sm:$0xff]  }
  0xda   : > { %2317 = vmatprep.subr.bf16.mxu1 %v4736_v45  ;;  %v4820_v45 = vld [vmem:[#allocation2 + $0x22c] ss:$16 sps:$4 sm:$0xff]  }
  0xdc   : > { %2277 = vmatpush2.bf16.msra.mxu0 %v4731_v46  ;;  %v4815_v46 = vld [vmem:[#allocation2 + $0x28] ss:$16 sps:$4 sm:$0xff]  }
  0xdd   : > { %2318 = vmatpush2.bf16.msra.mxu1 %v4734_v47  ;;  %2278 = vmatprep.subr.bf16.mxu0 %v4739_v48  ;;  %v4818_v47 = vld [vmem:[#allocation2 + $0x228] ss:$16 sps:$4 sm:$0xff]   ;;  %v4823_v48 = vld [vmem:[#allocation2 + $0xc] ss:$16 sps:$4 sm:$0xff]  }
  0xde   : > { %2319 = vmatprep.subr.bf16.mxu1 %v4742_v50  ;;  %v4826_v50 = vld [vmem:[#allocation2 + $0x20c] ss:$16 sps:$4 sm:$0xff]  }
  0xe0   : > { %2279 = vmatpush2.bf16.msra.mxu0 %v4737_v51  ;;  %v4821_v51 = vld [vmem:[#allocation2 + $0x8] ss:$16 sps:$4 sm:$0xff]  }
  0xe1   : > { %2320 = vmatpush2.bf16.msra.mxu1 %v4740_v53  ;;  %2280 = vmatprep.subr.bf16.mxu0 %v4745_v54  ;;  %v4824_v53 = vld [vmem:[#allocation2 + $0x208] ss:$16 sps:$4 sm:$0xff]   ;;  %v4829_v54 = vld [vmem:[#allocation2 + $0x1ec] ss:$16 sps:$4 sm:$0xff]  }
  0xe2   : > { %2321 = vmatprep.subr.bf16.mxu1 %v4748_v55  ;;  %v4832_v55 = vld [vmem:[#allocation2 + $0x3ec] ss:$16 sps:$4 sm:$0xff]  }
  0xe4   : > { %2281 = vmatpush2.bf16.msra.mxu0 %v4743_v56  ;;  %v4827_v56 = vld [vmem:[#allocation2 + $0x1e8] ss:$16 sps:$4 sm:$0xff]  }
  0xe5   : > { %2322 = vmatpush2.bf16.msra.mxu1 %v4746_v57  ;;  %2282 = vmatprep.subr.bf16.mxu0 %v4751_v58  ;;  %v4830_v57 = vld [vmem:[#allocation2 + $0x3e8] ss:$16 sps:$4 sm:$0xff]   ;;  %v4835_v58 = vld [vmem:[#allocation2 + $0x1cc] ss:$16 sps:$4 sm:$0xff]  }
  0xe6   : > { %2323 = vmatprep.subr.bf16.mxu1 %v4754_v59  ;;  %v4838_v59 = vld [vmem:[#allocation2 + $0x3cc] ss:$16 sps:$4 sm:$0xff]  }
  0xe8   : > { %2283 = vmatpush2.bf16.msra.mxu0 %v4749_v60  ;;  %v4833_v60 = vld [vmem:[#allocation2 + $0x1c8] ss:$16 sps:$4 sm:$0xff]  }
  0xe9   : > { %2324 = vmatpush2.bf16.msra.mxu1 %v4752_v61  ;;  %2284 = vmatprep.subr.bf16.mxu0 %v4757_v62  ;;  %v4836_v61 = vld [vmem:[#allocation2 + $0x3c8] ss:$16 sps:$4 sm:$0xff]   ;;  %v4841_v62 = vld [vmem:[#allocation2 + $0x1ac] ss:$16 sps:$4 sm:$0xff]  }
  0xea   : > { %2325 = vmatprep.subr.bf16.mxu1 %v4760_v63  ;;  %v4844_v63 = vld [vmem:[#allocation2 + $0x3ac] ss:$16 sps:$4 sm:$0xff]  }
  0xec   : > { %2285 = vmatpush2.bf16.msra.mxu0 %v4755_v0  ;;  %v4839_v0 = vld [vmem:[#allocation2 + $0x1a8] ss:$16 sps:$4 sm:$0xff]  }
  0xed   : > { %2326 = vmatpush2.bf16.msra.mxu1 %v4758_v1  ;;  %2286 = vmatprep.subr.bf16.mxu0 %v4763_v2  ;;  %v4842_v1 = vld [vmem:[#allocation2 + $0x3a8] ss:$16 sps:$4 sm:$0xff]   ;;  %v4847_v2 = vld [vmem:[#allocation2 + $0x18c] ss:$16 sps:$4 sm:$0xff]  }
  0xee   : > { %2327 = vmatprep.subr.bf16.mxu1 %v4766_v3  ;;  %v4850_v3 = vld [vmem:[#allocation2 + $0x38c] ss:$16 sps:$4 sm:$0xff]  }
  0xf0   : > { %2287 = vmatpush2.bf16.msra.mxu0 %v4761_v4  ;;  %v4845_v4 = vld [vmem:[#allocation2 + $0x188] ss:$16 sps:$4 sm:$0xff]  }
  0xf1   : > { %2328 = vmatpush2.bf16.msra.mxu1 %v4764_v5  ;;  %2288 = vmatprep.subr.bf16.mxu0 %v4769_v6  ;;  %v4848_v5 = vld [vmem:[#allocation2 + $0x388] ss:$16 sps:$4 sm:$0xff]   ;;  %v4853_v6 = vld [vmem:[#allocation2 + $0x16c] ss:$16 sps:$4 sm:$0xff]  }
  0xf2   : > { %2329 = vmatprep.subr.bf16.mxu1 %v4772_v7  ;;  %v4856_v7 = vld [vmem:[#allocation2 + $0x36c] ss:$16 sps:$4 sm:$0xff]  }
  0xf4   : > { %2289 = vmatpush2.bf16.msra.mxu0 %v4767_v10  ;;  %v4851_v10 = vld [vmem:[#allocation2 + $0x168] ss:$16 sps:$4 sm:$0xff]  }
  0xf5   : > { %2330 = vmatpush2.bf16.msra.mxu1 %v4770_v11  ;;  %2290 = vmatprep.subr.bf16.mxu0 %v4775_v12  ;;  %v4854_v11 = vld [vmem:[#allocation2 + $0x368] ss:$16 sps:$4 sm:$0xff]   ;;  %v4859_v12 = vld [vmem:[#allocation2 + $0x14c] ss:$16 sps:$4 sm:$0xff]  }
  0xf6   : > { %2331 = vmatprep.subr.bf16.mxu1 %v4778_v13  ;;  %v4862_v13 = vld [vmem:[#allocation2 + $0x34c] ss:$16 sps:$4 sm:$0xff]  }
  0xf8   : > { %2291 = vmatpush2.bf16.msra.mxu0 %v4773_v14  ;;  %v4857_v14 = vld [vmem:[#allocation2 + $0x148] ss:$16 sps:$4 sm:$0xff]  }
  0xf9   : > { %2332 = vmatpush2.bf16.msra.mxu1 %v4776_v15  ;;  %2342 = vmatprep.subr.bf16.mxu0 %v4781_v18  ;;  %v4860_v15 = vld [vmem:[#allocation2 + $0x348] ss:$16 sps:$4 sm:$0xff]  }
  0xfa   : > { %2383 = vmatprep.subr.bf16.mxu1 %v4784_v19  ;;  %v4863_v18 = vld [vmem:[#allocation2 + $0x128] ss:$16 sps:$4 sm:$0xff]  }
  0xfb   : > { %2293 = vmatmul.mubr.bf16.vlgmr.msra.gmra.mxu0 %v5587_v20  ;;  %v4866_v19 = vld [vmem:[#allocation2 + $0x328] ss:$16 sps:$4 sm:$0xff]  }
  0xfc   : > { %2334 = vmatmul.mubr.bf16.vlgmr.msra.gmra.mxu1 %v5589_v21  ;;  %2343 = vmatpush1.bf16.msra.mxu0 %v4779_v22  ;;  %v4871_v22 = vld [vmem:[#allocation2 + $0x10c] ss:$16 sps:$4 sm:$0xff]  }
  0xfd   : > { %2384 = vmatpush1.bf16.msra.mxu1 %v4782_v23  ;;  %2344 = vmatprep.subr.bf16.mxu0 %v4787_v24  ;;  %v4874_v23 = vld [vmem:[#allocation2 + $0x30c] ss:$16 sps:$4 sm:$0xff]   ;;  %v4869_v24 = vld [vmem:[#allocation2 + $0x108] ss:$16 sps:$4 sm:$0xff]  }
  0xfe   : > { %2385 = vmatprep.subr.bf16.mxu1 %v4790_v25  ;;  %2374 = vmatprep.mubr.bf16.mxu0 %v5548_v49  ;;  %v4806_v49 = vld [vmem:[#allocation2 + $0x268] ss:$16 sps:$4 sm:$0xff]  }
  0xff   : > { %2415 = vmatprep.mubr.bf16.mxu1 %v5553_v52  ;;  %v4811_v52 = vld [vmem:[#allocation2 + $0x4c] ss:$16 sps:$4 sm:$0xff]   ;;  %v4872_v25 = vld [vmem:[#allocation2 + $0x308] ss:$16 sps:$4 sm:$0xff]  }
 0x100   : > { %2345 = vmatpush1.bf16.msra.mxu0 %v4785_v26  ;;  %v4877_v26 = vld [vmem:[#allocation2 + $0x4ec] ss:$16 sps:$4 sm:$0xff]  }
 0x101   : > { %2386 = vmatpush1.bf16.msra.mxu1 %v4788_v27  ;;  %2346 = vmatprep.subr.bf16.mxu0 %v4793_v28  ;;  %v4880_v27 = vld [vmem:[#allocation2 + $0x6ec] ss:$16 sps:$4 sm:$0xff]   ;;  %v4875_v28 = vld [vmem:[#allocation2 + $0x4e8] ss:$16 sps:$4 sm:$0xff]  }
 0x102   : > { %2387 = vmatprep.subr.bf16.mxu1 %v4796_v29  ;;  %v4878_v29 = vld [vmem:[#allocation2 + $0x6e8] ss:$16 sps:$4 sm:$0xff]  }
 0x104   : > { %2347 = vmatpush1.bf16.msra.mxu0 %v4791_v30  ;;  %v4883_v30 = vld [vmem:[#allocation2 + $0x4cc] ss:$16 sps:$4 sm:$0xff]  }
 0x105   : > { %2388 = vmatpush1.bf16.msra.mxu1 %v4794_v31  ;;  %2348 = vmatprep.subr.bf16.mxu0 %v4799_v32  ;;  %v4886_v31 = vld [vmem:[#allocation2 + $0x6cc] ss:$16 sps:$4 sm:$0xff]   ;;  %v4881_v32 = vld [vmem:[#allocation2 + $0x4c8] ss:$16 sps:$4 sm:$0xff]  }
 0x106   : > { %2389 = vmatprep.subr.bf16.mxu1 %v4802_v33  ;;  %v4884_v33 = vld [vmem:[#allocation2 + $0x6c8] ss:$16 sps:$4 sm:$0xff]  }
 0x108   : > { %2349 = vmatpush1.bf16.msra.mxu0 %v4797_v34  ;;  %v4889_v34 = vld [vmem:[#allocation2 + $0x4ac] ss:$16 sps:$4 sm:$0xff]  }
 0x109   : > { %2390 = vmatpush1.bf16.msra.mxu1 %v4800_v35  ;;  %2350 = vmatprep.subr.bf16.mxu0 %v4805_v36  ;;  %v4892_v35 = vld [vmem:[#allocation2 + $0x6ac] ss:$16 sps:$4 sm:$0xff]   ;;  %v4887_v36 = vld [vmem:[#allocation2 + $0x4a8] ss:$16 sps:$4 sm:$0xff]  }
 0x10a   : > { %2391 = vmatprep.subr.bf16.mxu1 %v4808_v38  ;;  %v4890_v38 = vld [vmem:[#allocation2 + $0x6a8] ss:$16 sps:$4 sm:$0xff]  }
 0x10c   : > { %2351 = vmatpush1.bf16.msra.mxu0 %v4803_v39  ;;  %v4895_v39 = vld [vmem:[#allocation2 + $0x48c] ss:$16 sps:$4 sm:$0xff]  }
 0x10d   : > { %2392 = vmatpush1.bf16.msra.mxu1 %v4806_v49  ;;  %2352 = vmatprep.subr.bf16.mxu0 %v4811_v52  ;;  %v4893_v49 = vld [vmem:[#allocation2 + $0x488] ss:$16 sps:$4 sm:$0xff]   ;;  %v4901_v52 = vld [vmem:[#allocation2 + $0x46c] ss:$16 sps:$4 sm:$0xff]  }
 0x10e   : > { %2393 = vmatprep.subr.bf16.mxu1 %v4814_v41  ;;  %v4904_v41 = vld [vmem:[#allocation2 + $0x66c] ss:$16 sps:$4 sm:$0xff]  }
 0x110   : > { %2353 = vmatpush1.bf16.msra.mxu0 %v4809_v42  ;;  %v4899_v42 = vld [vmem:[#allocation2 + $0x468] ss:$16 sps:$4 sm:$0xff]  }
 0x111   : > { %2394 = vmatpush1.bf16.msra.mxu1 %v4812_v43  ;;  %2354 = vmatprep.subr.bf16.mxu0 %v4817_v44  ;;  %v4910_v43 = vld [vmem:[#allocation2 + $0x64c] ss:$16 sps:$4 sm:$0xff]   ;;  %v4905_v44 = vld [vmem:[#allocation2 + $0x448] ss:$16 sps:$4 sm:$0xff]  }
 0x112   : > { %2395 = vmatprep.subr.bf16.mxu1 %v4820_v45  ;;  %v4908_v45 = vld [vmem:[#allocation2 + $0x648] ss:$16 sps:$4 sm:$0xff]  }
 0x114   : > { %2355 = vmatpush1.bf16.msra.mxu0 %v4815_v46  ;;  %v4913_v46 = vld [vmem:[#allocation2 + $0x42c] ss:$16 sps:$4 sm:$0xff]  }
 0x115   : > { %2396 = vmatpush1.bf16.msra.mxu1 %v4818_v47  ;;  %2356 = vmatprep.subr.bf16.mxu0 %v4823_v48  ;;  %v4916_v47 = vld [vmem:[#allocation2 + $0x62c] ss:$16 sps:$4 sm:$0xff]   ;;  %v4911_v48 = vld [vmem:[#allocation2 + $0x428] ss:$16 sps:$4 sm:$0xff]  }
 0x116   : > { %2397 = vmatprep.subr.bf16.mxu1 %v4826_v50  ;;  %v4914_v50 = vld [vmem:[#allocation2 + $0x628] ss:$16 sps:$4 sm:$0xff]  }
 0x118   : > { %2357 = vmatpush1.bf16.msra.mxu0 %v4821_v51  ;;  %v4919_v51 = vld [vmem:[#allocation2 + $0x40c] ss:$16 sps:$4 sm:$0xff]  }
 0x119   : > { %2398 = vmatpush1.bf16.msra.mxu1 %v4824_v53  ;;  %2358 = vmatprep.subr.bf16.mxu0 %v4829_v54  ;;  %v4922_v53 = vld [vmem:[#allocation2 + $0x60c] ss:$16 sps:$4 sm:$0xff]   ;;  %v4917_v54 = vld [vmem:[#allocation2 + $0x408] ss:$16 sps:$4 sm:$0xff]  }
 0x11a   : > { %2399 = vmatprep.subr.bf16.mxu1 %v4832_v55  ;;  %v4920_v55 = vld [vmem:[#allocation2 + $0x608] ss:$16 sps:$4 sm:$0xff]  }
 0x11c   : > { %2359 = vmatpush2.bf16.msra.mxu0 %v4827_v56  ;;  %v4925_v56 = vld [vmem:[#allocation2 + $0x5ec] ss:$16 sps:$4 sm:$0xff]  }
 0x11d   : > { %2400 = vmatpush2.bf16.msra.mxu1 %v4830_v57  ;;  %2360 = vmatprep.subr.bf16.mxu0 %v4835_v58  ;;  %v4928_v57 = vld [vmem:[#allocation2 + $0x7ec] ss:$16 sps:$4 sm:$0xff]   ;;  %v4923_v58 = vld [vmem:[#allocation2 + $0x5e8] ss:$16 sps:$4 sm:$0xff]  }
 0x11e   : > { %2401 = vmatprep.subr.bf16.mxu1 %v4838_v59  ;;  %v4926_v59 = vld [vmem:[#allocation2 + $0x7e8] ss:$16 sps:$4 sm:$0xff]  }
 0x120   : > { %2361 = vmatpush2.bf16.msra.mxu0 %v4833_v60  ;;  %v4931_v60 = vld [vmem:[#allocation2 + $0x5cc] ss:$16 sps:$4 sm:$0xff]  }
 0x121   : > { %2402 = vmatpush2.bf16.msra.mxu1 %v4836_v61  ;;  %2362 = vmatprep.subr.bf16.mxu0 %v4841_v62  ;;  %v4934_v61 = vld [vmem:[#allocation2 + $0x7cc] ss:$16 sps:$4 sm:$0xff]   ;;  %v4929_v62 = vld [vmem:[#allocation2 + $0x5c8] ss:$16 sps:$4 sm:$0xff]  }
 0x122   : > { %2403 = vmatprep.subr.bf16.mxu1 %v4844_v63  ;;  %v4932_v63 = vld [vmem:[#allocation2 + $0x7c8] ss:$16 sps:$4 sm:$0xff]  }
 0x124   : > { %2363 = vmatpush2.bf16.msra.mxu0 %v4839_v0  ;;  %v4937_v0 = vld [vmem:[#allocation2 + $0x5ac] ss:$16 sps:$4 sm:$0xff]  }
 0x125   : > { %2404 = vmatpush2.bf16.msra.mxu1 %v4842_v1  ;;  %2364 = vmatprep.subr.bf16.mxu0 %v4847_v2  ;;  %v4940_v1 = vld [vmem:[#allocation2 + $0x7ac] ss:$16 sps:$4 sm:$0xff]   ;;  %v4935_v2 = vld [vmem:[#allocation2 + $0x5a8] ss:$16 sps:$4 sm:$0xff]  }
 0x126   : > { %2405 = vmatprep.subr.bf16.mxu1 %v4850_v3  ;;  %v4938_v3 = vld [vmem:[#allocation2 + $0x7a8] ss:$16 sps:$4 sm:$0xff]  }
 0x128   : > { %2365 = vmatpush2.bf16.msra.mxu0 %v4845_v4  ;;  %v4943_v4 = vld [vmem:[#allocation2 + $0x58c] ss:$16 sps:$4 sm:$0xff]  }
 0x129   : > { %2406 = vmatpush2.bf16.msra.mxu1 %v4848_v5  ;;  %2366 = vmatprep.subr.bf16.mxu0 %v4853_v6  ;;  %v4946_v5 = vld [vmem:[#allocation2 + $0x78c] ss:$16 sps:$4 sm:$0xff]   ;;  %v4941_v6 = vld [vmem:[#allocation2 + $0x588] ss:$16 sps:$4 sm:$0xff]  }
 0x12a   : > { %2407 = vmatprep.subr.bf16.mxu1 %v4856_v7  ;;  %v4944_v7 = vld [vmem:[#allocation2 + $0x788] ss:$16 sps:$4 sm:$0xff]  }
 0x12c   : > { %2367 = vmatpush2.bf16.msra.mxu0 %v4851_v10  ;;  %v4949_v10 = vld [vmem:[#allocation2 + $0x56c] ss:$16 sps:$4 sm:$0xff]  }
 0x12d   : > { %2408 = vmatpush2.bf16.msra.mxu1 %v4854_v11  ;;  %2368 = vmatprep.subr.bf16.mxu0 %v4859_v12  ;;  %v4952_v11 = vld [vmem:[#allocation2 + $0x76c] ss:$16 sps:$4 sm:$0xff]   ;;  %v4947_v12 = vld [vmem:[#allocation2 + $0x568] ss:$16 sps:$4 sm:$0xff]  }
 0x12e   : > { %2409 = vmatprep.subr.bf16.mxu1 %v4862_v13  ;;  %v4950_v13 = vld [vmem:[#allocation2 + $0x768] ss:$16 sps:$4 sm:$0xff]  }
 0x130   : > { %2369 = vmatpush2.bf16.msra.mxu0 %v4857_v14  ;;  %v4955_v14 = vld [vmem:[#allocation2 + $0x54c] ss:$16 sps:$4 sm:$0xff]  }
 0x131   : > { %2410 = vmatpush2.bf16.msra.mxu1 %v4860_v15  ;;  %2370 = vmatprep.subr.bf16.mxu0 %v4865_v16  ;;  %v4958_v15 = vld [vmem:[#allocation2 + $0x74c] ss:$16 sps:$4 sm:$0xff]   ;;  %v4953_v16 = vld [vmem:[#allocation2 + $0x548] ss:$16 sps:$4 sm:$0xff]  }
 0x132   : > { %2411 = vmatprep.subr.bf16.mxu1 %v4868_v17  ;;  %v4956_v17 = vld [vmem:[#allocation2 + $0x748] ss:$16 sps:$4 sm:$0xff]  }
 0x134   : > { %2371 = vmatpush2.bf16.msra.mxu0 %v4863_v18  ;;  %v4961_v18 = vld [vmem:[#allocation2 + $0x52c] ss:$16 sps:$4 sm:$0xff]  }
 0x135   : > { %2412 = vmatpush2.bf16.msra.mxu1 %v4866_v19  ;;  %2372 = vmatprep.subr.bf16.mxu0 %v4871_v22  ;;  %v4964_v19 = vld [vmem:[#allocation2 + $0x72c] ss:$16 sps:$4 sm:$0xff]   ;;  %v4959_v22 = vld [vmem:[#allocation2 + $0x528] ss:$16 sps:$4 sm:$0xff]  }
 0x136   : > { %2413 = vmatprep.subr.bf16.mxu1 %v4874_v23  ;;  %v4962_v23 = vld [vmem:[#allocation2 + $0x728] ss:$16 sps:$4 sm:$0xff]  }
 0x138   : > { %2373 = vmatpush2.bf16.msra.mxu0 %v4869_v24  ;;  %v4967_v24 = vld [vmem:[#allocation2 + $0x50c] ss:$16 sps:$4 sm:$0xff]  }
 0x139   : > { %2414 = vmatpush2.bf16.msra.mxu1 %v4872_v25  ;;  %2424 = vmatprep.subr.bf16.mxu0 %v4877_v26  ;;  %v4970_v25 = vld [vmem:[#allocation2 + $0x70c] ss:$16 sps:$4 sm:$0xff]   ;;  %v4965_v26 = vld [vmem:[#allocation2 + $0x508] ss:$16 sps:$4 sm:$0xff]  }
 0x13a   : > { %2465 = vmatprep.subr.bf16.mxu1 %v4880_v27  ;;  %v4968_v27 = vld [vmem:[#allocation2 + $0x708] ss:$16 sps:$4 sm:$0xff]  }
 0x13b   : > { %2375 = vmatmul.mubr.bf16.vlgmr.msra.gmra.mxu0 %v5563_v8  ;;  %v4898_v8 = vld [vmem:[#allocation2 + $0x68c] ss:$16 sps:$4 sm:$0xff]  }
 0x13c   : > { %2416 = vmatmul.mubr.bf16.vlgmr.msra.gmra.mxu1 %v5565_v9  ;;  %2425 = vmatpush1.bf16.msra.mxu0 %v4875_v28  ;;  %v4896_v9 = vld [vmem:[#allocation2 + $0x688] ss:$16 sps:$4 sm:$0xff]   ;;  %v4973_v28 = vld [vmem:[#allocation4 + $0x74] ss:$8 sps:$4 sm:$0xff]  }
 0x13d   : > { %2466 = vmatpush1.bf16.msra.mxu1 %v4878_v29  ;;  %2426 = vmatprep.subr.bf16.mxu0 %v4883_v30  ;;  %v4971_v29 = vld [vmem:[#allocation4 + $0x70] ss:$8 sps:$4 sm:$0xff]   ;;  %v4976_v30 = vld [vmem:[#allocation4 + $0x64] ss:$8 sps:$4 sm:$0xff]  }
 0x13e   : > { %2467 = vmatprep.subr.bf16.mxu1 %v4886_v31  ;;  %2456 = vmatprep.mubr.bf16.mxu0 %v5572_v37  ;;  %v4902_v37 = vld [vmem:[#allocation2 + $0x668] ss:$16 sps:$4 sm:$0xff]  }
 0x13f   : > { %2497 = vmatprep.mubr.bf16.mxu1 %v5577_v40  ;;  %v4907_v40 = vld [vmem:[#allocation2 + $0x44c] ss:$16 sps:$4 sm:$0xff]  }
 0x140   : > { %2427 = vmatpush1.bf16.msra.mxu0 %v4881_v32 }
 0x141   : > { %2468 = vmatpush1.bf16.msra.mxu1 %v4884_v33  ;;  %2428 = vmatprep.subr.bf16.mxu0 %v4889_v34  ;;  %v4974_v33 = vld [vmem:[#allocation4 + $0x60] ss:$8 sps:$4 sm:$0xff]  }
 0x142   : > { %2469 = vmatprep.subr.bf16.mxu1 %v4892_v35 }
 0x144   : > { %2429 = vmatpush1.bf16.msra.mxu0 %v4887_v36  ;;  %v4979_v36 = vld [vmem:[#allocation4 + $0x54] ss:$8 sps:$4 sm:$0xff]  }
 0x145   : > { %2470 = vmatpush1.bf16.msra.mxu1 %v4890_v38  ;;  %2430 = vmatprep.subr.bf16.mxu0 %v4895_v39 }
 0x146   : > { %2471 = vmatprep.subr.bf16.mxu1 %v4898_v8  ;;  %v4977_v8 = vld [vmem:[#allocation4 + $0x50] ss:$8 sps:$4 sm:$0xff]  }
 0x148   : > { %2431 = vmatpush1.bf16.msra.mxu0 %v4893_v49 }
 0x149   : > { %2472 = vmatpush1.bf16.msra.mxu1 %v4896_v9  ;;  %2432 = vmatprep.subr.bf16.mxu0 %v4901_v52  ;;  %v4982_v52 = vld [vmem:[#allocation4 + $0x44] ss:$8 sps:$4 sm:$0xff]  }
 0x14a   : > { %2473 = vmatprep.subr.bf16.mxu1 %v4904_v41  ;;  %v5019_v41 = vld [vmem:[#allocation4 + $0x170] ss:$8 sps:$4 sm:$0xff]  }
 0x14c   : > { %2433 = vmatpush1.bf16.msra.mxu0 %v4899_v42  ;;  %v5024_v42 = vld [vmem:[#allocation4 + $0x164] ss:$8 sps:$4 sm:$0xff]  }
 0x14d   : > { %2474 = vmatpush1.bf16.msra.mxu1 %v4902_v37  ;;  %2434 = vmatprep.subr.bf16.mxu0 %v4907_v40  ;;  %v5022_v37 = vld [vmem:[#allocation4 + $0x160] ss:$8 sps:$4 sm:$0xff]   ;;  %v4985_v40 = vld [vmem:[#allocation4 + $0x34] ss:$8 sps:$4 sm:$0xff]  }
 0x14e   : > { %2475 = vmatprep.subr.bf16.mxu1 %v4910_v43  ;;  %v5027_v43 = vld [vmem:[#allocation4 + $0x154] ss:$8 sps:$4 sm:$0xff]  }
 0x150   : > { %2435 = vmatpush1.bf16.msra.mxu0 %v4905_v44  ;;  %v4983_v44 = vld [vmem:[#allocation4 + $0x30] ss:$8 sps:$4 sm:$0xff]  }
 0x151   : > { %2476 = vmatpush1.bf16.msra.mxu1 %v4908_v45  ;;  %2436 = vmatprep.subr.bf16.mxu0 %v4913_v46  ;;  %v5025_v45 = vld [vmem:[#allocation4 + $0x150] ss:$8 sps:$4 sm:$0xff]   ;;  %v4988_v46 = vld [vmem:[#allocation4 + $0x24] ss:$8 sps:$4 sm:$0xff]  }
 0x152   : > { %2477 = vmatprep.subr.bf16.mxu1 %v4916_v47  ;;  %v5030_v47 = vld [vmem:[#allocation4 + $0x144] ss:$8 sps:$4 sm:$0xff]  }
 0x154   : > { %2437 = vmatpush1.bf16.msra.mxu0 %v4911_v48  ;;  %v4986_v48 = vld [vmem:[#allocation4 + $0x20] ss:$8 sps:$4 sm:$0xff]  }
 0x155   : > { %2478 = vmatpush1.bf16.msra.mxu1 %v4914_v50  ;;  %2438 = vmatprep.subr.bf16.mxu0 %v4919_v51  ;;  %v5028_v50 = vld [vmem:[#allocation4 + $0x140] ss:$8 sps:$4 sm:$0xff]   ;;  %v4991_v51 = vld [vmem:[#allocation4 + $0x14] ss:$8 sps:$4 sm:$0xff]  }
 0x156   : > { %2479 = vmatprep.subr.bf16.mxu1 %v4922_v53  ;;  %v5033_v53 = vld [vmem:[#allocation4 + $0x134] ss:$8 sps:$4 sm:$0xff]  }
 0x158   : > { %2439 = vmatpush1.bf16.msra.mxu0 %v4917_v54  ;;  %v4989_v54 = vld [vmem:[#allocation4 + $0x10] ss:$8 sps:$4 sm:$0xff]  }
 0x159   : > { %2480 = vmatpush1.bf16.msra.mxu1 %v4920_v55  ;;  %2440 = vmatprep.subr.bf16.mxu0 %v4925_v56  ;;  %v5031_v55 = vld [vmem:[#allocation4 + $0x130] ss:$8 sps:$4 sm:$0xff]   ;;  %v4994_v56 = vld [vmem:[#allocation4 + $0x4] ss:$8 sps:$4 sm:$0xff]  }
 0x15a   : > { %2481 = vmatprep.subr.bf16.mxu1 %v4928_v57  ;;  %v5036_v57 = vld [vmem:[#allocation4 + $0x124] ss:$8 sps:$4 sm:$0xff]  }
 0x15c   : > { %2441 = vmatpush2.bf16.msra.mxu0 %v4923_v58  ;;  %v4992_v58 = vld [vmem:[#allocation4] ss:$8 sps:$4 sm:$0xff]  }
 0x15d   : > { %2482 = vmatpush2.bf16.msra.mxu1 %v4926_v59  ;;  %2442 = vmatprep.subr.bf16.mxu0 %v4931_v60  ;;  %v5034_v59 = vld [vmem:[#allocation4 + $0x120] ss:$8 sps:$4 sm:$0xff]   ;;  %v4997_v60 = vld [vmem:[#allocation4 + $0xf4] ss:$8 sps:$4 sm:$0xff]  }
 0x15e   : > { %2483 = vmatprep.subr.bf16.mxu1 %v4934_v61  ;;  %v5039_v61 = vld [vmem:[#allocation4 + $0x114] ss:$8 sps:$4 sm:$0xff]  }
 0x160   : > { %2443 = vmatpush2.bf16.msra.mxu0 %v4929_v62  ;;  %v4995_v62 = vld [vmem:[#allocation4 + $0xf0] ss:$8 sps:$4 sm:$0xff]  }
 0x161   : > { %2484 = vmatpush2.bf16.msra.mxu1 %v4932_v63  ;;  %2444 = vmatprep.subr.bf16.mxu0 %v4937_v0  ;;  %v5037_v63 = vld [vmem:[#allocation4 + $0x110] ss:$8 sps:$4 sm:$0xff]   ;;  %v5000_v0 = vld [vmem:[#allocation4 + $0xe4] ss:$8 sps:$4 sm:$0xff]  }
 0x162   : > { %2485 = vmatprep.subr.bf16.mxu1 %v4940_v1  ;;  %v5042_v1 = vld [vmem:[#allocation4 + $0x104] ss:$8 sps:$4 sm:$0xff]  }
 0x164   : > { %2445 = vmatpush2.bf16.msra.mxu0 %v4935_v2  ;;  %v4998_v2 = vld [vmem:[#allocation4 + $0xe0] ss:$8 sps:$4 sm:$0xff]  }
 0x165   : > { %2486 = vmatpush2.bf16.msra.mxu1 %v4938_v3  ;;  %2446 = vmatprep.subr.bf16.mxu0 %v4943_v4  ;;  %v5040_v3 = vld [vmem:[#allocation4 + $0x100] ss:$8 sps:$4 sm:$0xff]   ;;  %v5003_v4 = vld [vmem:[#allocation4 + $0xd4] ss:$8 sps:$4 sm:$0xff]  }
 0x166   : > { %2487 = vmatprep.subr.bf16.mxu1 %v4946_v5  ;;  %v5045_v5 = vld [vmem:[#allocation4 + $0x1f4] ss:$8 sps:$4 sm:$0xff]  }
 0x168   : > { %2447 = vmatpush2.bf16.msra.mxu0 %v4941_v6  ;;  %v5001_v6 = vld [vmem:[#allocation4 + $0xd0] ss:$8 sps:$4 sm:$0xff]  }
 0x169   : > { %2488 = vmatpush2.bf16.msra.mxu1 %v4944_v7  ;;  %2448 = vmatprep.subr.bf16.mxu0 %v4949_v10  ;;  %v5043_v7 = vld [vmem:[#allocation4 + $0x1f0] ss:$8 sps:$4 sm:$0xff]   ;;  %v5006_v10 = vld [vmem:[#allocation4 + $0xc4] ss:$8 sps:$4 sm:$0xff]  }
 0x16a   : > { %2489 = vmatprep.subr.bf16.mxu1 %v4952_v11  ;;  %v5048_v11 = vld [vmem:[#allocation4 + $0x1e4] ss:$8 sps:$4 sm:$0xff]  }
 0x16c   : > { %2449 = vmatpush2.bf16.msra.mxu0 %v4947_v12  ;;  %v5004_v12 = vld [vmem:[#allocation4 + $0xc0] ss:$8 sps:$4 sm:$0xff]  }
 0x16d   : > { %2490 = vmatpush2.bf16.msra.mxu1 %v4950_v13  ;;  %2450 = vmatprep.subr.bf16.mxu0 %v4955_v14  ;;  %v5046_v13 = vld [vmem:[#allocation4 + $0x1e0] ss:$8 sps:$4 sm:$0xff]   ;;  %v5009_v14 = vld [vmem:[#allocation4 + $0xb4] ss:$8 sps:$4 sm:$0xff]  }
 0x16e   : > { %2491 = vmatprep.subr.bf16.mxu1 %v4958_v15  ;;  %v5051_v15 = vld [vmem:[#allocation4 + $0x1d4] ss:$8 sps:$4 sm:$0xff]  }
 0x170   : > { %2451 = vmatpush2.bf16.msra.mxu0 %v4953_v16  ;;  %v878_v16 = vlaneseq }
 0x171   : > { %2492 = vmatpush2.bf16.msra.mxu1 %v4956_v17  ;;  %2452 = vmatprep.subr.bf16.mxu0 %v4961_v18  ;;  %v5007_v17 = vld [vmem:[#allocation4 + $0xb0] ss:$8 sps:$4 sm:$0xff]  }
 0x172   : > { %2493 = vmatprep.subr.bf16.mxu1 %v4964_v19  ;;  %v5049_v18 = vld [vmem:[#allocation4 + $0x1d0] ss:$8 sps:$4 sm:$0xff]   ;;  %v5012_v19 = vld [vmem:[#allocation4 + $0xa4] ss:$8 sps:$4 sm:$0xff]  }
 0x174   : > { %2453 = vmatpush2.bf16.msra.mxu0 %v4959_v22  ;;  %v5054_v22 = vld [vmem:[#allocation4 + $0x1c4] ss:$8 sps:$4 sm:$0xff]  }
 0x175   : > { %2494 = vmatpush2.bf16.msra.mxu1 %v4962_v23  ;;  %2454 = vmatprep.subr.bf16.mxu0 %v4967_v24  ;;  %v5609_v23 = vshrl.u32 %v878_v16, 7  ;;  %v5010_v24 = vld [vmem:[#allocation4 + $0xa0] ss:$8 sps:$4 sm:$0xff]  }
 0x176   : > { %2495 = vmatprep.subr.bf16.mxu1 %v4970_v25  ;;  %v5052_v25 = vld [vmem:[#allocation4 + $0x1c0] ss:$8 sps:$4 sm:$0xff]  }
 0x177   : > { %v3040_v16 = vld [vmem:[%s5639_s16 + $0x160] sm:$0xff] }
 0x178   : > { %2455 = vmatpush2.bf16.msra.mxu0 %v4965_v26  ;;  %v5015_v26 = vld [vmem:[#allocation4 + $0x94] ss:$8 sps:$4 sm:$0xff]  }
 0x179   : > { %2496 = vmatpush2.bf16.msra.mxu1 %v4968_v27  ;;  %2910 = vmatprep.subr.bf16.mxu0 %v4973_v28  ;;  %v5057_v27 = vld [vmem:[#allocation4 + $0x1b4] ss:$8 sps:$4 sm:$0xff]   ;;  %v5612_v28 = vsub.s32 0, %v5609_v23 }
 0x17b   : > { %v5599_v31 = vpop.f32.mrf.mxu0  ;;  %2457 = vmatmul.mubr.bf16.vlgmr.msra.gmra.mxu0 %v5587_v20  ;;  %v5021_v20 = vld [vmem:[#allocation4 + $0x174] ss:$8 sps:$4 sm:$0xff]  }
 0x17c   : > { %v5601_v32 = vpop.f32.mrf.mxu1  ;;  %2498 = vmatmul.mubr.bf16.vlgmr.msra.gmra.mxu1 %v5589_v21  ;;  %2911 = vmatpush1.bf16.msra.mxu0 %v4971_v29  ;;  %v4980_v21 = vld [vmem:[#allocation4 + $0x40] ss:$8 sps:$4 sm:$0xff]  }
 0x17d   : > { %v5605_v34 = vpop.f32.mrf.mxu0  ;;  %2912 = vmatprep.subr.bf16.mxu0 %v4976_v30  ;;  %2951 = vmatprep.subr.bf16.mxu1 %v5021_v20  ;;  %v5617_v29 = vld [vmem:[%s5840_s2] sm:$0xf]  ;;  %v5620_v30 = vsub.s32 1, %v5609_v23 }
 0x17e   : > { %v5607_v35 = vpop.f32.mrf.mxu1  ;;  %2952 = vmatpush1.bf16.msra.mxu1 %v5019_v41  ;;  %v5060_v41 = vld [vmem:[#allocation4 + $0x1a4] ss:$8 sps:$4 sm:$0xff]  }
 0x17f   : > { %v2216_v38 = vpop.f32.mrf.mxu0  ;;  %2953 = vmatprep.subr.bf16.mxu1 %v5024_v42  ;;  %v5058_v42 = vld [vmem:[#allocation4 + $0x1a0] ss:$8 sps:$4 sm:$0xff]  }
 0x180   : > { %v2257_v39 = vpop.f32.mrf.mxu1  ;;  %2913 = vmatpush1.bf16.msra.mxu0 %v4974_v33  ;;  %v5013_v33 = vld [vmem:[#allocation4 + $0x90] ss:$8 sps:$4 sm:$0xff]   ;;  %v5018_v38 = vld [vmem:[#allocation4 + $0x84] ss:$8 sps:$4 sm:$0xff]  }
 0x181   : > { %v2217_v49 = vpop.f32.mrf.mxu0  ;;  %2914 = vmatprep.subr.bf16.mxu0 %v4979_v36  ;;  %v5055_v36 = vld [vmem:[#allocation4 + $0x1b0] ss:$8 sps:$4 sm:$0xff]   ;;  %v881_v39 = vrot.slane %v5617_v29, %v5612_v28 }
 0x182   : > { %v2258_v9 = vpop.f32.mrf.mxu1  ;;  %2954 = vmatpush1.bf16.msra.mxu1 %v5022_v37  ;;  %v5016_v49 = vld [vmem:[#allocation4 + $0x80] ss:$8 sps:$4 sm:$0xff]  }
 0x183   : > { %2955 = vmatprep.subr.bf16.mxu1 %v5027_v43  ;;  %v2213_v9 = vadd.f32 %v5599_v31, %v881_v39  ;;  %v5061_v31 = vld [vmem:[#allocation4 + $0x190] ss:$8 sps:$4 sm:$0xff]   ;;  %v3016_v39 = vld [vmem:[%s5639_s16 + $0xa0] sm:$0xff] }
 0x184   : > { %2915 = vmatpush1.bf16.msra.mxu0 %v4977_v8  ;;  %v885_v8 = vrot.slane %v5617_v29, %v5620_v30 }
 0x185   : > { %2916 = vmatprep.subr.bf16.mxu0 %v4982_v52  ;;  %v2254_v20 = vadd.f32 %v5601_v32, %v2213_v9  ;;  %v3004_v9 = vld [vmem:[%s5639_s16 + $0x40] sm:$0xff] }
 0x186   : > { %2956 = vmatpush1.bf16.msra.mxu1 %v5025_v45  ;;  %v2215_v52 = vadd.f32 %v5605_v34, %v885_v8 }
 0x187   : > { %2957 = vmatprep.subr.bf16.mxu1 %v5030_v47 }
 0x188   : > { %2917 = vmatpush1.bf16.msra.mxu0 %v4980_v21 }
 0x189   : > { %2918 = vmatprep.subr.bf16.mxu0 %v4985_v40  ;;  %v2256_v40 = vadd.f32 %v5607_v35, %v2215_v52  ;;  %v5064_v35 = vld [vmem:[#allocation4 + $0x180] ss:$8 sps:$4 sm:$0xff]  }
 0x18a   : > { %2958 = vmatpush1.bf16.msra.mxu1 %v5028_v50  ;;  %v3008_v52 = vld [vmem:[%s5639_s16 + $0x60] sm:$0xff] }
 0x18b   : > { %2959 = vmatprep.subr.bf16.mxu1 %v5033_v53 }
 0x18c   : > { %2919 = vmatpush1.bf16.msra.mxu0 %v4983_v44 }
 0x18d   : > { %2920 = vmatprep.subr.bf16.mxu0 %v4988_v46  ;;  %v5063_v46 = vld [vmem:[#allocation4 + $0x194] ss:$8 sps:$4 sm:$0xff]  }
 0x18e   : > { %2960 = vmatpush1.bf16.msra.mxu1 %v5031_v55  ;;  %v5066_v55 = vld [vmem:[#allocation4 + $0x184] ss:$8 sps:$4 sm:$0xff]  }
 0x18f   : > { %2961 = vmatprep.subr.bf16.mxu1 %v5036_v57 }
 0x190   : > { %2921 = vmatpush1.bf16.msra.mxu0 %v4986_v48 }
 0x191   : > { %2922 = vmatprep.subr.bf16.mxu0 %v4991_v51 }
 0x192   : > { %2962 = vmatpush1.bf16.msra.mxu1 %v5034_v59 }
 0x193   : > { %2963 = vmatprep.subr.bf16.mxu1 %v5039_v61 }
 0x194   : > { %2923 = vmatpush1.bf16.msra.mxu0 %v4989_v54 }
 0x195   : > { %2924 = vmatprep.subr.bf16.mxu0 %v4994_v56 }
 0x196   : > { %2964 = vmatpush1.bf16.msra.mxu1 %v5037_v63 }
 0x197   : > { %2965 = vmatprep.subr.bf16.mxu1 %v5042_v1 }
 0x198   : > { %2925 = vmatpush1.bf16.msra.mxu0 %v4992_v58 }
 0x199   : > { %2926 = vmatprep.subr.bf16.mxu0 %v4997_v60 }
 0x19a   : > { %2966 = vmatpush1.bf16.msra.mxu1 %v5040_v3  ;;  %v3052_v3 = vld [vmem:[%s5639_s16 + $0x1c0] sm:$0xff] }
 0x19b   : > { %2967 = vmatprep.subr.bf16.mxu1 %v5045_v5  ;;  %v5644_v5 = vld [vmem:[%s5639_s16 + $0x1c8] sm:$0xff] }
 0x19c   : > { %2927 = vmatpush2.bf16.msra.mxu0 %v4995_v62 }
 0x19d   : > { %2928 = vmatprep.subr.bf16.mxu0 %v5000_v0 }
 0x19e   : > { %2968 = vmatpush2.bf16.msra.mxu1 %v5043_v7 }
 0x19f   : > { %2969 = vmatprep.subr.bf16.mxu1 %v5048_v11  ;;  %v3044_v11 = vld [vmem:[%s5639_s16 + $0x180] sm:$0xff] }
 0x1a0   : > { %2929 = vmatpush2.bf16.msra.mxu0 %v4998_v2 }
 0x1a1   : > { %2930 = vmatprep.subr.bf16.mxu0 %v5003_v4  ;;  %v3056_v4 = vld [vmem:[%s5639_s16 + $0x1e0] sm:$0xff] }
 0x1a2   : > { %2970 = vmatpush2.bf16.msra.mxu1 %v5046_v13  ;;  %v4464_v7 = vcombine.high %v3052_v3, %v3056_v4 }
 0x1a3   : > { %2971 = vmatprep.subr.bf16.mxu1 %v5051_v15  ;;  %v3036_v15 = vld [vmem:[%s5639_s16 + $0x140] sm:$0xff] }
 0x1a4   : > { %2931 = vmatpush2.bf16.msra.mxu0 %v5001_v6  ;;  %v4463_v6 = vcombine.low %v3052_v3, %v3056_v4  ;;  %v3084_v4 = vld [vmem:[%s5639_s16 + $0x2c0] sm:$0xff] }
 0x1a5   : > { %2932 = vmatprep.subr.bf16.mxu0 %v5006_v10  ;;  %v5647_v10 = vld [vmem:[%s5639_s16 + $0x1e8] sm:$0xff] }
 0x1a6   : > { %2972 = vmatpush2.bf16.msra.mxu1 %v5049_v18  ;;  %v4466_v13 = vcombine.high %v5644_v5, %v5647_v10  ;;  %v4448_v18 = vcombine.high %v3036_v15, %v3040_v16 }
 0x1a7   : > { %2973 = vmatprep.subr.bf16.mxu1 %v5054_v22  ;;  %v3032_v22 = vld [vmem:[%s5639_s16 + $0x120] sm:$0xff] }
 0x1a8   : > { %2933 = vmatpush2.bf16.msra.mxu0 %v5004_v12  ;;  %v3048_v12 = vld [vmem:[%s5639_s16 + $0x1a0] sm:$0xff] }
 0x1a9   : > { %2934 = vmatprep.subr.bf16.mxu0 %v5009_v14  ;;  %v4456_v14 = vcombine.high %v3044_v11, %v3048_v12 }
 0x1aa   : > { %2974 = vmatpush2.bf16.msra.mxu1 %v5052_v25 }
 0x1ab   : > { %2975 = vmatprep.subr.bf16.mxu1 %v5057_v27  ;;  %v3024_v27 = vld [vmem:[%s5639_s16 + $0xe0] sm:$0xff] }
 0x1ac   : > { %2935 = vmatpush2.bf16.msra.mxu0 %v5007_v17  ;;  %v4455_v17 = vcombine.low %v3044_v11, %v3048_v12 }
 0x1ad   : > { %2936 = vmatprep.subr.bf16.mxu0 %v5012_v19  ;;  %v3028_v19 = vld [vmem:[%s5639_s16 + $0x100] sm:$0xff] }
 0x1ae   : > { %2976 = vmatpush2.bf16.msra.mxu1 %v5055_v36  ;;  %v4440_v25 = vcombine.high %v3028_v19, %v3032_v22 }
 0x1af   : > { %2977 = vmatprep.subr.bf16.mxu1 %v5060_v41 }
 0x1b0   : > { %2937 = vmatpush2.bf16.msra.mxu0 %v5010_v24  ;;  %v4447_v24 = vcombine.low %v3036_v15, %v3040_v16 }
 0x1b1   : > { %2938 = vmatprep.subr.bf16.mxu0 %v5015_v26  ;;  %v3020_v26 = vld [vmem:[%s5639_s16 + $0xc0] sm:$0xff] }
 0x1b2   : > { %2978 = vmatpush2.bf16.msra.mxu1 %v5058_v42  ;;  %v4432_v36 = vcombine.high %v3020_v26, %v3024_v27  ;;  %v4431_v8 = vcombine.low %v3020_v26, %v3024_v27  ;;  %v2996_v42 = vld [vmem:[%s5639_s16] sm:$0xff] }
 0x1b3   : > { %2979 = vmatprep.subr.bf16.mxu1 %v5063_v46 }
 0x1b4   : > { %2939 = vmatpush2.bf16.msra.mxu0 %v5013_v33  ;;  %v4439_v33 = vcombine.low %v3028_v19, %v3032_v22 }
 0x1b5   : > { %2940 = vmatprep.subr.bf16.mxu0 %v5018_v38  ;;  %v3012_v38 = vld [vmem:[%s5639_s16 + $0x80] sm:$0xff] }
 0x1b6   : > { %2980 = vmatpush2.bf16.msra.mxu1 %v5061_v31  ;;  %v4423_v41 = vcombine.low %v3012_v38, %v3016_v39  ;;  %v3112_v31 = vld [vmem:[%s5639_s16 + $0x3a0] sm:$0xff] }
 0x1b7   : > { %2981 = vmatprep.subr.bf16.mxu1 %v5066_v55 }
 0x1b8   : > { %2941 = vmatpush2.bf16.msra.mxu0 %v5016_v49  ;;  %v4424_v49 = vcombine.high %v3012_v38, %v3016_v39  ;;  %v3049_v38 = vld [vmem:[%s5639_s16 + $0x1a8] sm:$0xff] }
 0x1b9   : > { %3806 = vmatprep.subr.bf16.mxu0 %v4464_v7 }
 0x1ba   : > { %2982 = vmatpush2.bf16.msra.mxu1 %v5064_v35 }
 0x1bb   : > { %v2294_v21 = vpop.f32.mrf.mxu0  ;;  %3847 = vmatprep.subr.bf16.mxu1 %v4466_v13 }
 0x1bc   : > { %v2335_v37 = vpop.f32.mrf.mxu1  ;;  %v2295_v43 = vadd.f32 %v2294_v21, %v2254_v20  ;;  %v4416_v20 = vcombine.high %v3004_v9, %v3008_v52  ;;  %v3000_v21 = vld [vmem:[%s5639_s16 + $0x20] sm:$0xff] }
 0x1bd   : > { %v2296_v44 = vpop.f32.mrf.mxu0 }
 0x1be   : > { %v2337_v45 = vpop.f32.mrf.mxu1  ;;  %v2336_v47 = vadd.f32 %v2335_v37, %v2295_v43  ;;  %v2297_v48 = vadd.f32 %v2296_v44, %v2256_v40  ;;  %v4415_v37 = vcombine.low %v3004_v9, %v3008_v52  ;;  %v4408_v40 = vcombine.high %v2996_v42, %v3000_v21  ;;  %v3116_v43 = vld [vmem:[%s5639_s16 + $0x3c0] sm:$0xff] }
 0x1bf   : > { %v2298_v50 = vpop.f32.mrf.mxu0  ;;  %v3120_v44 = vld [vmem:[%s5639_s16 + $0x3e0] sm:$0xff] }
 0x1c0   : > { %v2339_v34 = vpop.f32.mrf.mxu1  ;;  %v2338_v51 = vadd.f32 %v2337_v45, %v2297_v48  ;;  %v2506_v32 = vmax.f32 %v2336_v47, 0.0  ;;  %v4407_v45 = vcombine.low %v2996_v42, %v3000_v21  ;;  %v4528_v46 = vcombine.high %v3116_v43, %v3120_v44  ;;  %v3108_v48 = vld [vmem:[%s5639_s16 + $0x380] sm:$0xff] }
 0x1c1   : > { %v2299_v53 = vpop.f32.mrf.mxu0  ;;  %v888_v47 = vsub.s32 2, %v5609_v23  ;;  %v892_v50 = vsub.s32 3, %v5609_v23  ;;  %v4527_v34 = vcombine.low %v3116_v43, %v3120_v44  ;;  %v3021_v43 = vld [vmem:[%s5639_s16 + $0xc8] sm:$0xff] }
 0x1c2   : > { %v2340_v54 = vpop.f32.mrf.mxu1  ;;  %v2507_v56 = vmax.f32 %v2338_v51, 0.0  ;;  %v2510_v58 = vpack.c.bf16 %v2506_v32, %v2506_v32  ;;  %v4520_v51 = vcombine.high %v3108_v48, %v3112_v31  ;;  %v3100_v53 = vld [vmem:[%s5639_s16 + $0x340] sm:$0xff]  ;;  %v3025_v44 = vld [vmem:[%s5639_s16 + $0xe8] sm:$0xff] }
 0x1c3   : > { %v889_v32 = vrot.slane %v5617_v29, %v888_v47  ;;  %v3104_v54 = vld [vmem:[%s5639_s16 + $0x360] sm:$0xff]  ;;  %v893_v55 = vrot.slane %v5617_v29, %v892_v50 }
 0x1c4   : > { %v2511_v57 = vpack.c.bf16 %v2507_v56, %v2507_v56  ;;  %v4519_v56 = vcombine.low %v3108_v48, %v3112_v31  ;;  %v4512_v35 = vcombine.high %v3100_v53, %v3104_v54  ;;  %v3088_v29 = vld [vmem:[%s5639_s16 + $0x2e0] sm:$0xff]  ;;  %v3013_v48 = vld [vmem:[%s5639_s16 + $0x88] sm:$0xff] }
 0x1c5   : > { %v3017_v31 = vld [vmem:[%s5639_s16 + $0xa8] sm:$0xff] }
 0x1c6   : > { %2942 = vmatprep.mubr.bf16.mxu0 %v2511_v57 }
 0x1c7   : > { %2943 = vmatmul.mubr.bf16.vlgmr.msra.gmra.mxu0 %v2510_v58  ;;  %v3092_v58 = vld [vmem:[%s5639_s16 + $0x300] sm:$0xff] }
 0x1c8   : > { %3807 = vmatpush1.bf16.msra.mxu0 %v4463_v6 }
 0x1c9   : > { %3808 = vmatprep.subr.bf16.mxu0 %v4456_v14 }
 0x1cc   : > { %3809 = vmatpush1.bf16.msra.mxu0 %v4455_v17  ;;  %v3076_v17 = vld [vmem:[%s5639_s16 + $0x280] sm:$0xff] }
 0x1cd   : > { %3810 = vmatprep.subr.bf16.mxu0 %v4448_v18 }
 0x1d0   : > { %3811 = vmatpush1.bf16.msra.mxu0 %v4447_v24  ;;  %v4495_v24 = vcombine.low %v3084_v4, %v3088_v29 }
 0x1d1   : > { %3812 = vmatprep.subr.bf16.mxu0 %v4440_v25 }
 0x1d4   : > { %3813 = vmatpush1.bf16.msra.mxu0 %v4439_v33 }
 0x1d5   : > { %3814 = vmatprep.subr.bf16.mxu0 %v4432_v36  ;;  %v3045_v36 = vld [vmem:[%s5639_s16 + $0x188] sm:$0xff] }
 0x1d6   : > { %v4458_v52 = vcombine.high %v3045_v36, %v3049_v38  ;;  %v4457_v42 = vcombine.low %v3045_v36, %v3049_v38  ;;  %v3073_v38 = vld [vmem:[%s5639_s16 + $0x268] sm:$0xff] }
 0x1d8   : > { %3815 = vmatpush1.bf16.msra.mxu0 %v4431_v8  ;;  %v4465_v8 = vcombine.low %v5644_v5, %v5647_v10  ;;  %v3029_v5 = vld [vmem:[%s5639_s16 + $0x108] sm:$0xff] }
 0x1d9   : > { %3816 = vmatprep.subr.bf16.mxu0 %v4424_v49  ;;  %v3033_v10 = vld [vmem:[%s5639_s16 + $0x128] sm:$0xff] }
 0x1dc   : > { %3817 = vmatpush1.bf16.msra.mxu0 %v4423_v41  ;;  %v3037_v41 = vld [vmem:[%s5639_s16 + $0x148] sm:$0xff] }
 0x1dd   : > { %3818 = vmatprep.subr.bf16.mxu0 %v4416_v20  ;;  %v3041_v20 = vld [vmem:[%s5639_s16 + $0x168] sm:$0xff] }
 0x1de   : > { %v4450_v21 = vcombine.high %v3037_v41, %v3041_v20 }
 0x1e0   : > { %3819 = vmatpush1.bf16.msra.mxu0 %v4415_v37  ;;  %v4449_v37 = vcombine.low %v3037_v41, %v3041_v20  ;;  %v3060_v41 = vld [vmem:[%s5639_s16 + $0x200] sm:$0xff] }
 0x1e1   : > { %3820 = vmatprep.subr.bf16.mxu0 %v4408_v40  ;;  %v4442_v40 = vcombine.high %v3029_v5, %v3033_v10  ;;  %v3064_v20 = vld [vmem:[%s5639_s16 + $0x220] sm:$0xff] }
 0x1e4   : > { %3821 = vmatpush1.bf16.msra.mxu0 %v4407_v45  ;;  %v4441_v45 = vcombine.low %v3029_v5, %v3033_v10  ;;  %v3065_v5 = vld [vmem:[%s5639_s16 + $0x228] sm:$0xff] }
 0x1e5   : > { %3822 = vmatprep.subr.bf16.mxu0 %v4528_v46  ;;  %v4434_v46 = vcombine.high %v3021_v43, %v3025_v44 }
 0x1e8   : > { %3823 = vmatpush2.bf16.msra.mxu0 %v4527_v34  ;;  %v4433_v34 = vcombine.low %v3021_v43, %v3025_v44 }
 0x1e9   : > { %3824 = vmatprep.subr.bf16.mxu0 %v4520_v51  ;;  %v4426_v51 = vcombine.high %v3013_v48, %v3017_v31 }
 0x1ec   : > { %3825 = vmatpush2.bf16.msra.mxu0 %v4519_v56  ;;  %v2997_v56 = vld [vmem:[%s5639_s16 + $0x8] sm:$0xff] }
 0x1ed   : > { %3826 = vmatprep.subr.bf16.mxu0 %v4512_v35  ;;  %v3001_v35 = vld [vmem:[%s5639_s16 + $0x28] sm:$0xff] }
 0x1fb   : > { %v5630_v59 = vpop.f32.mrf.mxu0 }
 0x1fc   : > { %v5632_v60 = vpop.f32.mrf.mxu1  ;;  %v2377_v57 = vadd.f32 %v5630_v59, %v889_v32  ;;  %v3005_v32 = vld [vmem:[%s5639_s16 + $0x48] sm:$0xff] }
 0x1fd   : > { %v5634_v61 = vpop.f32.mrf.mxu0 }
 0x1fe   : > { %v5636_v62 = vpop.f32.mrf.mxu1  ;;  %v2418_v3 = vadd.f32 %v5632_v60, %v2377_v57  ;;  %v3080_v60 = vld [vmem:[%s5639_s16 + $0x2a0] sm:$0xff] }
 0x1ff   : > { %v2380_v63 = vpop.f32.mrf.mxu0  ;;  %v4488_v27 = vcombine.high %v3076_v17, %v3080_v60  ;;  %v4487_v49 = vcombine.low %v3076_v17, %v3080_v60  ;;  %v3089_v17 = vld [vmem:[%s5639_s16 + $0x2e8] sm:$0xff] }
 0x200   : > { %v2421_v0 = vpop.f32.mrf.mxu1  ;;  %v3096_v63 = vld [vmem:[%s5639_s16 + $0x320] sm:$0xff] }
 0x201   : > { %v2381_v1 = vpop.f32.mrf.mxu0  ;;  %v2379_v0 = vadd.f32 %v5634_v61, %v893_v55  ;;  %v4503_v59 = vcombine.low %v3092_v58, %v3096_v63  ;;  %v4496_v61 = vcombine.high %v3084_v4, %v3088_v29  ;;  %v3113_v4 = vld [vmem:[%s5639_s16 + $0x3a8] sm:$0xff] }
 0x202   : > { %v2422_v2 = vpop.f32.mrf.mxu1  ;;  %v4511_v1 = vcombine.low %v3100_v53, %v3104_v54  ;;  %v3009_v53 = vld [vmem:[%s5639_s16 + $0x68] sm:$0xff]  ;;  %v4425_v54 = vcombine.low %v3013_v48, %v3017_v31  ;;  %v3055_v48 = vld [vmem:[%s5639_s16 + $0x1d8] sm:$0xff] }
 0x203   : > { %v4504_v2 = vcombine.high %v3092_v58, %v3096_v63  ;;  %v2420_v11 = vadd.f32 %v5636_v62, %v2379_v0  ;;  %v4418_v55 = vcombine.high %v3005_v32, %v3009_v53  ;;  %v4417_v57 = vcombine.low %v3005_v32, %v3009_v53  ;;  %v3117_v63 = vld [vmem:[%s5639_s16 + $0x3c8] sm:$0xff] }
 0x204   : > { %3827 = vmatpush2.bf16.msra.mxu0 %v4511_v1  ;;  %v4410_v58 = vcombine.high %v2997_v56, %v3001_v35  ;;  %v3121_v0 = vld [vmem:[%s5639_s16 + $0x3e8] sm:$0xff]  ;;  %v4409_v1 = vcombine.low %v2997_v56, %v3001_v35 }
 0x205   : > { %3828 = vmatprep.subr.bf16.mxu0 %v4504_v2  ;;  %v4530_v2 = vcombine.high %v3117_v63, %v3121_v0  ;;  %v4529_v29 = vcombine.low %v3117_v63, %v3121_v0 }
 0x208   : > { %3829 = vmatpush2.bf16.msra.mxu0 %v4503_v59 }
 0x209   : > { %3830 = vmatprep.subr.bf16.mxu0 %v4496_v61 }
 0x20c   : > { %3831 = vmatpush2.bf16.msra.mxu0 %v4495_v24 }
 0x20d   : > { %3832 = vmatprep.subr.bf16.mxu0 %v4488_v27  ;;  %v3072_v27 = vld [vmem:[%s5639_s16 + $0x260] sm:$0xff] }
 0x210   : > { %3833 = vmatpush2.bf16.msra.mxu0 %v4487_v49 }
 0x23b   : > { %v2458_v6 = vpop.f32.mrf.mxu0 }
 0x23c   : > { %v2499_v7 = vpop.f32.mrf.mxu1  ;;  %v2459_v12 = vadd.f32 %v2458_v6, %v2418_v3  ;;  %v3109_v3 = vld [vmem:[%s5639_s16 + $0x388] sm:$0xff] }
 0x23d   : > { %v2460_v13 = vpop.f32.mrf.mxu0  ;;  %v4522_v6 = vcombine.high %v3109_v3, %v3113_v4 }
 0x23e   : > { %v2501_v14 = vpop.f32.mrf.mxu1  ;;  %v2500_v15 = vadd.f32 %v2499_v7, %v2459_v12  ;;  %v2461_v16 = vadd.f32 %v2460_v13, %v2420_v11  ;;  %v3101_v7 = vld [vmem:[%s5639_s16 + $0x348] sm:$0xff]  ;;  %v4521_v12 = vcombine.low %v3109_v3, %v3113_v4 }
 0x23f   : > { %v2462_v18 = vpop.f32.mrf.mxu0  ;;  %v3105_v11 = vld [vmem:[%s5639_s16 + $0x368] sm:$0xff] }
 0x240   : > { %v2503_v19 = vpop.f32.mrf.mxu1  ;;  %v2502_v22 = vadd.f32 %v2501_v14, %v2461_v16  ;;  %v2508_v25 = vmax.f32 %v2500_v15, 0.0  ;;  %v4514_v59 = vcombine.high %v3101_v7, %v3105_v11  ;;  %v3093_v13 = vld [vmem:[%s5639_s16 + $0x308] sm:$0xff]  ;;  %v4513_v61 = vcombine.low %v3101_v7, %v3105_v11  ;;  %v3050_v7 = vld [vmem:[%s5639_s16 + $0x1b0] sm:$0xff]  ;;  %v3047_v11 = vld [vmem:[%s5639_s16 + $0x198] sm:$0xff] }
 0x241   : > { %v2463_v62 = vpop.f32.mrf.mxu0  ;;  %v3097_v14 = vld [vmem:[%s5639_s16 + $0x328] sm:$0xff] }
 0x242   : > { %v2504_v26 = vpop.f32.mrf.mxu1  ;;  %v2509_v33 = vmax.f32 %v2502_v22, 0.0  ;;  %v2512_v9 = vpack.c.bf16 %v2508_v25, %v2508_v25  ;;  %v4506_v15 = vcombine.high %v3093_v13, %v3097_v14  ;;  %v3085_v16 = vld [vmem:[%s5639_s16 + $0x2c8] sm:$0xff]  ;;  %v4505_v60 = vcombine.low %v3093_v13, %v3097_v14  ;;  %v3038_v14 = vld [vmem:[%s5639_s16 + $0x150] sm:$0xff] }
 0x243   : > { %v4498_v18 = vcombine.high %v3085_v16, %v3089_v17  ;;  %v3077_v19 = vld [vmem:[%s5639_s16 + $0x288] sm:$0xff]  ;;  %v4497_v24 = vcombine.low %v3085_v16, %v3089_v17  ;;  %v3068_v26 = vld [vmem:[%s5639_s16 + $0x240] sm:$0xff]  ;;  %v3042_v16 = vld [vmem:[%s5639_s16 + $0x170] sm:$0xff] }
 0x244   : > { %v2513_v39 = vpack.c.bf16 %v2509_v33, %v2509_v33  ;;  %v3081_v22 = vld [vmem:[%s5639_s16 + $0x2a8] sm:$0xff]  ;;  %v4480_v36 = vcombine.high %v3068_v26, %v3072_v27  ;;  %v3039_v17 = vld [vmem:[%s5639_s16 + $0x158] sm:$0xff] }
 0x245   : > { %v4490_v25 = vcombine.high %v3077_v19, %v3081_v22  ;;  %v4489_v62 = vcombine.low %v3077_v19, %v3081_v22  ;;  %v3069_v33 = vld [vmem:[%s5639_s16 + $0x248] sm:$0xff]  ;;  %v4452_v22 = vcombine.high %v3038_v14, %v3042_v16 }
 0x246   : > { %2983 = vmatprep.mubr.bf16.mxu1 %v2513_v39  ;;  %v4481_v49 = vcombine.low %v3069_v33, %v3073_v38  ;;  %3834 = vmatprep.subr.bf16.mxu0 %v4480_v36 }
 0x247   : > { %2984 = vmatmul.mubr.bf16.vlgmr.msra.gmra.mxu1 %v2512_v9  ;;  %v4482_v9 = vcombine.high %v3069_v33, %v3073_v38  ;;  %v4451_v33 = vcombine.low %v3038_v14, %v3042_v16  ;;  %v3110_v14 = vld [vmem:[%s5639_s16 + $0x390] sm:$0xff]  ;;  %v3115_v16 = vld [vmem:[%s5639_s16 + $0x3b8] sm:$0xff] }
 0x248   : > { %3848 = vmatpush1.bf16.msra.mxu1 %v4465_v8  ;;  %v4479_v8 = vcombine.low %v3068_v26, %v3072_v27  ;;  %v3031_v26 = vld [vmem:[%s5639_s16 + $0x118] sm:$0xff] }
 0x249   : > { %3849 = vmatprep.subr.bf16.mxu1 %v4458_v52  ;;  %v3035_v27 = vld [vmem:[%s5639_s16 + $0x138] sm:$0xff] }
 0x24a   : > { %3835 = vmatpush2.bf16.msra.mxu0 %v4479_v8  ;;  %v3022_v8 = vld [vmem:[%s5639_s16 + $0xd0] sm:$0xff] }
 0x24c   : > { %3850 = vmatpush1.bf16.msra.mxu1 %v4457_v42  ;;  %v3061_v42 = vld [vmem:[%s5639_s16 + $0x208] sm:$0xff] }
 0x24d   : > { %3851 = vmatprep.subr.bf16.mxu1 %v4450_v21  ;;  %v4472_v21 = vcombine.high %v3060_v41, %v3064_v20  ;;  %v4474_v43 = vcombine.high %v3061_v42, %v3065_v5 }
 0x24f   : > { %3836 = vmatprep.subr.bf16.mxu0 %v4472_v21 }
 0x250   : > { %3852 = vmatpush1.bf16.msra.mxu1 %v4449_v37  ;;  %v4471_v37 = vcombine.low %v3060_v41, %v3064_v20  ;;  %v4445_v20 = vcombine.low %v3031_v26, %v3035_v27 }
 0x251   : > { %3853 = vmatprep.subr.bf16.mxu1 %v4442_v40  ;;  %v4473_v40 = vcombine.low %v3061_v42, %v3065_v5  ;;  %v3014_v5 = vld [vmem:[%s5639_s16 + $0x90] sm:$0xff] }
 0x252   : > { %3837 = vmatpush2.bf16.msra.mxu0 %v4471_v37  ;;  %v3015_v37 = vld [vmem:[%s5639_s16 + $0x98] sm:$0xff] }
 0x254   : > { %3854 = vmatpush1.bf16.msra.mxu1 %v4441_v45  ;;  %v3054_v45 = vld [vmem:[%s5639_s16 + $0x1d0] sm:$0xff] }
 0x255   : > { %3855 = vmatprep.subr.bf16.mxu1 %v4434_v46  ;;  %v3058_v46 = vld [vmem:[%s5639_s16 + $0x1f0] sm:$0xff] }
 0x256   : > { %v4468_v31 = vcombine.high %v3054_v45, %v3058_v46 }
 0x258   : > { %3856 = vmatpush1.bf16.msra.mxu1 %v4433_v34  ;;  %v3059_v34 = vld [vmem:[%s5639_s16 + $0x1f8] sm:$0xff]  ;;  %3888 = vmatprep.subr.bf16.mxu0 %v4468_v31  ;;  %v3010_v31 = vld [vmem:[%s5639_s16 + $0x70] sm:$0xff] }
 0x259   : > { %3857 = vmatprep.subr.bf16.mxu1 %v4426_v51  ;;  %v4467_v51 = vcombine.low %v3054_v45, %v3058_v46  ;;  %v4469_v32 = vcombine.low %v3055_v48, %v3059_v34  ;;  %v4470_v53 = vcombine.high %v3055_v48, %v3059_v34  ;;  %v3006_v48 = vld [vmem:[%s5639_s16 + $0x50] sm:$0xff]  ;;  %v3007_v34 = vld [vmem:[%s5639_s16 + $0x58] sm:$0xff] }
 0x25c   : > { %3858 = vmatpush1.bf16.msra.mxu1 %v4425_v54  ;;  %v2578_v54 = vld [vmem:[%s5842_s4] sm:$0x3] }
 0x25d   : > { %3859 = vmatprep.subr.bf16.mxu1 %v4418_v55  ;;  %v2583_v55 = vrot.slane %v2578_v54, %v5612_v28  ;;  %v2587_v56 = vrot.slane %v2578_v54, %v5620_v30  ;;  %v4420_v54 = vcombine.high %v3006_v48, %v3010_v31 }
 0x260   : > { %3860 = vmatpush1.bf16.msra.mxu1 %v4417_v57 }
 0x261   : > { %3861 = vmatprep.subr.bf16.mxu1 %v4410_v58 }
 0x264   : > { %3862 = vmatpush1.bf16.msra.mxu1 %v4409_v1 }
 0x265   : > { %3863 = vmatprep.subr.bf16.mxu1 %v4530_v2 }
 0x268   : > { %3864 = vmatpush2.bf16.msra.mxu1 %v4529_v29  ;;  %v3046_v29 = vld [vmem:[%s5639_s16 + $0x190] sm:$0xff] }
 0x269   : > { %3865 = vmatprep.subr.bf16.mxu1 %v4522_v6 }
 0x26c   : > { %3866 = vmatpush2.bf16.msra.mxu1 %v4521_v12  ;;  %v3051_v12 = vld [vmem:[%s5639_s16 + $0x1b8] sm:$0xff] }
 0x26d   : > { %3867 = vmatprep.subr.bf16.mxu1 %v4514_v59  ;;  %v4461_v19 = vcombine.low %v3047_v11, %v3051_v12 }
 0x270   : > { %3868 = vmatpush2.bf16.msra.mxu1 %v4513_v61  ;;  %v4460_v61 = vcombine.high %v3046_v29, %v3050_v7 }
 0x271   : > { %3869 = vmatprep.subr.bf16.mxu1 %v4506_v15  ;;  %v4462_v15 = vcombine.high %v3047_v11, %v3051_v12 }
 0x274   : > { %3870 = vmatpush2.bf16.msra.mxu1 %v4505_v60  ;;  %v3043_v60 = vld [vmem:[%s5639_s16 + $0x178] sm:$0xff] }
 0x275   : > { %3871 = vmatprep.subr.bf16.mxu1 %v4498_v18  ;;  %v4459_v18 = vcombine.low %v3046_v29, %v3050_v7  ;;  %v4453_v36 = vcombine.low %v3039_v17, %v3043_v60  ;;  %v3119_v29 = vld [vmem:[%s5639_s16 + $0x3d8] sm:$0xff] }
 0x278   : > { %3872 = vmatpush2.bf16.msra.mxu1 %v4497_v24  ;;  %v4454_v24 = vcombine.high %v3039_v17, %v3043_v60 }
 0x279   : > { %3873 = vmatprep.subr.bf16.mxu1 %v4490_v25  ;;  %v3030_v25 = vld [vmem:[%s5639_s16 + $0x110] sm:$0xff] }
 0x27c   : > { %3874 = vmatpush2.bf16.msra.mxu1 %v4489_v62  ;;  %v3034_v62 = vld [vmem:[%s5639_s16 + $0x130] sm:$0xff] }
 0x27d   : > { %3875 = vmatprep.subr.bf16.mxu1 %v4482_v9  ;;  %v4444_v38 = vcombine.high %v3030_v25, %v3034_v62  ;;  %v3023_v9 = vld [vmem:[%s5639_s16 + $0xd8] sm:$0xff]  ;;  %v4443_v41 = vcombine.low %v3030_v25, %v3034_v62 }
 0x27e   : > { %v3103_v25 = vld [vmem:[%s5639_s16 + $0x358] sm:$0xff] }
 0x27f   : > { %v3107_v62 = vld [vmem:[%s5639_s16 + $0x378] sm:$0xff] }
 0x280   : > { %3876 = vmatpush2.bf16.msra.mxu1 %v4481_v49  ;;  %v3026_v49 = vld [vmem:[%s5639_s16 + $0xf0] sm:$0xff] }
 0x281   : > { %3877 = vmatprep.subr.bf16.mxu1 %v4474_v43  ;;  %v4436_v42 = vcombine.high %v3022_v8, %v3026_v49  ;;  %v4435_v43 = vcombine.low %v3022_v8, %v3026_v49  ;;  %v3095_v8 = vld [vmem:[%s5639_s16 + $0x318] sm:$0xff] }
 0x282   : > { %v3099_v49 = vld [vmem:[%s5639_s16 + $0x338] sm:$0xff] }
 0x284   : > { %3878 = vmatpush2.bf16.msra.mxu1 %v4473_v40  ;;  %v3019_v40 = vld [vmem:[%s5639_s16 + $0xb8] sm:$0xff] }
 0x285   : > { %3929 = vmatprep.subr.bf16.mxu1 %v4470_v53  ;;  %v4430_v46 = vcombine.high %v3015_v37, %v3019_v40  ;;  %v4429_v53 = vcombine.low %v3015_v37, %v3019_v40  ;;  %v4509_v40 = vcombine.low %v3095_v8, %v3099_v49 }
 0x287   : > { %v2944_v39 = vpop.f32.mrf.mxu0 }
 0x288   : > { %v2945_v35 = vadd.f32 %v2944_v39, %v2583_v55  ;;  %v4446_v39 = vcombine.high %v3031_v26, %v3035_v27 }
 0x289   : > { %v2946_v52 = vpop.f32.mrf.mxu0 }
 0x28a   : > { %v2947_v58 = vadd.f32 %v2946_v52, %v2587_v56  ;;  %v3027_v52 = vld [vmem:[%s5639_s16 + $0xf8] sm:$0xff]  ;;  %v2998_v56 = vld [vmem:[%s5639_s16 + $0x10] sm:$0xff] }
 0x28b   : > { %v2948_v10 = vpop.f32.mrf.mxu0  ;;  %v4438_v21 = vcombine.high %v3023_v9, %v3027_v52 }
 0x28c   : > { %v3018_v10 = vld [vmem:[%s5639_s16 + $0xb0] sm:$0xff] }
 0x28d   : > { %v2949_v44 = vpop.f32.mrf.mxu0  ;;  %v4428_v45 = vcombine.high %v3014_v5, %v3018_v10 }
 0x28e   : > { %v4437_v44 = vcombine.low %v3023_v9, %v3027_v52  ;;  %v4517_v52 = vcombine.low %v3103_v25, %v3107_v62 }
 0x307   : > { %v2985_v57 = vpop.f32.mrf.mxu1 }
 0x308   : > { %v2986_v63 = vadd.f32 %v2985_v57, %v2945_v35  ;;  %v3002_v35 = vld [vmem:[%s5639_s16 + $0x30] sm:$0xff]  ;;  %v2999_v57 = vld [vmem:[%s5639_s16 + $0x18] sm:$0xff] }
 0x309   : > { %v2987_v0 = vpop.f32.mrf.mxu1  ;;  %v4411_v7 = vcombine.low %v2998_v56, %v3002_v35 }
 0x30a   : > { %v2988_v1 = vadd.f32 %v2987_v0, %v2947_v58  ;;  %v2992_v2 = vmax.f32 %v2986_v63, 0.0  ;;  %v3003_v58 = vld [vmem:[%s5639_s16 + $0x38] sm:$0xff]  ;;  %v4419_v63 = vcombine.low %v3006_v48, %v3010_v31 }
 0x30b   : > { %v2989_v3 = vpop.f32.mrf.mxu1  ;;  %v4413_v11 = vcombine.low %v2999_v57, %v3003_v58  ;;  %v3079_v48 = vld [vmem:[%s5639_s16 + $0x298] sm:$0xff] }
 0x30c   : > { %v2993_v4 = vmax.f32 %v2988_v1, 0.0  ;;  %v5738_v13 = vpack.c.bf16 %v2992_v2, %v2992_v2  ;;  %v4412_v1 = vcombine.high %v2998_v56, %v3002_v35  ;;  %v4414_v2 = vcombine.high %v2999_v57, %v3003_v58  ;;  %v3118_v3 = vld [vmem:[%s5639_s16 + $0x3d0] sm:$0xff]  ;;  %v3083_v31 = vld [vmem:[%s5639_s16 + $0x2b8] sm:$0xff] }
 0x30d   : > { %v2990_v6 = vpop.f32.mrf.mxu1  ;;  %v3071_v56 = vld [vmem:[%s5639_s16 + $0x258] sm:$0xff]  ;;  %v4493_v58 = vcombine.low %v3079_v48, %v3083_v31 }
 0x30e   : > { %v2995_v59 = vpack.c.bf16 %v2993_v4, %v2993_v4  ;;  %v3122_v4 = vld [vmem:[%s5639_s16 + $0x3f0] sm:$0xff]  ;;  %v3123_v6 = vld [vmem:[%s5639_s16 + $0x3f8] sm:$0xff] }
 0x30f   : > { %v4532_v12 = vcombine.high %v3118_v3, %v3122_v4  ;;  %v4531_v17 = vcombine.low %v3118_v3, %v3122_v4  ;;  %v4533_v60 = vcombine.low %v3119_v29, %v3123_v6  ;;  %v3075_v35 = vld [vmem:[%s5639_s16 + $0x278] sm:$0xff] }
 0x310   : > { %3838 = vmatprep.mubr.bf16.mxu0 %v2995_v59  ;;  %3879 = vmatprep.mubr.bf16.mxu1 %v2995_v59  ;;  %v3063_v3 = vld [vmem:[%s5639_s16 + $0x218] sm:$0xff] }
 0x311   : > { %3839 = vmatmul.mubr.bf16.vlgmr.msra.gmra.mxu0 %v5738_v13  ;;  %3880 = vmatmul.mubr.bf16.vlgmr.msra.gmra.mxu1 %v5738_v13  ;;  %v3067_v4 = vld [vmem:[%s5639_s16 + $0x238] sm:$0xff] }
 0x312   : > { %3889 = vmatpush1.bf16.msra.mxu0 %v4467_v51  ;;  %3930 = vmatpush1.bf16.msra.mxu1 %v4469_v32  ;;  %v3011_v51 = vld [vmem:[%s5639_s16 + $0x78] sm:$0xff]  ;;  %v4427_v32 = vcombine.low %v3014_v5, %v3018_v10 }
 0x313   : > { %3920 = vmatprep.mubr.bf16.mxu0 %v2995_v59  ;;  %3961 = vmatprep.mubr.bf16.mxu1 %v2995_v59  ;;  %v4422_v55 = vcombine.high %v3007_v34, %v3011_v51  ;;  %v4421_v0 = vcombine.low %v3007_v34, %v3011_v51  ;;  %v4534_v59 = vcombine.high %v3119_v29, %v3123_v6  ;;  %v3087_v5 = vld [vmem:[%s5639_s16 + $0x2d8] sm:$0xff] }
 0x314   : > { %3890 = vmatprep.subr.bf16.mxu0 %v4460_v61  ;;  %3931 = vmatprep.subr.bf16.mxu1 %v4462_v15  ;;  %v3114_v61 = vld [vmem:[%s5639_s16 + $0x3b0] sm:$0xff]  ;;  %v3111_v15 = vld [vmem:[%s5639_s16 + $0x398] sm:$0xff]  ;;  %v4485_v6 = vcombine.low %v3071_v56, %v3075_v35 }
 0x315   : > { %v4523_v26 = vcombine.low %v3110_v14, %v3114_v61  ;;  %v4525_v27 = vcombine.low %v3111_v15, %v3115_v16  ;;  %v3091_v10 = vld [vmem:[%s5639_s16 + $0x2f8] sm:$0xff] }
 0x316   : > { %3891 = vmatpush1.bf16.msra.mxu0 %v4459_v18  ;;  %3932 = vmatpush1.bf16.msra.mxu1 %v4461_v19  ;;  %v4524_v18 = vcombine.high %v3110_v14, %v3114_v61  ;;  %v4526_v19 = vcombine.high %v3111_v15, %v3115_v16  ;;  %v4501_v51 = vcombine.low %v3087_v5, %v3091_v10  ;;  %v3124_v14 = vld [vmem:[%s596_s30] sm:$0xff] }
 0x317   : > { %3892 = vmatprep.subr.bf16.mxu0 %v4452_v22  ;;  %3933 = vmatprep.subr.bf16.mxu1 %v4454_v24  ;;  %v3102_v22 = vld [vmem:[%s5639_s16 + $0x350] sm:$0xff]  ;;  %v3129_v61 = vrot.slane %v3124_v14, %v5612_v28  ;;  %v3137_v15 = vrot.slane %v3124_v14, %v888_v47  ;;  %v3133_v16 = vrot.slane %v3124_v14, %v5620_v30 }
 0x318   : > { %v3106_v24 = vld [vmem:[%s5639_s16 + $0x370] sm:$0xff] }
 0x319   : > { %v4515_v9 = vcombine.low %v3102_v22, %v3106_v24 }
 0x31a   : > { %3893 = vmatpush1.bf16.msra.mxu0 %v4451_v33  ;;  %3934 = vmatpush1.bf16.msra.mxu1 %v4453_v36  ;;  %v4516_v33 = vcombine.high %v3102_v22, %v3106_v24  ;;  %v4518_v36 = vcombine.high %v3103_v25, %v3107_v62 }
 0x31b   : > { %3894 = vmatprep.subr.bf16.mxu0 %v4444_v38  ;;  %3935 = vmatprep.subr.bf16.mxu1 %v4446_v39  ;;  %v3094_v38 = vld [vmem:[%s5639_s16 + $0x310] sm:$0xff] }
 0x31c   : > { %v3098_v39 = vld [vmem:[%s5639_s16 + $0x330] sm:$0xff] }
 0x31d   : > { %v4507_v37 = vcombine.low %v3094_v38, %v3098_v39 }
 0x31e   : > { %3895 = vmatpush1.bf16.msra.mxu0 %v4443_v41  ;;  %3936 = vmatpush1.bf16.msra.mxu1 %v4445_v20  ;;  %v4508_v41 = vcombine.high %v3094_v38, %v3098_v39  ;;  %v4510_v20 = vcombine.high %v3095_v8, %v3099_v49 }
 0x31f   : > { %3896 = vmatprep.subr.bf16.mxu0 %v4436_v42  ;;  %3937 = vmatprep.subr.bf16.mxu1 %v4438_v21  ;;  %v3086_v42 = vld [vmem:[%s5639_s16 + $0x2d0] sm:$0xff] }
 0x320   : > { %v3090_v21 = vld [vmem:[%s5639_s16 + $0x2f0] sm:$0xff] }
 0x321   : > { %v4499_v34 = vcombine.low %v3086_v42, %v3090_v21 }
 0x322   : > { %3897 = vmatpush1.bf16.msra.mxu0 %v4435_v43  ;;  %3938 = vmatpush1.bf16.msra.mxu1 %v4437_v44  ;;  %v4500_v43 = vcombine.high %v3086_v42, %v3090_v21  ;;  %v4502_v44 = vcombine.high %v3087_v5, %v3091_v10 }
 0x323   : > { %3898 = vmatprep.subr.bf16.mxu0 %v4428_v45  ;;  %3939 = vmatprep.subr.bf16.mxu1 %v4430_v46  ;;  %v3078_v45 = vld [vmem:[%s5639_s16 + $0x290] sm:$0xff] }
 0x324   : > { %v3082_v46 = vld [vmem:[%s5639_s16 + $0x2b0] sm:$0xff] }
 0x325   : > { %v4491_v57 = vcombine.low %v3078_v45, %v3082_v46 }
 0x326   : > { %3899 = vmatpush1.bf16.msra.mxu0 %v4427_v32  ;;  %3940 = vmatpush1.bf16.msra.mxu1 %v4429_v53  ;;  %v4492_v32 = vcombine.high %v3078_v45, %v3082_v46  ;;  %v4494_v53 = vcombine.high %v3079_v48, %v3083_v31 }
 0x327   : > { %3900 = vmatprep.subr.bf16.mxu0 %v4420_v54  ;;  %3941 = vmatprep.subr.bf16.mxu1 %v4422_v55  ;;  %v3070_v54 = vld [vmem:[%s5639_s16 + $0x250] sm:$0xff] }
 0x328   : > { %v3074_v55 = vld [vmem:[%s5639_s16 + $0x270] sm:$0xff] }
 0x329   : > { %v4483_v29 = vcombine.low %v3070_v54, %v3074_v55 }
 0x32a   : > { %3901 = vmatpush1.bf16.msra.mxu0 %v4419_v63  ;;  %3942 = vmatpush1.bf16.msra.mxu1 %v4421_v0  ;;  %v4484_v63 = vcombine.high %v3070_v54, %v3074_v55  ;;  %v4486_v0 = vcombine.high %v3071_v56, %v3075_v35 }
 0x32b   : > { %3902 = vmatprep.subr.bf16.mxu0 %v4412_v1  ;;  %3943 = vmatprep.subr.bf16.mxu1 %v4414_v2  ;;  %v3062_v1 = vld [vmem:[%s5639_s16 + $0x210] sm:$0xff] }
 0x32c   : > { %v3066_v2 = vld [vmem:[%s5639_s16 + $0x230] sm:$0xff] }
 0x32e   : > { %3903 = vmatpush1.bf16.msra.mxu0 %v4411_v7  ;;  %3944 = vmatpush1.bf16.msra.mxu1 %v4413_v11  ;;  %v4476_v7 = vcombine.high %v3062_v1, %v3066_v2  ;;  %v4478_v11 = vcombine.high %v3063_v3, %v3067_v4 }
 0x32f   : > { %3904 = vmatprep.subr.bf16.mxu0 %v4532_v12  ;;  %3945 = vmatprep.subr.bf16.mxu1 %v4534_v59  ;;  %v4475_v12 = vcombine.low %v3062_v1, %v3066_v2  ;;  %v4477_v59 = vcombine.low %v3063_v3, %v3067_v4 }
 0x332   : > { %3905 = vmatpush2.bf16.msra.mxu0 %v4531_v17  ;;  %3946 = vmatpush2.bf16.msra.mxu1 %v4533_v60 }
 0x333   : > { %3906 = vmatprep.subr.bf16.mxu0 %v4524_v18  ;;  %3947 = vmatprep.subr.bf16.mxu1 %v4526_v19 }
 0x336   : > { %3907 = vmatpush2.bf16.msra.mxu0 %v4523_v26  ;;  %3948 = vmatpush2.bf16.msra.mxu1 %v4525_v27  ;;  %v3144_v26 = vsub.s32 4, %v5609_v23  ;;  %v3152_v27 = vsub.s32 6, %v5609_v23 }
 0x337   : > { %3908 = vmatprep.subr.bf16.mxu0 %v4516_v33  ;;  %3949 = vmatprep.subr.bf16.mxu1 %v4518_v36  ;;  %v3148_v33 = vsub.s32 5, %v5609_v23  ;;  %v3156_v36 = vsub.s32 7, %v5609_v23 }
 0x338   : > { %v3145_v38 = vrot.slane %v3124_v14, %v3144_v26  ;;  %v3153_v39 = vrot.slane %v3124_v14, %v3152_v27 }
 0x339   : > { %v3149_v8 = vrot.slane %v3124_v14, %v3148_v33  ;;  %v3157_v49 = vrot.slane %v3124_v14, %v3156_v36 }
 0x33a   : > { %3909 = vmatpush2.bf16.msra.mxu0 %v4515_v9  ;;  %3950 = vmatpush2.bf16.msra.mxu1 %v4517_v52 }
 0x33b   : > { %3910 = vmatprep.subr.bf16.mxu0 %v4508_v41  ;;  %3951 = vmatprep.subr.bf16.mxu1 %v4510_v20 }
 0x33e   : > { %3911 = vmatpush2.bf16.msra.mxu0 %v4507_v37  ;;  %3952 = vmatpush2.bf16.msra.mxu1 %v4509_v40 }
 0x33f   : > { %3912 = vmatprep.subr.bf16.mxu0 %v4500_v43  ;;  %3953 = vmatprep.subr.bf16.mxu1 %v4502_v44 }
 0x342   : > { %3913 = vmatpush2.bf16.msra.mxu0 %v4499_v34  ;;  %3954 = vmatpush2.bf16.msra.mxu1 %v4501_v51 }
 0x343   : > { %3914 = vmatprep.subr.bf16.mxu0 %v4492_v32  ;;  %3955 = vmatprep.subr.bf16.mxu1 %v4494_v53 }
 0x346   : > { %3915 = vmatpush2.bf16.msra.mxu0 %v4491_v57  ;;  %3956 = vmatpush2.bf16.msra.mxu1 %v4493_v58 }
 0x347   : > { %3916 = vmatprep.subr.bf16.mxu0 %v4484_v63  ;;  %3957 = vmatprep.subr.bf16.mxu1 %v4486_v0 }
 0x34a   : > { %3917 = vmatpush2.bf16.msra.mxu0 %v4483_v29  ;;  %3958 = vmatpush2.bf16.msra.mxu1 %v4485_v6 }
 0x34b   : > { %3918 = vmatprep.subr.bf16.mxu0 %v4476_v7  ;;  %3959 = vmatprep.subr.bf16.mxu1 %v4478_v11 }
 0x34e   : > { %3919 = vmatpush2.bf16.msra.mxu0 %v4475_v12  ;;  %3960 = vmatpush2.bf16.msra.mxu1 %v4477_v59 }
 0x351   : > { %3921 = vmatmul.mubr.bf16.vlgmr.msra.gmra.mxu0 %v5738_v13  ;;  %3962 = vmatmul.mubr.bf16.vlgmr.msra.gmra.mxu1 %v5738_v13  ;;  %v3141_v13 = vrot.slane %v3124_v14, %v892_v50 }
 0x3d1   : > { %v3840_v17 = vpop.f32.mrf.mxu0  ;;  %v3881_v60 = vpop.f32.mrf.mxu1 }
 0x3d2   : > { %v3841_v28 = vadd.f32 %v3840_v17, %v3129_v61  ;;  %v3882_v18 = vadd.f32 %v3881_v60, %v3137_v15 }
 0x3d3   : > { %v3842_v19 = vpop.f32.mrf.mxu0  ;;  %v3883_v47 = vpop.f32.mrf.mxu1 }
 0x3d4   : > { %3970 = vst [vmem:[%s5814_s13] sm:$0xff] %v3841_v28  ;;  %3972 = vst [vmem:[%s5814_s13 + $0x10] sm:$0xff] %v3882_v18  ;;  %v3843_v30 = vadd.f32 %v3842_v19, %v3133_v16  ;;  %v3884_v22 = vadd.f32 %v3883_v47, %v3141_v13 }
 0x3d5   : > { %v3844_v50 = vpop.f32.mrf.mxu0  ;;  %v3885_v24 = vpop.f32.mrf.mxu1 }
 0x3d6   : > { %3971 = vst [vmem:[%s5814_s13 + $0x8] sm:$0xff] %v3843_v30  ;;  %3973 = vst [vmem:[%s5814_s13 + $0x18] sm:$0xff] %v3884_v22 }
 0x3d7   : > { %v3845_v25 = vpop.f32.mrf.mxu0  ;;  %v3886_v62 = vpop.f32.mrf.mxu1 }
 0x411   : > { %v3922_v9 = vpop.f32.mrf.mxu0  ;;  %v3963_v52 = vpop.f32.mrf.mxu1 }
 0x412   : > { %v3923_v41 = vadd.f32 %v3922_v9, %v3145_v38  ;;  %v3964_v20 = vadd.f32 %v3963_v52, %v3153_v39 }
 0x413   : > { %v3924_v42 = vpop.f32.mrf.mxu0  ;;  %v3965_v21 = vpop.f32.mrf.mxu1 }
 0x414   : > { %3974 = vst [vmem:[%s5814_s13 + $0x20] sm:$0xff] %v3923_v41  ;;  %3976 = vst [vmem:[%s5814_s13 + $0x30] sm:$0xff] %v3964_v20  ;;  %v3925_v5 = vadd.f32 %v3924_v42, %v3149_v8  ;;  %v3966_v10 = vadd.f32 %v3965_v21, %v3157_v49 }
 0x415   : > { %v3926_v37 = vpop.f32.mrf.mxu0  ;;  %v3967_v40 = vpop.f32.mrf.mxu1 }
 0x416   : > { %3975 = vst [vmem:[%s5814_s13 + $0x28] sm:$0xff] %v3925_v5  ;;  %3977 = vst [vmem:[%s5814_s13 + $0x38] sm:$0xff] %v3966_v10 }
 0x417   : > { %v3927_v23 = vpop.f32.mrf.mxu0  ;;  %v3968_v43 = vpop.f32.mrf.mxu1 }
 0x418 PF: > { %p16_p7 = scmp.ge.s32.totalorder %s5214_s28, 6   ;;  %s5853_s24 = smov %s5145_s25 }
 0x419   : > { %s5854_s25 = smov %s5224_s8  ;;  %s5855_s26 = smov %s5214_s28 }
 0x41a   :  { %18 = sbr.rel (!%p16_p7) target bundleno = 3 (0x3), region = 118 }
 0x41f   :  { %4000 = vsyncpa [#allocation3], 1 }
 0x420   :  { %4002 = vsyncpa [#allocation3 + $0x1], 1 }
 0x421   :  { %4003 = vsyncpa [#allocation5], 1 }

// kernel: pointnet_forward.10
= control target key start
LH: loop header
LB: loop body
LE: loop exit
PB: predicated region body
PF: predicated region fallthrough
CT: control target
= control target key end

     0   :  { %s1486_s21 = smov 0   ;;  %s1488_s22 = smov 0   ;;  %s1757_s0 = inlined_call_operand.vmem [shape: f32[2,16,3], index: 0, kind: input, shape index: {}]   ;;  %s1758_s1 = inlined_call_operand.vmem [shape: bf16[2,3,64], index: 1, kind: input, shape index: {}]   ;;  %s1759_s2 = inlined_call_operand.vmem [shape: f32[1,64], index: 2, kind: input, shape index: {}]   ;;  %s1760_s3 = inlined_call_operand.vmem [shape: bf16[2,64,128], index: 3, kind: input, shape index: {}]   ;;  %s1761_s4 = inlined_call_operand.vmem [shape: f32[1,128], index: 4, kind: input, shape index: {}]   ;;  %s1762_s5 = inlined_call_operand.vmem [shape: bf16[1,128,1024], index: 5, kind: input, shape index: {}]   ;;  %s1763_s6 = inlined_call_operand.vmem [shape: f32[2,1,1,1024], index: 6, kind: output, shape index: {}]  }
   0x1   :  { %s1490_s23 = smov 0  }
   0x2 LB: > { %s35_s24 = sadd.s32 1, %s1439_s22  ;;  %p1283_p0 = scmp.ge.s32.totalorder %s1443_s23, 1  ;;  %s1443_s23 = sphi %s1490_s23, %s16_s23   ;;  %s1439_s22 = sphi %s1488_s22, %s1765_s22   ;;  %s1435_s21 = sphi %s1486_s21, %s1764_s21  }
   0x3   : > { %p37_p1 = scmp.ge.s32.totalorder %s35_s24, 2  ;;  %p263_p2 = scmp.lt.s32.totalorder %s1443_s23, 3 }
   0x5   : > { %s1767_s24 = smov (%p37_p1, %s35_s24), 0  ;;  %p264_p3 = pnand %p1283_p0, %p263_p2 }
   0x6   : > { %p312_p4 = scmp.lt.s32.totalorder (!%p264_p3), %s1435_s21, 1 }
   0x7   : > { %267 = sbr.rel (%p264_p3) target bundleno = 618 (0x26a), region = 44 }
   0xc   : > { %v1445_v0 = vmov 1   ;;  %v1446_v1 = vmov 0   ;;  %s1769_s21 = smov (!%p312_p4, %s1435_s21), 1  ;;  %v1447_v3 = vmov 0.0   ;;  %v1448_v7 = vmov 2   ;;  %v551_v10 = vld [vmem:[%s1762_s5 + $0x1c0] sm:$0xff] }
   0xd   : > { %1414 = vset.pattern.permute.xlu1 %v1445_v0  ;;  %1413 = vset.pattern.permute.xlu0 %v1446_v1  ;;  %s1363_s25 = sshll.u32 %s1769_s21, 4  ;;  %s1364_s29 = sshll.u32 %s1769_s21, 5  ;;  %vm1449_vm0 = vmmov 0   ;;  %v555_v11 = vld [vmem:[%s1762_s5 + $0x1e0] sm:$0xff]  ;;  %v1525_v12 = vld [vmem:[%s1762_s5 + $0x1c8] sm:$0xff]  ;;  %v359_v38 = vlaneseq  ;;  %vm448_vm1 = vcmask 523264  }
   0xe   : > { %912 = vmatprep.mubr.bf16.mxu1 %v1446_v1  ;;  %s319_s28 = scalar_lea.vmem %s1757_s0, %s1363_s25  ;;  %1370 = vmatprep.subr.bf16.mxu0 %v1447_v3  ;;  %s330_s8 = scalar_lea.vmem %s1760_s3, %s1364_s29  ;;  %v1354_v13 = vcombine.high %v551_v10, %v555_v11  ;;  %v1530_v14 = vld [vmem:[%s1762_s5 + $0x1e8] sm:$0xff]  ;;  %v1353_v15 = vcombine.low %v551_v10, %v555_v11  ;;  %v543_v16 = vld [vmem:[%s1762_s5 + $0x180] sm:$0xff] }
   0xf   : > { %v345_v2 = vld [vmem:[%s319_s28] sm:$0xff]  ;;  %v346_v4 = vld [vmem:[%s319_s28 + $0x8] sm:$0xff]  ;;  %v1417_v5 = vld [vmem:[%s330_s8 + $0x18] sm:$0xff]   ;;  %1378 = vmatprep.mubr.msk.bf16.mxu0 %vm1449_vm0, %v1447_v3  ;;  %v1355_v18 = vcombine.low %v1525_v12, %v1530_v14  ;;  %v1356_v19 = vcombine.high %v1525_v12, %v1530_v14  ;;  %s1286_s17 = sshll.u32 %s1769_s21, 1  ;;  %v1570_v39 = vshrl.u32 %v359_v38, 7  ;;  %s1289_s29 = sshll.u32 %s1769_s21, 3 }
  0x10   : > { %366 = vperm.xlu1 %1414, %v345_v2   ;;  %351 = vperm.xlu0 %1413, %v345_v2   ;;  %v1418_v6 = vld [vmem:[%s330_s8 + $0x10] sm:$0xff]   ;;  %v1419_v8 = vld [vmem:[%s330_s8 + $0x8] sm:$0xff]   ;;  %v1420_v9 = vld [vmem:[%s330_s8] sm:$0xff]   ;;  %s325_s20 = scalar_lea.vmem %s1758_s1, %s1286_s17  ;;  %s338_s8 = scalar_lea.vmem %s1763_s6, %s1289_s29 }
  0x11   : > { %1371 = vmatpush3.bf16.msra.mxu0 %v1417_v5  ;;  %v547_v17 = vld [vmem:[%s1762_s5 + $0x1a0] sm:$0xff]  ;;  %880 = vmatprep.subr.bf16.mxu1 %v1354_v13  ;;  %v375_v42 = vsub.s32 1, %v1570_v39  ;;  %v361_v43 = vsub.s32 0, %v1570_v39  ;;  %v391_v46 = vsub.s32 2, %v1570_v39  ;;  %v548_v5 = vld [vmem:[%s1762_s5 + $0x1a8] sm:$0xff] }
  0x12   : > { %1372 = vmatprep.subr.bf16.mxu0 %v1447_v3  ;;  %v1346_v20 = vcombine.high %v543_v16, %v547_v17  ;;  %881 = vmatpush1.bf16.msra.mxu1 %v1353_v15  ;;  %v1345_v21 = vcombine.low %v543_v16, %v547_v17  ;;  %v535_v22 = vld [vmem:[%s1762_s5 + $0x140] sm:$0xff]  ;;  %v536_v10 = vld [vmem:[%s1762_s5 + $0x148] sm:$0xff] }
  0x13   : > { %v539_v23 = vld [vmem:[%s1762_s5 + $0x160] sm:$0xff]  ;;  %v540_v11 = vld [vmem:[%s1762_s5 + $0x168] sm:$0xff] }
  0x14   : > { %370 = vperm.xlu1 %1414, %v346_v4   ;;  %356 = vperm.xlu0 %1413, %v346_v4   ;;  %v1338_v24 = vcombine.high %v535_v22, %v539_v23  ;;  %v1337_v25 = vcombine.low %v535_v22, %v539_v23  ;;  %v527_v26 = vld [vmem:[%s1762_s5 + $0x100] sm:$0xff]  ;;  %v1340_v15 = vcombine.high %v536_v10, %v540_v11  ;;  %v528_v16 = vld [vmem:[%s1762_s5 + $0x108] sm:$0xff] }
  0x15   : > { %1373 = vmatpush3.bf16.msra.mxu0 %v1418_v6  ;;  %882 = vmatprep.subr.bf16.mxu1 %v1346_v20  ;;  %v531_v27 = vld [vmem:[%s1762_s5 + $0x120] sm:$0xff]  ;;  %v532_v17 = vld [vmem:[%s1762_s5 + $0x128] sm:$0xff] }
  0x16   : > { %1374 = vmatprep.subr.bf16.mxu0 %v1447_v3  ;;  %883 = vmatpush1.bf16.msra.mxu1 %v1345_v21  ;;  %v1330_v28 = vcombine.high %v527_v26, %v531_v27  ;;  %v1329_v29 = vcombine.low %v527_v26, %v531_v27  ;;  %v519_v30 = vld [vmem:[%s1762_s5 + $0xc0] sm:$0xff]  ;;  %v1332_v20 = vcombine.high %v528_v16, %v532_v17  ;;  %v520_v12 = vld [vmem:[%s1762_s5 + $0xc8] sm:$0xff] }
  0x17   : > { %884 = vmatprep.subr.bf16.mxu1 %v1338_v24  ;;  %v523_v31 = vld [vmem:[%s1762_s5 + $0xe0] sm:$0xff]  ;;  %v524_v14 = vld [vmem:[%s1762_s5 + $0xe8] sm:$0xff] }
  0x18   : > { %1416 = vset.pattern.permute.xlu1 %v1448_v7  ;;  %1415 = vset.pattern.permute.xlu0 %v1448_v7  ;;  %v1322_v32 = vcombine.high %v519_v30, %v523_v31  ;;  %v1321_v33 = vcombine.low %v519_v30, %v523_v31  ;;  %v511_v34 = vld [vmem:[%s1762_s5 + $0x80] sm:$0xff]  ;;  %v1324_v21 = vcombine.high %v520_v12, %v524_v14  ;;  %v512_v22 = vld [vmem:[%s1762_s5 + $0x88] sm:$0xff] }
  0x19   : > { %386 = vperm.xlu1 %1416, %v346_v4   ;;  %382 = vperm.xlu0 %1415, %v345_v2   ;;  %v515_v35 = vld [vmem:[%s1762_s5 + $0xa0] sm:$0xff]  ;;  %v544_v4 = vld [vmem:[%s1762_s5 + $0x188] sm:$0xff]  ;;  %v1323_v24 = vcombine.low %v520_v12, %v524_v14 }
  0x1a   : > { %1375 = vmatpush3.bf16.msra.mxu0 %v1419_v8  ;;  %885 = vmatpush1.bf16.msra.mxu1 %v1337_v25  ;;  %v1314_v36 = vcombine.high %v511_v34, %v515_v35  ;;  %v1313_v37 = vcombine.low %v511_v34, %v515_v35  ;;  %v347_v40 = vld [vmem:[%s325_s20] sm:$0x3]  ;;  %v1347_v13 = vcombine.low %v544_v4, %v548_v5  ;;  %v516_v23 = vld [vmem:[%s1762_s5 + $0xa8] sm:$0xff] }
  0x1b   : > { %1376 = vmatprep.subr.bf16.mxu0 %v1447_v3  ;;  %886 = vmatprep.subr.bf16.mxu1 %v1330_v28  ;;  %v348_v41 = vunpack.c.l.bf16 %v347_v40  ;;  %v1290_v62 = vld [vmem:[%s1759_s2] ss:$0 sm:$0xff]  ;;  %v1316_v25 = vcombine.high %v512_v22, %v516_v23  ;;  %v1315_v26 = vcombine.low %v512_v22, %v516_v23  ;;  %v508_v31 = vld [vmem:[%s1762_s5 + $0x68] sm:$0xff]  ;;  %v525_v22 = vld [vmem:[%s1762_s5 + $0xf0] sm:$0xff] }
  0x1c   : > { %v503_v27 = vld [vmem:[%s1762_s5 + $0x40] sm:$0xff]  ;;  %v500_v40 = vld [vmem:[%s1762_s5 + $0x28] sm:$0xff]  ;;  %v526_v23 = vld [vmem:[%s1762_s5 + $0xf8] sm:$0xff] }
  0x1d   : > { %v376_v47 = vrot.slane %v348_v41, %v375_v42  ;;  %v362_v48 = vrot.slane %v348_v41, %v361_v43  ;;  %v392_v51 = vrot.slane %v348_v41, %v391_v46  ;;  %v507_v28 = vld [vmem:[%s1762_s5 + $0x60] sm:$0xff]  ;;  %v554_v46 = vld [vmem:[%s1762_s5 + $0x1d8] sm:$0xff] }
  0x1e   : > { %1377 = vmatpush3.bf16.msra.mxu0 %v1420_v9  ;;  %887 = vmatpush1.bf16.msra.mxu1 %v1329_v29  ;;  %v1348_v9 = vcombine.high %v544_v4, %v548_v5  ;;  %v504_v29 = vld [vmem:[%s1762_s5 + $0x48] sm:$0xff]  ;;  %v1306_v30 = vcombine.high %v503_v27, %v507_v28  ;;  %v1305_v34 = vcombine.low %v503_v27, %v507_v28  ;;  %v495_v35 = vld [vmem:[%s1762_s5] sm:$0xff]  ;;  %v537_v5 = vld [vmem:[%s1762_s5 + $0x150] sm:$0xff] }
  0x1f   : > { %923 = vmatprep.subr.bf16.mxu0 %v1356_v19  ;;  %888 = vmatprep.subr.bf16.mxu1 %v1322_v32  ;;  %v1339_v19 = vcombine.low %v536_v10, %v540_v11  ;;  %v1307_v32 = vcombine.low %v504_v29, %v508_v31  ;;  %v513_v28 = vld [vmem:[%s1762_s5 + $0x90] sm:$0xff] }
  0x22   : > { %889 = vmatpush1.bf16.msra.mxu1 %v1321_v33  ;;  %v1308_v33 = vcombine.high %v504_v29, %v508_v31  ;;  %v517_v29 = vld [vmem:[%s1762_s5 + $0xb0] sm:$0xff]  ;;  %v518_v31 = vld [vmem:[%s1762_s5 + $0xb8] sm:$0xff] }
  0x23   : > { %890 = vmatprep.subr.bf16.mxu1 %v1314_v36  ;;  %v499_v36 = vld [vmem:[%s1762_s5 + $0x20] sm:$0xff] }
  0x24   : > { %v1298_v38 = vcombine.high %v495_v35, %v499_v36  ;;  %v1297_v43 = vcombine.low %v495_v35, %v499_v36  ;;  %v505_v36 = vld [vmem:[%s1762_s5 + $0x50] sm:$0xff] }
  0x26   : > { %891 = vmatpush1.bf16.msra.mxu1 %v1313_v37  ;;  %v496_v37 = vld [vmem:[%s1762_s5 + $0x8] sm:$0xff] }
  0x27   : > { %892 = vmatprep.subr.bf16.mxu1 %v1306_v30  ;;  %v1299_v41 = vcombine.low %v496_v37, %v500_v40  ;;  %v1300_v42 = vcombine.high %v496_v37, %v500_v40  ;;  %v514_v30 = vld [vmem:[%s1762_s5 + $0x98] sm:$0xff]  ;;  %v509_v37 = vld [vmem:[%s1762_s5 + $0x70] sm:$0xff] }
  0x28   : > { %v1320_v35 = vcombine.high %v514_v30, %v518_v31  ;;  %v510_v40 = vld [vmem:[%s1762_s5 + $0x78] sm:$0xff] }
  0x2a   : > { %893 = vmatpush1.bf16.msra.mxu1 %v1305_v34  ;;  %v1318_v34 = vcombine.high %v513_v28, %v517_v29 }
  0x2b   : > { %894 = vmatprep.subr.bf16.mxu1 %v1298_v38  ;;  %v506_v38 = vld [vmem:[%s1762_s5 + $0x58] sm:$0xff] }
  0x2e   : > { %895 = vmatpush1.bf16.msra.mxu1 %v1297_v43  ;;  %v1310_v43 = vcombine.high %v505_v36, %v509_v37 }
  0x8b   : > { %v367_v44 = vpop.permute.xlu1 %366  ;;  %v352_v45 = vpop.permute.xlu0 %351 }
  0x8c   : > { %v377_v52 = vmul.f32 %v376_v47, %v367_v44  ;;  %v363_v53 = vmul.f32 %v362_v48, %v352_v45  ;;  %v553_v44 = vld [vmem:[%s1762_s5 + $0x1d0] sm:$0xff] }
  0x8d   : > { %v557_v45 = vld [vmem:[%s1762_s5 + $0x1f0] sm:$0xff] }
  0x8e   : > { %v379_v58 = vadd.f32 %v377_v52, %v363_v53  ;;  %v1291_v52 = vld [vmem:[%s1761_s4] ss:$0 sm:$0xff] }
  0x8f   : > { %v371_v49 = vpop.permute.xlu1 %370  ;;  %v357_v50 = vpop.permute.xlu0 %356 }
  0x90   : > { %v378_v54 = vmul.f32 %v376_v47, %v371_v49  ;;  %v364_v55 = vmul.f32 %v362_v48, %v357_v50  ;;  %v1358_v47 = vcombine.high %v553_v44, %v557_v45  ;;  %v558_v48 = vld [vmem:[%s1762_s5 + $0x1f8] sm:$0xff]  ;;  %v1357_v49 = vcombine.low %v553_v44, %v557_v45  ;;  %v497_v45 = vld [vmem:[%s1762_s5 + $0x10] sm:$0xff] }
  0x91   : > { %v1359_v50 = vcombine.low %v554_v46, %v558_v48  ;;  %v1312_v44 = vcombine.high %v506_v38, %v510_v40 }
  0x92   : > { %v380_v59 = vadd.f32 %v378_v54, %v364_v55  ;;  %966 = vmatprep.subr.bf16.mxu1 %v1358_v47  ;;  %v498_v47 = vld [vmem:[%s1762_s5 + $0x18] sm:$0xff] }
  0x94   : > { %v387_v56 = vpop.permute.xlu1 %386  ;;  %v383_v57 = vpop.permute.xlu0 %382 }
  0x95   : > { %v394_v60 = vmul.f32 %v392_v51, %v387_v56  ;;  %v393_v61 = vmul.f32 %v392_v51, %v383_v57  ;;  %v1360_v51 = vcombine.high %v554_v46, %v558_v48  ;;  %v501_v46 = vld [vmem:[%s1762_s5 + $0x30] sm:$0xff]  ;;  %v502_v48 = vld [vmem:[%s1762_s5 + $0x38] sm:$0xff] }
  0x97   : > { %v396_v63 = vadd.f32 %v394_v60, %v380_v59  ;;  %v395_v0 = vadd.f32 %v393_v61, %v379_v58  ;;  %v545_v58 = vld [vmem:[%s1762_s5 + $0x190] sm:$0xff]  ;;  %v546_v61 = vld [vmem:[%s1762_s5 + $0x198] sm:$0xff] }
  0x98   : > { %v549_v60 = vld [vmem:[%s1762_s5 + $0x1b0] sm:$0xff] }
  0x99   : > { %v405_v2 = vadd.f32 %v1290_v62, %v396_v63  ;;  %v404_v3 = vadd.f32 %v1290_v62, %v395_v0  ;;  %v550_v62 = vld [vmem:[%s1762_s5 + $0x1b8] sm:$0xff] }
  0x9a   : > { %v1352_v4 = vcombine.high %v546_v61, %v550_v62  ;;  %v1351_v10 = vcombine.low %v546_v61, %v550_v62 }
  0x9b   : > { %v407_v6 = vmax.f32 %v405_v2, 0.0  ;;  %v406_v7 = vmax.f32 %v404_v3, 0.0  ;;  %v1350_v3 = vcombine.high %v545_v58, %v549_v60 }
  0x9d   : > { %v416_v8 = vpack.c.bf16 %v407_v6, %v406_v7  ;;  %v541_v6 = vld [vmem:[%s1762_s5 + $0x170] sm:$0xff]  ;;  %v538_v7 = vld [vmem:[%s1762_s5 + $0x158] sm:$0xff] }
  0x9e   : > { %v1342_v11 = vcombine.high %v537_v5, %v541_v6 }
  0x9f   : > { %1379 = vmatmul.mubr.msk.bf16.vlgmr.msra.gmra.mxu0 %vm448_vm1, %v416_v8  ;;  %v542_v8 = vld [vmem:[%s1762_s5 + $0x178] sm:$0xff] }
  0xa0   : > { %924 = vmatpush1.bf16.msra.mxu0 %v1355_v18  ;;  %955 = vmatprep.mubr.bf16.mxu0 %v1446_v1  ;;  %v1331_v18 = vcombine.low %v528_v16, %v532_v17  ;;  %v533_v16 = vld [vmem:[%s1762_s5 + $0x130] sm:$0xff]  ;;  %v530_v17 = vld [vmem:[%s1762_s5 + $0x118] sm:$0xff]  ;;  %v1343_v12 = vcombine.low %v538_v7, %v542_v8 }
  0xa1   : > { %925 = vmatprep.subr.bf16.mxu0 %v1348_v9  ;;  %v1349_v9 = vcombine.low %v545_v58, %v549_v60 }
  0xa4   : > { %926 = vmatpush1.bf16.msra.mxu0 %v1347_v13  ;;  %v1344_v13 = vcombine.high %v538_v7, %v542_v8 }
  0xa5   : > { %927 = vmatprep.subr.bf16.mxu0 %v1340_v15  ;;  %v529_v15 = vld [vmem:[%s1762_s5 + $0x110] sm:$0xff] }
  0xa6   : > { %v1334_v14 = vcombine.high %v529_v15, %v533_v16 }
  0xa8   : > { %928 = vmatpush1.bf16.msra.mxu0 %v1339_v19  ;;  %v534_v19 = vld [vmem:[%s1762_s5 + $0x138] sm:$0xff] }
  0xa9   : > { %929 = vmatprep.subr.bf16.mxu0 %v1332_v20  ;;  %v1341_v20 = vcombine.low %v537_v5, %v541_v6 }
  0xac   : > { %930 = vmatpush1.bf16.msra.mxu0 %v1331_v18  ;;  %v1336_v18 = vcombine.high %v530_v17, %v534_v19 }
  0xad   : > { %931 = vmatprep.subr.bf16.mxu0 %v1324_v21  ;;  %v521_v21 = vld [vmem:[%s1762_s5 + $0xd0] sm:$0xff] }
  0xb0   : > { %932 = vmatpush1.bf16.msra.mxu0 %v1323_v24  ;;  %v1333_v24 = vcombine.low %v529_v15, %v533_v16 }
  0xb1   : > { %933 = vmatprep.subr.bf16.mxu0 %v1316_v25  ;;  %v1335_v25 = vcombine.low %v530_v17, %v534_v19 }
  0xb4   : > { %934 = vmatpush1.bf16.msra.mxu0 %v1315_v26  ;;  %v1326_v26 = vcombine.high %v521_v21, %v525_v22 }
  0xb5   : > { %935 = vmatprep.subr.bf16.mxu0 %v1308_v33 }
  0xb8   : > { %936 = vmatpush1.bf16.msra.mxu0 %v1307_v32  ;;  %v1325_v32 = vcombine.low %v521_v21, %v525_v22 }
  0xb9   : > { %937 = vmatprep.subr.bf16.mxu0 %v1300_v42  ;;  %v1319_v42 = vcombine.low %v514_v30, %v518_v31 }
  0xbc   : > { %938 = vmatpush1.bf16.msra.mxu0 %v1299_v41  ;;  %v1317_v41 = vcombine.low %v513_v28, %v517_v29 }
  0xbd   : > { %1009 = vmatprep.subr.bf16.mxu0 %v1360_v51  ;;  %v1302_v51 = vcombine.high %v497_v45, %v501_v46 }
 0x15f   : > { %v486_v53 = vpop.f32.mrf.mxu0 }
 0x160   : > { %v487_v55 = vadd.f32 %v1291_v52, %v486_v53  ;;  %v1301_v53 = vcombine.low %v497_v45, %v501_v46 }
 0x161   : > { %v1380_v54 = vpop.f32.mrf.mxu0 }
 0x162   : > { %v493_v63 = vmax.f32 %v487_v55, 0.0  ;;  %v1303_v54 = vcombine.low %v498_v47, %v502_v48 }
 0x163   : > { %v489_v56 = vpop.f32.mrf.mxu0 }
 0x164   : > { %v490_v57 = vadd.f32 %v1291_v52, %v489_v56  ;;  %v1304_v52 = vcombine.high %v498_v47, %v502_v48 }
 0x165   : > { %v1381_v59 = vpop.f32.mrf.mxu0 }
 0x166   : > { %v494_v0 = vmax.f32 %v490_v57, 0.0 }
 0x168   : > { %v1663_v2 = vpack.c.bf16 %v494_v0, %v493_v63 }
 0x16a   : > { %913 = vmatmul.mubr.bf16.vlgmr.msra.gmra.mxu1 %v1663_v2  ;;  %956 = vmatmul.mubr.bf16.vlgmr.msra.gmra.mxu0 %v1663_v2 }
 0x16b   : > { %967 = vmatpush1.bf16.msra.mxu1 %v1357_v49  ;;  %1010 = vmatpush1.bf16.msra.mxu0 %v1359_v50  ;;  %v1309_v49 = vcombine.low %v505_v36, %v509_v37  ;;  %v1311_v50 = vcombine.low %v506_v38, %v510_v40 }
 0x16c   : > { %968 = vmatprep.subr.bf16.mxu1 %v1350_v3  ;;  %1011 = vmatprep.subr.bf16.mxu0 %v1352_v4 }
 0x16d   : > { %998 = vmatprep.mubr.bf16.mxu1 %v1446_v1  ;;  %1041 = vmatprep.mubr.bf16.mxu0 %v1446_v1  ;;  %v522_v1 = vld [vmem:[%s1762_s5 + $0xd8] sm:$0xff] }
 0x16e   : > { %v1328_v27 = vcombine.high %v522_v1, %v526_v23  ;;  %v1327_v33 = vcombine.low %v522_v1, %v526_v23 }
 0x16f   : > { %969 = vmatpush1.bf16.msra.mxu1 %v1349_v9  ;;  %1012 = vmatpush1.bf16.msra.mxu0 %v1351_v10 }
 0x170   : > { %970 = vmatprep.subr.bf16.mxu1 %v1342_v11  ;;  %1013 = vmatprep.subr.bf16.mxu0 %v1344_v13 }
 0x173   : > { %971 = vmatpush1.bf16.msra.mxu1 %v1341_v20  ;;  %1014 = vmatpush1.bf16.msra.mxu0 %v1343_v12 }
 0x174   : > { %972 = vmatprep.subr.bf16.mxu1 %v1334_v14  ;;  %1015 = vmatprep.subr.bf16.mxu0 %v1336_v18 }
 0x177   : > { %973 = vmatpush1.bf16.msra.mxu1 %v1333_v24  ;;  %1016 = vmatpush1.bf16.msra.mxu0 %v1335_v25 }
 0x178   : > { %974 = vmatprep.subr.bf16.mxu1 %v1326_v26  ;;  %1017 = vmatprep.subr.bf16.mxu0 %v1328_v27  ;;  %v1450_v27 = vmov 1966171168  }
 0x179   : > { %v1122_v28 = vunpack.c.l.s4 %v1450_v27 }
 0x17b   : > { %975 = vmatpush1.bf16.msra.mxu1 %v1325_v32  ;;  %1018 = vmatpush1.bf16.msra.mxu0 %v1327_v33 }
 0x17c   : > { %976 = vmatprep.subr.bf16.mxu1 %v1318_v34  ;;  %1019 = vmatprep.subr.bf16.mxu0 %v1320_v35 }
 0x17f   : > { %977 = vmatpush1.bf16.msra.mxu1 %v1317_v41  ;;  %1020 = vmatpush1.bf16.msra.mxu0 %v1319_v42 }
 0x180   : > { %978 = vmatprep.subr.bf16.mxu1 %v1310_v43  ;;  %1021 = vmatprep.subr.bf16.mxu0 %v1312_v44  ;;  %v1123_v44 = vunpack.c.0.s8 %v1122_v28 }
 0x183   : > { %979 = vmatpush1.bf16.msra.mxu1 %v1309_v49  ;;  %1022 = vmatpush1.bf16.msra.mxu0 %v1311_v50 }
 0x184   : > { %980 = vmatprep.subr.bf16.mxu1 %v1302_v51  ;;  %1023 = vmatprep.subr.bf16.mxu0 %v1304_v52 }
 0x187   : > { %981 = vmatpush1.bf16.msra.mxu1 %v1301_v53  ;;  %1024 = vmatpush1.bf16.msra.mxu0 %v1303_v54 }
 0x18a   : > { %999 = vmatmul.mubr.bf16.vlgmr.msra.gmra.mxu1 %v1663_v2  ;;  %1042 = vmatmul.mubr.bf16.vlgmr.msra.gmra.mxu0 %v1663_v2 }
 0x22a   : > { %v914_v55 = vpop.f32.mrf.mxu1  ;;  %v957_v56 = vpop.f32.mrf.mxu0 }
 0x22c   : > { %v916_v57 = vpop.f32.mrf.mxu1  ;;  %v959_v58 = vpop.f32.mrf.mxu0 }
 0x22e   : > { %v918_v59 = vpop.f32.mrf.mxu1  ;;  %v961_v60 = vpop.f32.mrf.mxu0 }
 0x22f   : > { %v1053_v3 = vmax.f32 %v914_v55, %v918_v59  ;;  %v1067_v4 = vmax.f32 %v957_v56, %v961_v60 }
 0x230   : > { %v920_v61 = vpop.f32.mrf.mxu1  ;;  %v963_v62 = vpop.f32.mrf.mxu0 }
 0x231   : > { %v1060_v63 = vmax.f32 %v916_v57, %v920_v61  ;;  %v1074_v0 = vmax.f32 %v959_v58, %v963_v62  ;;  %v1054_v7 = vrot.slane %v1053_v3, 4  ;;  %v1068_v8 = vrot.slane %v1067_v4, 4 }
 0x232   : > { %v1126_v57 = vsub.s32 %v1123_v44, %v1570_v39 }
 0x233   : > { %v1061_v5 = vrot.slane %v1060_v63, 4  ;;  %v1075_v6 = vrot.slane %v1074_v0, 4  ;;  %v1055_v11 = vmax.f32 %v1053_v3, %v1054_v7  ;;  %v1069_v2 = vmax.f32 %v1067_v4, %v1068_v8 }
 0x235   : > { %v1062_v9 = vmax.f32 %v1060_v63, %v1061_v5  ;;  %v1076_v10 = vmax.f32 %v1074_v0, %v1075_v6  ;;  %v1056_v16 = vrot.slane %v1055_v11, 2  ;;  %v1070_v17 = vrot.slane %v1069_v2, 2 }
 0x237   : > { %v1063_v13 = vrot.slane %v1062_v9, 2  ;;  %v1077_v15 = vrot.slane %v1076_v10, 2  ;;  %v1057_v22 = vmax.f32 %v1055_v11, %v1056_v16  ;;  %v1071_v1 = vmax.f32 %v1069_v2, %v1070_v17 }
 0x239   : > { %v1064_v12 = vmax.f32 %v1062_v9, %v1063_v13  ;;  %v1078_v14 = vmax.f32 %v1076_v10, %v1077_v15  ;;  %v1058_v37 = vrot.slane %v1057_v22, 1  ;;  %v1072_v38 = vrot.slane %v1071_v1, 1 }
 0x23b   : > { %v1065_v29 = vrot.slane %v1064_v12, 1  ;;  %v1079_v30 = vrot.slane %v1078_v14, 1  ;;  %v1059_v51 = vmax.f32 %v1057_v22, %v1058_v37  ;;  %v1073_v52 = vmax.f32 %v1071_v1, %v1072_v38 }
 0x23d   : > { %v1066_v45 = vmax.f32 %v1064_v12, %v1065_v29  ;;  %v1080_v46 = vmax.f32 %v1078_v14, %v1079_v30 }
 0x23f   : > { %v1117_v58 = vcombine.low %v1059_v51, %v1066_v45  ;;  %v1118_v59 = vcombine.low %v1073_v52, %v1080_v46 }
 0x241   : > { %v1127_v4 = vrot.slane %v1117_v58, %v1126_v57  ;;  %v1134_v5 = vrot.slane %v1118_v59, %v1126_v57 }
 0x243   : > { %v1149_v2 = vcombine.low %v1127_v4, %v1134_v5 }
 0x245   : > { %v1157_v16 = vrot.slane %v1149_v2, %v1126_v57 }
 0x24a   : > { %v1000_v19 = vpop.f32.mrf.mxu1  ;;  %v1043_v20 = vpop.f32.mrf.mxu0 }
 0x24c   : > { %v1002_v18 = vpop.f32.mrf.mxu1  ;;  %v1045_v21 = vpop.f32.mrf.mxu0 }
 0x24e   : > { %v1004_v23 = vpop.f32.mrf.mxu1  ;;  %v1047_v24 = vpop.f32.mrf.mxu0 }
 0x24f   : > { %v1081_v25 = vmax.f32 %v1000_v19, %v1004_v23  ;;  %v1095_v26 = vmax.f32 %v1043_v20, %v1047_v24 }
 0x250   : > { %v1006_v31 = vpop.f32.mrf.mxu1  ;;  %v1049_v32 = vpop.f32.mrf.mxu0 }
 0x251   : > { %v1082_v33 = vrot.slane %v1081_v25, 4  ;;  %v1096_v34 = vrot.slane %v1095_v26, 4  ;;  %v1088_v35 = vmax.f32 %v1002_v18, %v1006_v31  ;;  %v1102_v36 = vmax.f32 %v1045_v21, %v1049_v32 }
 0x253   : > { %v1083_v40 = vmax.f32 %v1081_v25, %v1082_v33  ;;  %v1097_v41 = vmax.f32 %v1095_v26, %v1096_v34  ;;  %v1089_v42 = vrot.slane %v1088_v35, 4  ;;  %v1103_v43 = vrot.slane %v1102_v36, 4 }
 0x255   : > { %v1084_v47 = vrot.slane %v1083_v40, 2  ;;  %v1098_v48 = vrot.slane %v1097_v41, 2  ;;  %v1090_v49 = vmax.f32 %v1088_v35, %v1089_v42  ;;  %v1104_v50 = vmax.f32 %v1102_v36, %v1103_v43 }
 0x257   : > { %v1085_v53 = vmax.f32 %v1083_v40, %v1084_v47  ;;  %v1099_v54 = vmax.f32 %v1097_v41, %v1098_v48  ;;  %v1091_v55 = vrot.slane %v1090_v49, 2  ;;  %v1105_v56 = vrot.slane %v1104_v50, 2 }
 0x259   : > { %v1086_v60 = vrot.slane %v1085_v53, 1  ;;  %v1100_v61 = vrot.slane %v1099_v54, 1  ;;  %v1092_v62 = vmax.f32 %v1090_v49, %v1091_v55  ;;  %v1106_v63 = vmax.f32 %v1104_v50, %v1105_v56 }
 0x25b   : > { %v1093_v0 = vrot.slane %v1092_v62, 1  ;;  %v1107_v3 = vrot.slane %v1106_v63, 1  ;;  %v1087_v6 = vmax.f32 %v1085_v53, %v1086_v60  ;;  %v1101_v7 = vmax.f32 %v1099_v54, %v1100_v61 }
 0x25d   : > { %v1094_v8 = vmax.f32 %v1092_v62, %v1093_v0  ;;  %v1108_v9 = vmax.f32 %v1106_v63, %v1107_v3 }
 0x25f   : > { %v1119_v10 = vcombine.low %v1087_v6, %v1094_v8  ;;  %v1120_v11 = vcombine.low %v1101_v7, %v1108_v9 }
 0x261   : > { %v1141_v13 = vrot.slane %v1119_v10, %v1126_v57  ;;  %v1148_v39 = vrot.slane %v1120_v11, %v1126_v57 }
 0x263   : > { %v1150_v15 = vcombine.low %v1141_v13, %v1148_v39 }
 0x265   : > { %v1164_v17 = vrot.slane %v1150_v15, %v1126_v57 }
 0x267   : > { %v1165_v19 = vcombine.low %v1157_v16, %v1164_v17 }
 0x269   : > { %1168 = vst [vmem:[%s338_s8] sm:$0xff] %v1165_v19 }
 0x26a PF: > { %s16_s23 = sadd.s32 1, %s1443_s23   ;;  %s1764_s21 = smov %s1439_s22 }
 0x26b   : > { %p13_p5 = scmp.ge.s32.totalorder %s16_s23, 4   ;;  %s1765_s22 = smov %s1767_s24 }
 0x26d   :  { %15 = sbr.rel (!%p13_p5) target bundleno = 2 (0x2), region = 84 }

// kernel: pointnet_forward.11
= control target key start
LH: loop header
LB: loop body
LE: loop exit
PB: predicated region body
PF: predicated region fallthrough
CT: control target
= control target key end

     0   :  { %vm2594_vm0 = vcmask 326656   ;;  %s4622_s1 = inlined_call_operand.vmem [shape: bf16[1024,512], index: 1, kind: input, shape index: {}]   ;;  %s4623_s0 = inlined_call_operand.vmem [shape: f32[8,1024], index: 0, kind: input, shape index: {}]   ;;  %s4624_s3 = inlined_call_operand.vmem [shape: bf16[512,256], index: 3, kind: input, shape index: {}]   ;;  %s4625_s2 = inlined_call_operand.vmem [shape: f32[1,512], index: 2, kind: input, shape index: {}]   ;;  %s4626_s5 = inlined_call_operand.vmem [shape: bf16[256,40], index: 5, kind: input, shape index: {}]   ;;  %s4627_s4 = inlined_call_operand.vmem [shape: f32[1,256], index: 4, kind: input, shape index: {}]   ;;  %s4628_s6 = inlined_call_operand.vmem [shape: f32[1,40], index: 6, kind: input, shape index: {}]   ;;  %s4629_s7 = inlined_call_operand.vmem [shape: f32[8,40], index: 7, kind: output, shape index: {}]  }
   0x1   :  { %v2971_v0 = vld [vmem:[%s4622_s1 + $0xe4] ss:$16 sps:$4 sm:$0xff]   ;;  %v2975_v2 = vld [vmem:[%s4622_s1 + $0xe0] ss:$16 sps:$4 sm:$0xff]   ;;  %v28_v46 = vld [vmem:[%s4623_s0 + $0x8] sm:$0xff] }
   0x2   :  { %v2973_v1 = vld [vmem:[%s4622_s1 + $0x2e4] ss:$16 sps:$4 sm:$0xff]   ;;  %1601 = vmatprep.subr.bf16.mxu0 %v2971_v0  ;;  %v2976_v3 = vld [vmem:[%s4622_s1 + $0x2e0] ss:$16 sps:$4 sm:$0xff]   ;;  %v3658_v49 = vpack.c.bf16 %v28_v46, %v28_v46  ;;  %v30_v50 = vld [vmem:[%s4623_s0 + $0x18] sm:$0xff] }
   0x3   :  { %1642 = vmatprep.subr.bf16.mxu1 %v2973_v1  ;;  %v2977_v4 = vld [vmem:[%s4622_s1 + $0xc4] ss:$16 sps:$4 sm:$0xff]   ;;  %1602 = vmatpush1.bf16.msra.mxu0 %v2975_v2  ;;  %v2981_v6 = vld [vmem:[%s4622_s1 + $0xc0] ss:$16 sps:$4 sm:$0xff]   ;;  %v3666_v52 = vpack.c.bf16 %v30_v50, %v30_v50 }
   0x4   :  { %1643 = vmatpush1.bf16.msra.mxu1 %v2976_v3  ;;  %v2979_v5 = vld [vmem:[%s4622_s1 + $0x2c4] ss:$16 sps:$4 sm:$0xff]   ;;  %1603 = vmatprep.subr.bf16.mxu0 %v2977_v4  ;;  %v2982_v7 = vld [vmem:[%s4622_s1 + $0x2c0] ss:$16 sps:$4 sm:$0xff]  }
   0x5   :  { %1644 = vmatprep.subr.bf16.mxu1 %v2979_v5  ;;  %v2983_v8 = vld [vmem:[%s4622_s1 + $0xa4] ss:$16 sps:$4 sm:$0xff]   ;;  %v2987_v10 = vld [vmem:[%s4622_s1 + $0xa0] ss:$16 sps:$4 sm:$0xff]   ;;  %1633 = vmatprep.mubr.bf16.mxu0 %v3658_v49 }
   0x6   :  { %v2985_v9 = vld [vmem:[%s4622_s1 + $0x2a4] ss:$16 sps:$4 sm:$0xff]   ;;  %v2988_v11 = vld [vmem:[%s4622_s1 + $0x2a0] ss:$16 sps:$4 sm:$0xff]   ;;  %1674 = vmatprep.mubr.bf16.mxu1 %v3666_v52 }
   0x7   :  { %1604 = vmatpush1.bf16.msra.mxu0 %v2981_v6  ;;  %v2989_v12 = vld [vmem:[%s4622_s1 + $0x84] ss:$16 sps:$4 sm:$0xff]   ;;  %v2993_v14 = vld [vmem:[%s4622_s1 + $0x80] ss:$16 sps:$4 sm:$0xff]  }
   0x8   :  { %1645 = vmatpush1.bf16.msra.mxu1 %v2982_v7  ;;  %1605 = vmatprep.subr.bf16.mxu0 %v2983_v8  ;;  %v2991_v13 = vld [vmem:[%s4622_s1 + $0x284] ss:$16 sps:$4 sm:$0xff]   ;;  %v2994_v15 = vld [vmem:[%s4622_s1 + $0x280] ss:$16 sps:$4 sm:$0xff]  }
   0x9   :  { %1646 = vmatprep.subr.bf16.mxu1 %v2985_v9  ;;  %v2995_v16 = vld [vmem:[%s4622_s1 + $0x64] ss:$16 sps:$4 sm:$0xff]   ;;  %v2999_v18 = vld [vmem:[%s4622_s1 + $0x60] ss:$16 sps:$4 sm:$0xff]  }
   0xa   :  { %v2997_v17 = vld [vmem:[%s4622_s1 + $0x264] ss:$16 sps:$4 sm:$0xff]   ;;  %v3000_v19 = vld [vmem:[%s4622_s1 + $0x260] ss:$16 sps:$4 sm:$0xff]  }
   0xb   :  { %1606 = vmatpush1.bf16.msra.mxu0 %v2987_v10  ;;  %v3001_v20 = vld [vmem:[%s4622_s1 + $0x44] ss:$16 sps:$4 sm:$0xff]   ;;  %v3005_v22 = vld [vmem:[%s4622_s1 + $0x40] ss:$16 sps:$4 sm:$0xff]  }
   0xc   :  { %1647 = vmatpush1.bf16.msra.mxu1 %v2988_v11  ;;  %1607 = vmatprep.subr.bf16.mxu0 %v2989_v12  ;;  %v3003_v21 = vld [vmem:[%s4622_s1 + $0x244] ss:$16 sps:$4 sm:$0xff]   ;;  %v3006_v23 = vld [vmem:[%s4622_s1 + $0x240] ss:$16 sps:$4 sm:$0xff]  }
   0xd   :  { %1648 = vmatprep.subr.bf16.mxu1 %v2991_v13  ;;  %v3007_v24 = vld [vmem:[%s4622_s1 + $0x24] ss:$16 sps:$4 sm:$0xff]   ;;  %v3011_v26 = vld [vmem:[%s4622_s1 + $0x20] ss:$16 sps:$4 sm:$0xff]  }
   0xe   :  { %v3009_v25 = vld [vmem:[%s4622_s1 + $0x224] ss:$16 sps:$4 sm:$0xff]   ;;  %v3012_v27 = vld [vmem:[%s4622_s1 + $0x220] ss:$16 sps:$4 sm:$0xff]  }
   0xf   :  { %1608 = vmatpush1.bf16.msra.mxu0 %v2993_v14  ;;  %v3013_v28 = vld [vmem:[%s4622_s1 + $0x4] ss:$16 sps:$4 sm:$0xff]   ;;  %v3017_v30 = vld [vmem:[%s4622_s1] ss:$16 sps:$4 sm:$0xff]  }
  0x10   :  { %1649 = vmatpush1.bf16.msra.mxu1 %v2994_v15  ;;  %1609 = vmatprep.subr.bf16.mxu0 %v2995_v16  ;;  %v3015_v29 = vld [vmem:[%s4622_s1 + $0x204] ss:$16 sps:$4 sm:$0xff]   ;;  %v3018_v31 = vld [vmem:[%s4622_s1 + $0x200] ss:$16 sps:$4 sm:$0xff]  }
  0x11   :  { %1650 = vmatprep.subr.bf16.mxu1 %v2997_v17  ;;  %v3019_v32 = vld [vmem:[%s4622_s1 + $0x1e4] ss:$16 sps:$4 sm:$0xff]   ;;  %v3023_v34 = vld [vmem:[%s4622_s1 + $0x1e0] ss:$16 sps:$4 sm:$0xff]  }
  0x12   :  { %v3021_v33 = vld [vmem:[%s4622_s1 + $0x3e4] ss:$16 sps:$4 sm:$0xff]   ;;  %v3024_v35 = vld [vmem:[%s4622_s1 + $0x3e0] ss:$16 sps:$4 sm:$0xff]  }
  0x13   :  { %1610 = vmatpush1.bf16.msra.mxu0 %v2999_v18  ;;  %v3025_v36 = vld [vmem:[%s4622_s1 + $0x1c4] ss:$16 sps:$4 sm:$0xff]   ;;  %v3029_v38 = vld [vmem:[%s4622_s1 + $0x1c0] ss:$16 sps:$4 sm:$0xff]  }
  0x14   :  { %1651 = vmatpush1.bf16.msra.mxu1 %v3000_v19  ;;  %1611 = vmatprep.subr.bf16.mxu0 %v3001_v20  ;;  %v3027_v37 = vld [vmem:[%s4622_s1 + $0x3c4] ss:$16 sps:$4 sm:$0xff]   ;;  %v3030_v39 = vld [vmem:[%s4622_s1 + $0x3c0] ss:$16 sps:$4 sm:$0xff]  }
  0x15   :  { %1652 = vmatprep.subr.bf16.mxu1 %v3003_v21  ;;  %v3031_v40 = vld [vmem:[%s4622_s1 + $0x1a4] ss:$16 sps:$4 sm:$0xff]   ;;  %v3035_v42 = vld [vmem:[%s4622_s1 + $0x1a0] ss:$16 sps:$4 sm:$0xff]  }
  0x16   :  { %v3033_v41 = vld [vmem:[%s4622_s1 + $0x3a4] ss:$16 sps:$4 sm:$0xff]   ;;  %v3036_v43 = vld [vmem:[%s4622_s1 + $0x3a0] ss:$16 sps:$4 sm:$0xff]  }
  0x17   :  { %1612 = vmatpush1.bf16.msra.mxu0 %v3005_v22  ;;  %v3037_v44 = vld [vmem:[%s4622_s1 + $0x184] ss:$16 sps:$4 sm:$0xff]   ;;  %v3041_v47 = vld [vmem:[%s4622_s1 + $0x180] ss:$16 sps:$4 sm:$0xff]  }
  0x18   :  { %1653 = vmatpush1.bf16.msra.mxu1 %v3006_v23  ;;  %1613 = vmatprep.subr.bf16.mxu0 %v3007_v24  ;;  %v3039_v45 = vld [vmem:[%s4622_s1 + $0x384] ss:$16 sps:$4 sm:$0xff]   ;;  %v3042_v48 = vld [vmem:[%s4622_s1 + $0x380] ss:$16 sps:$4 sm:$0xff]  }
  0x19   :  { %1654 = vmatprep.subr.bf16.mxu1 %v3009_v25  ;;  %v3043_v51 = vld [vmem:[%s4622_s1 + $0x164] ss:$16 sps:$4 sm:$0xff]   ;;  %v3047_v54 = vld [vmem:[%s4622_s1 + $0x160] ss:$16 sps:$4 sm:$0xff]  }
  0x1a   :  { %v3045_v53 = vld [vmem:[%s4622_s1 + $0x364] ss:$16 sps:$4 sm:$0xff]   ;;  %v3048_v55 = vld [vmem:[%s4622_s1 + $0x360] ss:$16 sps:$4 sm:$0xff]  }
  0x1b   :  { %1614 = vmatpush1.bf16.msra.mxu0 %v3011_v26  ;;  %v3049_v56 = vld [vmem:[%s4622_s1 + $0x144] ss:$16 sps:$4 sm:$0xff]   ;;  %v3053_v58 = vld [vmem:[%s4622_s1 + $0x140] ss:$16 sps:$4 sm:$0xff]  }
  0x1c   :  { %1655 = vmatpush1.bf16.msra.mxu1 %v3012_v27  ;;  %1615 = vmatprep.subr.bf16.mxu0 %v3013_v28  ;;  %v3051_v57 = vld [vmem:[%s4622_s1 + $0x344] ss:$16 sps:$4 sm:$0xff]   ;;  %v3054_v59 = vld [vmem:[%s4622_s1 + $0x340] ss:$16 sps:$4 sm:$0xff]  }
  0x1d   :  { %1656 = vmatprep.subr.bf16.mxu1 %v3015_v29  ;;  %v3055_v60 = vld [vmem:[%s4622_s1 + $0x124] ss:$16 sps:$4 sm:$0xff]   ;;  %v3059_v62 = vld [vmem:[%s4622_s1 + $0x120] ss:$16 sps:$4 sm:$0xff]  }
  0x1e   :  { %v3057_v61 = vld [vmem:[%s4622_s1 + $0x324] ss:$16 sps:$4 sm:$0xff]   ;;  %v3060_v63 = vld [vmem:[%s4622_s1 + $0x320] ss:$16 sps:$4 sm:$0xff]  }
  0x1f   :  { %1616 = vmatpush1.bf16.msra.mxu0 %v3017_v30  ;;  %v3061_v0 = vld [vmem:[%s4622_s1 + $0x104] ss:$16 sps:$4 sm:$0xff]   ;;  %v3065_v2 = vld [vmem:[%s4622_s1 + $0x100] ss:$16 sps:$4 sm:$0xff]  }
  0x20   :  { %1657 = vmatpush1.bf16.msra.mxu1 %v3018_v31  ;;  %1617 = vmatprep.subr.bf16.mxu0 %v3019_v32  ;;  %v3063_v1 = vld [vmem:[%s4622_s1 + $0x304] ss:$16 sps:$4 sm:$0xff]   ;;  %v3066_v3 = vld [vmem:[%s4622_s1 + $0x300] ss:$16 sps:$4 sm:$0xff]  }
  0x21   :  { %1658 = vmatprep.subr.bf16.mxu1 %v3021_v33  ;;  %v27_v4 = vld [vmem:[%s4623_s0] sm:$0xff]  ;;  %v29_v5 = vld [vmem:[%s4623_s0 + $0x10] sm:$0xff] }
  0x22   :  { %v3069_v6 = vld [vmem:[%s4622_s1 + $0x4e4] ss:$16 sps:$4 sm:$0xff]   ;;  %v3727_v8 = vpack.c.bf16 %v27_v4, %v27_v4  ;;  %v3729_v9 = vpack.c.bf16 %v29_v5, %v29_v5  ;;  %v3067_v10 = vld [vmem:[%s4622_s1 + $0x4e0] ss:$16 sps:$4 sm:$0xff]  }
  0x23   :  { %1618 = vmatpush2.bf16.msra.mxu0 %v3023_v34  ;;  %v3072_v7 = vld [vmem:[%s4622_s1 + $0x6e4] ss:$16 sps:$4 sm:$0xff]   ;;  %v3070_v11 = vld [vmem:[%s4622_s1 + $0x6e0] ss:$16 sps:$4 sm:$0xff]   ;;  %v32_v34 = vld [vmem:[%s4623_s0 + $0x28] sm:$0xff] }
  0x24   :  { %1659 = vmatpush2.bf16.msra.mxu1 %v3024_v35  ;;  %1619 = vmatprep.subr.bf16.mxu0 %v3025_v36  ;;  %v3075_v12 = vld [vmem:[%s4622_s1 + $0x4c4] ss:$16 sps:$4 sm:$0xff]   ;;  %v3073_v14 = vld [vmem:[%s4622_s1 + $0x4c0] ss:$16 sps:$4 sm:$0xff]  }
  0x25   :  { %1660 = vmatprep.subr.bf16.mxu1 %v3027_v37  ;;  %v3078_v13 = vld [vmem:[%s4622_s1 + $0x6c4] ss:$16 sps:$4 sm:$0xff]   ;;  %v3076_v15 = vld [vmem:[%s4622_s1 + $0x6c0] ss:$16 sps:$4 sm:$0xff]   ;;  %v3814_v37 = vpack.c.bf16 %v32_v34, %v32_v34  ;;  %v3189_v34 = vld [vmem:[%s4622_s1 + $0x6c] ss:$16 sps:$4 sm:$0xff]  }
  0x26   :  { %v3081_v16 = vld [vmem:[%s4622_s1 + $0x4a4] ss:$16 sps:$4 sm:$0xff]   ;;  %v3079_v18 = vld [vmem:[%s4622_s1 + $0x4a0] ss:$16 sps:$4 sm:$0xff]  }
  0x27   :  { %1620 = vmatpush2.bf16.msra.mxu0 %v3029_v38  ;;  %v3084_v17 = vld [vmem:[%s4622_s1 + $0x6a4] ss:$16 sps:$4 sm:$0xff]   ;;  %v3082_v19 = vld [vmem:[%s4622_s1 + $0x6a0] ss:$16 sps:$4 sm:$0xff]   ;;  %v34_v38 = vld [vmem:[%s4623_s0 + $0x38] sm:$0xff] }
  0x28   :  { %1661 = vmatpush2.bf16.msra.mxu1 %v3030_v39  ;;  %1621 = vmatprep.subr.bf16.mxu0 %v3031_v40  ;;  %v3087_v20 = vld [vmem:[%s4622_s1 + $0x484] ss:$16 sps:$4 sm:$0xff]   ;;  %v3085_v22 = vld [vmem:[%s4622_s1 + $0x480] ss:$16 sps:$4 sm:$0xff]   ;;  %v3822_v40 = vpack.c.bf16 %v34_v38, %v34_v38  ;;  %v3190_v38 = vld [vmem:[%s4622_s1 + $0x268] ss:$16 sps:$4 sm:$0xff]  }
  0x29   :  { %1662 = vmatprep.subr.bf16.mxu1 %v3033_v41  ;;  %v3090_v21 = vld [vmem:[%s4622_s1 + $0x684] ss:$16 sps:$4 sm:$0xff]   ;;  %v3088_v23 = vld [vmem:[%s4622_s1 + $0x680] ss:$16 sps:$4 sm:$0xff]  }
  0x2a   :  { %v3093_v24 = vld [vmem:[%s4622_s1 + $0x464] ss:$16 sps:$4 sm:$0xff]   ;;  %v3091_v26 = vld [vmem:[%s4622_s1 + $0x460] ss:$16 sps:$4 sm:$0xff]  }
  0x2b   :  { %1622 = vmatpush2.bf16.msra.mxu0 %v3035_v42  ;;  %v3096_v25 = vld [vmem:[%s4622_s1 + $0x664] ss:$16 sps:$4 sm:$0xff]   ;;  %v3094_v27 = vld [vmem:[%s4622_s1 + $0x660] ss:$16 sps:$4 sm:$0xff]  }
  0x2c   :  { %1663 = vmatpush2.bf16.msra.mxu1 %v3036_v43  ;;  %1623 = vmatprep.subr.bf16.mxu0 %v3037_v44  ;;  %v3099_v28 = vld [vmem:[%s4622_s1 + $0x444] ss:$16 sps:$4 sm:$0xff]   ;;  %v3097_v30 = vld [vmem:[%s4622_s1 + $0x440] ss:$16 sps:$4 sm:$0xff]  }
  0x2d   :  { %1664 = vmatprep.subr.bf16.mxu1 %v3039_v45  ;;  %v3102_v29 = vld [vmem:[%s4622_s1 + $0x644] ss:$16 sps:$4 sm:$0xff]   ;;  %v3100_v31 = vld [vmem:[%s4622_s1 + $0x640] ss:$16 sps:$4 sm:$0xff]  }
  0x2e   :  { %v3105_v32 = vld [vmem:[%s4622_s1 + $0x424] ss:$16 sps:$4 sm:$0xff]   ;;  %v3103_v35 = vld [vmem:[%s4622_s1 + $0x420] ss:$16 sps:$4 sm:$0xff]  }
  0x2f   :  { %1624 = vmatpush2.bf16.msra.mxu0 %v3041_v47  ;;  %v3108_v33 = vld [vmem:[%s4622_s1 + $0x624] ss:$16 sps:$4 sm:$0xff]   ;;  %v3106_v36 = vld [vmem:[%s4622_s1 + $0x620] ss:$16 sps:$4 sm:$0xff]  }
  0x30   :  { %1665 = vmatpush2.bf16.msra.mxu1 %v3042_v48  ;;  %1625 = vmatprep.subr.bf16.mxu0 %v3043_v51  ;;  %v3111_v39 = vld [vmem:[%s4622_s1 + $0x404] ss:$16 sps:$4 sm:$0xff]   ;;  %v3109_v42 = vld [vmem:[%s4622_s1 + $0x400] ss:$16 sps:$4 sm:$0xff]  }
  0x31   :  { %1666 = vmatprep.subr.bf16.mxu1 %v3045_v53  ;;  %v3114_v41 = vld [vmem:[%s4622_s1 + $0x604] ss:$16 sps:$4 sm:$0xff]   ;;  %v3112_v43 = vld [vmem:[%s4622_s1 + $0x600] ss:$16 sps:$4 sm:$0xff]  }
  0x32   :  { %v3117_v44 = vld [vmem:[%s4622_s1 + $0x5e4] ss:$16 sps:$4 sm:$0xff]   ;;  %v3115_v46 = vld [vmem:[%s4622_s1 + $0x5e0] ss:$16 sps:$4 sm:$0xff]  }
  0x33   :  { %1626 = vmatpush2.bf16.msra.mxu0 %v3047_v54  ;;  %v3120_v45 = vld [vmem:[%s4622_s1 + $0x7e4] ss:$16 sps:$4 sm:$0xff]   ;;  %v3118_v47 = vld [vmem:[%s4622_s1 + $0x7e0] ss:$16 sps:$4 sm:$0xff]  }
  0x34   :  { %1667 = vmatpush2.bf16.msra.mxu1 %v3048_v55  ;;  %1627 = vmatprep.subr.bf16.mxu0 %v3049_v56  ;;  %v3123_v48 = vld [vmem:[%s4622_s1 + $0x5c4] ss:$16 sps:$4 sm:$0xff]   ;;  %v3121_v51 = vld [vmem:[%s4622_s1 + $0x5c0] ss:$16 sps:$4 sm:$0xff]  }
  0x35   :  { %1668 = vmatprep.subr.bf16.mxu1 %v3051_v57  ;;  %v3126_v50 = vld [vmem:[%s4622_s1 + $0x7c4] ss:$16 sps:$4 sm:$0xff]   ;;  %v3124_v53 = vld [vmem:[%s4622_s1 + $0x7c0] ss:$16 sps:$4 sm:$0xff]  }
  0x36   :  { %v3129_v54 = vld [vmem:[%s4622_s1 + $0x5a4] ss:$16 sps:$4 sm:$0xff]   ;;  %v3127_v56 = vld [vmem:[%s4622_s1 + $0x5a0] ss:$16 sps:$4 sm:$0xff]  }
  0x37   :  { %1628 = vmatpush2.bf16.msra.mxu0 %v3053_v58  ;;  %v3132_v55 = vld [vmem:[%s4622_s1 + $0x7a4] ss:$16 sps:$4 sm:$0xff]   ;;  %v3130_v57 = vld [vmem:[%s4622_s1 + $0x7a0] ss:$16 sps:$4 sm:$0xff]  }
  0x38   :  { %1669 = vmatpush2.bf16.msra.mxu1 %v3054_v59  ;;  %1629 = vmatprep.subr.bf16.mxu0 %v3055_v60  ;;  %v3135_v58 = vld [vmem:[%s4622_s1 + $0x584] ss:$16 sps:$4 sm:$0xff]   ;;  %v3133_v60 = vld [vmem:[%s4622_s1 + $0x580] ss:$16 sps:$4 sm:$0xff]  }
  0x39   :  { %1670 = vmatprep.subr.bf16.mxu1 %v3057_v61  ;;  %v3138_v59 = vld [vmem:[%s4622_s1 + $0x784] ss:$16 sps:$4 sm:$0xff]   ;;  %v3136_v61 = vld [vmem:[%s4622_s1 + $0x780] ss:$16 sps:$4 sm:$0xff]  }
  0x3a   :  { %v3145_v4 = vld [vmem:[%s4622_s1 + $0x540] ss:$16 sps:$4 sm:$0xff]  }
  0x3b   :  { %1630 = vmatpush2.bf16.msra.mxu0 %v3059_v62  ;;  %v3141_v62 = vld [vmem:[%s4622_s1 + $0x564] ss:$16 sps:$4 sm:$0xff]   ;;  %v3148_v5 = vld [vmem:[%s4622_s1 + $0x740] ss:$16 sps:$4 sm:$0xff]  }
  0x3c   :  { %1671 = vmatpush2.bf16.msra.mxu1 %v3060_v63  ;;  %1631 = vmatprep.subr.bf16.mxu0 %v3061_v0  ;;  %v3144_v63 = vld [vmem:[%s4622_s1 + $0x764] ss:$16 sps:$4 sm:$0xff]   ;;  %v3139_v0 = vld [vmem:[%s4622_s1 + $0x560] ss:$16 sps:$4 sm:$0xff]  }
  0x3d   :  { %1672 = vmatprep.subr.bf16.mxu1 %v3063_v1  ;;  %v3142_v1 = vld [vmem:[%s4622_s1 + $0x760] ss:$16 sps:$4 sm:$0xff]  }
  0x3f   :  { %1632 = vmatpush2.bf16.msra.mxu0 %v3065_v2  ;;  %v3147_v2 = vld [vmem:[%s4622_s1 + $0x544] ss:$16 sps:$4 sm:$0xff]  }
  0x40   :  { %1673 = vmatpush2.bf16.msra.mxu1 %v3066_v3  ;;  %1683 = vmatprep.subr.bf16.mxu0 %v3069_v6  ;;  %v3150_v3 = vld [vmem:[%s4622_s1 + $0x744] ss:$16 sps:$4 sm:$0xff]  }
  0x41   :  { %1724 = vmatprep.subr.bf16.mxu1 %v3072_v7  ;;  %v3153_v6 = vld [vmem:[%s4622_s1 + $0x524] ss:$16 sps:$4 sm:$0xff]  }
  0x42   :  { %1634 = vmatmul.mubr.bf16.vlgmr.msra.gmra.mxu0 %v3727_v8  ;;  %v3156_v7 = vld [vmem:[%s4622_s1 + $0x724] ss:$16 sps:$4 sm:$0xff]  }
  0x43   :  { %1675 = vmatmul.mubr.bf16.vlgmr.msra.gmra.mxu1 %v3729_v9  ;;  %1684 = vmatpush1.bf16.msra.mxu0 %v3067_v10  ;;  %v3151_v10 = vld [vmem:[%s4622_s1 + $0x520] ss:$16 sps:$4 sm:$0xff]  }
  0x44   :  { %1725 = vmatpush1.bf16.msra.mxu1 %v3070_v11  ;;  %1685 = vmatprep.subr.bf16.mxu0 %v3075_v12  ;;  %v3154_v11 = vld [vmem:[%s4622_s1 + $0x720] ss:$16 sps:$4 sm:$0xff]   ;;  %v3159_v12 = vld [vmem:[%s4622_s1 + $0x504] ss:$16 sps:$4 sm:$0xff]  }
  0x45   :  { %1726 = vmatprep.subr.bf16.mxu1 %v3078_v13  ;;  %1715 = vmatprep.mubr.bf16.mxu0 %v3814_v37  ;;  %v3162_v13 = vld [vmem:[%s4622_s1 + $0x704] ss:$16 sps:$4 sm:$0xff]  }
  0x46   :  { %1756 = vmatprep.mubr.bf16.mxu1 %v3822_v40 }
  0x47   :  { %1686 = vmatpush1.bf16.msra.mxu0 %v3073_v14  ;;  %v3157_v14 = vld [vmem:[%s4622_s1 + $0x500] ss:$16 sps:$4 sm:$0xff]  }
  0x48   :  { %1727 = vmatpush1.bf16.msra.mxu1 %v3076_v15  ;;  %1687 = vmatprep.subr.bf16.mxu0 %v3081_v16  ;;  %v3160_v15 = vld [vmem:[%s4622_s1 + $0x700] ss:$16 sps:$4 sm:$0xff]  }
  0x49   :  { %1728 = vmatprep.subr.bf16.mxu1 %v3084_v17  ;;  %v31_v16 = vld [vmem:[%s4623_s0 + $0x20] sm:$0xff]  ;;  %v33_v17 = vld [vmem:[%s4623_s0 + $0x30] sm:$0xff] }
  0x4b   :  { %1688 = vmatpush1.bf16.msra.mxu0 %v3079_v18  ;;  %v3165_v18 = vld [vmem:[%s4622_s1 + $0xec] ss:$16 sps:$4 sm:$0xff]  }
  0x4c   :  { %1729 = vmatpush1.bf16.msra.mxu1 %v3082_v19  ;;  %1689 = vmatprep.subr.bf16.mxu0 %v3087_v20  ;;  %v3168_v19 = vld [vmem:[%s4622_s1 + $0x2ec] ss:$16 sps:$4 sm:$0xff]   ;;  %v3943_v20 = vpack.c.bf16 %v31_v16, %v31_v16 }
  0x4d   :  { %1730 = vmatprep.subr.bf16.mxu1 %v3090_v21  ;;  %v3945_v21 = vpack.c.bf16 %v33_v17, %v33_v17  ;;  %v3249_v16 = vld [vmem:[%s4622_s1 + $0x12c] ss:$16 sps:$4 sm:$0xff]  }
  0x4e   :  { %v3252_v17 = vld [vmem:[%s4622_s1 + $0x32c] ss:$16 sps:$4 sm:$0xff]  }
  0x4f   :  { %1690 = vmatpush1.bf16.msra.mxu0 %v3085_v22  ;;  %v3163_v22 = vld [vmem:[%s4622_s1 + $0xe8] ss:$16 sps:$4 sm:$0xff]  }
  0x50   :  { %1731 = vmatpush1.bf16.msra.mxu1 %v3088_v23  ;;  %1691 = vmatprep.subr.bf16.mxu0 %v3093_v24  ;;  %v3166_v23 = vld [vmem:[%s4622_s1 + $0x2e8] ss:$16 sps:$4 sm:$0xff]   ;;  %v3171_v24 = vld [vmem:[%s4622_s1 + $0xcc] ss:$16 sps:$4 sm:$0xff]  }
  0x51   :  { %1732 = vmatprep.subr.bf16.mxu1 %v3096_v25  ;;  %v3174_v25 = vld [vmem:[%s4622_s1 + $0x2cc] ss:$16 sps:$4 sm:$0xff]  }
  0x53   :  { %1692 = vmatpush1.bf16.msra.mxu0 %v3091_v26  ;;  %v3169_v26 = vld [vmem:[%s4622_s1 + $0xc8] ss:$16 sps:$4 sm:$0xff]  }
  0x54   :  { %1733 = vmatpush1.bf16.msra.mxu1 %v3094_v27  ;;  %1693 = vmatprep.subr.bf16.mxu0 %v3099_v28  ;;  %v3172_v27 = vld [vmem:[%s4622_s1 + $0x2c8] ss:$16 sps:$4 sm:$0xff]   ;;  %v3177_v28 = vld [vmem:[%s4622_s1 + $0xac] ss:$16 sps:$4 sm:$0xff]  }
  0x55   :  { %1734 = vmatprep.subr.bf16.mxu1 %v3102_v29  ;;  %v3180_v29 = vld [vmem:[%s4622_s1 + $0x2ac] ss:$16 sps:$4 sm:$0xff]  }
  0x57   :  { %1694 = vmatpush1.bf16.msra.mxu0 %v3097_v30  ;;  %v3175_v30 = vld [vmem:[%s4622_s1 + $0xa8] ss:$16 sps:$4 sm:$0xff]  }
  0x58   :  { %1735 = vmatpush1.bf16.msra.mxu1 %v3100_v31  ;;  %1695 = vmatprep.subr.bf16.mxu0 %v3105_v32  ;;  %v3178_v31 = vld [vmem:[%s4622_s1 + $0x2a8] ss:$16 sps:$4 sm:$0xff]   ;;  %v3183_v32 = vld [vmem:[%s4622_s1 + $0x8c] ss:$16 sps:$4 sm:$0xff]  }
  0x59   :  { %1736 = vmatprep.subr.bf16.mxu1 %v3108_v33  ;;  %v3184_v33 = vld [vmem:[%s4622_s1 + $0x288] ss:$16 sps:$4 sm:$0xff]  }
  0x5b   :  { %1696 = vmatpush1.bf16.msra.mxu0 %v3103_v35  ;;  %v3192_v35 = vld [vmem:[%s4622_s1 + $0x26c] ss:$16 sps:$4 sm:$0xff]  }
  0x5c   :  { %1737 = vmatpush1.bf16.msra.mxu1 %v3106_v36  ;;  %1697 = vmatprep.subr.bf16.mxu0 %v3111_v39  ;;  %v3187_v36 = vld [vmem:[%s4622_s1 + $0x68] ss:$16 sps:$4 sm:$0xff]   ;;  %v3195_v39 = vld [vmem:[%s4622_s1 + $0x4c] ss:$16 sps:$4 sm:$0xff]  }
  0x5d   :  { %1738 = vmatprep.subr.bf16.mxu1 %v3114_v41  ;;  %v3198_v41 = vld [vmem:[%s4622_s1 + $0x24c] ss:$16 sps:$4 sm:$0xff]  }
  0x5f   :  { %1698 = vmatpush1.bf16.msra.mxu0 %v3109_v42  ;;  %v3193_v42 = vld [vmem:[%s4622_s1 + $0x48] ss:$16 sps:$4 sm:$0xff]  }
  0x60   :  { %1739 = vmatpush1.bf16.msra.mxu1 %v3112_v43  ;;  %1699 = vmatprep.subr.bf16.mxu0 %v3117_v44  ;;  %v3196_v43 = vld [vmem:[%s4622_s1 + $0x248] ss:$16 sps:$4 sm:$0xff]   ;;  %v3201_v44 = vld [vmem:[%s4622_s1 + $0x2c] ss:$16 sps:$4 sm:$0xff]  }
  0x61   :  { %1740 = vmatprep.subr.bf16.mxu1 %v3120_v45  ;;  %v3204_v45 = vld [vmem:[%s4622_s1 + $0x22c] ss:$16 sps:$4 sm:$0xff]  }
  0x63   :  { %1700 = vmatpush2.bf16.msra.mxu0 %v3115_v46  ;;  %v3199_v46 = vld [vmem:[%s4622_s1 + $0x28] ss:$16 sps:$4 sm:$0xff]  }
  0x64   :  { %1741 = vmatpush2.bf16.msra.mxu1 %v3118_v47  ;;  %1701 = vmatprep.subr.bf16.mxu0 %v3123_v48  ;;  %v3202_v47 = vld [vmem:[%s4622_s1 + $0x228] ss:$16 sps:$4 sm:$0xff]   ;;  %v3207_v48 = vld [vmem:[%s4622_s1 + $0xc] ss:$16 sps:$4 sm:$0xff]  }
  0x65   :  { %1742 = vmatprep.subr.bf16.mxu1 %v3126_v50  ;;  %v3210_v50 = vld [vmem:[%s4622_s1 + $0x20c] ss:$16 sps:$4 sm:$0xff]  }
  0x67   :  { %1702 = vmatpush2.bf16.msra.mxu0 %v3121_v51  ;;  %v3205_v51 = vld [vmem:[%s4622_s1 + $0x8] ss:$16 sps:$4 sm:$0xff]  }
  0x68   :  { %1743 = vmatpush2.bf16.msra.mxu1 %v3124_v53  ;;  %1703 = vmatprep.subr.bf16.mxu0 %v3129_v54  ;;  %v3208_v53 = vld [vmem:[%s4622_s1 + $0x208] ss:$16 sps:$4 sm:$0xff]   ;;  %v3213_v54 = vld [vmem:[%s4622_s1 + $0x1ec] ss:$16 sps:$4 sm:$0xff]  }
  0x69   :  { %1744 = vmatprep.subr.bf16.mxu1 %v3132_v55  ;;  %v3216_v55 = vld [vmem:[%s4622_s1 + $0x3ec] ss:$16 sps:$4 sm:$0xff]  }
  0x6b   :  { %1704 = vmatpush2.bf16.msra.mxu0 %v3127_v56  ;;  %v3211_v56 = vld [vmem:[%s4622_s1 + $0x1e8] ss:$16 sps:$4 sm:$0xff]  }
  0x6c   :  { %1745 = vmatpush2.bf16.msra.mxu1 %v3130_v57  ;;  %1705 = vmatprep.subr.bf16.mxu0 %v3135_v58  ;;  %v3214_v57 = vld [vmem:[%s4622_s1 + $0x3e8] ss:$16 sps:$4 sm:$0xff]   ;;  %v3219_v58 = vld [vmem:[%s4622_s1 + $0x1cc] ss:$16 sps:$4 sm:$0xff]  }
  0x6d   :  { %1746 = vmatprep.subr.bf16.mxu1 %v3138_v59  ;;  %v3222_v59 = vld [vmem:[%s4622_s1 + $0x3cc] ss:$16 sps:$4 sm:$0xff]  }
  0x6f   :  { %1706 = vmatpush2.bf16.msra.mxu0 %v3133_v60  ;;  %v3217_v60 = vld [vmem:[%s4622_s1 + $0x1c8] ss:$16 sps:$4 sm:$0xff]  }
  0x70   :  { %1747 = vmatpush2.bf16.msra.mxu1 %v3136_v61  ;;  %1707 = vmatprep.subr.bf16.mxu0 %v3141_v62  ;;  %v3220_v61 = vld [vmem:[%s4622_s1 + $0x3c8] ss:$16 sps:$4 sm:$0xff]   ;;  %v3225_v62 = vld [vmem:[%s4622_s1 + $0x1ac] ss:$16 sps:$4 sm:$0xff]  }
  0x71   :  { %1748 = vmatprep.subr.bf16.mxu1 %v3144_v63  ;;  %v3228_v63 = vld [vmem:[%s4622_s1 + $0x3ac] ss:$16 sps:$4 sm:$0xff]  }
  0x73   :  { %1708 = vmatpush2.bf16.msra.mxu0 %v3139_v0  ;;  %v3223_v0 = vld [vmem:[%s4622_s1 + $0x1a8] ss:$16 sps:$4 sm:$0xff]  }
  0x74   :  { %1749 = vmatpush2.bf16.msra.mxu1 %v3142_v1  ;;  %1709 = vmatprep.subr.bf16.mxu0 %v3147_v2  ;;  %v3226_v1 = vld [vmem:[%s4622_s1 + $0x3a8] ss:$16 sps:$4 sm:$0xff]   ;;  %v3231_v2 = vld [vmem:[%s4622_s1 + $0x18c] ss:$16 sps:$4 sm:$0xff]  }
  0x75   :  { %1750 = vmatprep.subr.bf16.mxu1 %v3150_v3  ;;  %v3234_v3 = vld [vmem:[%s4622_s1 + $0x38c] ss:$16 sps:$4 sm:$0xff]  }
  0x77   :  { %1710 = vmatpush2.bf16.msra.mxu0 %v3145_v4  ;;  %v3229_v4 = vld [vmem:[%s4622_s1 + $0x188] ss:$16 sps:$4 sm:$0xff]  }
  0x78   :  { %1751 = vmatpush2.bf16.msra.mxu1 %v3148_v5  ;;  %1711 = vmatprep.subr.bf16.mxu0 %v3153_v6  ;;  %v3232_v5 = vld [vmem:[%s4622_s1 + $0x388] ss:$16 sps:$4 sm:$0xff]   ;;  %v3237_v6 = vld [vmem:[%s4622_s1 + $0x16c] ss:$16 sps:$4 sm:$0xff]  }
  0x79   :  { %1752 = vmatprep.subr.bf16.mxu1 %v3156_v7  ;;  %v3240_v7 = vld [vmem:[%s4622_s1 + $0x36c] ss:$16 sps:$4 sm:$0xff]  }
  0x7b   :  { %1712 = vmatpush2.bf16.msra.mxu0 %v3151_v10  ;;  %v3235_v10 = vld [vmem:[%s4622_s1 + $0x168] ss:$16 sps:$4 sm:$0xff]  }
  0x7c   :  { %1753 = vmatpush2.bf16.msra.mxu1 %v3154_v11  ;;  %1713 = vmatprep.subr.bf16.mxu0 %v3159_v12  ;;  %v3238_v11 = vld [vmem:[%s4622_s1 + $0x368] ss:$16 sps:$4 sm:$0xff]   ;;  %v3243_v12 = vld [vmem:[%s4622_s1 + $0x14c] ss:$16 sps:$4 sm:$0xff]  }
  0x7d   :  { %1754 = vmatprep.subr.bf16.mxu1 %v3162_v13  ;;  %v3246_v13 = vld [vmem:[%s4622_s1 + $0x34c] ss:$16 sps:$4 sm:$0xff]  }
  0x7f   :  { %1714 = vmatpush2.bf16.msra.mxu0 %v3157_v14  ;;  %v3241_v14 = vld [vmem:[%s4622_s1 + $0x148] ss:$16 sps:$4 sm:$0xff]  }
  0x80   :  { %1755 = vmatpush2.bf16.msra.mxu1 %v3160_v15  ;;  %1765 = vmatprep.subr.bf16.mxu0 %v3165_v18  ;;  %v3244_v15 = vld [vmem:[%s4622_s1 + $0x348] ss:$16 sps:$4 sm:$0xff]  }
  0x81   :  { %1806 = vmatprep.subr.bf16.mxu1 %v3168_v19  ;;  %v3247_v18 = vld [vmem:[%s4622_s1 + $0x128] ss:$16 sps:$4 sm:$0xff]  }
  0x82   :  { %1716 = vmatmul.mubr.bf16.vlgmr.msra.gmra.mxu0 %v3943_v20  ;;  %v3250_v19 = vld [vmem:[%s4622_s1 + $0x328] ss:$16 sps:$4 sm:$0xff]  }
  0x83   :  { %1757 = vmatmul.mubr.bf16.vlgmr.msra.gmra.mxu1 %v3945_v21  ;;  %1766 = vmatpush1.bf16.msra.mxu0 %v3163_v22  ;;  %v3255_v22 = vld [vmem:[%s4622_s1 + $0x10c] ss:$16 sps:$4 sm:$0xff]  }
  0x84   :  { %1807 = vmatpush1.bf16.msra.mxu1 %v3166_v23  ;;  %1767 = vmatprep.subr.bf16.mxu0 %v3171_v24  ;;  %v3258_v23 = vld [vmem:[%s4622_s1 + $0x30c] ss:$16 sps:$4 sm:$0xff]   ;;  %v3253_v24 = vld [vmem:[%s4622_s1 + $0x108] ss:$16 sps:$4 sm:$0xff]  }
  0x85   :  { %1808 = vmatprep.subr.bf16.mxu1 %v3174_v25  ;;  %1797 = vmatprep.mubr.bf16.mxu0 %v3658_v49  ;;  %v3186_v49 = vld [vmem:[%s4622_s1 + $0x28c] ss:$16 sps:$4 sm:$0xff]   ;;  %v3256_v25 = vld [vmem:[%s4622_s1 + $0x308] ss:$16 sps:$4 sm:$0xff]  }
  0x86   :  { %1838 = vmatprep.mubr.bf16.mxu1 %v3666_v52  ;;  %v3181_v52 = vld [vmem:[%s4622_s1 + $0x88] ss:$16 sps:$4 sm:$0xff]  }
  0x87   :  { %1768 = vmatpush1.bf16.msra.mxu0 %v3169_v26  ;;  %v3261_v26 = vld [vmem:[%s4622_s1 + $0x4ec] ss:$16 sps:$4 sm:$0xff]  }
  0x88   :  { %1809 = vmatpush1.bf16.msra.mxu1 %v3172_v27  ;;  %1769 = vmatprep.subr.bf16.mxu0 %v3177_v28  ;;  %v3264_v27 = vld [vmem:[%s4622_s1 + $0x6ec] ss:$16 sps:$4 sm:$0xff]   ;;  %v3259_v28 = vld [vmem:[%s4622_s1 + $0x4e8] ss:$16 sps:$4 sm:$0xff]  }
  0x89   :  { %1810 = vmatprep.subr.bf16.mxu1 %v3180_v29  ;;  %v3262_v29 = vld [vmem:[%s4622_s1 + $0x6e8] ss:$16 sps:$4 sm:$0xff]  }
  0x8b   :  { %1770 = vmatpush1.bf16.msra.mxu0 %v3175_v30  ;;  %v3267_v30 = vld [vmem:[%s4622_s1 + $0x4cc] ss:$16 sps:$4 sm:$0xff]  }
  0x8c   :  { %1811 = vmatpush1.bf16.msra.mxu1 %v3178_v31  ;;  %1771 = vmatprep.subr.bf16.mxu0 %v3183_v32  ;;  %v3270_v31 = vld [vmem:[%s4622_s1 + $0x6cc] ss:$16 sps:$4 sm:$0xff]   ;;  %v3265_v32 = vld [vmem:[%s4622_s1 + $0x4c8] ss:$16 sps:$4 sm:$0xff]  }
  0x8d   :  { %1812 = vmatprep.subr.bf16.mxu1 %v3186_v49  ;;  %v3268_v49 = vld [vmem:[%s4622_s1 + $0x6c8] ss:$16 sps:$4 sm:$0xff]  }
  0x8f   :  { %1772 = vmatpush1.bf16.msra.mxu0 %v3181_v52  ;;  %v3273_v52 = vld [vmem:[%s4622_s1 + $0x4ac] ss:$16 sps:$4 sm:$0xff]  }
  0x90   :  { %1813 = vmatpush1.bf16.msra.mxu1 %v3184_v33  ;;  %1773 = vmatprep.subr.bf16.mxu0 %v3189_v34  ;;  %v3276_v33 = vld [vmem:[%s4622_s1 + $0x6ac] ss:$16 sps:$4 sm:$0xff]   ;;  %v3271_v34 = vld [vmem:[%s4622_s1 + $0x4a8] ss:$16 sps:$4 sm:$0xff]  }
  0x91   :  { %1814 = vmatprep.subr.bf16.mxu1 %v3192_v35  ;;  %v3282_v35 = vld [vmem:[%s4622_s1 + $0x68c] ss:$16 sps:$4 sm:$0xff]  }
  0x93   :  { %1774 = vmatpush1.bf16.msra.mxu0 %v3187_v36  ;;  %v3277_v36 = vld [vmem:[%s4622_s1 + $0x488] ss:$16 sps:$4 sm:$0xff]  }
  0x94   :  { %1815 = vmatpush1.bf16.msra.mxu1 %v3190_v38  ;;  %1775 = vmatprep.subr.bf16.mxu0 %v3195_v39  ;;  %v3288_v38 = vld [vmem:[%s4622_s1 + $0x66c] ss:$16 sps:$4 sm:$0xff]   ;;  %v3283_v39 = vld [vmem:[%s4622_s1 + $0x468] ss:$16 sps:$4 sm:$0xff]  }
  0x95   :  { %1816 = vmatprep.subr.bf16.mxu1 %v3198_v41  ;;  %v3286_v41 = vld [vmem:[%s4622_s1 + $0x668] ss:$16 sps:$4 sm:$0xff]  }
  0x97   :  { %1776 = vmatpush1.bf16.msra.mxu0 %v3193_v42  ;;  %v3291_v42 = vld [vmem:[%s4622_s1 + $0x44c] ss:$16 sps:$4 sm:$0xff]  }
  0x98   :  { %1817 = vmatpush1.bf16.msra.mxu1 %v3196_v43  ;;  %1777 = vmatprep.subr.bf16.mxu0 %v3201_v44  ;;  %v3294_v43 = vld [vmem:[%s4622_s1 + $0x64c] ss:$16 sps:$4 sm:$0xff]   ;;  %v3289_v44 = vld [vmem:[%s4622_s1 + $0x448] ss:$16 sps:$4 sm:$0xff]  }
  0x99   :  { %1818 = vmatprep.subr.bf16.mxu1 %v3204_v45  ;;  %v3292_v45 = vld [vmem:[%s4622_s1 + $0x648] ss:$16 sps:$4 sm:$0xff]  }
  0x9b   :  { %1778 = vmatpush1.bf16.msra.mxu0 %v3199_v46  ;;  %v3297_v46 = vld [vmem:[%s4622_s1 + $0x42c] ss:$16 sps:$4 sm:$0xff]  }
  0x9c   :  { %1819 = vmatpush1.bf16.msra.mxu1 %v3202_v47  ;;  %1779 = vmatprep.subr.bf16.mxu0 %v3207_v48  ;;  %v3300_v47 = vld [vmem:[%s4622_s1 + $0x62c] ss:$16 sps:$4 sm:$0xff]   ;;  %v3295_v48 = vld [vmem:[%s4622_s1 + $0x428] ss:$16 sps:$4 sm:$0xff]  }
  0x9d   :  { %1820 = vmatprep.subr.bf16.mxu1 %v3210_v50  ;;  %v3298_v50 = vld [vmem:[%s4622_s1 + $0x628] ss:$16 sps:$4 sm:$0xff]  }
  0x9f   :  { %1780 = vmatpush1.bf16.msra.mxu0 %v3205_v51  ;;  %v3303_v51 = vld [vmem:[%s4622_s1 + $0x40c] ss:$16 sps:$4 sm:$0xff]  }
  0xa0   :  { %1821 = vmatpush1.bf16.msra.mxu1 %v3208_v53  ;;  %1781 = vmatprep.subr.bf16.mxu0 %v3213_v54  ;;  %v3306_v53 = vld [vmem:[%s4622_s1 + $0x60c] ss:$16 sps:$4 sm:$0xff]   ;;  %v3301_v54 = vld [vmem:[%s4622_s1 + $0x408] ss:$16 sps:$4 sm:$0xff]  }
  0xa1   :  { %1822 = vmatprep.subr.bf16.mxu1 %v3216_v55  ;;  %v3304_v55 = vld [vmem:[%s4622_s1 + $0x608] ss:$16 sps:$4 sm:$0xff]  }
  0xa3   :  { %1782 = vmatpush2.bf16.msra.mxu0 %v3211_v56  ;;  %v3309_v56 = vld [vmem:[%s4622_s1 + $0x5ec] ss:$16 sps:$4 sm:$0xff]  }
  0xa4   :  { %1823 = vmatpush2.bf16.msra.mxu1 %v3214_v57  ;;  %1783 = vmatprep.subr.bf16.mxu0 %v3219_v58  ;;  %v3312_v57 = vld [vmem:[%s4622_s1 + $0x7ec] ss:$16 sps:$4 sm:$0xff]   ;;  %v3307_v58 = vld [vmem:[%s4622_s1 + $0x5e8] ss:$16 sps:$4 sm:$0xff]  }
  0xa5   :  { %1824 = vmatprep.subr.bf16.mxu1 %v3222_v59  ;;  %v3310_v59 = vld [vmem:[%s4622_s1 + $0x7e8] ss:$16 sps:$4 sm:$0xff]  }
  0xa7   :  { %1784 = vmatpush2.bf16.msra.mxu0 %v3217_v60  ;;  %v3315_v60 = vld [vmem:[%s4622_s1 + $0x5cc] ss:$16 sps:$4 sm:$0xff]  }
  0xa8   :  { %1825 = vmatpush2.bf16.msra.mxu1 %v3220_v61  ;;  %1785 = vmatprep.subr.bf16.mxu0 %v3225_v62  ;;  %v3318_v61 = vld [vmem:[%s4622_s1 + $0x7cc] ss:$16 sps:$4 sm:$0xff]   ;;  %v3313_v62 = vld [vmem:[%s4622_s1 + $0x5c8] ss:$16 sps:$4 sm:$0xff]  }
  0xa9   :  { %1826 = vmatprep.subr.bf16.mxu1 %v3228_v63  ;;  %v3316_v63 = vld [vmem:[%s4622_s1 + $0x7c8] ss:$16 sps:$4 sm:$0xff]  }
  0xab   :  { %1786 = vmatpush2.bf16.msra.mxu0 %v3223_v0  ;;  %v3321_v0 = vld [vmem:[%s4622_s1 + $0x5ac] ss:$16 sps:$4 sm:$0xff]  }
  0xac   :  { %1827 = vmatpush2.bf16.msra.mxu1 %v3226_v1  ;;  %1787 = vmatprep.subr.bf16.mxu0 %v3231_v2  ;;  %v3324_v1 = vld [vmem:[%s4622_s1 + $0x7ac] ss:$16 sps:$4 sm:$0xff]   ;;  %v3319_v2 = vld [vmem:[%s4622_s1 + $0x5a8] ss:$16 sps:$4 sm:$0xff]  }
  0xad   :  { %1828 = vmatprep.subr.bf16.mxu1 %v3234_v3  ;;  %v3322_v3 = vld [vmem:[%s4622_s1 + $0x7a8] ss:$16 sps:$4 sm:$0xff]  }
  0xaf   :  { %1788 = vmatpush2.bf16.msra.mxu0 %v3229_v4  ;;  %v3327_v4 = vld [vmem:[%s4622_s1 + $0x58c] ss:$16 sps:$4 sm:$0xff]  }
  0xb0   :  { %1829 = vmatpush2.bf16.msra.mxu1 %v3232_v5  ;;  %1789 = vmatprep.subr.bf16.mxu0 %v3237_v6  ;;  %v3330_v5 = vld [vmem:[%s4622_s1 + $0x78c] ss:$16 sps:$4 sm:$0xff]   ;;  %v3325_v6 = vld [vmem:[%s4622_s1 + $0x588] ss:$16 sps:$4 sm:$0xff]  }
  0xb1   :  { %1830 = vmatprep.subr.bf16.mxu1 %v3240_v7  ;;  %v3328_v7 = vld [vmem:[%s4622_s1 + $0x788] ss:$16 sps:$4 sm:$0xff]  }
  0xb3   :  { %1790 = vmatpush2.bf16.msra.mxu0 %v3235_v10  ;;  %v3333_v10 = vld [vmem:[%s4622_s1 + $0x56c] ss:$16 sps:$4 sm:$0xff]  }
  0xb4   :  { %1831 = vmatpush2.bf16.msra.mxu1 %v3238_v11  ;;  %1791 = vmatprep.subr.bf16.mxu0 %v3243_v12  ;;  %v3336_v11 = vld [vmem:[%s4622_s1 + $0x76c] ss:$16 sps:$4 sm:$0xff]   ;;  %v3331_v12 = vld [vmem:[%s4622_s1 + $0x568] ss:$16 sps:$4 sm:$0xff]  }
  0xb5   :  { %1832 = vmatprep.subr.bf16.mxu1 %v3246_v13  ;;  %v3334_v13 = vld [vmem:[%s4622_s1 + $0x768] ss:$16 sps:$4 sm:$0xff]  }
  0xb7   :  { %1792 = vmatpush2.bf16.msra.mxu0 %v3241_v14  ;;  %v3339_v14 = vld [vmem:[%s4622_s1 + $0x54c] ss:$16 sps:$4 sm:$0xff]  }
  0xb8   :  { %1833 = vmatpush2.bf16.msra.mxu1 %v3244_v15  ;;  %1793 = vmatprep.subr.bf16.mxu0 %v3249_v16  ;;  %v3342_v15 = vld [vmem:[%s4622_s1 + $0x74c] ss:$16 sps:$4 sm:$0xff]   ;;  %v3337_v16 = vld [vmem:[%s4622_s1 + $0x548] ss:$16 sps:$4 sm:$0xff]  }
  0xb9   :  { %1834 = vmatprep.subr.bf16.mxu1 %v3252_v17  ;;  %v3340_v17 = vld [vmem:[%s4622_s1 + $0x748] ss:$16 sps:$4 sm:$0xff]  }
  0xbb   :  { %1794 = vmatpush2.bf16.msra.mxu0 %v3247_v18  ;;  %v3345_v18 = vld [vmem:[%s4622_s1 + $0x52c] ss:$16 sps:$4 sm:$0xff]  }
  0xbc   :  { %1835 = vmatpush2.bf16.msra.mxu1 %v3250_v19  ;;  %1795 = vmatprep.subr.bf16.mxu0 %v3255_v22  ;;  %v3348_v19 = vld [vmem:[%s4622_s1 + $0x72c] ss:$16 sps:$4 sm:$0xff]   ;;  %v3343_v22 = vld [vmem:[%s4622_s1 + $0x528] ss:$16 sps:$4 sm:$0xff]  }
  0xbd   :  { %1836 = vmatprep.subr.bf16.mxu1 %v3258_v23  ;;  %v3346_v23 = vld [vmem:[%s4622_s1 + $0x728] ss:$16 sps:$4 sm:$0xff]  }
  0xbf   :  { %1796 = vmatpush2.bf16.msra.mxu0 %v3253_v24  ;;  %v3351_v24 = vld [vmem:[%s4622_s1 + $0x50c] ss:$16 sps:$4 sm:$0xff]  }
  0xc0   :  { %1837 = vmatpush2.bf16.msra.mxu1 %v3256_v25  ;;  %1847 = vmatprep.subr.bf16.mxu0 %v3261_v26  ;;  %v3354_v25 = vld [vmem:[%s4622_s1 + $0x70c] ss:$16 sps:$4 sm:$0xff]   ;;  %v3349_v26 = vld [vmem:[%s4622_s1 + $0x508] ss:$16 sps:$4 sm:$0xff]  }
  0xc1   :  { %1888 = vmatprep.subr.bf16.mxu1 %v3264_v27  ;;  %v3352_v27 = vld [vmem:[%s4622_s1 + $0x708] ss:$16 sps:$4 sm:$0xff]  }
  0xc2   :  { %1798 = vmatmul.mubr.bf16.vlgmr.msra.gmra.mxu0 %v3727_v8  ;;  %v3274_v8 = vld [vmem:[%s4622_s1 + $0x6a8] ss:$16 sps:$4 sm:$0xff]  }
  0xc3   :  { %1839 = vmatmul.mubr.bf16.vlgmr.msra.gmra.mxu1 %v3729_v9  ;;  %1848 = vmatpush1.bf16.msra.mxu0 %v3259_v28  ;;  %v3279_v9 = vld [vmem:[%s4622_s1 + $0x48c] ss:$16 sps:$4 sm:$0xff]  }
  0xc4   :  { %1889 = vmatpush1.bf16.msra.mxu1 %v3262_v29  ;;  %1849 = vmatprep.subr.bf16.mxu0 %v3267_v30  ;;  %v3357_v28 = vld [vmem:[%s4624_s3 + $0x74] ss:$8 sps:$4 sm:$0xff]   ;;  %v3355_v29 = vld [vmem:[%s4624_s3 + $0x70] ss:$8 sps:$4 sm:$0xff]   ;;  %v3360_v30 = vld [vmem:[%s4624_s3 + $0x64] ss:$8 sps:$4 sm:$0xff]  }
  0xc5   :  { %1890 = vmatprep.subr.bf16.mxu1 %v3270_v31  ;;  %1879 = vmatprep.mubr.bf16.mxu0 %v3814_v37  ;;  %v3280_v37 = vld [vmem:[%s4622_s1 + $0x688] ss:$16 sps:$4 sm:$0xff]  }
  0xc6   :  { %1920 = vmatprep.mubr.bf16.mxu1 %v3822_v40  ;;  %v3285_v40 = vld [vmem:[%s4622_s1 + $0x46c] ss:$16 sps:$4 sm:$0xff]  }
  0xc7   :  { %1850 = vmatpush1.bf16.msra.mxu0 %v3265_v32 }
  0xc8   :  { %1891 = vmatpush1.bf16.msra.mxu1 %v3268_v49  ;;  %1851 = vmatprep.subr.bf16.mxu0 %v3273_v52  ;;  %v3358_v49 = vld [vmem:[%s4624_s3 + $0x60] ss:$8 sps:$4 sm:$0xff]  }
  0xc9   :  { %1892 = vmatprep.subr.bf16.mxu1 %v3276_v33 }
  0xcb   :  { %1852 = vmatpush1.bf16.msra.mxu0 %v3271_v34  ;;  %v3363_v34 = vld [vmem:[%s4624_s3 + $0x54] ss:$8 sps:$4 sm:$0xff]  }
  0xcc   :  { %1893 = vmatpush1.bf16.msra.mxu1 %v3274_v8  ;;  %1853 = vmatprep.subr.bf16.mxu0 %v3279_v9 }
  0xcd   :  { %1894 = vmatprep.subr.bf16.mxu1 %v3282_v35 }
  0xcf   :  { %1854 = vmatpush1.bf16.msra.mxu0 %v3277_v36  ;;  %v3366_v36 = vld [vmem:[%s4624_s3 + $0x44] ss:$8 sps:$4 sm:$0xff]  }
  0xd0   :  { %1895 = vmatpush1.bf16.msra.mxu1 %v3280_v37  ;;  %1855 = vmatprep.subr.bf16.mxu0 %v3285_v40  ;;  %v3403_v37 = vld [vmem:[%s4624_s3 + $0x170] ss:$8 sps:$4 sm:$0xff]   ;;  %v3405_v40 = vld [vmem:[%s4624_s3 + $0x174] ss:$8 sps:$4 sm:$0xff]  }
  0xd1   :  { %1896 = vmatprep.subr.bf16.mxu1 %v3288_v38  ;;  %v3408_v38 = vld [vmem:[%s4624_s3 + $0x164] ss:$8 sps:$4 sm:$0xff]  }
  0xd3   :  { %1856 = vmatpush1.bf16.msra.mxu0 %v3283_v39  ;;  %v3364_v39 = vld [vmem:[%s4624_s3 + $0x40] ss:$8 sps:$4 sm:$0xff]  }
  0xd4   :  { %1897 = vmatpush1.bf16.msra.mxu1 %v3286_v41  ;;  %1857 = vmatprep.subr.bf16.mxu0 %v3291_v42  ;;  %v3406_v41 = vld [vmem:[%s4624_s3 + $0x160] ss:$8 sps:$4 sm:$0xff]   ;;  %v3369_v42 = vld [vmem:[%s4624_s3 + $0x34] ss:$8 sps:$4 sm:$0xff]  }
  0xd5   :  { %1898 = vmatprep.subr.bf16.mxu1 %v3294_v43  ;;  %v3411_v43 = vld [vmem:[%s4624_s3 + $0x154] ss:$8 sps:$4 sm:$0xff]  }
  0xd7   :  { %1858 = vmatpush1.bf16.msra.mxu0 %v3289_v44  ;;  %v3367_v44 = vld [vmem:[%s4624_s3 + $0x30] ss:$8 sps:$4 sm:$0xff]  }
  0xd8   :  { %1899 = vmatpush1.bf16.msra.mxu1 %v3292_v45  ;;  %1859 = vmatprep.subr.bf16.mxu0 %v3297_v46  ;;  %v3409_v45 = vld [vmem:[%s4624_s3 + $0x150] ss:$8 sps:$4 sm:$0xff]   ;;  %v3372_v46 = vld [vmem:[%s4624_s3 + $0x24] ss:$8 sps:$4 sm:$0xff]  }
  0xd9   :  { %1900 = vmatprep.subr.bf16.mxu1 %v3300_v47  ;;  %v3414_v47 = vld [vmem:[%s4624_s3 + $0x144] ss:$8 sps:$4 sm:$0xff]  }
  0xdb   :  { %1860 = vmatpush1.bf16.msra.mxu0 %v3295_v48  ;;  %v3370_v48 = vld [vmem:[%s4624_s3 + $0x20] ss:$8 sps:$4 sm:$0xff]  }
  0xdc   :  { %1901 = vmatpush1.bf16.msra.mxu1 %v3298_v50  ;;  %1861 = vmatprep.subr.bf16.mxu0 %v3303_v51  ;;  %v3412_v50 = vld [vmem:[%s4624_s3 + $0x140] ss:$8 sps:$4 sm:$0xff]   ;;  %v3375_v51 = vld [vmem:[%s4624_s3 + $0x14] ss:$8 sps:$4 sm:$0xff]  }
  0xdd   :  { %1902 = vmatprep.subr.bf16.mxu1 %v3306_v53  ;;  %v3417_v53 = vld [vmem:[%s4624_s3 + $0x134] ss:$8 sps:$4 sm:$0xff]  }
  0xdf   :  { %1862 = vmatpush1.bf16.msra.mxu0 %v3301_v54  ;;  %v3373_v54 = vld [vmem:[%s4624_s3 + $0x10] ss:$8 sps:$4 sm:$0xff]  }
  0xe0   :  { %1903 = vmatpush1.bf16.msra.mxu1 %v3304_v55  ;;  %1863 = vmatprep.subr.bf16.mxu0 %v3309_v56  ;;  %v3415_v55 = vld [vmem:[%s4624_s3 + $0x130] ss:$8 sps:$4 sm:$0xff]   ;;  %v3378_v56 = vld [vmem:[%s4624_s3 + $0x4] ss:$8 sps:$4 sm:$0xff]  }
  0xe1   :  { %1904 = vmatprep.subr.bf16.mxu1 %v3312_v57  ;;  %v3420_v57 = vld [vmem:[%s4624_s3 + $0x124] ss:$8 sps:$4 sm:$0xff]  }
  0xe3   :  { %1864 = vmatpush2.bf16.msra.mxu0 %v3307_v58  ;;  %v3376_v58 = vld [vmem:[%s4624_s3] ss:$8 sps:$4 sm:$0xff]  }
  0xe4   :  { %1905 = vmatpush2.bf16.msra.mxu1 %v3310_v59  ;;  %1865 = vmatprep.subr.bf16.mxu0 %v3315_v60  ;;  %v3418_v59 = vld [vmem:[%s4624_s3 + $0x120] ss:$8 sps:$4 sm:$0xff]   ;;  %v3381_v60 = vld [vmem:[%s4624_s3 + $0xf4] ss:$8 sps:$4 sm:$0xff]  }
  0xe5   :  { %1906 = vmatprep.subr.bf16.mxu1 %v3318_v61  ;;  %v3423_v61 = vld [vmem:[%s4624_s3 + $0x114] ss:$8 sps:$4 sm:$0xff]  }
  0xe7   :  { %1866 = vmatpush2.bf16.msra.mxu0 %v3313_v62  ;;  %v3379_v62 = vld [vmem:[%s4624_s3 + $0xf0] ss:$8 sps:$4 sm:$0xff]  }
  0xe8   :  { %1907 = vmatpush2.bf16.msra.mxu1 %v3316_v63  ;;  %1867 = vmatprep.subr.bf16.mxu0 %v3321_v0  ;;  %v3421_v63 = vld [vmem:[%s4624_s3 + $0x110] ss:$8 sps:$4 sm:$0xff]   ;;  %v3384_v0 = vld [vmem:[%s4624_s3 + $0xe4] ss:$8 sps:$4 sm:$0xff]  }
  0xe9   :  { %1908 = vmatprep.subr.bf16.mxu1 %v3324_v1  ;;  %v3426_v1 = vld [vmem:[%s4624_s3 + $0x104] ss:$8 sps:$4 sm:$0xff]  }
  0xeb   :  { %1868 = vmatpush2.bf16.msra.mxu0 %v3319_v2  ;;  %v3382_v2 = vld [vmem:[%s4624_s3 + $0xe0] ss:$8 sps:$4 sm:$0xff]  }
  0xec   :  { %1909 = vmatpush2.bf16.msra.mxu1 %v3322_v3  ;;  %1869 = vmatprep.subr.bf16.mxu0 %v3327_v4  ;;  %v3424_v3 = vld [vmem:[%s4624_s3 + $0x100] ss:$8 sps:$4 sm:$0xff]   ;;  %v3387_v4 = vld [vmem:[%s4624_s3 + $0xd4] ss:$8 sps:$4 sm:$0xff]  }
  0xed   :  { %1910 = vmatprep.subr.bf16.mxu1 %v3330_v5  ;;  %v3429_v5 = vld [vmem:[%s4624_s3 + $0x1f4] ss:$8 sps:$4 sm:$0xff]  }
  0xef   :  { %1870 = vmatpush2.bf16.msra.mxu0 %v3325_v6  ;;  %v3385_v6 = vld [vmem:[%s4624_s3 + $0xd0] ss:$8 sps:$4 sm:$0xff]  }
  0xf0   :  { %1911 = vmatpush2.bf16.msra.mxu1 %v3328_v7  ;;  %1871 = vmatprep.subr.bf16.mxu0 %v3333_v10  ;;  %v3427_v7 = vld [vmem:[%s4624_s3 + $0x1f0] ss:$8 sps:$4 sm:$0xff]   ;;  %v3390_v10 = vld [vmem:[%s4624_s3 + $0xc4] ss:$8 sps:$4 sm:$0xff]  }
  0xf1   :  { %1912 = vmatprep.subr.bf16.mxu1 %v3336_v11  ;;  %v3432_v11 = vld [vmem:[%s4624_s3 + $0x1e4] ss:$8 sps:$4 sm:$0xff]  }
  0xf3   :  { %1872 = vmatpush2.bf16.msra.mxu0 %v3331_v12  ;;  %v3388_v12 = vld [vmem:[%s4624_s3 + $0xc0] ss:$8 sps:$4 sm:$0xff]  }
  0xf4   :  { %1913 = vmatpush2.bf16.msra.mxu1 %v3334_v13  ;;  %1873 = vmatprep.subr.bf16.mxu0 %v3339_v14  ;;  %v3430_v13 = vld [vmem:[%s4624_s3 + $0x1e0] ss:$8 sps:$4 sm:$0xff]   ;;  %v3393_v14 = vld [vmem:[%s4624_s3 + $0xb4] ss:$8 sps:$4 sm:$0xff]  }
  0xf5   :  { %1914 = vmatprep.subr.bf16.mxu1 %v3342_v15  ;;  %v3435_v15 = vld [vmem:[%s4624_s3 + $0x1d4] ss:$8 sps:$4 sm:$0xff]  }
  0xf7   :  { %1874 = vmatpush2.bf16.msra.mxu0 %v3337_v16  ;;  %v301_v16 = vlaneseq }
  0xf8   :  { %1915 = vmatpush2.bf16.msra.mxu1 %v3340_v17  ;;  %1875 = vmatprep.subr.bf16.mxu0 %v3345_v18  ;;  %v3391_v17 = vld [vmem:[%s4624_s3 + $0xb0] ss:$8 sps:$4 sm:$0xff]  }
  0xf9   :  { %1916 = vmatprep.subr.bf16.mxu1 %v3348_v19  ;;  %v3433_v18 = vld [vmem:[%s4624_s3 + $0x1d0] ss:$8 sps:$4 sm:$0xff]   ;;  %v3396_v19 = vld [vmem:[%s4624_s3 + $0xa4] ss:$8 sps:$4 sm:$0xff]  }
  0xfb   :  { %1876 = vmatpush2.bf16.msra.mxu0 %v3343_v22  ;;  %v3438_v22 = vld [vmem:[%s4624_s3 + $0x1c4] ss:$8 sps:$4 sm:$0xff]  }
  0xfc   :  { %1917 = vmatpush2.bf16.msra.mxu1 %v3346_v23  ;;  %1877 = vmatprep.subr.bf16.mxu0 %v3351_v24  ;;  %v4493_v23 = vshrl.u32 %v301_v16, 7  ;;  %v3394_v24 = vld [vmem:[%s4624_s3 + $0xa0] ss:$8 sps:$4 sm:$0xff]   ;;  %v3462_v16 = vld [vmem:[%s4626_s5 + $0x10] sm:$0xff]  }
  0xfd   :  { %1918 = vmatprep.subr.bf16.mxu1 %v3354_v25  ;;  %v3436_v25 = vld [vmem:[%s4624_s3 + $0x1c0] ss:$8 sps:$4 sm:$0xff]  }
  0xff   :  { %1878 = vmatpush2.bf16.msra.mxu0 %v3349_v26  ;;  %v3399_v26 = vld [vmem:[%s4624_s3 + $0x94] ss:$8 sps:$4 sm:$0xff]  }
 0x100   :  { %1919 = vmatpush2.bf16.msra.mxu1 %v3352_v27  ;;  %2333 = vmatprep.subr.bf16.mxu0 %v3357_v28  ;;  %v3441_v27 = vld [vmem:[%s4624_s3 + $0x1b4] ss:$8 sps:$4 sm:$0xff]   ;;  %v303_v28 = vsub.s32 0, %v4493_v23 }
 0x101   :  { %2374 = vmatprep.subr.bf16.mxu1 %v3405_v40 }
 0x102   :  { %v4342_v31 = vpop.f32.mrf.mxu0  ;;  %1880 = vmatmul.mubr.bf16.vlgmr.msra.gmra.mxu0 %v3943_v20  ;;  %v3361_v20 = vld [vmem:[%s4624_s3 + $0x50] ss:$8 sps:$4 sm:$0xff]  }
 0x103   :  { %v4344_v32 = vpop.f32.mrf.mxu1  ;;  %1921 = vmatmul.mubr.bf16.vlgmr.msra.gmra.mxu1 %v3945_v21  ;;  %2334 = vmatpush1.bf16.msra.mxu0 %v3355_v29  ;;  %v4511_v29 = vld [vmem:[%s4625_s2] sm:$0xf] }
 0x104   :  { %v4351_v52 = vpop.f32.mrf.mxu0  ;;  %2335 = vmatprep.subr.bf16.mxu0 %v3360_v30  ;;  %2375 = vmatpush1.bf16.msra.mxu1 %v3403_v37  ;;  %v307_v30 = vsub.s32 1, %v4493_v23  ;;  %v3444_v37 = vld [vmem:[%s4624_s3 + $0x1a4] ss:$8 sps:$4 sm:$0xff]  }
 0x105   :  { %v4353_v33 = vpop.f32.mrf.mxu1  ;;  %2376 = vmatprep.subr.bf16.mxu1 %v3408_v38  ;;  %v3442_v38 = vld [vmem:[%s4624_s3 + $0x1a0] ss:$8 sps:$4 sm:$0xff]  }
 0x106   :  { %v1639_v8 = vpop.f32.mrf.mxu0 }
 0x107   :  { %v1680_v9 = vpop.f32.mrf.mxu1  ;;  %2336 = vmatpush1.bf16.msra.mxu0 %v3358_v49  ;;  %v3397_v49 = vld [vmem:[%s4624_s3 + $0x90] ss:$8 sps:$4 sm:$0xff]   ;;  %v3402_v8 = vld [vmem:[%s4624_s3 + $0x84] ss:$8 sps:$4 sm:$0xff]  }
 0x108   :  { %v1640_v21 = vpop.f32.mrf.mxu0  ;;  %2337 = vmatprep.subr.bf16.mxu0 %v3363_v34  ;;  %2377 = vmatpush1.bf16.msra.mxu1 %v3406_v41  ;;  %v3439_v34 = vld [vmem:[%s4624_s3 + $0x1b0] ss:$8 sps:$4 sm:$0xff]   ;;  %v304_v9 = vrot.slane %v4511_v29, %v303_v28 }
 0x109   :  { %v1681_v35 = vpop.f32.mrf.mxu1  ;;  %2378 = vmatprep.subr.bf16.mxu1 %v3411_v43  ;;  %v3400_v21 = vld [vmem:[%s4624_s3 + $0x80] ss:$8 sps:$4 sm:$0xff]  }
 0x10a   :  { %v1636_v35 = vadd.f32 %v4342_v31, %v304_v9 }
 0x10b   :  { %2338 = vmatpush1.bf16.msra.mxu0 %v3361_v20  ;;  %v308_v20 = vrot.slane %v4511_v29, %v307_v30 }
 0x10c   :  { %2339 = vmatprep.subr.bf16.mxu0 %v3366_v36  ;;  %2379 = vmatpush1.bf16.msra.mxu1 %v3409_v45  ;;  %v1677_v40 = vadd.f32 %v4344_v32, %v1636_v35  ;;  %v3445_v32 = vld [vmem:[%s4624_s3 + $0x190] ss:$8 sps:$4 sm:$0xff]  }
 0x10d   :  { %2380 = vmatprep.subr.bf16.mxu1 %v3414_v47  ;;  %v1638_v36 = vadd.f32 %v4351_v52, %v308_v20 }
 0x10f   :  { %2340 = vmatpush1.bf16.msra.mxu0 %v3364_v39 }
 0x110   :  { %2341 = vmatprep.subr.bf16.mxu0 %v3369_v42  ;;  %2381 = vmatpush1.bf16.msra.mxu1 %v3412_v50  ;;  %v1679_v42 = vadd.f32 %v4353_v33, %v1638_v36 }
 0x111   :  { %2382 = vmatprep.subr.bf16.mxu1 %v3417_v53 }
 0x113   :  { %2342 = vmatpush1.bf16.msra.mxu0 %v3367_v44  ;;  %v3447_v44 = vld [vmem:[%s4624_s3 + $0x194] ss:$8 sps:$4 sm:$0xff]  }
 0x114   :  { %2343 = vmatprep.subr.bf16.mxu0 %v3372_v46  ;;  %2383 = vmatpush1.bf16.msra.mxu1 %v3415_v55 }
 0x115   :  { %2384 = vmatprep.subr.bf16.mxu1 %v3420_v57 }
 0x117   :  { %2344 = vmatpush1.bf16.msra.mxu0 %v3370_v48 }
 0x118   :  { %2345 = vmatprep.subr.bf16.mxu0 %v3375_v51  ;;  %2385 = vmatpush1.bf16.msra.mxu1 %v3418_v59 }
 0x119   :  { %2386 = vmatprep.subr.bf16.mxu1 %v3423_v61 }
 0x11b   :  { %2346 = vmatpush1.bf16.msra.mxu0 %v3373_v54  ;;  %v3450_v54 = vld [vmem:[%s4624_s3 + $0x184] ss:$8 sps:$4 sm:$0xff]  }
 0x11c   :  { %2347 = vmatprep.subr.bf16.mxu0 %v3378_v56  ;;  %2387 = vmatpush1.bf16.msra.mxu1 %v3421_v63  ;;  %v3448_v56 = vld [vmem:[%s4624_s3 + $0x180] ss:$8 sps:$4 sm:$0xff]  }
 0x11d   :  { %2388 = vmatprep.subr.bf16.mxu1 %v3426_v1 }
 0x11f   :  { %2348 = vmatpush1.bf16.msra.mxu0 %v3376_v58 }
 0x120   :  { %2349 = vmatprep.subr.bf16.mxu0 %v3381_v60  ;;  %2389 = vmatpush1.bf16.msra.mxu1 %v3424_v3  ;;  %v3451_v3 = vld [vmem:[%s4626_s5 + $0x78] sm:$0xff]  }
 0x121   :  { %2390 = vmatprep.subr.bf16.mxu1 %v3429_v5  ;;  %v3453_v5 = vld [vmem:[%s4626_s5 + $0x70] sm:$0xff]  }
 0x123   :  { %2350 = vmatpush2.bf16.msra.mxu0 %v3379_v62 }
 0x124   :  { %2351 = vmatprep.subr.bf16.mxu0 %v3384_v0  ;;  %2391 = vmatpush2.bf16.msra.mxu1 %v3427_v7  ;;  %v3455_v7 = vld [vmem:[%s4626_s5 + $0x68] sm:$0xff]  }
 0x125   :  { %2392 = vmatprep.subr.bf16.mxu1 %v3432_v11  ;;  %v3457_v11 = vld [vmem:[%s4626_s5 + $0x60] sm:$0xff]  }
 0x127   :  { %2352 = vmatpush2.bf16.msra.mxu0 %v3382_v2 }
 0x128   :  { %2353 = vmatprep.subr.bf16.mxu0 %v3387_v4  ;;  %2393 = vmatpush2.bf16.msra.mxu1 %v3430_v13  ;;  %v3452_v4 = vld [vmem:[%s4626_s5 + $0x38] sm:$0xff]  }
 0x129   :  { %2394 = vmatprep.subr.bf16.mxu1 %v3435_v15  ;;  %v3459_v13 = vld [vmem:[%s4626_s5 + $0x58] sm:$0xff]   ;;  %v3461_v15 = vld [vmem:[%s4626_s5 + $0x50] sm:$0xff]  }
 0x12b   :  { %2354 = vmatpush2.bf16.msra.mxu0 %v3385_v6  ;;  %v3454_v6 = vld [vmem:[%s4626_s5 + $0x30] sm:$0xff]  }
 0x12c   :  { %2355 = vmatprep.subr.bf16.mxu0 %v3390_v10  ;;  %2395 = vmatpush2.bf16.msra.mxu1 %v3433_v18  ;;  %v3456_v10 = vld [vmem:[%s4626_s5 + $0x28] sm:$0xff]   ;;  %v315_v18 = vsub.s32 3, %v4493_v23 }
 0x12d   :  { %2396 = vmatprep.subr.bf16.mxu1 %v3438_v22 }
 0x12e   :  { %v316_v22 = vrot.slane %v4511_v29, %v315_v18 }
 0x12f   :  { %2356 = vmatpush2.bf16.msra.mxu0 %v3388_v12  ;;  %v3458_v12 = vld [vmem:[%s4626_s5 + $0x20] sm:$0xff]  }
 0x130   :  { %2357 = vmatprep.subr.bf16.mxu0 %v3393_v14  ;;  %2397 = vmatpush2.bf16.msra.mxu1 %v3436_v25  ;;  %v3460_v14 = vld [vmem:[%s4626_s5 + $0x18] sm:$0xff]  }
 0x131   :  { %2398 = vmatprep.subr.bf16.mxu1 %v3441_v27 }
 0x133   :  { %2358 = vmatpush2.bf16.msra.mxu0 %v3391_v17  ;;  %v311_v17 = vsub.s32 2, %v4493_v23  ;;  %v2932_v23 = vld [vmem:[%s4628_s6] ss:$0 sm:$0xff] }
 0x134   :  { %2359 = vmatprep.subr.bf16.mxu0 %v3396_v19  ;;  %2399 = vmatpush2.bf16.msra.mxu1 %v3439_v34 }
 0x135   :  { %2400 = vmatprep.subr.bf16.mxu1 %v3444_v37  ;;  %v312_v19 = vrot.slane %v4511_v29, %v311_v17 }
 0x137   :  { %2360 = vmatpush2.bf16.msra.mxu0 %v3394_v24 }
 0x138   :  { %2361 = vmatprep.subr.bf16.mxu0 %v3399_v26  ;;  %2401 = vmatpush2.bf16.msra.mxu1 %v3442_v38 }
 0x139   :  { %2402 = vmatprep.subr.bf16.mxu1 %v3447_v44  ;;  %v3464_v44 = vld [vmem:[%s4626_s5 + $0x8] sm:$0xff]  }
 0x13b   :  { %2362 = vmatpush2.bf16.msra.mxu0 %v3397_v49 }
 0x13c   :  { %2363 = vmatprep.subr.bf16.mxu0 %v3402_v8  ;;  %2403 = vmatpush2.bf16.msra.mxu1 %v3445_v32  ;;  %v3465_v32 = vld [vmem:[%s4626_s5 + $0x40] sm:$0xff]  }
 0x13d   :  { %2404 = vmatprep.subr.bf16.mxu1 %v3450_v54 }
 0x13f   :  { %2364 = vmatpush2.bf16.msra.mxu0 %v3400_v21 }
 0x140   :  { %2405 = vmatpush2.bf16.msra.mxu1 %v3448_v56  ;;  %2949 = vmatprep.subr.bf16.mxu0 %v3451_v3 }
 0x142   :  { %v1717_v39 = vpop.f32.mrf.mxu0 }
 0x143   :  { %v1758_v41 = vpop.f32.mrf.mxu1  ;;  %v1718_v43 = vadd.f32 %v1717_v39, %v1677_v40 }
 0x144   :  { %v1719_v31 = vpop.f32.mrf.mxu0 }
 0x145   :  { %v1760_v52 = vpop.f32.mrf.mxu1  ;;  %v1759_v45 = vadd.f32 %v1758_v41, %v1718_v43  ;;  %v1720_v46 = vadd.f32 %v1719_v31, %v1679_v42 }
 0x146   :  { %v1721_v47 = vpop.f32.mrf.mxu0 }
 0x147   :  { %v1762_v48 = vpop.f32.mrf.mxu1  ;;  %v1761_v50 = vadd.f32 %v1760_v52, %v1720_v46  ;;  %v1929_v33 = vmax.f32 %v1759_v45, 0.0  ;;  %v3463_v52 = vld [vmem:[%s4626_s5 + $0x48] sm:$0xff]   ;;  %v3466_v47 = vld [vmem:[%s4626_s5] sm:$0xff]  }
 0x148   :  { %v1722_v51 = vpop.f32.mrf.mxu0 }
 0x149   :  { %v1763_v53 = vpop.f32.mrf.mxu1  ;;  %v1930_v55 = vmax.f32 %v1761_v50, 0.0  ;;  %v1933_v58 = vpack.c.bf16 %v1929_v33, %v1929_v33  ;;  %v2001_v50 = vld [vmem:[%s4627_s4] sm:$0x3] }
 0x14a   :  { %v2006_v33 = vrot.slane %v2001_v50, %v303_v28  ;;  %v2010_v51 = vrot.slane %v2001_v50, %v307_v30 }
 0x14b   :  { %v1934_v57 = vpack.c.bf16 %v1930_v55, %v1930_v55 }
 0x14d   :  { %2365 = vmatprep.mubr.bf16.mxu0 %v1934_v57 }
 0x14e   :  { %2366 = vmatmul.mubr.bf16.vlgmr.msra.gmra.mxu0 %v1933_v58 }
 0x14f   :  { %2950 = vmatpush3.bf16.msra.mxu0 %v3452_v4 }
 0x150   :  { %2951 = vmatprep.subr.bf16.mxu0 %v3453_v5 }
 0x153   :  { %2952 = vmatpush3.bf16.msra.mxu0 %v3454_v6 }
 0x154   :  { %2953 = vmatprep.subr.bf16.mxu0 %v3455_v7 }
 0x157   :  { %2954 = vmatpush3.bf16.msra.mxu0 %v3456_v10 }
 0x158   :  { %2955 = vmatprep.subr.bf16.mxu0 %v3457_v11 }
 0x15b   :  { %2956 = vmatpush3.bf16.msra.mxu0 %v3458_v12 }
 0x15c   :  { %2957 = vmatprep.subr.bf16.mxu0 %v3459_v13 }
 0x15f   :  { %2958 = vmatpush3.bf16.msra.mxu0 %v3460_v14 }
 0x160   :  { %2959 = vmatprep.subr.bf16.mxu0 %v3461_v15 }
 0x163   :  { %2960 = vmatpush3.bf16.msra.mxu0 %v3462_v16 }
 0x164   :  { %2961 = vmatprep.subr.bf16.mxu0 %v3463_v52 }
 0x167   :  { %2962 = vmatpush3.bf16.msra.mxu0 %v3464_v44 }
 0x168   :  { %2963 = vmatprep.subr.bf16.mxu0 %v3465_v32 }
 0x16b   :  { %2964 = vmatpush3.bf16.msra.mxu0 %v3466_v47 }
 0x182   :  { %v1799_v59 = vpop.f32.mrf.mxu0 }
 0x183   :  { %v1840_v60 = vpop.f32.mrf.mxu1  ;;  %v1800_v24 = vadd.f32 %v1799_v59, %v312_v19 }
 0x184   :  { %v1801_v61 = vpop.f32.mrf.mxu0 }
 0x185   :  { %v1842_v62 = vpop.f32.mrf.mxu1  ;;  %v1802_v25 = vadd.f32 %v1801_v61, %v316_v22  ;;  %v1841_v26 = vadd.f32 %v1840_v60, %v1800_v24 }
 0x186   :  { %v1803_v63 = vpop.f32.mrf.mxu0 }
 0x187   :  { %v1844_v0 = vpop.f32.mrf.mxu1  ;;  %v1843_v34 = vadd.f32 %v1842_v62, %v1802_v25 }
 0x188   :  { %v1804_v1 = vpop.f32.mrf.mxu0 }
 0x189   :  { %v1845_v2 = vpop.f32.mrf.mxu1 }
 0x1c2   :  { %v1881_v27 = vpop.f32.mrf.mxu0 }
 0x1c3   :  { %v1922_v49 = vpop.f32.mrf.mxu1  ;;  %v1882_v8 = vadd.f32 %v1881_v27, %v1841_v26 }
 0x1c4   :  { %v1883_v9 = vpop.f32.mrf.mxu0 }
 0x1c5   :  { %v1924_v20 = vpop.f32.mrf.mxu1  ;;  %v1923_v21 = vadd.f32 %v1922_v49, %v1882_v8  ;;  %v1884_v35 = vadd.f32 %v1883_v9, %v1843_v34 }
 0x1c6   :  { %v1885_v36 = vpop.f32.mrf.mxu0 }
 0x1c7   :  { %v1926_v37 = vpop.f32.mrf.mxu1  ;;  %v1925_v40 = vadd.f32 %v1924_v20, %v1884_v35  ;;  %v1931_v38 = vmax.f32 %v1923_v21, 0.0 }
 0x1c8   :  { %v1886_v39 = vpop.f32.mrf.mxu0 }
 0x1c9   :  { %v1927_v41 = vpop.f32.mrf.mxu1  ;;  %v1932_v42 = vmax.f32 %v1925_v40, 0.0  ;;  %v1935_v29 = vpack.c.bf16 %v1931_v38, %v1931_v38 }
 0x1cb   :  { %v1936_v43 = vpack.c.bf16 %v1932_v42, %v1932_v42 }
 0x1cd   :  { %2406 = vmatprep.mubr.bf16.mxu1 %v1936_v43 }
 0x1ce   :  { %2407 = vmatmul.mubr.bf16.vlgmr.msra.gmra.mxu1 %v1935_v29 }
 0x20e   :  { %v2367_v31 = vpop.f32.mrf.mxu0 }
 0x20f   :  { %v2368_v53 = vadd.f32 %v2367_v31, %v2006_v33 }
 0x210   :  { %v2369_v45 = vpop.f32.mrf.mxu0 }
 0x211   :  { %v2370_v55 = vadd.f32 %v2369_v45, %v2010_v51 }
 0x212   :  { %v2371_v46 = vpop.f32.mrf.mxu0 }
 0x214   :  { %v2372_v48 = vpop.f32.mrf.mxu0 }
 0x28e   :  { %v2408_v54 = vpop.f32.mrf.mxu1 }
 0x28f   :  { %v2409_v56 = vadd.f32 %v2408_v54, %v2368_v53 }
 0x290   :  { %v2410_v57 = vpop.f32.mrf.mxu1 }
 0x291   :  { %v2411_v58 = vadd.f32 %v2410_v57, %v2370_v55  ;;  %v2415_v59 = vmax.f32 %v2409_v56, 0.0 }
 0x292   :  { %v2412_v60 = vpop.f32.mrf.mxu1 }
 0x293   :  { %v2416_v61 = vmax.f32 %v2411_v58, 0.0  ;;  %v2417_v0 = vpack.c.bf16 %v2415_v59, %v2415_v59 }
 0x294   :  { %v2413_v62 = vpop.f32.mrf.mxu1 }
 0x295   :  { %v2418_v63 = vpack.c.bf16 %v2416_v61, %v2416_v61 }
 0x297   :  { %2586 = vmatprep.mubr.bf16.mxu0 %v2418_v63 }
 0x298   :  { %2587 = vmatmul.mubr.bf16.vlgmr.msra.gmra.mxu0 %v2417_v0 }
 0x358   :  { %v2965_v1 = vpop.f32.mrf.mxu0 }
 0x35a   :  { %v2966_v2 = vpop.f32.mrf.mxu0 }
 0x35b   :  { %v2967_v28 = vadd.f32 %v2966_v2, %v2965_v1 }
 0x35c   :  { %v2968_v30 = vpop.f32.mrf.mxu0 }
 0x35d   :  { %v2589_v3 = vadd.f32 %v2967_v28, %v2932_v23 }
 0x35e   :  { %v2969_v4 = vpop.f32.mrf.mxu0 }
 0x35f   :  { %v2595_v5 = vsel %vm2594_vm0, %v2589_v3, -inf }
 0x360   :  { %2596 = vmax.xlane.f32.xlu0 %v2595_v5 }
 0x3e9   :  { %v2597_v6 = vpop.xlane.xlu0 %2596 }
 0x3ea   :  { %v2598_v7 = vsub.f32 %v2589_v3, %v2597_v6 }
 0x3ec   :  { %v2599_v10 = vmul.f32 1.442695, %v2598_v7 }
 0x3ee   :  { %3467 = vpow2.f32 %v2599_v10 }
 0x3fb   :  { %v3468_v11 = vpop.eup %3467 }
 0x3fc   :  { %v2601_v12 = vsel %vm2594_vm0, %v3468_v11, 0.0 }
 0x3fd   :  { %2602 = vadd.xlane.f32.xlu0 %v2601_v12 }
 0x486   :  { %v2603_v13 = vpop.xlane.xlu0 %2602 }
 0x487   :  { %3469 = vlog2.f32 %v2603_v13 }
 0x494   :  { %v3470_v14 = vpop.eup %3469 }
 0x495   :  { %v2605_v15 = vmul.f32 0.6931472, %v3470_v14 }
 0x497   :  { %v2606_v16 = vsub.f32 %v2598_v7, %v2605_v15 }
 0x499   :  { %2607 = vst.msk [vmem:[%s4629_s7] sm:$0xff] %vm2594_vm0, %v2606_v16 }

</bundles_post_ra>
